<compile_context>
chip_gen: v6e
topology: v6e:2x2x1
jax: 0.10.0
libtpu: 0.0.40
codegen_flags: <defaults>
</compile_context>

<pallas_src>
import functools
import math

import jax
import jax.numpy as jnp
from jax.experimental import pallas as pl
from jax.experimental.pallas import tpu as pltpu


# ---------------------------------------------------------------------------
# Fused encoder kernel (one compile per unique (B, S, E, H, F))
# ---------------------------------------------------------------------------

@functools.lru_cache(maxsize=None)
def _build_encoder(B, S, E, H, F):
    hd = E // H
    scale = 1.0 / math.sqrt(hd)

    def kernel(x_ref, win_ref, bin_ref, wout_ref, bout_ref,
               ln1g_ref, ln1b_ref, w1_ref, b1_ref, w2_ref, b2_ref,
               ln2g_ref, ln2b_ref, o_ref):
        x = x_ref[0]                                   # (S, E) f32
        x_bf = x.astype(jnp.bfloat16)

        # ---- multi-head self-attention (batch_first, q=k=v=x) -------------
        # QKV projection for all heads at once, lane-packed: (S, 3E)
        qkv = jnp.dot(x_bf, win_ref[...],
                      preferred_element_type=jnp.float32) + bin_ref[...]

        heads_out = []
        for h in range(H):                             # static unroll over heads
            q = qkv[:, h * hd:(h + 1) * hd]            # (S, hd) f32
            k = qkv[:, E + h * hd:E + (h + 1) * hd]
            v = qkv[:, 2 * E + h * hd:2 * E + (h + 1) * hd]
            # scores (S, S); hd-deep contraction kept in f32 (negligible FLOPs)
            s = jax.lax.dot_general(q, k, (((1,), (1,)), ((), ())),
                                    preferred_element_type=jnp.float32) * scale
            s = s - jnp.max(s, axis=-1, keepdims=True)
            p = jnp.exp(s)
            l_inv = pl.reciprocal(jnp.sum(p, axis=-1, keepdims=True), approx=True)
            o = jnp.dot(p.astype(jnp.bfloat16), v.astype(jnp.bfloat16),
                        preferred_element_type=jnp.float32) * l_inv     # (S, hd)
            heads_out.append(o)
        o_cat = jnp.concatenate(heads_out, axis=-1)    # (S, E), lane-packed heads

        attn = jnp.dot(o_cat.astype(jnp.bfloat16), wout_ref[...],
                       preferred_element_type=jnp.float32) + bout_ref[...]

        # ---- residual + LayerNorm 1 (multihead_norm) -----------------------
        y = attn + x
        mu = jnp.mean(y, axis=-1, keepdims=True)
        yc = y - mu
        var = jnp.mean(yc * yc, axis=-1, keepdims=True)
        y = yc * jax.lax.rsqrt(var + 1e-5) * ln1g_ref[...] + ln1b_ref[...]

        # ---- PWFF: Linear -> tanh -> Linear --------------------------------
        h1 = jnp.dot(y.astype(jnp.bfloat16), w1_ref[...],
                     preferred_element_type=jnp.float32) + b1_ref[...]   # (S, F)
        h1 = jnp.tanh(h1)
        h2 = jnp.dot(h1.astype(jnp.bfloat16), w2_ref[...],
                     preferred_element_type=jnp.float32) + b2_ref[...]   # (S, E)

        # ---- residual + LayerNorm 2 (ff_norm) ------------------------------
        z = h2 + y
        mu2 = jnp.mean(z, axis=-1, keepdims=True)
        zc = z - mu2
        var2 = jnp.mean(zc * zc, axis=-1, keepdims=True)
        o_ref[0] = zc * jax.lax.rsqrt(var2 + 1e-5) * ln2g_ref[...] + ln2b_ref[...]

    def full(shape):
        # whole array as one block, identical for every grid step
        return pl.BlockSpec(shape, lambda b, _n=len(shape): (0,) * _n)

    return pl.pallas_call(
        kernel,
        out_shape=jax.ShapeDtypeStruct((B, S, E), jnp.float32),
        grid_spec=pltpu.PrefetchScalarGridSpec(
            num_scalar_prefetch=0,
            grid=(B,),
            in_specs=[
                pl.BlockSpec((1, S, E), lambda b: (b, 0, 0)),   # x
                full((E, 3 * E)), full((1, 3 * E)),             # in_proj  W^T, b
                full((E, E)),     full((1, E)),                 # out_proj W^T, b
                full((1, E)),     full((1, E)),                 # multihead_norm g, b
                full((E, F)),     full((1, F)),                 # ff.lin_in  W^T, b
                full((F, E)),     full((1, E)),                 # ff.lin_out W^T, b
                full((1, E)),     full((1, E)),                 # ff_norm g, b
            ],
            out_specs=pl.BlockSpec((1, S, E), lambda b: (b, 0, 0)),
        ),
        compiler_params=pltpu.CompilerParams(
            dimension_semantics=("parallel",)),   # batch shards across TCs (v7x)
    )


# ---------------------------------------------------------------------------
# Wrapper: host-side weight prep (transpose + bf16 cast, once per call under jit)
# ---------------------------------------------------------------------------

@functools.partial(jax.jit, static_argnames=("heads",))
def transformer_encoder_forward(params, x, heads):
    B, S, E = x.shape
    F = params["ff_w1"].shape[0]
    assert E % heads == 0
    fn = _build_encoder(B, S, E, heads, F)
    return fn(
        x.astype(jnp.float32),
        params["in_w"].T.astype(jnp.bfloat16),
        params["in_b"].reshape(1, 3 * E).astype(jnp.float32),
        params["out_w"].T.astype(jnp.bfloat16),
        params["out_b"].reshape(1, E).astype(jnp.float32),
        params["ln1_g"].reshape(1, E).astype(jnp.float32),
        params["ln1_b"].reshape(1, E).astype(jnp.float32),
        params["ff_w1"].T.astype(jnp.bfloat16),
        params["ff_b1"].reshape(1, F).astype(jnp.float32),
        params["ff_w2"].T.astype(jnp.bfloat16),
        params["ff_b2"].reshape(1, E).astype(jnp.float32),
        params["ln2_g"].reshape(1, E).astype(jnp.float32),
        params["ln2_b"].reshape(1, E).astype(jnp.float32),
    )


# ---------------------------------------------------------------------------
# Deterministic init (shapes follow torch: Linear weight is [out, in])
# ---------------------------------------------------------------------------

def init_params(key, dims, ff_width):
    E, F = dims, ff_width
    ks = jax.random.split(key, 8)

    def lin(k, out_d, in_d):
        kw, kb = jax.random.split(k)
        w = jax.random.normal(kw, (out_d, in_d), jnp.float32) / math.sqrt(in_d)
        b = 0.02 * jax.random.normal(kb, (out_d,), jnp.float32)
        return w, b

    in_w, in_b = lin(ks[0], 3 * E, E)      # MultiheadAttention in_proj
    out_w, out_b = lin(ks[1], E, E)        # MultiheadAttention out_proj
    ff_w1, ff_b1 = lin(ks[2], F, E)        # PWFF.lin_in
    ff_w2, ff_b2 = lin(ks[3], E, F)        # PWFF.lin_out
    ln1_g = 1.0 + 0.05 * jax.random.normal(ks[4], (E,), jnp.float32)
    ln1_b = 0.05 * jax.random.normal(ks[5], (E,), jnp.float32)
    ln2_g = 1.0 + 0.05 * jax.random.normal(ks[6], (E,), jnp.float32)
    ln2_b = 0.05 * jax.random.normal(ks[7], (E,), jnp.float32)
    return dict(in_w=in_w, in_b=in_b, out_w=out_w, out_b=out_b,
                ln1_g=ln1_g, ln1_b=ln1_b,
                ff_w1=ff_w1, ff_b1=ff_b1, ff_w2=ff_w2, ff_b2=ff_b2,
                ln2_g=ln2_g, ln2_b=ln2_b)


# ---------------------------------------------------------------------------
# Pure-JAX f32 reference (mirrors the PyTorch forward exactly)
# ---------------------------------------------------------------------------

def reference_forward(params, x, heads):
    B, S, E = x.shape
    hd = E // heads

    def ln(t, g, b):
        mu = t.mean(-1, keepdims=True)
        var = ((t - mu) ** 2).mean(-1, keepdims=True)
        return (t - mu) * jax.lax.rsqrt(var + 1e-5) * g + b

    qkv = x @ params["in_w"].T + params["in_b"]
    q, k, v = qkv[..., :E], qkv[..., E:2 * E], qkv[..., 2 * E:]

    def split(t):
        return t.reshape(B, S, heads, hd).transpose(0, 2, 1, 3)

    qh, kh, vh = split(q), split(k), split(v)
    s = jnp.einsum("bhqd,bhkd->bhqk", qh, kh) / math.sqrt(hd)
    p = jax.nn.softmax(s, axis=-1)
    o = jnp.einsum("bhqk,bhkd->bhqd", p, vh)
    o = o.transpose(0, 2, 1, 3).reshape(B, S, E)
    attn = o @ params["out_w"].T + params["out_b"]

    y = ln(attn + x, params["ln1_g"], params["ln1_b"])
    h = jnp.tanh(y @ params["ff_w1"].T + params["ff_b1"])
    h = h @ params["ff_w2"].T + params["ff_b2"]
    return ln(h + y, params["ln2_g"], params["ln2_b"])


if __name__ == "__main__":
    B, S, E, HEADS, FF = 2, 128, 64, 8, 256   # dims=64, ff_width=256, heads=8
    key = jax.random.PRNGKey(0)
    pkey, xkey = jax.random.split(key)
    params = init_params(pkey, E, FF)
    x = jax.random.normal(xkey, (B, S, E), jnp.float32)

    out = transformer_encoder_forward(params, x, heads=HEADS)
    out = jax.block_until_ready(out)

    assert out.shape == (B, S, E), out.shape
    assert bool(jnp.all(jnp.isfinite(out)))
    ref = reference_forward(params, x, HEADS)
    max_err = float(jnp.max(jnp.abs(out - ref)))
    # bf16 MXU inputs + approx reciprocal vs f32 reference: loose but meaningful bound
    assert max_err < 1e-1, f"max |pallas - reference| = {max_err}"
    print("KERNEL_OK")
</pallas_src>

<mosaic_0001>
module attributes {stable_mosaic.version = 11 : i64} {
  func.func @kernel(%arg0: i32, %arg1: memref<1x128x64xf32, #tpu.memory_space<vmem>>, %arg2: memref<64x192xbf16, #tpu.memory_space<vmem>>, %arg3: memref<1x192xf32, #tpu.memory_space<vmem>>, %arg4: memref<64x64xbf16, #tpu.memory_space<vmem>>, %arg5: memref<1x64xf32, #tpu.memory_space<vmem>>, %arg6: memref<1x64xf32, #tpu.memory_space<vmem>>, %arg7: memref<1x64xf32, #tpu.memory_space<vmem>>, %arg8: memref<64x256xbf16, #tpu.memory_space<vmem>>, %arg9: memref<1x256xf32, #tpu.memory_space<vmem>>, %arg10: memref<256x64xbf16, #tpu.memory_space<vmem>>, %arg11: memref<1x64xf32, #tpu.memory_space<vmem>>, %arg12: memref<1x64xf32, #tpu.memory_space<vmem>>, %arg13: memref<1x64xf32, #tpu.memory_space<vmem>>, %arg14: memref<1x128x64xf32, #tpu.memory_space<vmem>>) attributes {dimension_semantics = [#tpu.dimension_semantics<parallel>], iteration_bounds = array<i64: 2>, scalar_prefetch = 0 : i64, scratch_operands = 0 : i64, tpu.core_type = #tpu.core_type<tc>, window_params = [{transform_indices = @transform_0, window_bounds = array<i64: 1, 128, 64>}, {pipeline_mode = #tpu.pipeline_mode<synchronous>, transform_indices = @transform_1, window_bounds = array<i64: 64, 192>}, {pipeline_mode = #tpu.pipeline_mode<synchronous>, transform_indices = @transform_2, window_bounds = array<i64: 1, 192>}, {pipeline_mode = #tpu.pipeline_mode<synchronous>, transform_indices = @transform_3, window_bounds = array<i64: 64, 64>}, {pipeline_mode = #tpu.pipeline_mode<synchronous>, transform_indices = @transform_4, window_bounds = array<i64: 1, 64>}, {pipeline_mode = #tpu.pipeline_mode<synchronous>, transform_indices = @transform_5, window_bounds = array<i64: 1, 64>}, {pipeline_mode = #tpu.pipeline_mode<synchronous>, transform_indices = @transform_6, window_bounds = array<i64: 1, 64>}, {pipeline_mode = #tpu.pipeline_mode<synchronous>, transform_indices = @transform_7, window_bounds = array<i64: 64, 256>}, {pipeline_mode = #tpu.pipeline_mode<synchronous>, transform_indices = @transform_8, window_bounds = array<i64: 1, 256>}, {pipeline_mode = #tpu.pipeline_mode<synchronous>, transform_indices = @transform_9, window_bounds = array<i64: 256, 64>}, {pipeline_mode = #tpu.pipeline_mode<synchronous>, transform_indices = @transform_10, window_bounds = array<i64: 1, 64>}, {pipeline_mode = #tpu.pipeline_mode<synchronous>, transform_indices = @transform_11, window_bounds = array<i64: 1, 64>}, {pipeline_mode = #tpu.pipeline_mode<synchronous>, transform_indices = @transform_12, window_bounds = array<i64: 1, 64>}, {transform_indices = @transform_13, window_bounds = array<i64: 1, 128, 64>}]} {
    %c0 = arith.constant 0 : index
    %c0_0 = arith.constant 0 : index
    %c0_1 = arith.constant 0 : index
    %0 = vector.load %arg1[%c0, %c0_0, %c0_1] : memref<1x128x64xf32, #tpu.memory_space<vmem>>, vector<1x128x64xf32>
    %1 = vector.shape_cast %0 : vector<1x128x64xf32> to vector<128x64xf32>
    %2 = arith.truncf %1 : vector<128x64xf32> to vector<128x64xbf16>
    %c0_2 = arith.constant 0 : index
    %c0_3 = arith.constant 0 : index
    %3 = vector.load %arg2[%c0_2, %c0_3] : memref<64x192xbf16, #tpu.memory_space<vmem>>, vector<64x192xbf16>
    %cst = arith.constant dense<0.000000e+00> : vector<128x192xf32>
    %4 = tpu.matmul %2, %3, %cst {dimension_numbers = #tpu.dot_dimension_numbers<[1], [0], [0], [1], [0, 0, 1, 1], [], []>} : vector<128x64xbf16>, vector<64x192xbf16>, vector<128x192xf32> -> vector<128x192xf32>
    %c0_4 = arith.constant 0 : index
    %c0_5 = arith.constant 0 : index
    %5 = vector.load %arg3[%c0_4, %c0_5] : memref<1x192xf32, #tpu.memory_space<vmem>>, vector<1x192xf32>
    %6 = vector.broadcast %5 : vector<1x192xf32> to vector<128x192xf32>
    %7 = arith.addf %4, %6 : vector<128x192xf32>
    %8 = vector.extract_strided_slice %7 {offsets = [0, 0], sizes = [128, 8], strides = [1, 1]} : vector<128x192xf32> to vector<128x8xf32>
    %9 = vector.extract_strided_slice %7 {offsets = [0, 64], sizes = [128, 8], strides = [1, 1]} : vector<128x192xf32> to vector<128x8xf32>
    %10 = vector.extract_strided_slice %7 {offsets = [0, 128], sizes = [128, 8], strides = [1, 1]} : vector<128x192xf32> to vector<128x8xf32>
    %cst_6 = arith.constant dense<0.000000e+00> : vector<128x128xf32>
    %11 = tpu.matmul %8, %9, %cst_6 {dimension_numbers = #tpu.dot_dimension_numbers<[1], [1], [0], [0], [0, 0, 1, 0], [], []>} : vector<128x8xf32>, vector<128x8xf32>, vector<128x128xf32> -> vector<128x128xf32>
    %cst_7 = arith.constant 0.353553385 : f32
    %12 = vector.broadcast %cst_7 : f32 to vector<128x128xf32>
    %13 = arith.mulf %11, %12 : vector<128x128xf32>
    %cst_8 = arith.constant dense<0xFF800000> : vector<128xf32>
    %14 = vector.multi_reduction <maximumf>, %13, %cst_8 [1] : vector<128x128xf32> to vector<128xf32>
    %15 = vector.shape_cast %14 : vector<128xf32> to vector<128x1xf32>
    %16 = vector.broadcast %15 : vector<128x1xf32> to vector<128x128xf32>
    %17 = arith.subf %13, %16 : vector<128x128xf32>
    %18 = math.exp %17 : vector<128x128xf32>
    %cst_9 = arith.constant dense<0.000000e+00> : vector<128xf32>
    %19 = vector.multi_reduction <add>, %18, %cst_9 [1] : vector<128x128xf32> to vector<128xf32>
    %20 = vector.shape_cast %19 : vector<128xf32> to vector<128x1xf32>
    %21 = tpu.reciprocal %20 {approx = true} : vector<128x1xf32> -> vector<128x1xf32>
    %22 = arith.truncf %18 : vector<128x128xf32> to vector<128x128xbf16>
    %23 = arith.truncf %10 : vector<128x8xf32> to vector<128x8xbf16>
    %cst_10 = arith.constant dense<0.000000e+00> : vector<128x8xf32>
    %24 = tpu.matmul %22, %23, %cst_10 {dimension_numbers = #tpu.dot_dimension_numbers<[1], [0], [0], [1], [0, 0, 1, 1], [], []>} : vector<128x128xbf16>, vector<128x8xbf16>, vector<128x8xf32> -> vector<128x8xf32>
    %25 = vector.broadcast %21 : vector<128x1xf32> to vector<128x8xf32>
    %26 = arith.mulf %24, %25 : vector<128x8xf32>
    %27 = vector.extract_strided_slice %7 {offsets = [0, 8], sizes = [128, 8], strides = [1, 1]} : vector<128x192xf32> to vector<128x8xf32>
    %28 = vector.extract_strided_slice %7 {offsets = [0, 72], sizes = [128, 8], strides = [1, 1]} : vector<128x192xf32> to vector<128x8xf32>
    %29 = vector.extract_strided_slice %7 {offsets = [0, 136], sizes = [128, 8], strides = [1, 1]} : vector<128x192xf32> to vector<128x8xf32>
    %cst_11 = arith.constant dense<0.000000e+00> : vector<128x128xf32>
    %30 = tpu.matmul %27, %28, %cst_11 {dimension_numbers = #tpu.dot_dimension_numbers<[1], [1], [0], [0], [0, 0, 1, 0], [], []>} : vector<128x8xf32>, vector<128x8xf32>, vector<128x128xf32> -> vector<128x128xf32>
    %cst_12 = arith.constant 0.353553385 : f32
    %31 = vector.broadcast %cst_12 : f32 to vector<128x128xf32>
    %32 = arith.mulf %30, %31 : vector<128x128xf32>
    %cst_13 = arith.constant dense<0xFF800000> : vector<128xf32>
    %33 = vector.multi_reduction <maximumf>, %32, %cst_13 [1] : vector<128x128xf32> to vector<128xf32>
    %34 = vector.shape_cast %33 : vector<128xf32> to vector<128x1xf32>
    %35 = vector.broadcast %34 : vector<128x1xf32> to vector<128x128xf32>
    %36 = arith.subf %32, %35 : vector<128x128xf32>
    %37 = math.exp %36 : vector<128x128xf32>
    %cst_14 = arith.constant dense<0.000000e+00> : vector<128xf32>
    %38 = vector.multi_reduction <add>, %37, %cst_14 [1] : vector<128x128xf32> to vector<128xf32>
    %39 = vector.shape_cast %38 : vector<128xf32> to vector<128x1xf32>
    %40 = tpu.reciprocal %39 {approx = true} : vector<128x1xf32> -> vector<128x1xf32>
    %41 = arith.truncf %37 : vector<128x128xf32> to vector<128x128xbf16>
    %42 = arith.truncf %29 : vector<128x8xf32> to vector<128x8xbf16>
    %cst_15 = arith.constant dense<0.000000e+00> : vector<128x8xf32>
    %43 = tpu.matmul %41, %42, %cst_15 {dimension_numbers = #tpu.dot_dimension_numbers<[1], [0], [0], [1], [0, 0, 1, 1], [], []>} : vector<128x128xbf16>, vector<128x8xbf16>, vector<128x8xf32> -> vector<128x8xf32>
    %44 = vector.broadcast %40 : vector<128x1xf32> to vector<128x8xf32>
    %45 = arith.mulf %43, %44 : vector<128x8xf32>
    %46 = vector.extract_strided_slice %7 {offsets = [0, 16], sizes = [128, 8], strides = [1, 1]} : vector<128x192xf32> to vector<128x8xf32>
    %47 = vector.extract_strided_slice %7 {offsets = [0, 80], sizes = [128, 8], strides = [1, 1]} : vector<128x192xf32> to vector<128x8xf32>
    %48 = vector.extract_strided_slice %7 {offsets = [0, 144], sizes = [128, 8], strides = [1, 1]} : vector<128x192xf32> to vector<128x8xf32>
    %cst_16 = arith.constant dense<0.000000e+00> : vector<128x128xf32>
    %49 = tpu.matmul %46, %47, %cst_16 {dimension_numbers = #tpu.dot_dimension_numbers<[1], [1], [0], [0], [0, 0, 1, 0], [], []>} : vector<128x8xf32>, vector<128x8xf32>, vector<128x128xf32> -> vector<128x128xf32>
    %cst_17 = arith.constant 0.353553385 : f32
    %50 = vector.broadcast %cst_17 : f32 to vector<128x128xf32>
    %51 = arith.mulf %49, %50 : vector<128x128xf32>
    %cst_18 = arith.constant dense<0xFF800000> : vector<128xf32>
    %52 = vector.multi_reduction <maximumf>, %51, %cst_18 [1] : vector<128x128xf32> to vector<128xf32>
    %53 = vector.shape_cast %52 : vector<128xf32> to vector<128x1xf32>
    %54 = vector.broadcast %53 : vector<128x1xf32> to vector<128x128xf32>
    %55 = arith.subf %51, %54 : vector<128x128xf32>
    %56 = math.exp %55 : vector<128x128xf32>
    %cst_19 = arith.constant dense<0.000000e+00> : vector<128xf32>
    %57 = vector.multi_reduction <add>, %56, %cst_19 [1] : vector<128x128xf32> to vector<128xf32>
    %58 = vector.shape_cast %57 : vector<128xf32> to vector<128x1xf32>
    %59 = tpu.reciprocal %58 {approx = true} : vector<128x1xf32> -> vector<128x1xf32>
    %60 = arith.truncf %56 : vector<128x128xf32> to vector<128x128xbf16>
    %61 = arith.truncf %48 : vector<128x8xf32> to vector<128x8xbf16>
    %cst_20 = arith.constant dense<0.000000e+00> : vector<128x8xf32>
    %62 = tpu.matmul %60, %61, %cst_20 {dimension_numbers = #tpu.dot_dimension_numbers<[1], [0], [0], [1], [0, 0, 1, 1], [], []>} : vector<128x128xbf16>, vector<128x8xbf16>, vector<128x8xf32> -> vector<128x8xf32>
    %63 = vector.broadcast %59 : vector<128x1xf32> to vector<128x8xf32>
    %64 = arith.mulf %62, %63 : vector<128x8xf32>
    %65 = vector.extract_strided_slice %7 {offsets = [0, 24], sizes = [128, 8], strides = [1, 1]} : vector<128x192xf32> to vector<128x8xf32>
    %66 = vector.extract_strided_slice %7 {offsets = [0, 88], sizes = [128, 8], strides = [1, 1]} : vector<128x192xf32> to vector<128x8xf32>
    %67 = vector.extract_strided_slice %7 {offsets = [0, 152], sizes = [128, 8], strides = [1, 1]} : vector<128x192xf32> to vector<128x8xf32>
    %cst_21 = arith.constant dense<0.000000e+00> : vector<128x128xf32>
    %68 = tpu.matmul %65, %66, %cst_21 {dimension_numbers = #tpu.dot_dimension_numbers<[1], [1], [0], [0], [0, 0, 1, 0], [], []>} : vector<128x8xf32>, vector<128x8xf32>, vector<128x128xf32> -> vector<128x128xf32>
    %cst_22 = arith.constant 0.353553385 : f32
    %69 = vector.broadcast %cst_22 : f32 to vector<128x128xf32>
    %70 = arith.mulf %68, %69 : vector<128x128xf32>
    %cst_23 = arith.constant dense<0xFF800000> : vector<128xf32>
    %71 = vector.multi_reduction <maximumf>, %70, %cst_23 [1] : vector<128x128xf32> to vector<128xf32>
    %72 = vector.shape_cast %71 : vector<128xf32> to vector<128x1xf32>
    %73 = vector.broadcast %72 : vector<128x1xf32> to vector<128x128xf32>
    %74 = arith.subf %70, %73 : vector<128x128xf32>
    %75 = math.exp %74 : vector<128x128xf32>
    %cst_24 = arith.constant dense<0.000000e+00> : vector<128xf32>
    %76 = vector.multi_reduction <add>, %75, %cst_24 [1] : vector<128x128xf32> to vector<128xf32>
    %77 = vector.shape_cast %76 : vector<128xf32> to vector<128x1xf32>
    %78 = tpu.reciprocal %77 {approx = true} : vector<128x1xf32> -> vector<128x1xf32>
    %79 = arith.truncf %75 : vector<128x128xf32> to vector<128x128xbf16>
    %80 = arith.truncf %67 : vector<128x8xf32> to vector<128x8xbf16>
    %cst_25 = arith.constant dense<0.000000e+00> : vector<128x8xf32>
    %81 = tpu.matmul %79, %80, %cst_25 {dimension_numbers = #tpu.dot_dimension_numbers<[1], [0], [0], [1], [0, 0, 1, 1], [], []>} : vector<128x128xbf16>, vector<128x8xbf16>, vector<128x8xf32> -> vector<128x8xf32>
    %82 = vector.broadcast %78 : vector<128x1xf32> to vector<128x8xf32>
    %83 = arith.mulf %81, %82 : vector<128x8xf32>
    %84 = vector.extract_strided_slice %7 {offsets = [0, 32], sizes = [128, 8], strides = [1, 1]} : vector<128x192xf32> to vector<128x8xf32>
    %85 = vector.extract_strided_slice %7 {offsets = [0, 96], sizes = [128, 8], strides = [1, 1]} : vector<128x192xf32> to vector<128x8xf32>
    %86 = vector.extract_strided_slice %7 {offsets = [0, 160], sizes = [128, 8], strides = [1, 1]} : vector<128x192xf32> to vector<128x8xf32>
    %cst_26 = arith.constant dense<0.000000e+00> : vector<128x128xf32>
    %87 = tpu.matmul %84, %85, %cst_26 {dimension_numbers = #tpu.dot_dimension_numbers<[1], [1], [0], [0], [0, 0, 1, 0], [], []>} : vector<128x8xf32>, vector<128x8xf32>, vector<128x128xf32> -> vector<128x128xf32>
    %cst_27 = arith.constant 0.353553385 : f32
    %88 = vector.broadcast %cst_27 : f32 to vector<128x128xf32>
    %89 = arith.mulf %87, %88 : vector<128x128xf32>
    %cst_28 = arith.constant dense<0xFF800000> : vector<128xf32>
    %90 = vector.multi_reduction <maximumf>, %89, %cst_28 [1] : vector<128x128xf32> to vector<128xf32>
    %91 = vector.shape_cast %90 : vector<128xf32> to vector<128x1xf32>
    %92 = vector.broadcast %91 : vector<128x1xf32> to vector<128x128xf32>
    %93 = arith.subf %89, %92 : vector<128x128xf32>
    %94 = math.exp %93 : vector<128x128xf32>
    %cst_29 = arith.constant dense<0.000000e+00> : vector<128xf32>
    %95 = vector.multi_reduction <add>, %94, %cst_29 [1] : vector<128x128xf32> to vector<128xf32>
    %96 = vector.shape_cast %95 : vector<128xf32> to vector<128x1xf32>
    %97 = tpu.reciprocal %96 {approx = true} : vector<128x1xf32> -> vector<128x1xf32>
    %98 = arith.truncf %94 : vector<128x128xf32> to vector<128x128xbf16>
    %99 = arith.truncf %86 : vector<128x8xf32> to vector<128x8xbf16>
    %cst_30 = arith.constant dense<0.000000e+00> : vector<128x8xf32>
    %100 = tpu.matmul %98, %99, %cst_30 {dimension_numbers = #tpu.dot_dimension_numbers<[1], [0], [0], [1], [0, 0, 1, 1], [], []>} : vector<128x128xbf16>, vector<128x8xbf16>, vector<128x8xf32> -> vector<128x8xf32>
    %101 = vector.broadcast %97 : vector<128x1xf32> to vector<128x8xf32>
    %102 = arith.mulf %100, %101 : vector<128x8xf32>
    %103 = vector.extract_strided_slice %7 {offsets = [0, 40], sizes = [128, 8], strides = [1, 1]} : vector<128x192xf32> to vector<128x8xf32>
    %104 = vector.extract_strided_slice %7 {offsets = [0, 104], sizes = [128, 8], strides = [1, 1]} : vector<128x192xf32> to vector<128x8xf32>
    %105 = vector.extract_strided_slice %7 {offsets = [0, 168], sizes = [128, 8], strides = [1, 1]} : vector<128x192xf32> to vector<128x8xf32>
    %cst_31 = arith.constant dense<0.000000e+00> : vector<128x128xf32>
    %106 = tpu.matmul %103, %104, %cst_31 {dimension_numbers = #tpu.dot_dimension_numbers<[1], [1], [0], [0], [0, 0, 1, 0], [], []>} : vector<128x8xf32>, vector<128x8xf32>, vector<128x128xf32> -> vector<128x128xf32>
    %cst_32 = arith.constant 0.353553385 : f32
    %107 = vector.broadcast %cst_32 : f32 to vector<128x128xf32>
    %108 = arith.mulf %106, %107 : vector<128x128xf32>
    %cst_33 = arith.constant dense<0xFF800000> : vector<128xf32>
    %109 = vector.multi_reduction <maximumf>, %108, %cst_33 [1] : vector<128x128xf32> to vector<128xf32>
    %110 = vector.shape_cast %109 : vector<128xf32> to vector<128x1xf32>
    %111 = vector.broadcast %110 : vector<128x1xf32> to vector<128x128xf32>
    %112 = arith.subf %108, %111 : vector<128x128xf32>
    %113 = math.exp %112 : vector<128x128xf32>
    %cst_34 = arith.constant dense<0.000000e+00> : vector<128xf32>
    %114 = vector.multi_reduction <add>, %113, %cst_34 [1] : vector<128x128xf32> to vector<128xf32>
    %115 = vector.shape_cast %114 : vector<128xf32> to vector<128x1xf32>
    %116 = tpu.reciprocal %115 {approx = true} : vector<128x1xf32> -> vector<128x1xf32>
    %117 = arith.truncf %113 : vector<128x128xf32> to vector<128x128xbf16>
    %118 = arith.truncf %105 : vector<128x8xf32> to vector<128x8xbf16>
    %cst_35 = arith.constant dense<0.000000e+00> : vector<128x8xf32>
    %119 = tpu.matmul %117, %118, %cst_35 {dimension_numbers = #tpu.dot_dimension_numbers<[1], [0], [0], [1], [0, 0, 1, 1], [], []>} : vector<128x128xbf16>, vector<128x8xbf16>, vector<128x8xf32> -> vector<128x8xf32>
    %120 = vector.broadcast %116 : vector<128x1xf32> to vector<128x8xf32>
    %121 = arith.mulf %119, %120 : vector<128x8xf32>
    %122 = vector.extract_strided_slice %7 {offsets = [0, 48], sizes = [128, 8], strides = [1, 1]} : vector<128x192xf32> to vector<128x8xf32>
    %123 = vector.extract_strided_slice %7 {offsets = [0, 112], sizes = [128, 8], strides = [1, 1]} : vector<128x192xf32> to vector<128x8xf32>
    %124 = vector.extract_strided_slice %7 {offsets = [0, 176], sizes = [128, 8], strides = [1, 1]} : vector<128x192xf32> to vector<128x8xf32>
    %cst_36 = arith.constant dense<0.000000e+00> : vector<128x128xf32>
    %125 = tpu.matmul %122, %123, %cst_36 {dimension_numbers = #tpu.dot_dimension_numbers<[1], [1], [0], [0], [0, 0, 1, 0], [], []>} : vector<128x8xf32>, vector<128x8xf32>, vector<128x128xf32> -> vector<128x128xf32>
    %cst_37 = arith.constant 0.353553385 : f32
    %126 = vector.broadcast %cst_37 : f32 to vector<128x128xf32>
    %127 = arith.mulf %125, %126 : vector<128x128xf32>
    %cst_38 = arith.constant dense<0xFF800000> : vector<128xf32>
    %128 = vector.multi_reduction <maximumf>, %127, %cst_38 [1] : vector<128x128xf32> to vector<128xf32>
    %129 = vector.shape_cast %128 : vector<128xf32> to vector<128x1xf32>
    %130 = vector.broadcast %129 : vector<128x1xf32> to vector<128x128xf32>
    %131 = arith.subf %127, %130 : vector<128x128xf32>
    %132 = math.exp %131 : vector<128x128xf32>
    %cst_39 = arith.constant dense<0.000000e+00> : vector<128xf32>
    %133 = vector.multi_reduction <add>, %132, %cst_39 [1] : vector<128x128xf32> to vector<128xf32>
    %134 = vector.shape_cast %133 : vector<128xf32> to vector<128x1xf32>
    %135 = tpu.reciprocal %134 {approx = true} : vector<128x1xf32> -> vector<128x1xf32>
    %136 = arith.truncf %132 : vector<128x128xf32> to vector<128x128xbf16>
    %137 = arith.truncf %124 : vector<128x8xf32> to vector<128x8xbf16>
    %cst_40 = arith.constant dense<0.000000e+00> : vector<128x8xf32>
    %138 = tpu.matmul %136, %137, %cst_40 {dimension_numbers = #tpu.dot_dimension_numbers<[1], [0], [0], [1], [0, 0, 1, 1], [], []>} : vector<128x128xbf16>, vector<128x8xbf16>, vector<128x8xf32> -> vector<128x8xf32>
    %139 = vector.broadcast %135 : vector<128x1xf32> to vector<128x8xf32>
    %140 = arith.mulf %138, %139 : vector<128x8xf32>
    %141 = vector.extract_strided_slice %7 {offsets = [0, 56], sizes = [128, 8], strides = [1, 1]} : vector<128x192xf32> to vector<128x8xf32>
    %142 = vector.extract_strided_slice %7 {offsets = [0, 120], sizes = [128, 8], strides = [1, 1]} : vector<128x192xf32> to vector<128x8xf32>
    %143 = vector.extract_strided_slice %7 {offsets = [0, 184], sizes = [128, 8], strides = [1, 1]} : vector<128x192xf32> to vector<128x8xf32>
    %cst_41 = arith.constant dense<0.000000e+00> : vector<128x128xf32>
    %144 = tpu.matmul %141, %142, %cst_41 {dimension_numbers = #tpu.dot_dimension_numbers<[1], [1], [0], [0], [0, 0, 1, 0], [], []>} : vector<128x8xf32>, vector<128x8xf32>, vector<128x128xf32> -> vector<128x128xf32>
    %cst_42 = arith.constant 0.353553385 : f32
    %145 = vector.broadcast %cst_42 : f32 to vector<128x128xf32>
    %146 = arith.mulf %144, %145 : vector<128x128xf32>
    %cst_43 = arith.constant dense<0xFF800000> : vector<128xf32>
    %147 = vector.multi_reduction <maximumf>, %146, %cst_43 [1] : vector<128x128xf32> to vector<128xf32>
    %148 = vector.shape_cast %147 : vector<128xf32> to vector<128x1xf32>
    %149 = vector.broadcast %148 : vector<128x1xf32> to vector<128x128xf32>
    %150 = arith.subf %146, %149 : vector<128x128xf32>
    %151 = math.exp %150 : vector<128x128xf32>
    %cst_44 = arith.constant dense<0.000000e+00> : vector<128xf32>
    %152 = vector.multi_reduction <add>, %151, %cst_44 [1] : vector<128x128xf32> to vector<128xf32>
    %153 = vector.shape_cast %152 : vector<128xf32> to vector<128x1xf32>
    %154 = tpu.reciprocal %153 {approx = true} : vector<128x1xf32> -> vector<128x1xf32>
    %155 = arith.truncf %151 : vector<128x128xf32> to vector<128x128xbf16>
    %156 = arith.truncf %143 : vector<128x8xf32> to vector<128x8xbf16>
    %cst_45 = arith.constant dense<0.000000e+00> : vector<128x8xf32>
    %157 = tpu.matmul %155, %156, %cst_45 {dimension_numbers = #tpu.dot_dimension_numbers<[1], [0], [0], [1], [0, 0, 1, 1], [], []>} : vector<128x128xbf16>, vector<128x8xbf16>, vector<128x8xf32> -> vector<128x8xf32>
    %158 = vector.broadcast %154 : vector<128x1xf32> to vector<128x8xf32>
    %159 = arith.mulf %157, %158 : vector<128x8xf32>
    %160 = tpu.concatenate %26, %45, %64, %83, %102, %121, %140, %159 in 1 : vector<128x8xf32>, vector<128x8xf32>, vector<128x8xf32>, vector<128x8xf32>, vector<128x8xf32>, vector<128x8xf32>, vector<128x8xf32>, vector<128x8xf32> -> vector<128x64xf32>
    %161 = arith.truncf %160 : vector<128x64xf32> to vector<128x64xbf16>
    %c0_46 = arith.constant 0 : index
    %c0_47 = arith.constant 0 : index
    %162 = vector.load %arg4[%c0_46, %c0_47] : memref<64x64xbf16, #tpu.memory_space<vmem>>, vector<64x64xbf16>
    %cst_48 = arith.constant dense<0.000000e+00> : vector<128x64xf32>
    %163 = tpu.matmul %161, %162, %cst_48 {dimension_numbers = #tpu.dot_dimension_numbers<[1], [0], [0], [1], [0, 0, 1, 1], [], []>} : vector<128x64xbf16>, vector<64x64xbf16>, vector<128x64xf32> -> vector<128x64xf32>
    %c0_49 = arith.constant 0 : index
    %c0_50 = arith.constant 0 : index
    %164 = vector.load %arg5[%c0_49, %c0_50] : memref<1x64xf32, #tpu.memory_space<vmem>>, vector<1x64xf32>
    %165 = vector.broadcast %164 : vector<1x64xf32> to vector<128x64xf32>
    %166 = arith.addf %163, %165 : vector<128x64xf32>
    %167 = arith.addf %166, %1 : vector<128x64xf32>
    %cst_51 = arith.constant dense<0.000000e+00> : vector<128xf32>
    %168 = vector.multi_reduction <add>, %167, %cst_51 [1] : vector<128x64xf32> to vector<128xf32>
    %169 = vector.shape_cast %168 : vector<128xf32> to vector<128x1xf32>
    %cst_52 = arith.constant 6.400000e+01 : f32
    %170 = vector.broadcast %cst_52 : f32 to vector<128x1xf32>
    %171 = arith.divf %169, %170 : vector<128x1xf32>
    %172 = vector.broadcast %171 : vector<128x1xf32> to vector<128x64xf32>
    %173 = arith.subf %167, %172 : vector<128x64xf32>
    %174 = arith.mulf %173, %173 : vector<128x64xf32>
    %cst_53 = arith.constant dense<0.000000e+00> : vector<128xf32>
    %175 = vector.multi_reduction <add>, %174, %cst_53 [1] : vector<128x64xf32> to vector<128xf32>
    %176 = vector.shape_cast %175 : vector<128xf32> to vector<128x1xf32>
    %cst_54 = arith.constant 6.400000e+01 : f32
    %177 = vector.broadcast %cst_54 : f32 to vector<128x1xf32>
    %178 = arith.divf %176, %177 : vector<128x1xf32>
    %cst_55 = arith.constant 9.99999974E-6 : f32
    %179 = vector.broadcast %cst_55 : f32 to vector<128x1xf32>
    %180 = arith.addf %178, %179 : vector<128x1xf32>
    %181 = math.rsqrt %180 : vector<128x1xf32>
    %182 = vector.broadcast %181 : vector<128x1xf32> to vector<128x64xf32>
    %183 = arith.mulf %173, %182 : vector<128x64xf32>
    %c0_56 = arith.constant 0 : index
    %c0_57 = arith.constant 0 : index
    %184 = vector.load %arg6[%c0_56, %c0_57] : memref<1x64xf32, #tpu.memory_space<vmem>>, vector<1x64xf32>
    %185 = vector.broadcast %184 : vector<1x64xf32> to vector<128x64xf32>
    %186 = arith.mulf %183, %185 : vector<128x64xf32>
    %c0_58 = arith.constant 0 : index
    %c0_59 = arith.constant 0 : index
    %187 = vector.load %arg7[%c0_58, %c0_59] : memref<1x64xf32, #tpu.memory_space<vmem>>, vector<1x64xf32>
    %188 = vector.broadcast %187 : vector<1x64xf32> to vector<128x64xf32>
    %189 = arith.addf %186, %188 : vector<128x64xf32>
    %190 = arith.truncf %189 : vector<128x64xf32> to vector<128x64xbf16>
    %c0_60 = arith.constant 0 : index
    %c0_61 = arith.constant 0 : index
    %191 = vector.load %arg8[%c0_60, %c0_61] : memref<64x256xbf16, #tpu.memory_space<vmem>>, vector<64x256xbf16>
    %cst_62 = arith.constant dense<0.000000e+00> : vector<128x256xf32>
    %192 = tpu.matmul %190, %191, %cst_62 {dimension_numbers = #tpu.dot_dimension_numbers<[1], [0], [0], [1], [0, 0, 1, 1], [], []>} : vector<128x64xbf16>, vector<64x256xbf16>, vector<128x256xf32> -> vector<128x256xf32>
    %c0_63 = arith.constant 0 : index
    %c0_64 = arith.constant 0 : index
    %193 = vector.load %arg9[%c0_63, %c0_64] : memref<1x256xf32, #tpu.memory_space<vmem>>, vector<1x256xf32>
    %194 = vector.broadcast %193 : vector<1x256xf32> to vector<128x256xf32>
    %195 = arith.addf %192, %194 : vector<128x256xf32>
    %196 = math.tanh %195 : vector<128x256xf32>
    %197 = arith.truncf %196 : vector<128x256xf32> to vector<128x256xbf16>
    %c0_65 = arith.constant 0 : index
    %c0_66 = arith.constant 0 : index
    %198 = vector.load %arg10[%c0_65, %c0_66] : memref<256x64xbf16, #tpu.memory_space<vmem>>, vector<256x64xbf16>
    %cst_67 = arith.constant dense<0.000000e+00> : vector<128x64xf32>
    %199 = tpu.matmul %197, %198, %cst_67 {dimension_numbers = #tpu.dot_dimension_numbers<[1], [0], [0], [1], [0, 0, 1, 1], [], []>} : vector<128x256xbf16>, vector<256x64xbf16>, vector<128x64xf32> -> vector<128x64xf32>
    %c0_68 = arith.constant 0 : index
    %c0_69 = arith.constant 0 : index
    %200 = vector.load %arg11[%c0_68, %c0_69] : memref<1x64xf32, #tpu.memory_space<vmem>>, vector<1x64xf32>
    %201 = vector.broadcast %200 : vector<1x64xf32> to vector<128x64xf32>
    %202 = arith.addf %199, %201 : vector<128x64xf32>
    %203 = arith.addf %202, %189 : vector<128x64xf32>
    %cst_70 = arith.constant dense<0.000000e+00> : vector<128xf32>
    %204 = vector.multi_reduction <add>, %203, %cst_70 [1] : vector<128x64xf32> to vector<128xf32>
    %205 = vector.shape_cast %204 : vector<128xf32> to vector<128x1xf32>
    %cst_71 = arith.constant 6.400000e+01 : f32
    %206 = vector.broadcast %cst_71 : f32 to vector<128x1xf32>
    %207 = arith.divf %205, %206 : vector<128x1xf32>
    %208 = vector.broadcast %207 : vector<128x1xf32> to vector<128x64xf32>
    %209 = arith.subf %203, %208 : vector<128x64xf32>
    %210 = arith.mulf %209, %209 : vector<128x64xf32>
    %cst_72 = arith.constant dense<0.000000e+00> : vector<128xf32>
    %211 = vector.multi_reduction <add>, %210, %cst_72 [1] : vector<128x64xf32> to vector<128xf32>
    %212 = vector.shape_cast %211 : vector<128xf32> to vector<128x1xf32>
    %cst_73 = arith.constant 6.400000e+01 : f32
    %213 = vector.broadcast %cst_73 : f32 to vector<128x1xf32>
    %214 = arith.divf %212, %213 : vector<128x1xf32>
    %cst_74 = arith.constant 9.99999974E-6 : f32
    %215 = vector.broadcast %cst_74 : f32 to vector<128x1xf32>
    %216 = arith.addf %214, %215 : vector<128x1xf32>
    %217 = math.rsqrt %216 : vector<128x1xf32>
    %218 = vector.broadcast %217 : vector<128x1xf32> to vector<128x64xf32>
    %219 = arith.mulf %209, %218 : vector<128x64xf32>
    %c0_75 = arith.constant 0 : index
    %c0_76 = arith.constant 0 : index
    %220 = vector.load %arg12[%c0_75, %c0_76] : memref<1x64xf32, #tpu.memory_space<vmem>>, vector<1x64xf32>
    %221 = vector.broadcast %220 : vector<1x64xf32> to vector<128x64xf32>
    %222 = arith.mulf %219, %221 : vector<128x64xf32>
    %c0_77 = arith.constant 0 : index
    %c0_78 = arith.constant 0 : index
    %223 = vector.load %arg13[%c0_77, %c0_78] : memref<1x64xf32, #tpu.memory_space<vmem>>, vector<1x64xf32>
    %224 = vector.broadcast %223 : vector<1x64xf32> to vector<128x64xf32>
    %225 = arith.addf %222, %224 : vector<128x64xf32>
    %c0_79 = arith.constant 0 : index
    %c0_80 = arith.constant 0 : index
    %c0_81 = arith.constant 0 : index
    %226 = vector.load %arg14[%c0_79, %c0_80, %c0_81] : memref<1x128x64xf32, #tpu.memory_space<vmem>>, vector<1x128x64xf32>
    %227 = vector.shape_cast %226 : vector<1x128x64xf32> to vector<128x64xf32>
    %228 = vector.shape_cast %225 : vector<128x64xf32> to vector<1x128x64xf32>
    tpu.vector_store %arg14[%c0_79, %c0_80, %c0_81], %228 {strides = array<i32>} : memref<1x128x64xf32, #tpu.memory_space<vmem>>, vector<1x128x64xf32>,
    return
  }
  func.func @transform_0(%arg0: i32) -> (i32, i32, i32) {
    %c0_i32 = arith.constant 0 : i32
    %c0_i32_0 = arith.constant 0 : i32
    %c0_i32_1 = arith.constant 0 : i32
    return %arg0, %c0_i32, %c0_i32_0 : i32, i32, i32
  }
  func.func @transform_1(%arg0: i32) -> (i32, i32) {
    %c0_i32 = arith.constant 0 : i32
    %c0_i32_0 = arith.constant 0 : i32
    %c0_i32_1 = arith.constant 0 : i32
    return %c0_i32, %c0_i32_0 : i32, i32
  }
  func.func @transform_2(%arg0: i32) -> (i32, i32) {
    %c0_i32 = arith.constant 0 : i32
    %c0_i32_0 = arith.constant 0 : i32
    %c0_i32_1 = arith.constant 0 : i32
    return %c0_i32, %c0_i32_0 : i32, i32
  }
  func.func @transform_3(%arg0: i32) -> (i32, i32) {
    %c0_i32 = arith.constant 0 : i32
    %c0_i32_0 = arith.constant 0 : i32
    %c0_i32_1 = arith.constant 0 : i32
    return %c0_i32, %c0_i32_0 : i32, i32
  }
  func.func @transform_4(%arg0: i32) -> (i32, i32) {
    %c0_i32 = arith.constant 0 : i32
    %c0_i32_0 = arith.constant 0 : i32
    %c0_i32_1 = arith.constant 0 : i32
    return %c0_i32, %c0_i32_0 : i32, i32
  }
  func.func @transform_5(%arg0: i32) -> (i32, i32) {
    %c0_i32 = arith.constant 0 : i32
    %c0_i32_0 = arith.constant 0 : i32
    %c0_i32_1 = arith.constant 0 : i32
    return %c0_i32, %c0_i32_0 : i32, i32
  }
  func.func @transform_6(%arg0: i32) -> (i32, i32) {
    %c0_i32 = arith.constant 0 : i32
    %c0_i32_0 = arith.constant 0 : i32
    %c0_i32_1 = arith.constant 0 : i32
    return %c0_i32, %c0_i32_0 : i32, i32
  }
  func.func @transform_7(%arg0: i32) -> (i32, i32) {
    %c0_i32 = arith.constant 0 : i32
    %c0_i32_0 = arith.constant 0 : i32
    %c0_i32_1 = arith.constant 0 : i32
    return %c0_i32, %c0_i32_0 : i32, i32
  }
  func.func @transform_8(%arg0: i32) -> (i32, i32) {
    %c0_i32 = arith.constant 0 : i32
    %c0_i32_0 = arith.constant 0 : i32
    %c0_i32_1 = arith.constant 0 : i32
    return %c0_i32, %c0_i32_0 : i32, i32
  }
  func.func @transform_9(%arg0: i32) -> (i32, i32) {
    %c0_i32 = arith.constant 0 : i32
    %c0_i32_0 = arith.constant 0 : i32
    %c0_i32_1 = arith.constant 0 : i32
    return %c0_i32, %c0_i32_0 : i32, i32
  }
  func.func @transform_10(%arg0: i32) -> (i32, i32) {
    %c0_i32 = arith.constant 0 : i32
    %c0_i32_0 = arith.constant 0 : i32
    %c0_i32_1 = arith.constant 0 : i32
    return %c0_i32, %c0_i32_0 : i32, i32
  }
  func.func @transform_11(%arg0: i32) -> (i32, i32) {
    %c0_i32 = arith.constant 0 : i32
    %c0_i32_0 = arith.constant 0 : i32
    %c0_i32_1 = arith.constant 0 : i32
    return %c0_i32, %c0_i32_0 : i32, i32
  }
  func.func @transform_12(%arg0: i32) -> (i32, i32) {
    %c0_i32 = arith.constant 0 : i32
    %c0_i32_0 = arith.constant 0 : i32
    %c0_i32_1 = arith.constant 0 : i32
    return %c0_i32, %c0_i32_0 : i32, i32
  }
  func.func @transform_13(%arg0: i32) -> (i32, i32, i32) {
    %c0_i32 = arith.constant 0 : i32
    %c0_i32_0 = arith.constant 0 : i32
    %c0_i32_1 = arith.constant 0 : i32
    return %arg0, %c0_i32, %c0_i32_0 : i32, i32, i32
  }
}

</mosaic_0001>

<bundles_post_ra>
// kernel: transformer_encoder_forward.1
= control target key start
LH: loop header
LB: loop body
LE: loop exit
PB: predicated region body
PF: predicated region fallthrough
CT: control target
= control target key end

     0   :  { %s9605_s25 = smov 0   ;;  %s13983_s0 = inlined_call_operand.vmem [shape: f32[2,128,64], index: 0, kind: input, shape index: {}]   ;;  %s13984_s1 = inlined_call_operand.vmem [shape: bf16[64,192], index: 1, kind: input, shape index: {}]   ;;  %s13985_s2 = inlined_call_operand.vmem [shape: f32[1,192], index: 2, kind: input, shape index: {}]   ;;  %s13986_s3 = inlined_call_operand.vmem [shape: bf16[64,64], index: 3, kind: input, shape index: {}]   ;;  %s13987_s4 = inlined_call_operand.vmem [shape: f32[1,64], index: 4, kind: input, shape index: {}]   ;;  %s13988_s5 = inlined_call_operand.vmem [shape: f32[1,64], index: 5, kind: input, shape index: {}]   ;;  %s13989_s6 = inlined_call_operand.vmem [shape: f32[1,64], index: 6, kind: input, shape index: {}]   ;;  %s13990_s7 = inlined_call_operand.vmem [shape: bf16[64,256], index: 7, kind: input, shape index: {}]   ;;  %s13991_s8 = inlined_call_operand.vmem [shape: f32[1,256], index: 8, kind: input, shape index: {}]   ;;  %s13992_s9 = inlined_call_operand.vmem [shape: bf16[256,64], index: 9, kind: input, shape index: {}]   ;;  %s13993_s10 = inlined_call_operand.vmem [shape: f32[1,64], index: 10, kind: input, shape index: {}]   ;;  %s13994_s11 = inlined_call_operand.vmem [shape: f32[1,64], index: 11, kind: input, shape index: {}]   ;;  %s13995_s12 = inlined_call_operand.vmem [shape: f32[1,64], index: 12, kind: input, shape index: {}]   ;;  %s13996_s13 = inlined_call_operand.vmem [shape: f32[2,128,64], index: 13, kind: output, shape index: {}]  }
   0x1 LB: > { %s6968_s26 = sadd.s32 4294967295, %s9517_s25   ;;  %p6972_p0 = scmp.ge.s32.totalorder %s9517_s25, 1  ;;  %s9517_s25 = sphi %s9605_s25, %s23_s25  }
   0x2   : > { %p387_p1 = scmp.lt.s32.totalorder %s9517_s25, 3 }
   0x4   : > { %p388_p2 = pnand %p6972_p0, %p387_p1 }
   0x6   : > { %391 = sbr.rel (%p388_p2) target bundleno = 5444 (0x1544), region = 72 }
   0xb   : > { %v8811_v0 = vld [vmem:[%s13984_s1 + $0x34] ss:$8 sps:$4 sm:$0xff]   ;;  %p431_p3 = scmp.lt.s32.totalorder %s6968_s26, 1  ;;  %v8813_v1 = vld [vmem:[%s13984_s1 + $0x30] ss:$8 sps:$4 sm:$0xff]   ;;  %v13999_v2 = vmov 0   ;;  %v476_v33 = vlaneseq }
   0xc   : > { %583 = vmatprep.mubr.bf16.mxu0 %v13999_v2  ;;  %559 = vmatprep.subr.bf16.mxu0 %v8811_v0  ;;  %v8814_v3 = vld [vmem:[%s13984_s1 + $0x24] ss:$8 sps:$4 sm:$0xff]   ;;  %v8816_v4 = vld [vmem:[%s13984_s1 + $0x20] ss:$8 sps:$4 sm:$0xff]   ;;  %v8817_v5 = vld [vmem:[%s13984_s1 + $0x14] ss:$8 sps:$4 sm:$0xff]  }
   0xd   : > { %s14700_s26 = smov (!%p431_p3, %s6968_s26), 1  ;;  %560 = vmatpush1.bf16.msra.mxu0 %v8813_v1  ;;  %v8819_v6 = vld [vmem:[%s13984_s1 + $0x10] ss:$8 sps:$4 sm:$0xff]   ;;  %v8820_v7 = vld [vmem:[%s13984_s1 + $0x4] ss:$8 sps:$4 sm:$0xff]   ;;  %vm526_vm0 = vcmask 523264  }
   0xe   : > { %561 = vmatprep.subr.bf16.mxu0 %v8814_v3  ;;  %s7301_s20 = sshll.u32 %s14700_s26, 7  ;;  %v8822_v8 = vld [vmem:[%s13984_s1] ss:$8 sps:$4 sm:$0xff]   ;;  %v9679_v34 = vshrl.u32 %v476_v33, 7  ;;  %vm712_vm1 = vcmask 64512   ;;  %s9520_s17 = smov 64  }
   0xf   : > { %s9640_s27 = scalar_lea.vmem %s13983_s0, %s7301_s20  ;;  %v474_v36 = vld [vmem:[%s13985_s2] sm:$0x3]  ;;  %s9521_s18 = smov 56   ;;  %vm5601_vm2 = vcmask 130048   ;;  %vm5618_vm3 = vcmask 195584   ;;  %vm5635_vm4 = vcmask 261120  }
  0x10   : > { %v442_v9 = vld [vmem:[%s9640_s27] sm:$0xff]  ;;  %v443_v10 = vld [vmem:[%s9640_s27 + $0x8] sm:$0xff]  ;;  %v444_v12 = vld [vmem:[%s9640_s27 + $0x10] sm:$0xff]  ;;  %14129 = vst [vmem:[#allocation2_spill] sm:$0xff] %v9679_v34  ;;  %v13997_v35 = vsub.s32 0, %v9679_v34  ;;  %s9522_s19 = smov 120  }
  0x11   : > { %562 = vmatpush1.bf16.msra.mxu0 %v8816_v4  ;;  %v458_v11 = vpack.c.bf16 %v443_v10, %v442_v9  ;;  %v445_v13 = vld [vmem:[%s9640_s27 + $0x18] sm:$0xff]  ;;  %v446_v15 = vld [vmem:[%s9640_s27 + $0x20] sm:$0xff]  ;;  %v447_v16 = vld [vmem:[%s9640_s27 + $0x28] sm:$0xff]  ;;  %v13998_v9 = vsub.s32 1, %v9679_v34  ;;  %s9523_s21 = smov 48   ;;  %s9524_s22 = smov 112  }
  0x12   : > { %563 = vmatprep.subr.bf16.mxu0 %v8817_v5  ;;  %v459_v14 = vpack.c.bf16 %v445_v13, %v444_v12  ;;  %v460_v17 = vpack.c.bf16 %v447_v16, %v446_v15  ;;  %v448_v18 = vld [vmem:[%s9640_s27 + $0x30] sm:$0xff]  ;;  %v449_v19 = vld [vmem:[%s9640_s27 + $0x38] sm:$0xff]  ;;  %v450_v21 = vld [vmem:[%s9640_s27 + $0x40] sm:$0xff]  ;;  %v9687_v37 = vrot.slane %v474_v36, %v13997_v35  ;;  %s9525_s23 = smov 40   ;;  %s9526_s24 = smov 104   ;;  %vm5652_vm5 = vcmask 326656  }
  0x13   : > { %v461_v20 = vpack.c.bf16 %v449_v19, %v448_v18  ;;  %v451_v22 = vld [vmem:[%s9640_s27 + $0x48] sm:$0xff]  ;;  %v452_v24 = vld [vmem:[%s9640_s27 + $0x50] sm:$0xff]  ;;  %v453_v25 = vld [vmem:[%s9640_s27 + $0x58] sm:$0xff]  ;;  %v483_v13 = vrot.slane %v474_v36, %v13998_v9  ;;  %s9527_s28 = smov 32   ;;  %s9528_s29 = smov 96   ;;  %vm5669_vm6 = vcmask 392192  }
  0x14   : > { %v462_v23 = vpack.c.bf16 %v451_v22, %v450_v21  ;;  %v463_v26 = vpack.c.bf16 %v453_v25, %v452_v24  ;;  %v454_v27 = vld [vmem:[%s9640_s27 + $0x60] sm:$0xff]  ;;  %v455_v28 = vld [vmem:[%s9640_s27 + $0x68] sm:$0xff]  ;;  %v456_v30 = vld [vmem:[%s9640_s27 + $0x70] sm:$0xff]  ;;  %s9529_s30 = smov 24   ;;  %s9530_s14 = smov 88   ;;  %vm5686_vm7 = vcmask 457728  }
  0x15   : > { %564 = vmatpush1.bf16.msra.mxu0 %v8819_v6  ;;  %v464_v29 = vpack.c.bf16 %v455_v28, %v454_v27  ;;  %v457_v31 = vld [vmem:[%s9640_s27 + $0x78] sm:$0xff]  ;;  %s9531_s15 = smov 16   ;;  %s9532_s16 = smov 80  }
  0x16   : > { %565 = vmatprep.subr.bf16.mxu0 %v8820_v7  ;;  %v465_v32 = vpack.c.bf16 %v457_v31, %v456_v30 }
  0x19   : > { %566 = vmatpush1.bf16.msra.mxu0 %v8822_v8 }
  0x1c   : > { %6985 = vmatmul.mubr.msk.bf16.vlgmr.msra.gmra.mxu0 %vm526_vm0, %v458_v11 }
  0x1d   : > { %593 = vmatprep.mubr.bf16.mxu0 %v13999_v2 }
  0x24   : > { %6986 = vmatmul.mubr.msk.bf16.gmra.mxu0 %vm526_vm0, %v459_v14 }
  0x25   : > { %603 = vmatprep.mubr.bf16.mxu0 %v13999_v2 }
  0x2c   : > { %6987 = vmatmul.mubr.msk.bf16.gmra.mxu0 %vm526_vm0, %v460_v17 }
  0x2d   : > { %613 = vmatprep.mubr.bf16.mxu0 %v13999_v2 }
  0x34   : > { %6988 = vmatmul.mubr.msk.bf16.gmra.mxu0 %vm526_vm0, %v461_v20 }
  0x35   : > { %623 = vmatprep.mubr.bf16.mxu0 %v13999_v2 }
  0x3c   : > { %6989 = vmatmul.mubr.msk.bf16.gmra.mxu0 %vm526_vm0, %v462_v23 }
  0x3d   : > { %633 = vmatprep.mubr.bf16.mxu0 %v13999_v2 }
  0x44   : > { %6990 = vmatmul.mubr.msk.bf16.gmra.mxu0 %vm526_vm0, %v463_v26 }
  0x45   : > { %643 = vmatprep.mubr.bf16.mxu0 %v13999_v2 }
  0x4c   : > { %6991 = vmatmul.mubr.msk.bf16.gmra.mxu0 %vm526_vm0, %v464_v29 }
  0x4d   : > { %653 = vmatprep.mubr.bf16.mxu0 %v13999_v2 }
  0x54   : > { %6992 = vmatmul.mubr.msk.bf16.gmra.mxu0 %vm526_vm0, %v465_v32 }
  0xdc   : > { %v585_v38 = vpop.f32.mrf.mxu0 }
  0xdd   : > { %v9690_v39 = vadd.f32 %v585_v38, %v9687_v37 }
  0xde   : > { %v9692_v40 = vpop.f32.mrf.mxu0 }
  0xdf   : > { %7795 = vmatprep.mubr.msk.f32.mxu1 %vm712_vm1, %v9690_v39 }
  0xe0   : > { %v589_v41 = vpop.f32.mrf.mxu0 }
  0xe1   : > { %v9697_v42 = vadd.f32 %v589_v41, %v9687_v37 }
  0xe2   : > { %v9699_v43 = vpop.f32.mrf.mxu0 }
  0xe4   : > { %v595_v44 = vpop.f32.mrf.mxu0 }
  0xe5   : > { %v9702_v45 = vadd.f32 %v595_v44, %v9687_v37 }
  0xe6   : > { %v9704_v46 = vpop.f32.mrf.mxu0 }
  0xe8   : > { %v599_v47 = vpop.f32.mrf.mxu0 }
  0xe9   : > { %v9707_v48 = vadd.f32 %v599_v47, %v9687_v37 }
  0xea   : > { %v9709_v49 = vpop.f32.mrf.mxu0 }
  0xec   : > { %v605_v50 = vpop.f32.mrf.mxu0 }
  0xed   : > { %v9775_v33 = vadd.f32 %v605_v50, %v9687_v37 }
  0xee   : > { %v9711_v51 = vpop.f32.mrf.mxu0 }
  0xf0   : > { %v9713_v52 = vpop.f32.mrf.mxu0 }
  0xf2   : > { %v9715_v53 = vpop.f32.mrf.mxu0 }
  0xf3   : > { %v612_v47 = vadd.f32 %v9715_v53, %v483_v13  ;;  %v602_v53 = vadd.f32 %v9709_v49, %v483_v13  ;;  %v588_v49 = vadd.f32 %v9692_v40, %v483_v13 }
  0xf4   : > { %v615_v54 = vpop.f32.mrf.mxu0 }
  0xf5   : > { %v9761_v28 = vadd.f32 %v615_v54, %v9687_v37  ;;  %v608_v54 = vadd.f32 %v9711_v51, %v483_v13  ;;  %v598_v51 = vadd.f32 %v9704_v46, %v483_v13 }
  0xf6   : > { %v617_v55 = vpop.f32.mrf.mxu0 }
  0xf7   : > { %v618_v41 = vadd.f32 %v617_v55, %v483_v13  ;;  %v9799_v55 = vadd.f32 %v9713_v52, %v9687_v37  ;;  %v9813_v52 = vpack.c.bf16 %v602_v53, %v598_v51 }
  0xf8   : > { %v619_v56 = vpop.f32.mrf.mxu0 }
  0xf9   : > { %v9785_v44 = vadd.f32 %v619_v56, %v9687_v37  ;;  %v9803_v56 = vpack.c.bf16 %v612_v47, %v608_v54 }
  0xfa   : > { %v621_v57 = vpop.f32.mrf.mxu0 }
  0xfb   : > { %v622_v36 = vadd.f32 %v621_v57, %v483_v13  ;;  %14132 = vst [vmem:[#allocation5_spill] sm:$0xff] %v9803_v56 }
  0xfc   : > { %v625_v58 = vpop.f32.mrf.mxu0 }
  0xfd   : > { %v9746_v23 = vadd.f32 %v625_v58, %v9687_v37  ;;  %v9789_v50 = vpack.c.bf16 %v622_v36, %v618_v41 }
  0xfe   : > { %v627_v59 = vpop.f32.mrf.mxu0 }
  0xff   : > { %v628_v31 = vadd.f32 %v627_v59, %v483_v13 }
 0x100   : > { %v629_v60 = vpop.f32.mrf.mxu0 }
 0x101   : > { %v9771_v32 = vadd.f32 %v629_v60, %v9687_v37 }
 0x102   : > { %v631_v61 = vpop.f32.mrf.mxu0 }
 0x103   : > { %v632_v29 = vadd.f32 %v631_v61, %v483_v13 }
 0x104   : > { %v635_v62 = vpop.f32.mrf.mxu0 }
 0x105   : > { %v9731_v14 = vadd.f32 %v635_v62, %v9687_v37  ;;  %v9777_v38 = vpack.c.bf16 %v632_v29, %v628_v31 }
 0x106   : > { %v637_v63 = vpop.f32.mrf.mxu0 }
 0x107   : > { %v638_v26 = vadd.f32 %v637_v63, %v483_v13 }
 0x108   : > { %v639_v0 = vpop.f32.mrf.mxu0 }
 0x109   : > { %v9757_v27 = vadd.f32 %v639_v0, %v9687_v37 }
 0x10a   : > { %v641_v1 = vpop.f32.mrf.mxu0 }
 0x10b   : > { %v642_v24 = vadd.f32 %v641_v1, %v483_v13 }
 0x10c   : > { %v645_v3 = vpop.f32.mrf.mxu0 }
 0x10d   : > { %v9724_v10 = vadd.f32 %v645_v3, %v9687_v37  ;;  %v9763_v30 = vpack.c.bf16 %v642_v24, %v638_v26 }
 0x10e   : > { %v647_v4 = vpop.f32.mrf.mxu0 }
 0x10f   : > { %v648_v20 = vadd.f32 %v647_v4, %v483_v13 }
 0x110   : > { %v649_v5 = vpop.f32.mrf.mxu0 }
 0x111   : > { %v9718_v6 = vadd.f32 %v649_v5, %v9687_v37 }
 0x112   : > { %v651_v7 = vpop.f32.mrf.mxu0 }
 0x113   : > { %706 = vrot.lane.b32.xlu1 %v9718_v6, %s9520_s17  ;;  %v652_v17 = vadd.f32 %v651_v7, %v483_v13 }
 0x114   : > { %v655_v8 = vpop.f32.mrf.mxu0 }
 0x115   : > { %v9741_v21 = vadd.f32 %v655_v8, %v9687_v37  ;;  %v9748_v25 = vpack.c.bf16 %v652_v17, %v648_v20 }
 0x116   : > { %v657_v11 = vpop.f32.mrf.mxu0 }
 0x117   : > { %704 = vrot.lane.b32.xlu1 %v9724_v10, %s9520_s17  ;;  %v658_v18 = vadd.f32 %v657_v11, %v483_v13  ;;  %14131 = vst [vmem:[#allocation4_spill] sm:$0xff] %v9748_v25 }
 0x118   : > { %v659_v12 = vpop.f32.mrf.mxu0 }
 0x119   : > { %v9734_v15 = vadd.f32 %v659_v12, %v9687_v37  ;;  %v592_v37 = vadd.f32 %v9699_v43, %v483_v13 }
 0x11a   : > { %v661_v16 = vpop.f32.mrf.mxu0 }
 0x11b   : > { %14130 = vst [vmem:[#allocation3_spill] sm:$0xff] %v9734_v15  ;;  %v662_v19 = vadd.f32 %v661_v16, %v483_v13  ;;  %710 = vrot.lane.b32.xlu0 %v9734_v15, %s9520_s17  ;;  %700 = vrot.lane.b32.xlu1 %v9731_v14, %s9520_s17  ;;  %v9822_v46 = vpack.c.bf16 %v592_v37, %v588_v49 }
 0x11d   : > { %v9743_v22 = vpack.c.bf16 %v662_v19, %v658_v18  ;;  %14133 = vst [vmem:[#allocation6_spill] sm:$0xff] %v9822_v46 }
 0x11f   : > { %7819 = vmatprep.subr.bf16.mxu0 %v9743_v22  ;;  %708 = vrot.lane.b32.xlu0 %v9741_v21, %s9520_s17 }
 0x120   : > { %696 = vrot.lane.b32.xlu1 %v9746_v23, %s9520_s17  ;;  %7820 = vmatpush3.bf16.msra.mxu0 %v9743_v22 }
 0x121   : > { %7821 = vmatprep.subr.bf16.mxu0 %v9748_v25 }
 0x123   : > { %702 = vrot.lane.b32.xlu0 %v9757_v27, %s9520_s17 }
 0x124   : > { %692 = vrot.lane.b32.xlu1 %v9761_v28, %s9520_s17  ;;  %7822 = vmatpush3.bf16.msra.mxu0 %v9748_v25 }
 0x125   : > { %7823 = vmatprep.subr.bf16.mxu0 %v9763_v30 }
 0x127   : > { %698 = vrot.lane.b32.xlu0 %v9771_v32, %s9520_s17 }
 0x128   : > { %688 = vrot.lane.b32.xlu1 %v9775_v33, %s9520_s17  ;;  %7824 = vmatpush3.bf16.msra.mxu0 %v9763_v30 }
 0x129   : > { %7825 = vmatprep.subr.bf16.mxu0 %v9777_v38 }
 0x12b   : > { %694 = vrot.lane.b32.xlu0 %v9785_v44, %s9520_s17 }
 0x12c   : > { %684 = vrot.lane.b32.xlu1 %v9702_v45, %s9520_s17  ;;  %7826 = vmatpush3.bf16.msra.mxu0 %v9777_v38 }
 0x12d   : > { %7827 = vmatprep.subr.bf16.mxu0 %v9789_v50 }
 0x12f   : > { %690 = vrot.lane.b32.xlu0 %v9799_v55, %s9520_s17 }
 0x130   : > { %680 = vrot.lane.b32.xlu1 %v9690_v39, %s9520_s17  ;;  %7828 = vmatpush3.bf16.msra.mxu0 %v9789_v50 }
 0x131   : > { %7829 = vmatprep.subr.bf16.mxu0 %v9803_v56 }
 0x133   : > { %686 = vrot.lane.b32.xlu0 %v9707_v48, %s9520_s17 }
 0x134   : > { %1255 = vrot.lane.b32.xlu1 %v9741_v21, %s9521_s18  ;;  %7830 = vmatpush3.bf16.msra.mxu0 %v9803_v56 }
 0x135   : > { %7831 = vmatprep.subr.bf16.mxu0 %v9813_v52 }
 0x137   : > { %682 = vrot.lane.b32.xlu0 %v9697_v42, %s9520_s17  ;;  %s9533_s17 = smov 8  }
 0x138   : > { %1251 = vrot.lane.b32.xlu1 %v9724_v10, %s9521_s18  ;;  %7832 = vmatpush3.bf16.msra.mxu0 %v9813_v52 }
 0x139   : > { %7833 = vmatprep.subr.bf16.mxu0 %v9822_v46 }
 0x13b   : > { %1257 = vrot.lane.b32.xlu0 %v9734_v15, %s9521_s18 }
 0x13c   : > { %1247 = vrot.lane.b32.xlu1 %v9731_v14, %s9521_s18  ;;  %7834 = vmatpush3.bf16.msra.mxu0 %v9822_v46 }
 0x13f   : > { %1253 = vrot.lane.b32.xlu0 %v9718_v6, %s9521_s18 }
 0x140   : > { %1243 = vrot.lane.b32.xlu1 %v9746_v23, %s9521_s18 }
 0x143   : > { %1249 = vrot.lane.b32.xlu0 %v9757_v27, %s9521_s18 }
 0x144   : > { %1239 = vrot.lane.b32.xlu1 %v9761_v28, %s9521_s18 }
 0x147   : > { %1245 = vrot.lane.b32.xlu0 %v9771_v32, %s9521_s18 }
 0x148   : > { %1235 = vrot.lane.b32.xlu1 %v9775_v33, %s9521_s18 }
 0x14b   : > { %1241 = vrot.lane.b32.xlu0 %v9785_v44, %s9521_s18 }
 0x14c   : > { %1231 = vrot.lane.b32.xlu1 %v9702_v45, %s9521_s18 }
 0x14f   : > { %1237 = vrot.lane.b32.xlu0 %v9799_v55, %s9521_s18 }
 0x150   : > { %1227 = vrot.lane.b32.xlu1 %v9690_v39, %s9521_s18 }
 0x153   : > { %1233 = vrot.lane.b32.xlu0 %v9707_v48, %s9521_s18 }
 0x154   : > { %1197 = vrot.lane.b32.xlu1 %v9697_v42, %s9522_s19 }
 0x157   : > { %1229 = vrot.lane.b32.xlu0 %v9697_v42, %s9521_s18 }
 0x158   : > { %1201 = vrot.lane.b32.xlu1 %v9707_v48, %s9522_s19 }
 0x15b   : > { %1195 = vrot.lane.b32.xlu0 %v9690_v39, %s9522_s19 }
 0x15c   : > { %1205 = vrot.lane.b32.xlu1 %v9799_v55, %s9522_s19 }
 0x15f   : > { %1199 = vrot.lane.b32.xlu0 %v9702_v45, %s9522_s19 }
 0x160   : > { %1209 = vrot.lane.b32.xlu1 %v9785_v44, %s9522_s19 }
 0x163   : > { %1203 = vrot.lane.b32.xlu0 %v9775_v33, %s9522_s19 }
 0x164   : > { %1213 = vrot.lane.b32.xlu1 %v9771_v32, %s9522_s19 }
 0x167   : > { %1207 = vrot.lane.b32.xlu0 %v9761_v28, %s9522_s19 }
 0x168   : > { %1217 = vrot.lane.b32.xlu1 %v9757_v27, %s9522_s19 }
 0x16b   : > { %1211 = vrot.lane.b32.xlu0 %v9746_v23, %s9522_s19 }
 0x16c   : > { %1221 = vrot.lane.b32.xlu1 %v9718_v6, %s9522_s19 }
 0x16f   : > { %1215 = vrot.lane.b32.xlu0 %v9731_v14, %s9522_s19 }
 0x170   : > { %1225 = vrot.lane.b32.xlu1 %v9734_v15, %s9522_s19 }
 0x173   : > { %1219 = vrot.lane.b32.xlu0 %v9724_v10, %s9522_s19 }
 0x174   : > { %1638 = vrot.lane.b32.xlu1 %v9763_v30, %s9522_s19 }
 0x177   : > { %1223 = vrot.lane.b32.xlu0 %v9741_v21, %s9522_s19 }
 0x178   : > { %1636 = vrot.lane.b32.xlu1 %v9777_v38, %s9522_s19 }
 0x17b   : > { %1640 = vrot.lane.b32.xlu0 %v9748_v25, %s9522_s19 }
 0x17c   : > { %1634 = vrot.lane.b32.xlu1 %v9789_v50, %s9522_s19 }
 0x17f   : > { %1630 = vrot.lane.b32.xlu0 %v9813_v52, %s9522_s19 }
 0x180   : > { %1632 = vrot.lane.b32.xlu1 %v9803_v56, %s9522_s19 }
 0x183   : > { %1821 = vrot.lane.b32.xlu0 %v9724_v10, %s9523_s21 }
 0x184   : > { %1628 = vrot.lane.b32.xlu1 %v9822_v46, %s9522_s19 }
 0x185   : > { %v707_v40 = vpop.permute.xlu1 %706 }
 0x187   : > { %1817 = vrot.lane.b32.xlu0 %v9731_v14, %s9523_s21 }
 0x188   : > { %1825 = vrot.lane.b32.xlu1 %v9741_v21, %s9523_s21 }
 0x189   : > { %v705_v43 = vpop.permute.xlu1 %704 }
 0x18b   : > { %1813 = vrot.lane.b32.xlu0 %v9746_v23, %s9523_s21 }
 0x18c   : > { %1823 = vrot.lane.b32.xlu1 %v9718_v6, %s9523_s21 }
 0x18d   : > { %v711_v57 = vpop.permute.xlu0 %710  ;;  %v701_v58 = vpop.permute.xlu1 %700 }
 0x18e   : > { %7763 = vmatprep.subr.msk.mxu1 %vm712_vm1, %v711_v57 }
 0x18f   : > { %7764 = vmatpush3.xpose.msk.msra.mxu1 %vm712_vm1, %v711_v57  ;;  %1827 = vrot.lane.b32.xlu0 %v9734_v15, %s9523_s21 }
 0x190   : > { %1819 = vrot.lane.b32.xlu1 %v9757_v27, %s9523_s21 }
 0x191   : > { %v709_v59 = vpop.permute.xlu0 %708 }
 0x192   : > { %v697_v60 = vpop.permute.xlu1 %696  ;;  %7765 = vmatprep.subr.msk.mxu1 %vm712_vm1, %v709_v59 }
 0x193   : > { %7766 = vmatpush3.xpose.msk.msra.mxu1 %vm712_vm1, %v709_v59 }
 0x194   : > { %1815 = vrot.lane.b32.xlu1 %v9771_v32, %s9523_s21  ;;  %7767 = vmatprep.subr.msk.mxu1 %vm712_vm1, %v707_v40 }
 0x195   : > { %v703_v61 = vpop.permute.xlu0 %702 }
 0x196   : > { %v693_v62 = vpop.permute.xlu1 %692 }
 0x197   : > { %7768 = vmatpush3.xpose.msk.msra.mxu1 %vm712_vm1, %v707_v40 }
 0x198   : > { %1811 = vrot.lane.b32.xlu1 %v9785_v44, %s9523_s21  ;;  %7769 = vmatprep.subr.msk.mxu1 %vm712_vm1, %v705_v43 }
 0x199   : > { %v699_v0 = vpop.permute.xlu0 %698 }
 0x19a   : > { %v689_v63 = vpop.permute.xlu1 %688 }
 0x19b   : > { %7770 = vmatpush3.xpose.msk.msra.mxu1 %vm712_vm1, %v705_v43 }
 0x19c   : > { %1809 = vrot.lane.b32.xlu1 %v9761_v28, %s9523_s21  ;;  %7771 = vmatprep.subr.msk.mxu1 %vm712_vm1, %v703_v61 }
 0x19d   : > { %v695_v3 = vpop.permute.xlu0 %694 }
 0x19e   : > { %v685_v1 = vpop.permute.xlu1 %684 }
 0x19f   : > { %7772 = vmatpush3.xpose.msk.msra.mxu1 %vm712_vm1, %v703_v61 }
 0x1a0   : > { %1642 = vrot.lane.b32.xlu1 %v9743_v22, %s9522_s19  ;;  %7773 = vmatprep.subr.msk.mxu1 %vm712_vm1, %v701_v58  ;;  %s9534_s19 = smov 72  }
 0x1a1   : > { %v691_v7 = vpop.permute.xlu0 %690 }
 0x1a2   : > { %v681_v4 = vpop.permute.xlu1 %680 }
 0x1a3   : > { %7774 = vmatpush3.xpose.msk.msra.mxu1 %vm712_vm1, %v701_v58 }
 0x1a4   : > { %7775 = vmatprep.subr.msk.mxu1 %vm712_vm1, %v699_v0 }
 0x1a5   : > { %v687_v11 = vpop.permute.xlu0 %686 }
 0x1a6   : > { %v1256_v5 = vpop.permute.xlu1 %1255 }
 0x1a7   : > { %7776 = vmatpush3.xpose.msk.msra.mxu1 %vm712_vm1, %v699_v0 }
 0x1a8   : > { %7777 = vmatprep.subr.msk.mxu1 %vm712_vm1, %v697_v60 }
 0x1a9   : > { %v683_v16 = vpop.permute.xlu0 %682 }
 0x1aa   : > { %v1252_v8 = vpop.permute.xlu1 %1251 }
 0x1ab   : > { %7778 = vmatpush3.xpose.msk.msra.mxu1 %vm712_vm1, %v697_v60 }
 0x1ac   : > { %7779 = vmatprep.subr.msk.mxu1 %vm712_vm1, %v695_v3 }
 0x1ad   : > { %v1258_v18 = vpop.permute.xlu0 %1257 }
 0x1ae   : > { %v1248_v12 = vpop.permute.xlu1 %1247 }
 0x1af   : > { %7780 = vmatpush3.xpose.msk.msra.mxu1 %vm712_vm1, %v695_v3 }
 0x1b0   : > { %7781 = vmatprep.subr.msk.mxu1 %vm712_vm1, %v693_v62 }
 0x1b1   : > { %v1254_v24 = vpop.permute.xlu0 %1253 }
 0x1b2   : > { %v9946_v13 = vpop.permute.xlu1 %1243 }
 0x1b3   : > { %7782 = vmatpush3.xpose.msk.msra.mxu1 %vm712_vm1, %v693_v62 }
 0x1b4   : > { %7783 = vmatprep.subr.msk.mxu1 %vm712_vm1, %v691_v7 }
 0x1b5   : > { %v1250_v29 = vpop.permute.xlu0 %1249 }
 0x1b6   : > { %v9950_v17 = vpop.permute.xlu1 %1239 }
 0x1b7   : > { %7784 = vmatpush3.xpose.msk.msra.mxu1 %vm712_vm1, %v691_v7 }
 0x1b8   : > { %7785 = vmatprep.subr.msk.mxu1 %vm712_vm1, %v689_v63 }
 0x1b9   : > { %v1246_v41 = vpop.permute.xlu0 %1245 }
 0x1ba   : > { %v9954_v19 = vpop.permute.xlu1 %1235 }
 0x1bb   : > { %7786 = vmatpush3.xpose.msk.msra.mxu1 %vm712_vm1, %v689_v63 }
 0x1bc   : > { %7787 = vmatprep.subr.msk.mxu1 %vm712_vm1, %v687_v11 }
 0x1bd   : > { %v1242_v54 = vpop.permute.xlu0 %1241 }
 0x1be   : > { %v9958_v20 = vpop.permute.xlu1 %1231 }
 0x1bf   : > { %7788 = vmatpush3.xpose.msk.msra.mxu1 %vm712_vm1, %v687_v11 }
 0x1c0   : > { %7789 = vmatprep.subr.msk.mxu1 %vm712_vm1, %v685_v1 }
 0x1c1   : > { %v1238_v37 = vpop.permute.xlu0 %1237 }
 0x1c2   : > { %v9962_v26 = vpop.permute.xlu1 %1227 }
 0x1c3   : > { %7790 = vmatpush3.xpose.msk.msra.mxu1 %vm712_vm1, %v685_v1 }
 0x1c4   : > { %7791 = vmatprep.subr.msk.mxu1 %vm712_vm1, %v683_v16 }
 0x1c5   : > { %v1234_v40 = vpop.permute.xlu0 %1233 }
 0x1c6   : > { %v9966_v31 = vpop.permute.xlu1 %1197 }
 0x1c7   : > { %7792 = vmatpush3.xpose.msk.msra.mxu1 %vm712_vm1, %v683_v16 }
 0x1c8   : > { %7793 = vmatprep.subr.msk.mxu1 %vm712_vm1, %v681_v4 }
 0x1c9   : > { %v1230_v58 = vpop.permute.xlu0 %1229 }
 0x1ca   : > { %v9970_v36 = vpop.permute.xlu1 %1201 }
 0x1cb   : > { %7794 = vmatpush3.xpose.msk.msra.mxu1 %vm712_vm1, %v681_v4 }
 0x1cc   : > { %7851 = vmatprep.subr.msk.mxu1 %vm712_vm1, %v1258_v18 }
 0x1cd   : > { %v1196_v60 = vpop.permute.xlu0 %1195 }
 0x1ce   : > { %v9974_v47 = vpop.permute.xlu1 %1205  ;;  %7796 = vmatmul.mubr.msk.f32.vlgmr.msra.gmra.mxu1 %vm712_vm1, %v9697_v42 }
 0x1cf   : > { %7798 = vmatprep.mubr.msk.f32.mxu1 %vm712_vm1, %v9702_v45  ;;  %7852 = vmatpush3.xpose.msk.msra.mxu1 %vm712_vm1, %v1258_v18 }
 0x1d0   : > { %7853 = vmatprep.subr.msk.mxu1 %vm712_vm1, %v1256_v5 }
 0x1d1   : > { %v1200_v4 = vpop.permute.xlu0 %1199 }
 0x1d2   : > { %v9982_v53 = vpop.permute.xlu1 %1209  ;;  %7799 = vmatmul.mubr.msk.f32.gmra.mxu1 %vm712_vm1, %v9707_v48 }
 0x1d3   : > { %7801 = vmatprep.mubr.msk.f32.mxu1 %vm712_vm1, %v9775_v33  ;;  %7854 = vmatpush3.xpose.msk.msra.mxu1 %vm712_vm1, %v1256_v5 }
 0x1d4   : > { %7855 = vmatprep.subr.msk.mxu1 %vm712_vm1, %v1254_v24 }
 0x1d6   : > { %v9990_v51 = vpop.permute.xlu1 %1213  ;;  %7802 = vmatmul.mubr.msk.f32.gmra.mxu1 %vm712_vm1, %v9799_v55 }
 0x1d7   : > { %7804 = vmatprep.mubr.msk.f32.mxu1 %vm712_vm1, %v9761_v28  ;;  %7856 = vmatpush3.xpose.msk.msra.mxu1 %vm712_vm1, %v1254_v24 }
 0x1d8   : > { %7857 = vmatprep.subr.msk.mxu1 %vm712_vm1, %v1252_v8 }
 0x1da   : > { %v9998_v49 = vpop.permute.xlu1 %1217  ;;  %7805 = vmatmul.mubr.msk.f32.gmra.mxu1 %vm712_vm1, %v9785_v44 }
 0x1db   : > { %7807 = vmatprep.mubr.msk.f32.mxu1 %vm712_vm1, %v9746_v23  ;;  %7858 = vmatpush3.xpose.msk.msra.mxu1 %vm712_vm1, %v1252_v8  ;;  %v1204_v8 = vpop.permute.xlu0 %1203 }
 0x1dc   : > { %7859 = vmatprep.subr.msk.mxu1 %vm712_vm1, %v1250_v29 }
 0x1de   : > { %v10006_v43 = vpop.permute.xlu1 %1221  ;;  %7808 = vmatmul.mubr.msk.f32.gmra.mxu1 %vm712_vm1, %v9771_v32 }
 0x1df   : > { %7810 = vmatprep.mubr.msk.f32.mxu1 %vm712_vm1, %v9731_v14  ;;  %7860 = vmatpush3.xpose.msk.msra.mxu1 %vm712_vm1, %v1250_v29 }
 0x1e0   : > { %7861 = vmatprep.subr.msk.mxu1 %vm712_vm1, %v1248_v12 }
 0x1e2   : > { %v10014_v57 = vpop.permute.xlu1 %1225  ;;  %7811 = vmatmul.mubr.msk.f32.gmra.mxu1 %vm712_vm1, %v9757_v27 }
 0x1e3   : > { %7813 = vmatprep.mubr.msk.f32.mxu1 %vm712_vm1, %v9724_v10  ;;  %7862 = vmatpush3.xpose.msk.msra.mxu1 %vm712_vm1, %v1248_v12  ;;  %v1208_v12 = vpop.permute.xlu0 %1207 }
 0x1e4   : > { %7863 = vmatprep.subr.msk.mxu1 %vm712_vm1, %v1246_v41 }
 0x1e6   : > { %v10022_v59 = vpop.permute.xlu1 %1638  ;;  %7814 = vmatmul.mubr.msk.f32.gmra.mxu1 %vm712_vm1, %v9718_v6 }
 0x1e7   : > { %7816 = vmatprep.mubr.msk.f32.mxu1 %vm712_vm1, %v9741_v21  ;;  %7864 = vmatpush3.xpose.msk.msra.mxu1 %vm712_vm1, %v1246_v41 }
 0x1e8   : > { %7865 = vmatprep.subr.msk.mxu1 %vm712_vm1, %v9946_v13 }
 0x1ea   : > { %v10031_v61 = vpop.permute.xlu1 %1636  ;;  %7817 = vmatmul.mubr.msk.f32.gmra.mxu1 %vm712_vm1, %v9734_v15 }
 0x1eb   : > { %7866 = vmatpush3.xpose.msk.msra.mxu1 %vm712_vm1, %v9946_v13  ;;  %7883 = vmatprep.mubr.msk.f32.mxu1 %vm712_vm1, %v1196_v60 }
 0x1ec   : > { %7867 = vmatprep.subr.msk.mxu1 %vm712_vm1, %v1242_v54 }
 0x1ee   : > { %v10039_v62 = vpop.permute.xlu1 %1634 }
 0x1ef   : > { %7868 = vmatpush3.xpose.msk.msra.mxu1 %vm712_vm1, %v1242_v54 }
 0x1f0   : > { %7869 = vmatprep.subr.msk.mxu1 %vm712_vm1, %v9950_v17 }
 0x1f2   : > { %v10044_v63 = vpop.permute.xlu1 %1632 }
 0x1f3   : > { %7870 = vmatpush3.xpose.msk.msra.mxu1 %vm712_vm1, %v9950_v17  ;;  %v1212_v17 = vpop.permute.xlu0 %1211 }
 0x1f4   : > { %7871 = vmatprep.subr.msk.mxu1 %vm712_vm1, %v1238_v37 }
 0x1f6   : > { %v10049_v0 = vpop.permute.xlu1 %1628 }
 0x1f7   : > { %7872 = vmatpush3.xpose.msk.msra.mxu1 %vm712_vm1, %v1238_v37  ;;  %v1216_v18 = vpop.permute.xlu0 %1215 }
 0x1f8   : > { %7873 = vmatprep.subr.msk.mxu1 %vm712_vm1, %v9954_v19 }
 0x1fa   : > { %v10054_v1 = vpop.permute.xlu1 %1825 }
 0x1fb   : > { %14134 = vst [vmem:[#allocation7_spill] sm:$0xff] %v10054_v1  ;;  %7874 = vmatpush3.xpose.msk.msra.mxu1 %vm712_vm1, %v9954_v19  ;;  %v1220_v19 = vpop.permute.xlu0 %1219 }
 0x1fc   : > { %7875 = vmatprep.subr.msk.mxu1 %vm712_vm1, %v1234_v40 }
 0x1fe   : > { %v10059_v3 = vpop.permute.xlu1 %1823 }
 0x1ff   : > { %14135 = vst [vmem:[#allocation8_spill] sm:$0xff] %v10059_v3  ;;  %7876 = vmatpush3.xpose.msk.msra.mxu1 %vm712_vm1, %v1234_v40 }
 0x200   : > { %7877 = vmatprep.subr.msk.mxu1 %vm712_vm1, %v9958_v20 }
 0x202   : > { %v10064_v5 = vpop.permute.xlu1 %1819 }
 0x203   : > { %14136 = vst [vmem:[#allocation9_spill] sm:$0xff] %v10064_v5  ;;  %7878 = vmatpush3.xpose.msk.msra.mxu1 %vm712_vm1, %v9958_v20  ;;  %v1224_v20 = vpop.permute.xlu0 %1223 }
 0x204   : > { %7879 = vmatprep.subr.msk.mxu1 %vm712_vm1, %v1230_v58 }
 0x206   : > { %v10069_v7 = vpop.permute.xlu1 %1815 }
 0x207   : > { %14137 = vst [vmem:[#allocation10_spill] sm:$0xff] %v10069_v7  ;;  %7880 = vmatpush3.xpose.msk.msra.mxu1 %vm712_vm1, %v1230_v58  ;;  %v10170_v9 = vpop.permute.xlu0 %1640 }
 0x208   : > { %7881 = vmatprep.subr.msk.mxu1 %vm712_vm1, %v9962_v26 }
 0x20a   : > { %v10074_v11 = vpop.permute.xlu1 %1811 }
 0x20b   : > { %14138 = vst [vmem:[#allocation11_spill] sm:$0xff] %v10074_v11  ;;  %7882 = vmatpush3.xpose.msk.msra.mxu1 %vm712_vm1, %v9962_v26 }
 0x20e   : > { %v10078_v13 = vpop.permute.xlu1 %1809  ;;  %7884 = vmatmul.mubr.msk.f32.vlgmr.msra.gmra.mxu1 %vm712_vm1, %v9966_v31 }
 0x20f   : > { %14139 = vst [vmem:[#allocation12_spill] sm:$0xff] %v10078_v13  ;;  %7886 = vmatprep.mubr.msk.f32.mxu1 %vm712_vm1, %v1200_v4  ;;  %v10172_v13 = vpop.permute.xlu0 %1630 }
 0x212   : > { %v10083_v16 = vpop.permute.xlu1 %1642  ;;  %7887 = vmatmul.mubr.msk.f32.gmra.mxu1 %vm712_vm1, %v9970_v36 }
 0x213   : > { %7907 = vmatprep.subr.bf16.mxu0 %v10083_v16  ;;  %7889 = vmatprep.mubr.msk.f32.mxu1 %vm712_vm1, %v1204_v8  ;;  %v10174_v11 = vpop.permute.xlu0 %1821 }
 0x214   : > { %14140 = vst [vmem:[#allocation13_spill] sm:$0xff] %v10174_v11 }
 0x216   : > { %7890 = vmatmul.mubr.msk.f32.gmra.mxu1 %vm712_vm1, %v9974_v47 }
 0x217   : > { %7892 = vmatprep.mubr.msk.f32.mxu1 %vm712_vm1, %v1208_v12  ;;  %v10181_v25 = vpop.permute.xlu0 %1817 }
 0x21a   : > { %7893 = vmatmul.mubr.msk.f32.gmra.mxu1 %vm712_vm1, %v9982_v53 }
 0x21b   : > { %7895 = vmatprep.mubr.msk.f32.mxu1 %vm712_vm1, %v1212_v17 }
 0x21e   : > { %7896 = vmatmul.mubr.msk.f32.gmra.mxu1 %vm712_vm1, %v9990_v51 }
 0x21f   : > { %7898 = vmatprep.mubr.msk.f32.mxu1 %vm712_vm1, %v1216_v18 }
 0x222   : > { %7899 = vmatmul.mubr.msk.f32.gmra.mxu1 %vm712_vm1, %v9998_v49 }
 0x223   : > { %7901 = vmatprep.mubr.msk.f32.mxu1 %vm712_vm1, %v1220_v19 }
 0x226   : > { %7902 = vmatmul.mubr.msk.f32.gmra.mxu1 %vm712_vm1, %v10006_v43 }
 0x227   : > { %7904 = vmatprep.mubr.msk.f32.mxu1 %vm712_vm1, %v1224_v20 }
 0x22a   : > { %7905 = vmatmul.mubr.msk.f32.gmra.mxu1 %vm712_vm1, %v10014_v57 }
 0x28e   : > { %v7797_v24 = vpop.f32.mrf.mxu1 }
 0x28f   : > { %v10106_v26 = vmul.f32 0.35355338, %v7797_v24 }
 0x290   : > { %v843_v29 = vpop.f32.mrf.mxu1 }
 0x291   : > { %940 = vmax.xlane.f32.xlu1 %v10106_v26  ;;  %v10109_v31 = vmul.f32 0.35355338, %v843_v29 }
 0x292   : > { %v7800_v36 = vpop.f32.mrf.mxu1 }
 0x293   : > { %938 = vmax.xlane.f32.xlu0 %v10109_v31  ;;  %v10112_v47 = vmul.f32 0.35355338, %v7800_v36 }
 0x294   : > { %v853_v41 = vpop.f32.mrf.mxu1 }
 0x295   : > { %v10115_v51 = vmul.f32 0.35355338, %v853_v41 }
 0x296   : > { %v7803_v54 = vpop.f32.mrf.mxu1 }
 0x297   : > { %944 = vmax.xlane.f32.xlu0 %v10112_v47  ;;  %v10121_v43 = vmul.f32 0.35355338, %v7803_v54 }
 0x298   : > { %v863_v53 = vpop.f32.mrf.mxu1 }
 0x299   : > { %v10117_v37 = vmul.f32 0.35355338, %v863_v53 }
 0x29a   : > { %v7806_v49 = vpop.f32.mrf.mxu1 }
 0x29b   : > { %942 = vmax.xlane.f32.xlu0 %v10115_v51  ;;  %946 = vmax.xlane.f32.xlu1 %v10117_v37  ;;  %v10127_v4 = vmul.f32 0.35355338, %v7806_v49 }
 0x29c   : > { %v873_v40 = vpop.f32.mrf.mxu1 }
 0x29d   : > { %v10123_v57 = vmul.f32 0.35355338, %v873_v40 }
 0x29e   : > { %v7809_v58 = vpop.f32.mrf.mxu1 }
 0x29f   : > { %948 = vmax.xlane.f32.xlu0 %v10121_v43  ;;  %950 = vmax.xlane.f32.xlu1 %v10123_v57  ;;  %v10133_v18 = vmul.f32 0.35355338, %v7809_v58 }
 0x2a0   : > { %v883_v60 = vpop.f32.mrf.mxu1 }
 0x2a1   : > { %v10129_v8 = vmul.f32 0.35355338, %v883_v60 }
 0x2a2   : > { %v7812_v12 = vpop.f32.mrf.mxu1 }
 0x2a3   : > { %952 = vmax.xlane.f32.xlu0 %v10127_v4  ;;  %954 = vmax.xlane.f32.xlu1 %v10129_v8  ;;  %v10139_v29 = vmul.f32 0.35355338, %v7812_v12 }
 0x2a4   : > { %v893_v17 = vpop.f32.mrf.mxu1 }
 0x2a5   : > { %v10135_v19 = vmul.f32 0.35355338, %v893_v17 }
 0x2a6   : > { %v7815_v20 = vpop.f32.mrf.mxu1 }
 0x2a7   : > { %956 = vmax.xlane.f32.xlu0 %v10133_v18  ;;  %958 = vmax.xlane.f32.xlu1 %v10135_v19  ;;  %v10145_v53 = vmul.f32 0.35355338, %v7815_v20 }
 0x2a8   : > { %v903_v24 = vpop.f32.mrf.mxu1 }
 0x2a9   : > { %v10141_v36 = vmul.f32 0.35355338, %v903_v24 }
 0x2aa   : > { %v7818_v41 = vpop.f32.mrf.mxu1 }
 0x2ab   : > { %960 = vmax.xlane.f32.xlu0 %v10139_v29  ;;  %962 = vmax.xlane.f32.xlu1 %v10141_v36  ;;  %v10151_v40 = vmul.f32 0.35355338, %v7818_v41 }
 0x2ac   : > { %v913_v54 = vpop.f32.mrf.mxu1 }
 0x2ad   : > { %v10147_v49 = vmul.f32 0.35355338, %v913_v54 }
 0x2af   : > { %964 = vmax.xlane.f32.xlu0 %v10145_v53  ;;  %966 = vmax.xlane.f32.xlu1 %v10147_v49 }
 0x2b3   : > { %968 = vmax.xlane.f32.xlu0 %v10151_v40 }
 0x2ce   : > { %v7885_v58 = vpop.f32.mrf.mxu1 }
 0x2cf   : > { %v10154_v60 = vmul.f32 0.35355338, %v7885_v58 }
 0x2d0   : > { %v1389_v12 = vpop.f32.mrf.mxu1 }
 0x2d1   : > { %v10156_v17 = vmul.f32 0.35355338, %v1389_v12  ;;  %1486 = vmax.xlane.f32.xlu0 %v10154_v60 }
 0x2d2   : > { %v7888_v20 = vpop.f32.mrf.mxu1 }
 0x2d3   : > { %v10159_v24 = vmul.f32 0.35355338, %v7888_v20  ;;  %1484 = vmax.xlane.f32.xlu1 %v10156_v17 }
 0x2d4   : > { %v1399_v54 = vpop.f32.mrf.mxu1 }
 0x2d5   : > { %1490 = vmax.xlane.f32.xlu0 %v10159_v24  ;;  %v10163_v41 = vmul.f32 0.35355338, %v1399_v54 }
 0x2d6   : > { %v7891_v58 = vpop.f32.mrf.mxu1 }
 0x2d7   : > { %v10176_v7 = vmul.f32 0.35355338, %v7891_v58  ;;  %v10192_v58 = vpop.permute.xlu0 %1813 }
 0x2d8   : > { %v1409_v12 = vpop.f32.mrf.mxu1  ;;  %14146 = vst [vmem:[#allocation19_spill] sm:$0xff] %v10192_v58 }
 0x2d9   : > { %1488 = vmax.xlane.f32.xlu0 %v10163_v41  ;;  %14141 = vst [vmem:[#allocation14_spill] sm:$0xff] %v10176_v7  ;;  %v10183_v3 = vmul.f32 0.35355338, %v1409_v12 }
 0x2da   : > { %v7894_v35 = vpop.f32.mrf.mxu1 }
 0x2db   : > { %14143 = vst [vmem:[#allocation16_spill] sm:$0xff] %v10183_v3  ;;  %v10189_v11 = vmul.f32 0.35355338, %v7894_v35 }
 0x2dc   : > { %v1419_v20 = vpop.f32.mrf.mxu1 }
 0x2dd   : > { %14145 = vst [vmem:[#allocation18_spill] sm:$0xff] %v10189_v11  ;;  %v10198_v12 = vmul.f32 0.35355338, %v1419_v20 }
 0x2de   : > { %v7897_v2 = vpop.f32.mrf.mxu1 }
 0x2df   : > { %14148 = vst [vmem:[#allocation21_spill] sm:$0xff] %v10198_v12 }
 0x2e0   : > { %v1429_v34 = vpop.f32.mrf.mxu1 }
 0x2e1   : > { %v10179_v5 = vmul.f32 0.35355338, %v1429_v34 }
 0x2e2   : > { %v7900_v54 = vpop.f32.mrf.mxu1 }
 0x2e3   : > { %14142 = vst [vmem:[#allocation15_spill] sm:$0xff] %v10179_v5 }
 0x2e4   : > { %1805 = vrot.lane.b32.xlu1 %v9775_v33, %s9523_s21  ;;  %v1439_v46 = vpop.f32.mrf.mxu1 }
 0x2e5   : > { %v10187_v1 = vmul.f32 0.35355338, %v1439_v46  ;;  %v10203_v46 = vmul.f32 0.35355338, %v7897_v2 }
 0x2e6   : > { %v7903_v56 = vpop.f32.mrf.mxu1 }
 0x2e7   : > { %14144 = vst [vmem:[#allocation17_spill] sm:$0xff] %v10187_v1 }
 0x2e8   : > { %v1449_v15 = vpop.f32.mrf.mxu1 }
 0x2e9   : > { %v10194_v34 = vmul.f32 0.35355338, %v1449_v15 }
 0x2ea   : > { %v7906_v2 = vpop.f32.mrf.mxu1 }
 0x2eb   : > { %14147 = vst [vmem:[#allocation20_spill] sm:$0xff] %v10194_v34 }
 0x2ef   : > { %1807 = vrot.lane.b32.xlu0 %v9799_v55, %s9523_s21 }
 0x308   : > { %1494 = vmax.xlane.f32.xlu1 %v10176_v7 }
 0x30c   : > { %1500 = vmax.xlane.f32.xlu1 %v10179_v5  ;;  %v10201_v5 = vpop.permute.xlu0 %1827 }
 0x30e   : > { %1492 = vmax.xlane.f32.xlu0 %v10183_v3  ;;  %v10207_v3 = vmul.f32 0.35355338, %v7900_v54 }
 0x310   : > { %1504 = vmax.xlane.f32.xlu1 %v10187_v1 }
 0x312   : > { %1498 = vmax.xlane.f32.xlu0 %v10189_v11 }
 0x314   : > { %1508 = vmax.xlane.f32.xlu1 %v10194_v34  ;;  %v10211_v34 = vmul.f32 0.35355338, %v7903_v56 }
 0x316   : > { %1496 = vmax.xlane.f32.xlu0 %v10198_v12 }
 0x31a   : > { %v941_v35 = vpop.xlane.xlu1 %940  ;;  %1502 = vmax.xlane.f32.xlu0 %v10203_v46 }
 0x31b   : > { %v971_v1 = vsub.f32 %v10106_v26, %v941_v35  ;;  %v10215_v26 = vmul.f32 0.35355338, %v7906_v2 }
 0x31c   : > { %v939_v15 = vpop.xlane.xlu0 %938 }
 0x31d   : > { %v988_v7 = vmul.f32 1.442695, %v971_v1  ;;  %v970_v11 = vsub.f32 %v10109_v31, %v939_v15 }
 0x31e   : > { %1506 = vmax.xlane.f32.xlu0 %v10207_v3 }
 0x31f   : > { %v986_v20 = vmul.f32 1.442695, %v970_v11  ;;  %8855 = vpow2.f32 %v988_v7 }
 0x320   : > { %v945_v12 = vpop.xlane.xlu0 %944 }
 0x321   : > { %8857 = vpow2.f32 %v986_v20  ;;  %v973_v58 = vsub.f32 %v10112_v47, %v945_v12 }
 0x322   : > { %1510 = vmax.xlane.f32.xlu0 %v10211_v34 }
 0x323   : > { %v992_v54 = vmul.f32 1.442695, %v973_v58 }
 0x324   : > { %v943_v35 = vpop.xlane.xlu0 %942  ;;  %v947_v1 = vpop.xlane.xlu1 %946 }
 0x325   : > { %v972_v31 = vsub.f32 %v10115_v51, %v943_v35  ;;  %v974_v15 = vsub.f32 %v10117_v37, %v947_v1  ;;  %1801 = vrot.lane.b32.xlu1 %v9702_v45, %s9523_s21  ;;  %8859 = vpow2.f32 %v992_v54 }
 0x326   : > { %1514 = vmax.xlane.f32.xlu0 %v10215_v26 }
 0x327   : > { %v990_v56 = vmul.f32 1.442695, %v972_v31  ;;  %v994_v7 = vmul.f32 1.442695, %v974_v15 }
 0x328   : > { %v949_v11 = vpop.xlane.xlu0 %948  ;;  %v951_v47 = vpop.xlane.xlu1 %950 }
 0x329   : > { %8861 = vpow2.f32 %v990_v56  ;;  %v975_v12 = vsub.f32 %v10121_v43, %v949_v11  ;;  %v976_v58 = vsub.f32 %v10123_v57, %v951_v47 }
 0x32a   : > { %8863 = vpow2.f32 %v994_v7 }
 0x32b   : > { %v996_v20 = vmul.f32 1.442695, %v975_v12  ;;  %v998_v51 = vmul.f32 1.442695, %v976_v58 }
 0x32c   : > { %v953_v2 = vpop.xlane.xlu0 %952  ;;  %v955_v37 = vpop.xlane.xlu1 %954 }
 0x32d   : > { %v10224_v35 = vpop.eup %8855  ;;  %8865 = vpow2.f32 %v996_v20  ;;  %v977_v1 = vsub.f32 %v10127_v4, %v953_v2  ;;  %v978_v54 = vsub.f32 %v10129_v8, %v955_v37 }
 0x32e   : > { %14149 = vst [vmem:[#allocation22_spill] sm:$0xff] %v10224_v35  ;;  %v10228_v31 = vpop.eup %8857  ;;  %8867 = vpow2.f32 %v998_v51 }
 0x32f   : > { %14150 = vst [vmem:[#allocation23_spill] sm:$0xff] %v10228_v31  ;;  %v1000_v15 = vmul.f32 1.442695, %v977_v1  ;;  %v1066_v43 = vpack.c.bf16 %v10224_v35, %v10228_v31  ;;  %v1002_v57 = vmul.f32 1.442695, %v978_v54 }
 0x330   : > { %v957_v56 = vpop.xlane.xlu0 %956  ;;  %v959_v7 = vpop.xlane.xlu1 %958 }
 0x331   : > { %8869 = vpow2.f32 %v1000_v15  ;;  %v979_v11 = vsub.f32 %v10133_v18, %v957_v56  ;;  %v980_v47 = vsub.f32 %v10135_v19, %v959_v7  ;;  %7835 = vmatprep.mubr.bf16.mxu0 %v1066_v43 }
 0x332   : > { %8871 = vpow2.f32 %v1002_v57  ;;  %v10234_v20 = vpop.eup %8859 }
 0x333   : > { %v1004_v12 = vmul.f32 1.442695, %v979_v11  ;;  %v1006_v4 = vmul.f32 1.442695, %v980_v47  ;;  %14151 = vst [vmem:[#allocation24_spill] sm:$0xff] %v10234_v20 }
 0x334   : > { %v961_v8 = vpop.xlane.xlu0 %960  ;;  %v963_v58 = vpop.xlane.xlu1 %962 }
 0x335   : > { %8873 = vpow2.f32 %v1004_v12  ;;  %v981_v2 = vsub.f32 %v10139_v29, %v961_v8  ;;  %v982_v51 = vsub.f32 %v10141_v36, %v963_v58  ;;  %v1459_v58 = vpop.f32.mrf.mxu1 }
 0x336   : > { %v10238_v37 = vpop.eup %8861  ;;  %8875 = vpow2.f32 %v1006_v4 }
 0x337   : > { %14152 = vst [vmem:[#allocation25_spill] sm:$0xff] %v10238_v37  ;;  %v1008_v1 = vmul.f32 1.442695, %v981_v2  ;;  %v1067_v18 = vpack.c.bf16 %v10234_v20, %v10238_v37  ;;  %v1010_v19 = vmul.f32 1.442695, %v982_v51  ;;  %v10242_v43 = vpop.eup %8863 }
 0x338   : > { %v965_v54 = vpop.xlane.xlu0 %964  ;;  %v967_v15 = vpop.xlane.xlu1 %966  ;;  %14153 = vst [vmem:[#allocation26_spill] sm:$0xff] %v10242_v43 }
 0x339   : > { %8877 = vpow2.f32 %v1008_v1  ;;  %v983_v57 = vsub.f32 %v10145_v53, %v965_v54  ;;  %v984_v56 = vsub.f32 %v10147_v49, %v967_v15  ;;  %7836 = vmatmul.mubr.bf16.vlgmr.msra.gmra.mxu0 %v1067_v18  ;;  %v10280_v1 = vmul.f32 0.35355338, %v1459_v58 }
 0x33a   : > { %v10246_v29 = vpop.eup %8865  ;;  %7908 = vmatpush3.bf16.msra.mxu0 %v10083_v16  ;;  %8879 = vpow2.f32 %v1010_v19 }
 0x33b   : > { %14154 = vst [vmem:[#allocation27_spill] sm:$0xff] %v10246_v29  ;;  %v1012_v36 = vmul.f32 1.442695, %v983_v57  ;;  %7909 = vmatprep.subr.bf16.mxu0 %v10170_v9  ;;  %v1068_v7 = vpack.c.bf16 %v10246_v29, %v10242_v43  ;;  %v1014_v11 = vmul.f32 1.442695, %v984_v56  ;;  %v10254_v53 = vpop.eup %8867 }
 0x33c   : > { %v969_v47 = vpop.xlane.xlu0 %968  ;;  %1803 = vrot.lane.b32.xlu0 %v9707_v48, %s9523_s21  ;;  %14155 = vst [vmem:[#allocation28_spill] sm:$0xff] %v10254_v53 }
 0x33d   : > { %8881 = vpow2.f32 %v1012_v36  ;;  %v985_v49 = vsub.f32 %v10151_v40, %v969_v47  ;;  %7839 = vmatprep.mubr.bf16.mxu0 %v1068_v7 }
 0x33e   : > { %v10257_v12 = vpop.eup %8869  ;;  %7910 = vmatpush3.bf16.msra.mxu0 %v10170_v9  ;;  %8883 = vpow2.f32 %v1014_v11 }
 0x33f   : > { %14156 = vst [vmem:[#allocation29_spill] sm:$0xff] %v10257_v12  ;;  %v1016_v16 = vmul.f32 1.442695, %v985_v49  ;;  %7911 = vmatprep.subr.bf16.mxu0 %v10022_v59  ;;  %v1069_v4 = vpack.c.bf16 %v10257_v12, %v10254_v53  ;;  %v10265_v8 = vpop.eup %8871 }
 0x340   : > { %1799 = vrot.lane.b32.xlu0 %v9697_v42, %s9523_s21  ;;  %14157 = vst [vmem:[#allocation30_spill] sm:$0xff] %v10265_v8 }
 0x341   : > { %8885 = vpow2.f32 %v1016_v16  ;;  %7840 = vmatmul.mubr.bf16.gmra.mxu0 %v1069_v4 }
 0x342   : > { %v10267_v40 = vpop.eup %8873  ;;  %7912 = vmatpush3.bf16.msra.mxu0 %v10022_v59 }
 0x343   : > { %14158 = vst [vmem:[#allocation31_spill] sm:$0xff] %v10267_v40  ;;  %7913 = vmatprep.subr.bf16.mxu0 %v10031_v61  ;;  %v1070_v9 = vpack.c.bf16 %v10267_v40, %v10265_v8  ;;  %v10275_v2 = vpop.eup %8875 }
 0x344   : > { %1765 = vrot.lane.b32.xlu0 %v9690_v39, %s9524_s22  ;;  %14159 = vst [vmem:[#allocation32_spill] sm:$0xff] %v10275_v2 }
 0x345   : > { %7843 = vmatprep.mubr.bf16.mxu0 %v1070_v9 }
 0x346   : > { %v10277_v51 = vpop.eup %8877  ;;  %7914 = vmatpush3.bf16.msra.mxu0 %v10031_v61 }
 0x347   : > { %14160 = vst [vmem:[#allocation33_spill] sm:$0xff] %v10277_v51  ;;  %7915 = vmatprep.subr.bf16.mxu0 %v10039_v62  ;;  %v1071_v59 = vpack.c.bf16 %v10277_v51, %v10275_v2  ;;  %v10287_v18 = vpop.eup %8879 }
 0x348   : > { %1769 = vrot.lane.b32.xlu0 %v9702_v45, %s9524_s22  ;;  %14161 = vst [vmem:[#allocation34_spill] sm:$0xff] %v10287_v18 }
 0x349   : > { %7844 = vmatmul.mubr.bf16.gmra.mxu0 %v1071_v59  ;;  %1512 = vmax.xlane.f32.xlu1 %v10280_v1  ;;  %v14167_v59 = vld [vmem:[#allocation3_spill] sm:$0xff] }
 0x34a   : > { %v10290_v19 = vpop.eup %8881  ;;  %7916 = vmatpush3.bf16.msra.mxu0 %v10039_v62 }
 0x34b   : > { %14162 = vst [vmem:[#allocation35_spill] sm:$0xff] %v10290_v19  ;;  %7917 = vmatprep.subr.bf16.mxu0 %v10044_v63  ;;  %v1072_v61 = vpack.c.bf16 %v10290_v19, %v10287_v18  ;;  %v10298_v54 = vpop.eup %8883 }
 0x34c   : > { %1773 = vrot.lane.b32.xlu0 %v9775_v33, %s9524_s22  ;;  %14163 = vst [vmem:[#allocation36_spill] sm:$0xff] %v10298_v54 }
 0x34d   : > { %7847 = vmatprep.mubr.bf16.mxu0 %v1072_v61  ;;  %v14168_v61 = vld [vmem:[#allocation7_spill] sm:$0xff] }
 0x34e   : > { %v10300_v15 = vpop.eup %8885  ;;  %7918 = vmatpush3.bf16.msra.mxu0 %v10044_v63 }
 0x34f   : > { %14164 = vst [vmem:[#allocation37_spill] sm:$0xff] %v10300_v15  ;;  %7919 = vmatprep.subr.bf16.mxu0 %v10172_v13  ;;  %v1073_v62 = vpack.c.bf16 %v10300_v15, %v10298_v54 }
 0x350   : > { %1777 = vrot.lane.b32.xlu0 %v9761_v28, %s9524_s22 }
 0x351   : > { %7848 = vmatmul.mubr.bf16.gmra.mxu0 %v1073_v62  ;;  %v14169_v62 = vld [vmem:[#allocation8_spill] sm:$0xff] }
 0x352   : > { %7920 = vmatpush3.bf16.msra.mxu0 %v10172_v13 }
 0x353   : > { %7921 = vmatprep.subr.bf16.mxu0 %v10049_v0 }
 0x354   : > { %1781 = vrot.lane.b32.xlu0 %v9746_v23, %s9524_s22 }
 0x356   : > { %7922 = vmatpush3.bf16.msra.mxu0 %v10049_v0 }
 0x357   : > { %7939 = vmatprep.subr.msk.mxu0 %vm712_vm1, %v10201_v5 }
 0x358   : > { %1785 = vrot.lane.b32.xlu0 %v9731_v14, %s9524_s22 }
 0x35a   : > { %v1487_v63 = vpop.xlane.xlu0 %1486  ;;  %1797 = vrot.lane.b32.xlu1 %v9690_v39, %s9523_s21 }
 0x35b   : > { %v1517_v57 = vsub.f32 %v10154_v60, %v1487_v63  ;;  %v14171_v63 = vld [vmem:[#allocation13_spill] sm:$0xff] }
 0x35c   : > { %1789 = vrot.lane.b32.xlu0 %v9724_v10, %s9524_s22  ;;  %v1485_v13 = vpop.xlane.xlu1 %1484 }
 0x35d   : > { %v1534_v56 = vmul.f32 1.442695, %v1517_v57  ;;  %v1516_v36 = vsub.f32 %v10156_v17, %v1485_v13  ;;  %v14172_v57 = vld [vmem:[#allocation5_spill] sm:$0xff] }
 0x35e   : > { %v1491_v0 = vpop.xlane.xlu0 %1490  ;;  %1767 = vrot.lane.b32.xlu1 %v9697_v42, %s9524_s22  ;;  %v14173_v13 = vld [vmem:[#allocation9_spill] sm:$0xff] }
 0x35f   : > { %v1532_v7 = vmul.f32 1.442695, %v1516_v36  ;;  %v1519_v11 = vsub.f32 %v10159_v24, %v1491_v0  ;;  %8887 = vpow2.f32 %v1534_v56  ;;  %v14174_v56 = vld [vmem:[#allocation6_spill] sm:$0xff] }
 0x360   : > { %1793 = vrot.lane.b32.xlu0 %v9741_v21, %s9524_s22  ;;  %v1806_v36 = vpop.permute.xlu1 %1805  ;;  %v14175_v0 = vld [vmem:[#allocation10_spill] sm:$0xff] }
 0x361   : > { %8889 = vpow2.f32 %v1532_v7  ;;  %v1538_v60 = vmul.f32 1.442695, %v1519_v11  ;;  %v14176_v7 = vld [vmem:[#allocation19_spill] sm:$0xff] }
 0x362   : > { %v1489_v47 = vpop.xlane.xlu0 %1488  ;;  %1771 = vrot.lane.b32.xlu1 %v9707_v48, %s9524_s22 }
 0x363   : > { %v1518_v49 = vsub.f32 %v10163_v41, %v1489_v47  ;;  %8891 = vpow2.f32 %v1538_v60  ;;  %v14177_v47 = vld [vmem:[#allocation14_spill] sm:$0xff] }
 0x364   : > { %2204 = vrot.lane.b32.xlu0 %v9743_v22, %s9524_s22 }
 0x365   : > { %v1536_v17 = vmul.f32 1.442695, %v1518_v49  ;;  %v14178_v49 = vld [vmem:[#allocation11_spill] sm:$0xff] }
 0x366   : > { %1775 = vrot.lane.b32.xlu1 %v9799_v55, %s9524_s22  ;;  %v1808_v60 = vpop.permute.xlu0 %1807 }
 0x367   : > { %8893 = vpow2.f32 %v1536_v17 }
 0x368   : > { %2200 = vrot.lane.b32.xlu0 %v9763_v30, %s9524_s22 }
 0x36a   : > { %1779 = vrot.lane.b32.xlu1 %v9785_v44, %s9524_s22 }
 0x36c   : > { %2198 = vrot.lane.b32.xlu0 %v9777_v38, %s9524_s22  ;;  %v10341_v24 = vpop.eup %8887 }
 0x36e   : > { %v10343_v41 = vpop.eup %8889  ;;  %1783 = vrot.lane.b32.xlu1 %v9771_v32, %s9524_s22 }
 0x36f   : > { %14165 = vst [vmem:[#allocation38_spill] sm:$0xff] %v10343_v41  ;;  %v1612_v16 = vpack.c.bf16 %v10341_v24, %v10343_v41 }
 0x370   : > { %2196 = vrot.lane.b32.xlu0 %v9789_v50, %s9524_s22  ;;  %v10353_v4 = vpop.eup %8891 }
 0x371   : > { %7923 = vmatprep.mubr.bf16.mxu0 %v1612_v16 }
 0x372   : > { %1787 = vrot.lane.b32.xlu1 %v9757_v27, %s9524_s22 }
 0x374   : > { %v10355_v9 = vpop.eup %8893  ;;  %2192 = vrot.lane.b32.xlu0 %v9813_v52, %s9524_s22 }
 0x375   : > { %14166 = vst [vmem:[#allocation39_spill] sm:$0xff] %v10355_v9  ;;  %v1613_v58 = vpack.c.bf16 %v10353_v4, %v10355_v9 }
 0x376   : > { %1791 = vrot.lane.b32.xlu1 %v9718_v6, %s9524_s22 }
 0x377   : > { %7924 = vmatmul.mubr.bf16.vlgmr.msra.gmra.mxu0 %v1613_v58 }
 0x378   : > { %7940 = vmatpush3.xpose.msk.msra.mxu0 %vm712_vm1, %v10201_v5  ;;  %2389 = vrot.lane.b32.xlu0 %v14167_v59, %s9525_s23  ;;  %v14170_v5 = vld [vmem:[#allocation4_spill] sm:$0xff] }
 0x379   : > { %7941 = vmatprep.subr.msk.mxu0 %vm712_vm1, %v14168_v61 }
 0x37a   : > { %1795 = vrot.lane.b32.xlu1 %v14167_v59, %s9524_s22 }
 0x37c   : > { %7942 = vmatpush3.xpose.msk.msra.mxu0 %vm712_vm1, %v14168_v61  ;;  %2383 = vrot.lane.b32.xlu0 %v9724_v10, %s9525_s23  ;;  %v14179_v61 = vld [vmem:[#allocation16_spill] sm:$0xff] }
 0x37d   : > { %7943 = vmatprep.subr.msk.mxu0 %vm712_vm1, %v14169_v62 }
 0x37e   : > { %2202 = vrot.lane.b32.xlu1 %v14170_v5, %s9524_s22 }
 0x380   : > { %7944 = vmatpush3.xpose.msk.msra.mxu0 %vm712_vm1, %v14169_v62  ;;  %2379 = vrot.lane.b32.xlu0 %v9731_v14, %s9525_s23 }
 0x381   : > { %7945 = vmatprep.subr.msk.mxu0 %vm712_vm1, %v14171_v63 }
 0x382   : > { %2194 = vrot.lane.b32.xlu1 %v14172_v57, %s9524_s22 }
 0x384   : > { %7946 = vmatpush3.xpose.msk.msra.mxu0 %vm712_vm1, %v14171_v63  ;;  %2375 = vrot.lane.b32.xlu0 %v9746_v23, %s9525_s23  ;;  %v14180_v63 = vld [vmem:[#allocation12_spill] sm:$0xff] }
 0x385   : > { %7947 = vmatprep.subr.msk.mxu0 %vm712_vm1, %v14173_v13 }
 0x386   : > { %2190 = vrot.lane.b32.xlu1 %v14174_v56, %s9524_s22 }
 0x388   : > { %7948 = vmatpush3.xpose.msk.msra.mxu0 %vm712_vm1, %v14173_v13 }
 0x389   : > { %7949 = vmatprep.subr.msk.mxu0 %vm712_vm1, %v10181_v25 }
 0x38a   : > { %2387 = vrot.lane.b32.xlu1 %v9741_v21, %s9525_s23 }
 0x38c   : > { %7950 = vmatpush3.xpose.msk.msra.mxu0 %vm712_vm1, %v10181_v25 }
 0x38d   : > { %7951 = vmatprep.subr.msk.mxu0 %vm712_vm1, %v14175_v0 }
 0x38e   : > { %2385 = vrot.lane.b32.xlu1 %v9718_v6, %s9525_s23 }
 0x390   : > { %7952 = vmatpush3.xpose.msk.msra.mxu0 %vm712_vm1, %v14175_v0 }
 0x391   : > { %7953 = vmatprep.subr.msk.mxu0 %vm712_vm1, %v14176_v7  ;;  %v1495_v11 = vpop.xlane.xlu1 %1494 }
 0x392   : > { %2381 = vrot.lane.b32.xlu1 %v9757_v27, %s9525_s23  ;;  %v1521_v25 = vsub.f32 %v14177_v47, %v1495_v11 }
 0x394   : > { %7954 = vmatpush3.xpose.msk.msra.mxu0 %vm712_vm1, %v14176_v7  ;;  %v1542_v17 = vmul.f32 1.442695, %v1521_v25  ;;  %v14181_v7 = vld [vmem:[#allocation18_spill] sm:$0xff]  ;;  %v14182_v25 = vld [vmem:[#allocation15_spill] sm:$0xff] }
 0x395   : > { %7955 = vmatprep.subr.msk.mxu0 %vm712_vm1, %v14178_v49  ;;  %v1501_v58 = vpop.xlane.xlu1 %1500 }
 0x396   : > { %2377 = vrot.lane.b32.xlu1 %v9771_v32, %s9525_s23  ;;  %8895 = vpow2.f32 %v1542_v17 }
 0x397   : > { %v1493_v16 = vpop.xlane.xlu0 %1492 }
 0x398   : > { %v1520_v62 = vsub.f32 %v14179_v61, %v1493_v16  ;;  %7956 = vmatpush3.xpose.msk.msra.mxu0 %vm712_vm1, %v14178_v49  ;;  %v1524_v49 = vsub.f32 %v14182_v25, %v1501_v58  ;;  %v14185_v25 = vld [vmem:[#allocation20_spill] sm:$0xff] }
 0x399   : > { %7957 = vmatprep.subr.msk.mxu0 %vm712_vm1, %v14180_v63  ;;  %v1505_v47 = vpop.xlane.xlu1 %1504 }
 0x39a   : > { %v1540_v13 = vmul.f32 1.442695, %v1520_v62  ;;  %2373 = vrot.lane.b32.xlu1 %v9785_v44, %s9525_s23  ;;  %v14183_v62 = vld [vmem:[#allocation21_spill] sm:$0xff] }
 0x39b   : > { %v1499_v0 = vpop.xlane.xlu0 %1498 }
 0x39c   : > { %8897 = vpow2.f32 %v1540_v13  ;;  %v1523_v11 = vsub.f32 %v14181_v7, %v1499_v0  ;;  %7958 = vmatpush3.xpose.msk.msra.mxu0 %vm712_vm1, %v14180_v63  ;;  %v1548_v13 = vmul.f32 1.442695, %v1524_v49  ;;  %v14184_v0 = vld [vmem:[#allocation17_spill] sm:$0xff] }
 0x39d   : > { %7959 = vmatprep.subr.msk.mxu0 %vm712_vm1, %v1808_v60  ;;  %v1526_v63 = vsub.f32 %v14184_v0, %v1505_v47  ;;  %v1509_v54 = vpop.xlane.xlu1 %1508 }
 0x39e   : > { %2371 = vrot.lane.b32.xlu1 %v9761_v28, %s9525_s23  ;;  %v1546_v16 = vmul.f32 1.442695, %v1523_v11 }
 0x39f   : > { %v1497_v61 = vpop.xlane.xlu0 %1496  ;;  %v1552_v11 = vmul.f32 1.442695, %v1526_v63 }
 0x3a0   : > { %v1522_v15 = vsub.f32 %v14183_v62, %v1497_v61  ;;  %7960 = vmatpush3.xpose.msk.msra.mxu0 %vm712_vm1, %v1808_v60  ;;  %8899 = vpow2.f32 %v1546_v16  ;;  %v1528_v61 = vsub.f32 %v14185_v25, %v1509_v54 }
 0x3a1   : > { %7961 = vmatprep.subr.msk.mxu0 %vm712_vm1, %v1806_v36 }
 0x3a2   : > { %v1544_v17 = vmul.f32 1.442695, %v1522_v15 }
 0x3a3   : > { %v1503_v7 = vpop.xlane.xlu0 %1502  ;;  %v10441_v62 = vpop.eup %8895 }
 0x3a4   : > { %8901 = vpow2.f32 %v1544_v17  ;;  %v1525_v19 = vsub.f32 %v10203_v46, %v1503_v7  ;;  %7962 = vmatpush3.xpose.msk.msra.mxu0 %vm712_vm1, %v1806_v36  ;;  %14186 = vst [vmem:[#allocation3_spill] sm:$0xff] %v10441_v62  ;;  %v1556_v46 = vmul.f32 1.442695, %v1528_v61 }
 0x3a5   : > { %8903 = vpow2.f32 %v1548_v13 }
 0x3a6   : > { %v1550_v58 = vmul.f32 1.442695, %v1525_v19 }
 0x3a7   : > { %v1507_v60 = vpop.xlane.xlu0 %1506 }
 0x3a8   : > { %8905 = vpow2.f32 %v1550_v58  ;;  %v1527_v15 = vsub.f32 %v10207_v3, %v1507_v60 }
 0x3a9   : > { %v10444_v47 = vpop.eup %8897  ;;  %8907 = vpow2.f32 %v1552_v11 }
 0x3aa   : > { %14187 = vst [vmem:[#allocation7_spill] sm:$0xff] %v10444_v47  ;;  %v1554_v49 = vmul.f32 1.442695, %v1527_v15  ;;  %v1614_v16 = vpack.c.bf16 %v10441_v62, %v10444_v47 }
 0x3ab   : > { %v1511_v36 = vpop.xlane.xlu0 %1510 }
 0x3ac   : > { %8909 = vpow2.f32 %v1554_v49  ;;  %v1529_v19 = vsub.f32 %v10211_v34, %v1511_v36  ;;  %7927 = vmatprep.mubr.bf16.mxu0 %v1614_v16  ;;  %v1802_v34 = vpop.permute.xlu1 %1801 }
 0x3ad   : > { %8911 = vpow2.f32 %v1556_v46  ;;  %v10449_v13 = vpop.eup %8899 }
 0x3ae   : > { %v1558_v54 = vmul.f32 1.442695, %v1529_v19  ;;  %14188 = vst [vmem:[#allocation8_spill] sm:$0xff] %v10449_v13 }
 0x3af   : > { %v1515_v17 = vpop.xlane.xlu0 %1514 }
 0x3b0   : > { %8913 = vpow2.f32 %v1558_v54 }
 0x3b1   : > { %v10451_v3 = vpop.eup %8901 }
 0x3b2   : > { %14189 = vst [vmem:[#allocation4_spill] sm:$0xff] %v10451_v3  ;;  %v1615_v0 = vpack.c.bf16 %v10449_v13, %v10451_v3  ;;  %v10455_v7 = vpop.eup %8903 }
 0x3b3   : > { %v1804_v63 = vpop.permute.xlu0 %1803  ;;  %14190 = vst [vmem:[#allocation13_spill] sm:$0xff] %v10455_v7 }
 0x3b4   : > { %7928 = vmatmul.mubr.bf16.gmra.mxu0 %v1615_v0  ;;  %7963 = vmatprep.subr.msk.mxu0 %vm712_vm1, %v1804_v63 }
 0x3b5   : > { %v10458_v58 = vpop.eup %8905  ;;  %7964 = vmatpush3.xpose.msk.msra.mxu0 %vm712_vm1, %v1804_v63 }
 0x3b6   : > { %14191 = vst [vmem:[#allocation5_spill] sm:$0xff] %v10458_v58  ;;  %7965 = vmatprep.subr.msk.mxu0 %vm712_vm1, %v1802_v34  ;;  %v1616_v11 = vpack.c.bf16 %v10458_v58, %v10455_v7  ;;  %v10464_v61 = vpop.eup %8907 }
 0x3b7   : > { %v1800_v25 = vpop.permute.xlu0 %1799  ;;  %14192 = vst [vmem:[#allocation9_spill] sm:$0xff] %v10464_v61 }
 0x3b8   : > { %7931 = vmatprep.mubr.bf16.mxu0 %v1616_v11 }
 0x3b9   : > { %v10466_v60 = vpop.eup %8909  ;;  %7966 = vmatpush3.xpose.msk.msra.mxu0 %vm712_vm1, %v1802_v34  ;;  %v1531_v34 = vsub.f32 %v10215_v26, %v1515_v17 }
 0x3ba   : > { %14193 = vst [vmem:[#allocation6_spill] sm:$0xff] %v10466_v60  ;;  %7967 = vmatprep.subr.msk.mxu0 %vm712_vm1, %v1800_v25  ;;  %v1617_v15 = vpack.c.bf16 %v10466_v60, %v10464_v61  ;;  %v10472_v16 = vpop.eup %8911 }
 0x3bb   : > { %v1766_v49 = vpop.permute.xlu0 %1765  ;;  %14194 = vst [vmem:[#allocation10_spill] sm:$0xff] %v10472_v16  ;;  %v1562_v18 = vmul.f32 1.442695, %v1531_v34 }
 0x3bc   : > { %7932 = vmatmul.mubr.bf16.gmra.mxu0 %v1617_v15 }
 0x3bd   : > { %v10474_v46 = vpop.eup %8913  ;;  %7968 = vmatpush3.xpose.msk.msra.mxu0 %vm712_vm1, %v1800_v25  ;;  %8915 = vpow2.f32 %v1562_v18 }
 0x3be   : > { %14195 = vst [vmem:[#allocation19_spill] sm:$0xff] %v10474_v46  ;;  %v1618_v36 = vpack.c.bf16 %v10474_v46, %v10472_v16 }
 0x3bf   : > { %v1770_v19 = vpop.permute.xlu0 %1769 }
 0x3c0   : > { %7935 = vmatprep.mubr.bf16.mxu0 %v1618_v36 }
 0x3c3   : > { %v1774_v54 = vpop.permute.xlu0 %1773 }
 0x3c7   : > { %v1778_v0 = vpop.permute.xlu0 %1777 }
 0x3ca   : > { %v10483_v34 = vpop.eup %8915 }
 0x3cb   : > { %v1782_v63 = vpop.permute.xlu0 %1781  ;;  %14196 = vst [vmem:[#allocation14_spill] sm:$0xff] %v10483_v34 }
 0x3cf   : > { %v1786_v11 = vpop.permute.xlu0 %1785 }
 0x3d2   : > { %v1513_v51 = vpop.xlane.xlu1 %1512 }
 0x3d3   : > { %v1530_v2 = vsub.f32 %v10280_v1, %v1513_v51  ;;  %v1790_v15 = vpop.permute.xlu0 %1789 }
 0x3d5   : > { %v1560_v40 = vmul.f32 1.442695, %v1530_v2 }
 0x3d6   : > { %v1798_v8 = vpop.permute.xlu1 %1797 }
 0x3d7   : > { %8917 = vpow2.f32 %v1560_v40  ;;  %v1794_v25 = vpop.permute.xlu0 %1793  ;;  %7969 = vmatprep.subr.msk.mxu0 %vm712_vm1, %v1798_v8 }
 0x3d8   : > { %7970 = vmatpush3.xpose.msk.msra.mxu0 %vm712_vm1, %v1798_v8 }
 0x3da   : > { %v1768_v36 = vpop.permute.xlu1 %1767 }
 0x3db   : > { %v2205_v12 = vpop.permute.xlu0 %2204 }
 0x3dc   : > { %7995 = vmatprep.subr.bf16.mxu1 %v2205_v12 }
 0x3dd   : > { %7996 = vmatpush3.bf16.msra.mxu1 %v2205_v12 }
 0x3de   : > { %v1772_v26 = vpop.permute.xlu1 %1771 }
 0x3df   : > { %v2201_v18 = vpop.permute.xlu0 %2200 }
 0x3e2   : > { %v1776_v17 = vpop.permute.xlu1 %1775 }
 0x3e4   : > { %v10485_v29 = vpop.eup %8917 }
 0x3e5   : > { %14197 = vst [vmem:[#allocation11_spill] sm:$0xff] %v10485_v29  ;;  %v1619_v2 = vpack.c.bf16 %v10483_v34, %v10485_v29 }
 0x3e6   : > { %v1780_v51 = vpop.permute.xlu1 %1779 }
 0x3e7   : > { %7936 = vmatmul.mubr.bf16.gmra.mxu0 %v1619_v2 }
 0x3e8   : > { %7971 = vmatprep.mubr.msk.f32.mxu0 %vm712_vm1, %v1766_v49  ;;  %v2199_v49 = vpop.permute.xlu0 %2198 }
 0x3ea   : > { %v1784_v40 = vpop.permute.xlu1 %1783 }
 0x3ee   : > { %v1788_v1 = vpop.permute.xlu1 %1787 }
 0x3ef   : > { %7972 = vmatmul.mubr.msk.f32.vlgmr.msra.gmra.mxu0 %vm712_vm1, %v1768_v36 }
 0x3f0   : > { %7974 = vmatprep.mubr.msk.f32.mxu0 %vm712_vm1, %v1770_v19  ;;  %v2197_v19 = vpop.permute.xlu0 %2196 }
 0x3f2   : > { %v1792_v12 = vpop.permute.xlu1 %1791 }
 0x3f3   : > { %7975 = vmatmul.mubr.msk.f32.gmra.mxu0 %vm712_vm1, %v1772_v26 }
 0x3f4   : > { %7977 = vmatprep.mubr.msk.f32.mxu0 %vm712_vm1, %v1774_v54 }
 0x3f6   : > { %v1796_v8 = vpop.permute.xlu1 %1795 }
 0x3f7   : > { %7978 = vmatmul.mubr.msk.f32.gmra.mxu0 %vm712_vm1, %v1776_v17 }
 0x3f8   : > { %7980 = vmatprep.mubr.msk.f32.mxu0 %vm712_vm1, %v1778_v0  ;;  %v2193_v0 = vpop.permute.xlu0 %2192 }
 0x3fa   : > { %v2203_v2 = vpop.permute.xlu1 %2202 }
 0x3fb   : > { %7981 = vmatmul.mubr.msk.f32.gmra.mxu0 %vm712_vm1, %v1780_v51  ;;  %7997 = vmatprep.subr.bf16.mxu1 %v2203_v2 }
 0x3fc   : > { %7983 = vmatprep.mubr.msk.f32.mxu0 %vm712_vm1, %v1782_v63  ;;  %7998 = vmatpush3.bf16.msra.mxu1 %v2203_v2 }
 0x3fd   : > { %7999 = vmatprep.subr.bf16.mxu1 %v2201_v18 }
 0x3fe   : > { %v2195_v54 = vpop.permute.xlu1 %2194 }
 0x3ff   : > { %7984 = vmatmul.mubr.msk.f32.gmra.mxu0 %vm712_vm1, %v1784_v40 }
 0x400   : > { %7986 = vmatprep.mubr.msk.f32.mxu0 %vm712_vm1, %v1786_v11  ;;  %8000 = vmatpush3.bf16.msra.mxu1 %v2201_v18  ;;  %v10505_v11 = vpop.permute.xlu0 %2389 }
 0x401   : > { %8001 = vmatprep.subr.bf16.mxu1 %v2199_v49 }
 0x402   : > { %v2191_v63 = vpop.permute.xlu1 %2190 }
 0x403   : > { %7987 = vmatmul.mubr.msk.f32.gmra.mxu0 %vm712_vm1, %v1788_v1 }
 0x404   : > { %7989 = vmatprep.mubr.msk.f32.mxu0 %vm712_vm1, %v1790_v15  ;;  %8002 = vmatpush3.bf16.msra.mxu1 %v2199_v49  ;;  %v10509_v15 = vpop.f32.mrf.mxu0  ;;  %v10644_v35 = vpop.permute.xlu0 %2383 }
 0x405   : > { %8003 = vmatprep.subr.bf16.mxu1 %v2197_v19  ;;  %14198 = vst [vmem:[#allocation16_spill] sm:$0xff] %v10509_v15 }
 0x406   : > { %v10511_v36 = vpop.f32.mrf.mxu0 }
 0x407   : > { %7990 = vmatmul.mubr.msk.f32.gmra.mxu0 %vm712_vm1, %v1792_v12  ;;  %14199 = vst [vmem:[#allocation12_spill] sm:$0xff] %v10511_v36 }
 0x408   : > { %7992 = vmatprep.mubr.msk.f32.mxu0 %vm712_vm1, %v1794_v25  ;;  %8004 = vmatpush3.bf16.msra.mxu1 %v2197_v19  ;;  %v10513_v25 = vpop.f32.mrf.mxu0  ;;  %v10653_v34 = vpop.permute.xlu0 %2379 }
 0x409   : > { %8005 = vmatprep.subr.bf16.mxu1 %v2195_v54  ;;  %14200 = vst [vmem:[#allocation18_spill] sm:$0xff] %v10513_v25 }
 0x40a   : > { %v10515_v26 = vpop.f32.mrf.mxu0 }
 0x40b   : > { %7993 = vmatmul.mubr.msk.f32.gmra.mxu0 %vm712_vm1, %v1796_v8  ;;  %14201 = vst [vmem:[#allocation15_spill] sm:$0xff] %v10515_v26 }
 0x40c   : > { %8006 = vmatpush3.bf16.msra.mxu1 %v2195_v54  ;;  %v10517_v17 = vpop.f32.mrf.mxu0  ;;  %v10661_v29 = vpop.permute.xlu0 %2375 }
 0x40d   : > { %8007 = vmatprep.subr.bf16.mxu1 %v2193_v0  ;;  %14202 = vst [vmem:[#allocation21_spill] sm:$0xff] %v10517_v17 }
 0x40e   : > { %v10519_v51 = vpop.f32.mrf.mxu0 }
 0x40f   : > { %14203 = vst [vmem:[#allocation17_spill] sm:$0xff] %v10519_v51 }
 0x410   : > { %8008 = vmatpush3.bf16.msra.mxu1 %v2193_v0  ;;  %v10521_v40 = vpop.f32.mrf.mxu0 }
 0x411   : > { %8009 = vmatprep.subr.bf16.mxu1 %v2191_v63  ;;  %14204 = vst [vmem:[#allocation20_spill] sm:$0xff] %v10521_v40 }
 0x412   : > { %v10523_v1 = vpop.f32.mrf.mxu0 }
 0x413   : > { %14205 = vst [vmem:[#allocation40_spill] sm:$0xff] %v10523_v1 }
 0x414   : > { %8010 = vmatpush3.bf16.msra.mxu1 %v2191_v63  ;;  %v10525_v12 = vpop.f32.mrf.mxu0 }
 0x415   : > { %8027 = vmatprep.subr.msk.mxu1 %vm712_vm1, %v10505_v11  ;;  %14206 = vst [vmem:[#allocation41_spill] sm:$0xff] %v10525_v12 }
 0x416   : > { %v10527_v8 = vpop.f32.mrf.mxu0 }
 0x417   : > { %14207 = vst [vmem:[#allocation42_spill] sm:$0xff] %v10527_v8 }
 0x418   : > { %v10529_v18 = vpop.f32.mrf.mxu0 }
 0x419   : > { %14208 = vst [vmem:[#allocation43_spill] sm:$0xff] %v10529_v18 }
 0x41a   : > { %v10531_v2 = vpop.f32.mrf.mxu0 }
 0x41b   : > { %14209 = vst [vmem:[#allocation44_spill] sm:$0xff] %v10531_v2 }
 0x41c   : > { %v10533_v49 = vpop.f32.mrf.mxu0 }
 0x41d   : > { %14210 = vst [vmem:[#allocation45_spill] sm:$0xff] %v10533_v49 }
 0x41e   : > { %v10535_v19 = vpop.f32.mrf.mxu0 }
 0x41f   : > { %14211 = vst [vmem:[#allocation46_spill] sm:$0xff] %v10535_v19 }
 0x420   : > { %v10537_v54 = vpop.f32.mrf.mxu0 }
 0x421   : > { %14212 = vst [vmem:[#allocation47_spill] sm:$0xff] %v10537_v54 }
 0x422   : > { %v10539_v0 = vpop.f32.mrf.mxu0 }
 0x423   : > { %14213 = vst [vmem:[#allocation48_spill] sm:$0xff] %v10539_v0 }
 0x437   : > { %v10541_v63 = vpop.f32.mrf.mxu0 }
 0x438   : > { %14214 = vst [vmem:[#allocation49_spill] sm:$0xff] %v10541_v63 }
 0x439   : > { %v10543_v40 = vpop.f32.mrf.mxu0 }
 0x43a   : > { %14215 = vst [vmem:[#allocation50_spill] sm:$0xff] %v10543_v40 }
 0x43b   : > { %v10545_v1 = vpop.f32.mrf.mxu0 }
 0x43c   : > { %14216 = vst [vmem:[#allocation51_spill] sm:$0xff] %v10545_v1 }
 0x43d   : > { %v10547_v12 = vpop.f32.mrf.mxu0 }
 0x43e   : > { %14217 = vst [vmem:[#allocation52_spill] sm:$0xff] %v10547_v12 }
 0x474   : > { %v10549_v8 = vpop.f32.mrf.mxu0 }
 0x475   : > { %14218 = vst [vmem:[#allocation53_spill] sm:$0xff] %v10549_v8 }
 0x476   : > { %v10551_v18 = vpop.f32.mrf.mxu0 }
 0x477   : > { %14219 = vst [vmem:[#allocation54_spill] sm:$0xff] %v10551_v18 }
 0x478   : > { %v10553_v2 = vpop.f32.mrf.mxu0 }
 0x479   : > { %14220 = vst [vmem:[#allocation55_spill] sm:$0xff] %v10553_v2 }
 0x47a   : > { %v10555_v49 = vpop.f32.mrf.mxu0 }
 0x47b   : > { %14221 = vst [vmem:[#allocation56_spill] sm:$0xff] %v10555_v49 }
 0x47c   : > { %v10557_v19 = vpop.f32.mrf.mxu0 }
 0x47d   : > { %14222 = vst [vmem:[#allocation57_spill] sm:$0xff] %v10557_v19 }
 0x47e   : > { %v10559_v54 = vpop.f32.mrf.mxu0 }
 0x47f   : > { %14223 = vst [vmem:[#allocation58_spill] sm:$0xff] %v10559_v54 }
 0x480   : > { %v10561_v0 = vpop.f32.mrf.mxu0 }
 0x481   : > { %14224 = vst [vmem:[#allocation59_spill] sm:$0xff] %v10561_v0 }
 0x482   : > { %v10563_v51 = vpop.f32.mrf.mxu0 }
 0x483   : > { %14225 = vst [vmem:[#allocation60_spill] sm:$0xff] %v10563_v51 }
 0x4a7   : > { %v10565_v17 = vpop.f32.mrf.mxu0 }
 0x4a8   : > { %14226 = vst [vmem:[#allocation61_spill] sm:$0xff] %v10565_v17 }
 0x4a9   : > { %v10567_v15 = vpop.f32.mrf.mxu0 }
 0x4aa   : > { %14227 = vst [vmem:[#allocation62_spill] sm:$0xff] %v10567_v15 }
 0x4ab   : > { %v10569_v25 = vpop.f32.mrf.mxu0 }
 0x4ac   : > { %14228 = vst [vmem:[#allocation63_spill] sm:$0xff] %v10569_v25 }
 0x4ad   : > { %v10571_v26 = vpop.f32.mrf.mxu0 }
 0x4ae   : > { %14229 = vst [vmem:[#allocation64_spill] sm:$0xff] %v10571_v26 }
 0x4af   : > { %v7973_v36 = vpop.f32.mrf.mxu0 }
 0x4b0   : > { %v10573_v18 = vmul.f32 0.35355338, %v7973_v36 }
 0x4b1   : > { %v1959_v49 = vpop.f32.mrf.mxu0 }
 0x4b2   : > { %v10575_v2 = vmul.f32 0.35355338, %v1959_v49  ;;  %2056 = vmax.xlane.f32.xlu1 %v10573_v18 }
 0x4b3   : > { %v7976_v17 = vpop.f32.mrf.mxu0 }
 0x4b4   : > { %2054 = vmax.xlane.f32.xlu0 %v10575_v2  ;;  %v10583_v19 = vmul.f32 0.35355338, %v7976_v17 }
 0x4b5   : > { %v1969_v15 = vpop.f32.mrf.mxu0 }
 0x4b6   : > { %v10588_v8 = vmul.f32 0.35355338, %v1969_v15 }
 0x4b7   : > { %v7979_v25 = vpop.f32.mrf.mxu0 }
 0x4b8   : > { %v10594_v12 = vmul.f32 0.35355338, %v7979_v25 }
 0x4b9   : > { %v1979_v26 = vpop.f32.mrf.mxu0 }
 0x4ba   : > { %v10585_v0 = vmul.f32 0.35355338, %v1979_v26 }
 0x4bb   : > { %v7982_v51 = vpop.f32.mrf.mxu0 }
 0x4bc   : > { %v10591_v63 = vmul.f32 0.35355338, %v7982_v51 }
 0x4bd   : > { %v1989_v36 = vpop.f32.mrf.mxu0 }
 0x4be   : > { %v10597_v40 = vmul.f32 0.35355338, %v1989_v36 }
 0x4bf   : > { %v7985_v54 = vpop.f32.mrf.mxu0 }
 0x4c0   : > { %v10603_v53 = vmul.f32 0.35355338, %v7985_v54 }
 0x4c1   : > { %v1999_v49 = vpop.f32.mrf.mxu0 }
 0x4c2   : > { %v10600_v26 = vmul.f32 0.35355338, %v1999_v49 }
 0x4c3   : > { %2367 = vrot.lane.b32.xlu1 %v9775_v33, %s9525_s23  ;;  %v7988_v1 = vpop.f32.mrf.mxu0 }
 0x4c4   : > { %v10609_v20 = vmul.f32 0.35355338, %v7988_v1  ;;  %v10626_v1 = vpop.permute.xlu1 %2387 }
 0x4c5   : > { %v2009_v17 = vpop.f32.mrf.mxu0 }
 0x4c6   : > { %v10606_v51 = vmul.f32 0.35355338, %v2009_v17 }
 0x4c7   : > { %v7991_v15 = vpop.f32.mrf.mxu0 }
 0x4c8   : > { %v10615_v49 = vmul.f32 0.35355338, %v7991_v15  ;;  %v10630_v15 = vpop.permute.xlu1 %2385 }
 0x4c9   : > { %v2019_v25 = vpop.f32.mrf.mxu0 }
 0x4ca   : > { %2369 = vrot.lane.b32.xlu0 %v9799_v55, %s9525_s23  ;;  %v10612_v36 = vmul.f32 0.35355338, %v2019_v25 }
 0x4cb   : > { %v7994_v54 = vpop.f32.mrf.mxu0 }
 0x4cc   : > { %v10619_v17 = vmul.f32 0.35355338, %v7994_v54  ;;  %v10636_v25 = vpop.permute.xlu1 %2381 }
 0x4cd   : > { %v2029_v43 = vpop.f32.mrf.mxu0 }
 0x4ce   : > { %v10646_v37 = vmul.f32 0.35355338, %v2029_v43 }
 0x4d0   : > { %v10640_v54 = vpop.permute.xlu1 %2377 }
 0x4d4   : > { %v10651_v31 = vpop.permute.xlu1 %2373 }
 0x4d8   : > { %v10657_v46 = vpop.permute.xlu1 %2371 }
 0x4e7   : > { %2060 = vmax.xlane.f32.xlu1 %v10583_v19 }
 0x4e9   : > { %2062 = vmax.xlane.f32.xlu0 %v10585_v0 }
 0x4eb   : > { %2058 = vmax.xlane.f32.xlu1 %v10588_v8 }
 0x4ed   : > { %2068 = vmax.xlane.f32.xlu0 %v10591_v63 }
 0x4ef   : > { %2064 = vmax.xlane.f32.xlu1 %v10594_v12 }
 0x4f1   : > { %2066 = vmax.xlane.f32.xlu0 %v10597_v40 }
 0x4f3   : > { %2070 = vmax.xlane.f32.xlu1 %v10600_v26 }
 0x4f5   : > { %2072 = vmax.xlane.f32.xlu0 %v10603_v53 }
 0x4f7   : > { %2074 = vmax.xlane.f32.xlu1 %v10606_v51 }
 0x4f9   : > { %2076 = vmax.xlane.f32.xlu0 %v10609_v20 }
 0x4fb   : > { %2078 = vmax.xlane.f32.xlu1 %v10612_v36 }
 0x4fd   : > { %2080 = vmax.xlane.f32.xlu0 %v10615_v49 }
 0x501   : > { %2084 = vmax.xlane.f32.xlu0 %v10619_v17 }
 0x50c   : > { %2363 = vrot.lane.b32.xlu1 %v9702_v45, %s9525_s23 }
 0x517   : > { %2365 = vrot.lane.b32.xlu0 %v9707_v48, %s9525_s23 }
 0x51b   : > { %2361 = vrot.lane.b32.xlu0 %v9697_v42, %s9525_s23 }
 0x51f   : > { %2327 = vrot.lane.b32.xlu0 %v9690_v39, %s9526_s24 }
 0x523   : > { %2331 = vrot.lane.b32.xlu0 %v9702_v45, %s9526_s24 }
 0x527   : > { %2335 = vrot.lane.b32.xlu0 %v9775_v33, %s9526_s24 }
 0x52b   : > { %2339 = vrot.lane.b32.xlu0 %v9761_v28, %s9526_s24 }
 0x52f   : > { %2343 = vrot.lane.b32.xlu0 %v9746_v23, %s9526_s24 }
 0x530   : > { %2082 = vmax.xlane.f32.xlu1 %v10646_v37 }
 0x533   : > { %2347 = vrot.lane.b32.xlu0 %v9731_v14, %s9526_s24 }
 0x537   : > { %2351 = vrot.lane.b32.xlu0 %v9724_v10, %s9526_s24 }
 0x53b   : > { %2355 = vrot.lane.b32.xlu0 %v9741_v21, %s9526_s24  ;;  %v2057_v43 = vpop.xlane.xlu1 %2056 }
 0x53c   : > { %v2087_v16 = vsub.f32 %v10573_v18, %v2057_v43 }
 0x53d   : > { %v2055_v60 = vpop.xlane.xlu0 %2054 }
 0x53e   : > { %v2104_v61 = vmul.f32 1.442695, %v2087_v16  ;;  %v2086_v7 = vsub.f32 %v10575_v2, %v2055_v60 }
 0x53f   : > { %2766 = vrot.lane.b32.xlu0 %v9743_v22, %s9526_s24  ;;  %v10713_v60 = vpop.permute.xlu1 %2367 }
 0x540   : > { %v2102_v3 = vmul.f32 1.442695, %v2086_v7  ;;  %8919 = vpow2.f32 %v2104_v61 }
 0x541   : > { %2359 = vrot.lane.b32.xlu1 %v9690_v39, %s9525_s23  ;;  %v10717_v16 = vpop.permute.xlu0 %2369 }
 0x542   : > { %8921 = vpow2.f32 %v2102_v3 }
 0x543   : > { %2762 = vrot.lane.b32.xlu0 %v9763_v30, %s9526_s24 }
 0x545   : > { %2329 = vrot.lane.b32.xlu1 %v9697_v42, %s9526_s24 }
 0x547   : > { %2760 = vrot.lane.b32.xlu0 %v9777_v38, %s9526_s24 }
 0x549   : > { %2333 = vrot.lane.b32.xlu1 %v9707_v48, %s9526_s24 }
 0x54b   : > { %2758 = vrot.lane.b32.xlu0 %v9789_v50, %s9526_s24 }
 0x54d   : > { %2337 = vrot.lane.b32.xlu1 %v9799_v55, %s9526_s24  ;;  %v10683_v7 = vpop.eup %8919 }
 0x54f   : > { %v10685_v3 = vpop.eup %8921  ;;  %2754 = vrot.lane.b32.xlu0 %v9813_v52, %s9526_s24 }
 0x550   : > { %14230 = vst [vmem:[#allocation65_spill] sm:$0xff] %v10685_v3  ;;  %v2182_v61 = vpack.c.bf16 %v10683_v7, %v10685_v3 }
 0x551   : > { %2341 = vrot.lane.b32.xlu1 %v9785_v44, %s9526_s24 }
 0x552   : > { %8011 = vmatprep.mubr.bf16.mxu1 %v2182_v61 }
 0x553   : > { %2951 = vrot.lane.b32.xlu0 %v14167_v59, %s9527_s28 }
 0x555   : > { %2345 = vrot.lane.b32.xlu1 %v9771_v32, %s9526_s24 }
 0x557   : > { %2945 = vrot.lane.b32.xlu0 %v9724_v10, %s9527_s28 }
 0x559   : > { %2349 = vrot.lane.b32.xlu1 %v9757_v27, %s9526_s24 }
 0x55b   : > { %2941 = vrot.lane.b32.xlu0 %v9731_v14, %s9527_s28 }
 0x55d   : > { %2353 = vrot.lane.b32.xlu1 %v9718_v6, %s9526_s24 }
 0x55f   : > { %2937 = vrot.lane.b32.xlu0 %v9746_v23, %s9527_s28 }
 0x561   : > { %2357 = vrot.lane.b32.xlu1 %v14167_v59, %s9526_s24 }
 0x565   : > { %2764 = vrot.lane.b32.xlu1 %v14170_v5, %s9526_s24 }
 0x569   : > { %2756 = vrot.lane.b32.xlu1 %v14172_v57, %s9526_s24 }
 0x56d   : > { %2752 = vrot.lane.b32.xlu1 %v14174_v56, %s9526_s24 }
 0x570   : > { %v2061_v18 = vpop.xlane.xlu1 %2060 }
 0x571   : > { %v2089_v2 = vsub.f32 %v10583_v19, %v2061_v18  ;;  %2949 = vrot.lane.b32.xlu1 %v9741_v21, %s9527_s28 }
 0x572   : > { %v2063_v43 = vpop.xlane.xlu0 %2062 }
 0x573   : > { %v2108_v61 = vmul.f32 1.442695, %v2089_v2  ;;  %v2090_v47 = vsub.f32 %v10585_v0, %v2063_v43 }
 0x574   : > { %v2059_v3 = vpop.xlane.xlu1 %2058 }
 0x575   : > { %v2088_v58 = vsub.f32 %v10588_v8, %v2059_v3  ;;  %2947 = vrot.lane.b32.xlu1 %v9718_v6, %s9527_s28  ;;  %8923 = vpow2.f32 %v2108_v61  ;;  %v2110_v13 = vmul.f32 1.442695, %v2090_v47 }
 0x576   : > { %v2069_v9 = vpop.xlane.xlu0 %2068 }
 0x577   : > { %v2106_v41 = vmul.f32 1.442695, %v2088_v58  ;;  %v2093_v19 = vsub.f32 %v10591_v63, %v2069_v9 }
 0x578   : > { %v2065_v62 = vpop.xlane.xlu1 %2064 }
 0x579   : > { %8925 = vpow2.f32 %v2106_v41  ;;  %v2091_v18 = vsub.f32 %v10594_v12, %v2065_v62  ;;  %2943 = vrot.lane.b32.xlu1 %v9757_v27, %s9527_s28  ;;  %v2116_v43 = vmul.f32 1.442695, %v2093_v19 }
 0x57a   : > { %v2067_v0 = vpop.xlane.xlu0 %2066  ;;  %8927 = vpow2.f32 %v2110_v13 }
 0x57b   : > { %v2112_v2 = vmul.f32 1.442695, %v2091_v18  ;;  %v2092_v8 = vsub.f32 %v10597_v40, %v2067_v0 }
 0x57c   : > { %v2071_v3 = vpop.xlane.xlu1 %2070 }
 0x57d   : > { %8929 = vpow2.f32 %v2112_v2  ;;  %v2114_v58 = vmul.f32 1.442695, %v2092_v8  ;;  %v2094_v47 = vsub.f32 %v10600_v26, %v2071_v3  ;;  %2939 = vrot.lane.b32.xlu1 %v9771_v32, %s9527_s28 }
 0x57e   : > { %v2073_v41 = vpop.xlane.xlu0 %2072 }
 0x57f   : > { %8931 = vpow2.f32 %v2114_v58  ;;  %v2118_v9 = vmul.f32 1.442695, %v2094_v47  ;;  %v2095_v62 = vsub.f32 %v10603_v53, %v2073_v41 }
 0x580   : > { %v2075_v12 = vpop.xlane.xlu1 %2074  ;;  %8933 = vpow2.f32 %v2116_v43 }
 0x581   : > { %v2120_v63 = vmul.f32 1.442695, %v2095_v62  ;;  %v2096_v40 = vsub.f32 %v10606_v51, %v2075_v12  ;;  %2935 = vrot.lane.b32.xlu1 %v9785_v44, %s9527_s28  ;;  %8935 = vpow2.f32 %v2118_v9 }
 0x582   : > { %v2077_v13 = vpop.xlane.xlu0 %2076  ;;  %v10739_v19 = vpop.eup %8923 }
 0x583   : > { %8937 = vpow2.f32 %v2120_v63  ;;  %v2097_v26 = vsub.f32 %v10609_v20, %v2077_v13  ;;  %14231 = vst [vmem:[#allocation66_spill] sm:$0xff] %v10739_v19  ;;  %v2122_v18 = vmul.f32 1.442695, %v2096_v40 }
 0x584   : > { %v2079_v61 = vpop.xlane.xlu1 %2078 }
 0x585   : > { %v2124_v0 = vmul.f32 1.442695, %v2097_v26  ;;  %v2098_v53 = vsub.f32 %v10612_v36, %v2079_v61  ;;  %2933 = vrot.lane.b32.xlu1 %v9761_v28, %s9527_s28 }
 0x586   : > { %v10744_v2 = vpop.eup %8925  ;;  %v2081_v51 = vpop.xlane.xlu0 %2080 }
 0x587   : > { %14232 = vst [vmem:[#allocation67_spill] sm:$0xff] %v10744_v2  ;;  %8939 = vpow2.f32 %v2124_v0  ;;  %v2126_v8 = vmul.f32 1.442695, %v2098_v53  ;;  %v2099_v3 = vsub.f32 %v10615_v49, %v2081_v51  ;;  %v2183_v20 = vpack.c.bf16 %v10739_v19, %v10744_v2  ;;  %v10749_v43 = vpop.eup %8927 }
 0x588   : > { %14233 = vst [vmem:[#allocation68_spill] sm:$0xff] %v10749_v43  ;;  %8941 = vpow2.f32 %v2122_v18 }
 0x589   : > { %v2128_v58 = vmul.f32 1.442695, %v2099_v3  ;;  %8012 = vmatmul.mubr.bf16.vlgmr.msra.gmra.mxu1 %v2183_v20  ;;  %8943 = vpow2.f32 %v2126_v8  ;;  %v2364_v3 = vpop.permute.xlu1 %2363 }
 0x58a   : > { %v10751_v47 = vpop.eup %8929  ;;  %8028 = vmatpush3.xpose.msk.msra.mxu1 %vm712_vm1, %v10505_v11  ;;  %v2085_v36 = vpop.xlane.xlu0 %2084 }
 0x58b   : > { %14234 = vst [vmem:[#allocation69_spill] sm:$0xff] %v10751_v47  ;;  %8945 = vpow2.f32 %v2128_v58  ;;  %8029 = vmatprep.subr.msk.mxu1 %vm712_vm1, %v10626_v1  ;;  %v2184_v49 = vpack.c.bf16 %v10751_v47, %v10749_v43 }
 0x58c   : > { %v10759_v41 = vpop.eup %8931 }
 0x58d   : > { %14235 = vst [vmem:[#allocation70_spill] sm:$0xff] %v10759_v41  ;;  %8015 = vmatprep.mubr.bf16.mxu1 %v2184_v49  ;;  %v10761_v9 = vpop.eup %8933 }
 0x58e   : > { %14236 = vst [vmem:[#allocation71_spill] sm:$0xff] %v10761_v9  ;;  %8030 = vmatpush3.xpose.msk.msra.mxu1 %vm712_vm1, %v10626_v1  ;;  %v2366_v62 = vpop.permute.xlu0 %2365  ;;  %v10765_v12 = vpop.eup %8935  ;;  %v2185_v11 = vpack.c.bf16 %v10761_v9, %v10759_v41 }
 0x58f   : > { %14237 = vst [vmem:[#allocation72_spill] sm:$0xff] %v10765_v12  ;;  %8031 = vmatprep.subr.msk.mxu1 %vm712_vm1, %v10630_v15 }
 0x590   : > { %v10771_v63 = vpop.eup %8937 }
 0x591   : > { %14238 = vst [vmem:[#allocation73_spill] sm:$0xff] %v10771_v63  ;;  %8016 = vmatmul.mubr.bf16.gmra.mxu1 %v2185_v11  ;;  %v2186_v40 = vpack.c.bf16 %v10771_v63, %v10765_v12 }
 0x592   : > { %8032 = vmatpush3.xpose.msk.msra.mxu1 %vm712_vm1, %v10630_v15  ;;  %v2362_v13 = vpop.permute.xlu0 %2361 }
 0x593   : > { %8033 = vmatprep.subr.msk.mxu1 %vm712_vm1, %v10644_v35  ;;  %8019 = vmatprep.mubr.bf16.mxu1 %v2186_v40 }
 0x594   : > { %v10779_v1 = vpop.eup %8939 }
 0x595   : > { %14239 = vst [vmem:[#allocation74_spill] sm:$0xff] %v10779_v1  ;;  %v10781_v26 = vpop.eup %8941 }
 0x596   : > { %14240 = vst [vmem:[#allocation75_spill] sm:$0xff] %v10781_v26  ;;  %8034 = vmatpush3.xpose.msk.msra.mxu1 %vm712_vm1, %v10644_v35  ;;  %v2328_v61 = vpop.permute.xlu0 %2327  ;;  %v10785_v18 = vpop.eup %8943  ;;  %v2187_v15 = vpack.c.bf16 %v10779_v1, %v10781_v26 }
 0x597   : > { %14241 = vst [vmem:[#allocation76_spill] sm:$0xff] %v10785_v18  ;;  %8035 = vmatprep.subr.msk.mxu1 %vm712_vm1, %v10636_v25 }
 0x598   : > { %v10791_v0 = vpop.eup %8945 }
 0x599   : > { %14242 = vst [vmem:[#allocation77_spill] sm:$0xff] %v10791_v0  ;;  %8020 = vmatmul.mubr.bf16.gmra.mxu1 %v2187_v15  ;;  %v2188_v53 = vpack.c.bf16 %v10791_v0, %v10785_v18 }
 0x59a   : > { %8036 = vmatpush3.xpose.msk.msra.mxu1 %vm712_vm1, %v10636_v25  ;;  %v2332_v51 = vpop.permute.xlu0 %2331 }
 0x59b   : > { %8037 = vmatprep.subr.msk.mxu1 %vm712_vm1, %v10653_v34  ;;  %8023 = vmatprep.mubr.bf16.mxu1 %v2188_v53 }
 0x59e   : > { %8038 = vmatpush3.xpose.msk.msra.mxu1 %vm712_vm1, %v10653_v34  ;;  %v2336_v35 = vpop.permute.xlu0 %2335 }
 0x59f   : > { %8039 = vmatprep.subr.msk.mxu1 %vm712_vm1, %v10640_v54 }
 0x5a2   : > { %8040 = vmatpush3.xpose.msk.msra.mxu1 %vm712_vm1, %v10640_v54  ;;  %v2340_v8 = vpop.permute.xlu0 %2339 }
 0x5a3   : > { %8041 = vmatprep.subr.msk.mxu1 %vm712_vm1, %v10661_v29 }
 0x5a6   : > { %8042 = vmatpush3.xpose.msk.msra.mxu1 %vm712_vm1, %v10661_v29  ;;  %v2344_v25 = vpop.permute.xlu0 %2343 }
 0x5a7   : > { %8043 = vmatprep.subr.msk.mxu1 %vm712_vm1, %v10651_v31 }
 0x5aa   : > { %8044 = vmatpush3.xpose.msk.msra.mxu1 %vm712_vm1, %v10651_v31  ;;  %v2348_v34 = vpop.permute.xlu0 %2347  ;;  %v2101_v31 = vsub.f32 %v10619_v17, %v2085_v36 }
 0x5ab   : > { %8045 = vmatprep.subr.msk.mxu1 %vm712_vm1, %v10657_v46 }
 0x5ae   : > { %8046 = vmatpush3.xpose.msk.msra.mxu1 %vm712_vm1, %v10657_v46  ;;  %v2352_v54 = vpop.permute.xlu0 %2351  ;;  %v2132_v46 = vmul.f32 1.442695, %v2101_v31 }
 0x5af   : > { %8047 = vmatprep.subr.msk.mxu1 %vm712_vm1, %v10717_v16 }
 0x5b0   : > { %8947 = vpow2.f32 %v2132_v46 }
 0x5b2   : > { %8048 = vmatpush3.xpose.msk.msra.mxu1 %vm712_vm1, %v10717_v16  ;;  %v2356_v29 = vpop.permute.xlu0 %2355 }
 0x5b3   : > { %8049 = vmatprep.subr.msk.mxu1 %vm712_vm1, %v10713_v60 }
 0x5b6   : > { %8050 = vmatpush3.xpose.msk.msra.mxu1 %vm712_vm1, %v10713_v60  ;;  %v2767_v20 = vpop.permute.xlu0 %2766 }
 0x5b7   : > { %8051 = vmatprep.subr.msk.mxu1 %vm712_vm1, %v2366_v62  ;;  %8083 = vmatprep.subr.bf16.mxu0 %v2767_v20 }
 0x5b8   : > { %8084 = vmatpush3.bf16.msra.mxu0 %v2767_v20 }
 0x5b9   : > { %v2083_v58 = vpop.xlane.xlu1 %2082 }
 0x5ba   : > { %8052 = vmatpush3.xpose.msk.msra.mxu1 %vm712_vm1, %v2366_v62  ;;  %v2100_v16 = vsub.f32 %v10646_v37, %v2083_v58  ;;  %v2763_v20 = vpop.permute.xlu0 %2762 }
 0x5bb   : > { %8053 = vmatprep.subr.msk.mxu1 %vm712_vm1, %v2364_v3 }
 0x5bc   : > { %v2130_v49 = vmul.f32 1.442695, %v2100_v16 }
 0x5bd   : > { %v2360_v11 = vpop.permute.xlu1 %2359  ;;  %v10835_v37 = vpop.eup %8947 }
 0x5be   : > { %8949 = vpow2.f32 %v2130_v49  ;;  %8054 = vmatpush3.xpose.msk.msra.mxu1 %vm712_vm1, %v2364_v3  ;;  %14243 = vst [vmem:[#allocation78_spill] sm:$0xff] %v10835_v37 }
 0x5bf   : > { %8055 = vmatprep.subr.msk.mxu1 %vm712_vm1, %v2362_v13 }
 0x5c1   : > { %v2330_v17 = vpop.permute.xlu1 %2329 }
 0x5c2   : > { %8056 = vmatpush3.xpose.msk.msra.mxu1 %vm712_vm1, %v2362_v13 }
 0x5c3   : > { %8057 = vmatprep.subr.msk.mxu1 %vm712_vm1, %v2360_v11 }
 0x5c5   : > { %v2334_v60 = vpop.permute.xlu1 %2333 }
 0x5c6   : > { %8058 = vmatpush3.xpose.msk.msra.mxu1 %vm712_vm1, %v2360_v11 }
 0x5c9   : > { %v2338_v36 = vpop.permute.xlu1 %2337 }
 0x5cb   : > { %v10837_v62 = vpop.eup %8949 }
 0x5cc   : > { %14244 = vst [vmem:[#allocation79_spill] sm:$0xff] %v10837_v62  ;;  %v2189_v40 = vpack.c.bf16 %v10835_v37, %v10837_v62 }
 0x5cd   : > { %v2342_v15 = vpop.permute.xlu1 %2341 }
 0x5ce   : > { %8024 = vmatmul.mubr.bf16.gmra.mxu1 %v2189_v40 }
 0x5cf   : > { %8059 = vmatprep.mubr.msk.f32.mxu1 %vm712_vm1, %v2328_v61  ;;  %v2761_v61 = vpop.permute.xlu0 %2760 }
 0x5d1   : > { %v2346_v53 = vpop.permute.xlu1 %2345 }
 0x5d5   : > { %v2350_v3 = vpop.permute.xlu1 %2349 }
 0x5d6   : > { %8060 = vmatmul.mubr.msk.f32.vlgmr.msra.gmra.mxu1 %vm712_vm1, %v2330_v17 }
 0x5d7   : > { %8062 = vmatprep.mubr.msk.f32.mxu1 %vm712_vm1, %v2332_v51  ;;  %v2759_v51 = vpop.permute.xlu0 %2758 }
 0x5d9   : > { %v2354_v13 = vpop.permute.xlu1 %2353 }
 0x5da   : > { %8063 = vmatmul.mubr.msk.f32.gmra.mxu1 %vm712_vm1, %v2334_v60 }
 0x5db   : > { %8065 = vmatprep.mubr.msk.f32.mxu1 %vm712_vm1, %v2336_v35 }
 0x5dd   : > { %v2358_v31 = vpop.permute.xlu1 %2357 }
 0x5de   : > { %8066 = vmatmul.mubr.msk.f32.gmra.mxu1 %vm712_vm1, %v2338_v36 }
 0x5df   : > { %8068 = vmatprep.mubr.msk.f32.mxu1 %vm712_vm1, %v2340_v8  ;;  %v2755_v8 = vpop.permute.xlu0 %2754 }
 0x5e1   : > { %v2765_v46 = vpop.permute.xlu1 %2764 }
 0x5e2   : > { %8069 = vmatmul.mubr.msk.f32.gmra.mxu1 %vm712_vm1, %v2342_v15  ;;  %8085 = vmatprep.subr.bf16.mxu0 %v2765_v46 }
 0x5e3   : > { %8071 = vmatprep.mubr.msk.f32.mxu1 %vm712_vm1, %v2344_v25  ;;  %8086 = vmatpush3.bf16.msra.mxu0 %v2765_v46 }
 0x5e4   : > { %8087 = vmatprep.subr.bf16.mxu0 %v2763_v20 }
 0x5e5   : > { %v2757_v35 = vpop.permute.xlu1 %2756 }
 0x5e6   : > { %8072 = vmatmul.mubr.msk.f32.gmra.mxu1 %vm712_vm1, %v2346_v53 }
 0x5e7   : > { %8074 = vmatprep.mubr.msk.f32.mxu1 %vm712_vm1, %v2348_v34  ;;  %8088 = vmatpush3.bf16.msra.mxu0 %v2763_v20  ;;  %v10857_v34 = vpop.permute.xlu0 %2951 }
 0x5e8   : > { %8089 = vmatprep.subr.bf16.mxu0 %v2761_v61 }
 0x5e9   : > { %v2753_v25 = vpop.permute.xlu1 %2752 }
 0x5ea   : > { %8075 = vmatmul.mubr.msk.f32.gmra.mxu1 %vm712_vm1, %v2350_v3 }
 0x5eb   : > { %8077 = vmatprep.mubr.msk.f32.mxu1 %vm712_vm1, %v2352_v54  ;;  %8090 = vmatpush3.bf16.msra.mxu0 %v2761_v61 }
 0x5ec   : > { %8091 = vmatprep.subr.bf16.mxu0 %v2759_v51 }
 0x5ee   : > { %8078 = vmatmul.mubr.msk.f32.gmra.mxu1 %vm712_vm1, %v2354_v13 }
 0x5ef   : > { %8080 = vmatprep.mubr.msk.f32.mxu1 %vm712_vm1, %v2356_v29  ;;  %8092 = vmatpush3.bf16.msra.mxu0 %v2759_v51 }
 0x5f0   : > { %8093 = vmatprep.subr.bf16.mxu0 %v2757_v35 }
 0x5f2   : > { %8081 = vmatmul.mubr.msk.f32.gmra.mxu1 %vm712_vm1, %v2358_v31 }
 0x5f3   : > { %8094 = vmatpush3.bf16.msra.mxu0 %v2757_v35 }
 0x5f4   : > { %8095 = vmatprep.subr.bf16.mxu0 %v2755_v8 }
 0x5f7   : > { %8096 = vmatpush3.bf16.msra.mxu0 %v2755_v8 }
 0x5f8   : > { %8097 = vmatprep.subr.bf16.mxu0 %v2753_v25 }
 0x5fb   : > { %8098 = vmatpush3.bf16.msra.mxu0 %v2753_v25 }
 0x5fc   : > { %8115 = vmatprep.subr.msk.mxu0 %vm712_vm1, %v10857_v34 }
 0x649   : > { %v10861_v54 = vpop.f32.mrf.mxu1 }
 0x64a   : > { %14245 = vst [vmem:[#allocation80_spill] sm:$0xff] %v10861_v54 }
 0x64b   : > { %v10863_v58 = vpop.f32.mrf.mxu1 }
 0x64c   : > { %14246 = vst [vmem:[#allocation81_spill] sm:$0xff] %v10863_v58 }
 0x64d   : > { %v10865_v29 = vpop.f32.mrf.mxu1 }
 0x64e   : > { %14247 = vst [vmem:[#allocation82_spill] sm:$0xff] %v10865_v29 }
 0x64f   : > { %v10867_v16 = vpop.f32.mrf.mxu1 }
 0x650   : > { %14248 = vst [vmem:[#allocation83_spill] sm:$0xff] %v10867_v16  ;;  %v10964_v16 = vpop.permute.xlu0 %2945 }
 0x651   : > { %v10869_v49 = vpop.f32.mrf.mxu1 }
 0x652   : > { %14249 = vst [vmem:[#allocation84_spill] sm:$0xff] %v10869_v49 }
 0x653   : > { %v10871_v11 = vpop.f32.mrf.mxu1 }
 0x654   : > { %14250 = vst [vmem:[#allocation85_spill] sm:$0xff] %v10871_v11  ;;  %v10973_v0 = vpop.permute.xlu0 %2941 }
 0x655   : > { %v10873_v17 = vpop.f32.mrf.mxu1 }
 0x656   : > { %14251 = vst [vmem:[#allocation86_spill] sm:$0xff] %v10873_v17 }
 0x657   : > { %v10875_v60 = vpop.f32.mrf.mxu1 }
 0x658   : > { %14252 = vst [vmem:[#allocation87_spill] sm:$0xff] %v10875_v60  ;;  %v10981_v18 = vpop.permute.xlu0 %2937 }
 0x659   : > { %v10877_v36 = vpop.f32.mrf.mxu1 }
 0x65a   : > { %14253 = vst [vmem:[#allocation88_spill] sm:$0xff] %v10877_v36 }
 0x65b   : > { %v10879_v40 = vpop.f32.mrf.mxu1 }
 0x65c   : > { %14254 = vst [vmem:[#allocation89_spill] sm:$0xff] %v10879_v40 }
 0x65d   : > { %v10881_v15 = vpop.f32.mrf.mxu1 }
 0x65e   : > { %14255 = vst [vmem:[#allocation90_spill] sm:$0xff] %v10881_v15 }
 0x65f   : > { %v10883_v53 = vpop.f32.mrf.mxu1 }
 0x660   : > { %14256 = vst [vmem:[#allocation91_spill] sm:$0xff] %v10883_v53 }
 0x68e   : > { %v10885_v3 = vpop.f32.mrf.mxu1 }
 0x68f   : > { %14257 = vst [vmem:[#allocation92_spill] sm:$0xff] %v10885_v3 }
 0x690   : > { %v10887_v13 = vpop.f32.mrf.mxu1 }
 0x691   : > { %14258 = vst [vmem:[#allocation93_spill] sm:$0xff] %v10887_v13 }
 0x692   : > { %v10889_v31 = vpop.f32.mrf.mxu1 }
 0x693   : > { %14259 = vst [vmem:[#allocation94_spill] sm:$0xff] %v10889_v31 }
 0x694   : > { %v10891_v20 = vpop.f32.mrf.mxu1 }
 0x695   : > { %14260 = vst [vmem:[#allocation95_spill] sm:$0xff] %v10891_v20 }
 0x696   : > { %v8061_v46 = vpop.f32.mrf.mxu1 }
 0x697   : > { %v10893_v61 = vmul.f32 0.35355338, %v8061_v46 }
 0x698   : > { %v2521_v51 = vpop.f32.mrf.mxu1 }
 0x699   : > { %v10895_v35 = vmul.f32 0.35355338, %v2521_v51  ;;  %2618 = vmax.xlane.f32.xlu1 %v10893_v61 }
 0x69a   : > { %v8064_v8 = vpop.f32.mrf.mxu1 }
 0x69b   : > { %2616 = vmax.xlane.f32.xlu0 %v10895_v35  ;;  %v10903_v40 = vmul.f32 0.35355338, %v8064_v8 }
 0x69c   : > { %v2531_v25 = vpop.f32.mrf.mxu1 }
 0x69d   : > { %v10908_v36 = vmul.f32 0.35355338, %v2531_v25 }
 0x69e   : > { %v8067_v13 = vpop.f32.mrf.mxu1 }
 0x69f   : > { %v10914_v11 = vmul.f32 0.35355338, %v8067_v13 }
 0x6a0   : > { %v2541_v20 = vpop.f32.mrf.mxu1 }
 0x6a1   : > { %v10905_v53 = vmul.f32 0.35355338, %v2541_v20 }
 0x6a2   : > { %v8070_v3 = vpop.f32.mrf.mxu1 }
 0x6a3   : > { %v10911_v60 = vmul.f32 0.35355338, %v8070_v3 }
 0x6a4   : > { %v2551_v46 = vpop.f32.mrf.mxu1 }
 0x6a5   : > { %v10917_v17 = vmul.f32 0.35355338, %v2551_v46 }
 0x6a6   : > { %v8073_v31 = vpop.f32.mrf.mxu1 }
 0x6a7   : > { %v10923_v49 = vmul.f32 0.35355338, %v8073_v31 }
 0x6a8   : > { %v2561_v51 = vpop.f32.mrf.mxu1 }
 0x6a9   : > { %v10920_v20 = vmul.f32 0.35355338, %v2561_v51 }
 0x6aa   : > { %2929 = vrot.lane.b32.xlu1 %v9775_v33, %s9527_s28  ;;  %v8076_v15 = vpop.f32.mrf.mxu1 }
 0x6ab   : > { %v10929_v29 = vmul.f32 0.35355338, %v8076_v15  ;;  %v10946_v15 = vpop.permute.xlu1 %2949 }
 0x6ac   : > { %v2571_v8 = vpop.f32.mrf.mxu1 }
 0x6ad   : > { %v10926_v3 = vmul.f32 0.35355338, %v2571_v8 }
 0x6ae   : > { %v8079_v25 = vpop.f32.mrf.mxu1 }
 0x6af   : > { %v10935_v51 = vmul.f32 0.35355338, %v8079_v25  ;;  %v10950_v25 = vpop.permute.xlu1 %2947 }
 0x6b0   : > { %v2581_v13 = vpop.f32.mrf.mxu1 }
 0x6b1   : > { %2931 = vrot.lane.b32.xlu0 %v9799_v55, %s9527_s28  ;;  %v10932_v46 = vmul.f32 0.35355338, %v2581_v13 }
 0x6b2   : > { %v8082_v31 = vpop.f32.mrf.mxu1 }
 0x6b3   : > { %v10939_v8 = vmul.f32 0.35355338, %v8082_v31  ;;  %v10956_v13 = vpop.permute.xlu1 %2943 }
 0x6b4   : > { %v2591_v54 = vpop.f32.mrf.mxu1 }
 0x6b5   : > { %v10966_v58 = vmul.f32 0.35355338, %v2591_v54 }
 0x6b7   : > { %v10960_v31 = vpop.permute.xlu1 %2939 }
 0x6bb   : > { %v10971_v37 = vpop.permute.xlu1 %2935 }
 0x6bf   : > { %v10977_v62 = vpop.permute.xlu1 %2933 }
 0x6ce   : > { %2622 = vmax.xlane.f32.xlu1 %v10903_v40 }
 0x6d0   : > { %2624 = vmax.xlane.f32.xlu0 %v10905_v53 }
 0x6d2   : > { %2620 = vmax.xlane.f32.xlu1 %v10908_v36 }
 0x6d4   : > { %2630 = vmax.xlane.f32.xlu0 %v10911_v60 }
 0x6d6   : > { %2626 = vmax.xlane.f32.xlu1 %v10914_v11 }
 0x6d8   : > { %2628 = vmax.xlane.f32.xlu0 %v10917_v17 }
 0x6da   : > { %2632 = vmax.xlane.f32.xlu1 %v10920_v20 }
 0x6dc   : > { %2634 = vmax.xlane.f32.xlu0 %v10923_v49 }
 0x6de   : > { %2636 = vmax.xlane.f32.xlu1 %v10926_v3 }
 0x6e0   : > { %2638 = vmax.xlane.f32.xlu0 %v10929_v29 }
 0x6e2   : > { %2640 = vmax.xlane.f32.xlu1 %v10932_v46 }
 0x6e4   : > { %2642 = vmax.xlane.f32.xlu0 %v10935_v51 }
 0x6e8   : > { %2646 = vmax.xlane.f32.xlu0 %v10939_v8 }
 0x6f3   : > { %2925 = vrot.lane.b32.xlu1 %v9702_v45, %s9527_s28 }
 0x6fe   : > { %2927 = vrot.lane.b32.xlu0 %v9707_v48, %s9527_s28 }
 0x702   : > { %2923 = vrot.lane.b32.xlu0 %v9697_v42, %s9527_s28 }
 0x706   : > { %2889 = vrot.lane.b32.xlu0 %v9690_v39, %s9528_s29 }
 0x70a   : > { %2893 = vrot.lane.b32.xlu0 %v9702_v45, %s9528_s29 }
 0x70e   : > { %2897 = vrot.lane.b32.xlu0 %v9775_v33, %s9528_s29 }
 0x712   : > { %2901 = vrot.lane.b32.xlu0 %v9761_v28, %s9528_s29 }
 0x716   : > { %2905 = vrot.lane.b32.xlu0 %v9746_v23, %s9528_s29 }
 0x717   : > { %2644 = vmax.xlane.f32.xlu1 %v10966_v58 }
 0x71a   : > { %2909 = vrot.lane.b32.xlu0 %v9731_v14, %s9528_s29 }
 0x71e   : > { %2913 = vrot.lane.b32.xlu0 %v9724_v10, %s9528_s29 }
 0x722   : > { %2917 = vrot.lane.b32.xlu0 %v9741_v21, %s9528_s29  ;;  %v2619_v54 = vpop.xlane.xlu1 %2618 }
 0x723   : > { %v2649_v1 = vsub.f32 %v10893_v61, %v2619_v54 }
 0x724   : > { %v2617_v63 = vpop.xlane.xlu0 %2616 }
 0x725   : > { %v2666_v26 = vmul.f32 1.442695, %v2649_v1  ;;  %v2648_v12 = vsub.f32 %v10895_v35, %v2617_v63 }
 0x726   : > { %3328 = vrot.lane.b32.xlu0 %v9743_v22, %s9528_s29  ;;  %v11033_v1 = vpop.permute.xlu1 %2929 }
 0x727   : > { %v2664_v41 = vmul.f32 1.442695, %v2648_v12  ;;  %8951 = vpow2.f32 %v2666_v26 }
 0x728   : > { %2921 = vrot.lane.b32.xlu1 %v9690_v39, %s9527_s28  ;;  %v11037_v26 = vpop.permute.xlu0 %2931 }
 0x729   : > { %8953 = vpow2.f32 %v2664_v41 }
 0x72a   : > { %3324 = vrot.lane.b32.xlu0 %v9763_v30, %s9528_s29 }
 0x72c   : > { %2891 = vrot.lane.b32.xlu1 %v9697_v42, %s9528_s29 }
 0x72e   : > { %3322 = vrot.lane.b32.xlu0 %v9777_v38, %s9528_s29 }
 0x730   : > { %2895 = vrot.lane.b32.xlu1 %v9707_v48, %s9528_s29 }
 0x732   : > { %3320 = vrot.lane.b32.xlu0 %v9789_v50, %s9528_s29 }
 0x734   : > { %2899 = vrot.lane.b32.xlu1 %v9799_v55, %s9528_s29  ;;  %v11003_v12 = vpop.eup %8951 }
 0x735   : > { %14261 = vst [vmem:[#allocation96_spill] sm:$0xff] %v11003_v12 }
 0x736   : > { %v11005_v41 = vpop.eup %8953  ;;  %3316 = vrot.lane.b32.xlu0 %v9813_v52, %s9528_s29 }
 0x737   : > { %14262 = vst [vmem:[#allocation97_spill] sm:$0xff] %v11005_v41  ;;  %v2744_v63 = vpack.c.bf16 %v11003_v12, %v11005_v41 }
 0x738   : > { %2903 = vrot.lane.b32.xlu1 %v9785_v44, %s9528_s29 }
 0x739   : > { %8099 = vmatprep.mubr.bf16.mxu0 %v2744_v63 }
 0x73a   : > { %3513 = vrot.lane.b32.xlu0 %v14167_v59, %s9529_s30 }
 0x73c   : > { %2907 = vrot.lane.b32.xlu1 %v9771_v32, %s9528_s29 }
 0x73e   : > { %3507 = vrot.lane.b32.xlu0 %v9724_v10, %s9529_s30 }
 0x740   : > { %2911 = vrot.lane.b32.xlu1 %v9757_v27, %s9528_s29 }
 0x742   : > { %3503 = vrot.lane.b32.xlu0 %v9731_v14, %s9529_s30 }
 0x744   : > { %2915 = vrot.lane.b32.xlu1 %v9718_v6, %s9528_s29 }
 0x746   : > { %3499 = vrot.lane.b32.xlu0 %v9746_v23, %s9529_s30 }
 0x748   : > { %2919 = vrot.lane.b32.xlu1 %v14167_v59, %s9528_s29 }
 0x74c   : > { %3326 = vrot.lane.b32.xlu1 %v14170_v5, %s9528_s29 }
 0x750   : > { %3318 = vrot.lane.b32.xlu1 %v14172_v57, %s9528_s29 }
 0x754   : > { %3314 = vrot.lane.b32.xlu1 %v14174_v56, %s9528_s29  ;;  %s13900_s29 = scalar_lea.vmem %s13996_s13, %s7301_s20 }
 0x757   : > { %v2623_v61 = vpop.xlane.xlu1 %2622 }
 0x758   : > { %v2651_v35 = vsub.f32 %v10903_v40, %v2623_v61  ;;  %3511 = vrot.lane.b32.xlu1 %v9741_v21, %s9529_s30 }
 0x759   : > { %v2625_v54 = vpop.xlane.xlu0 %2624 }
 0x75a   : > { %v2670_v63 = vmul.f32 1.442695, %v2651_v35  ;;  %v2652_v43 = vsub.f32 %v10905_v53, %v2625_v54 }
 0x75b   : > { %v2621_v41 = vpop.xlane.xlu1 %2620 }
 0x75c   : > { %v2650_v2 = vsub.f32 %v10908_v36, %v2621_v41  ;;  %3509 = vrot.lane.b32.xlu1 %v9718_v6, %s9529_s30  ;;  %8955 = vpow2.f32 %v2670_v63  ;;  %v2672_v12 = vmul.f32 1.442695, %v2652_v43 }
 0x75d   : > { %v2631_v9 = vpop.xlane.xlu0 %2630 }
 0x75e   : > { %v2668_v47 = vmul.f32 1.442695, %v2650_v2  ;;  %v2655_v40 = vsub.f32 %v10911_v60, %v2631_v9 }
 0x75f   : > { %v2627_v19 = vpop.xlane.xlu1 %2626 }
 0x760   : > { %8957 = vpow2.f32 %v2668_v47  ;;  %v2653_v61 = vsub.f32 %v10914_v11, %v2627_v19  ;;  %3505 = vrot.lane.b32.xlu1 %v9757_v27, %s9529_s30  ;;  %v2678_v54 = vmul.f32 1.442695, %v2655_v40 }
 0x761   : > { %v2629_v53 = vpop.xlane.xlu0 %2628  ;;  %8959 = vpow2.f32 %v2672_v12 }
 0x762   : > { %v2674_v35 = vmul.f32 1.442695, %v2653_v61  ;;  %v2654_v36 = vsub.f32 %v10917_v17, %v2629_v53 }
 0x763   : > { %v2633_v41 = vpop.xlane.xlu1 %2632 }
 0x764   : > { %8961 = vpow2.f32 %v2674_v35  ;;  %v2676_v2 = vmul.f32 1.442695, %v2654_v36  ;;  %v2656_v43 = vsub.f32 %v10920_v20, %v2633_v41  ;;  %3501 = vrot.lane.b32.xlu1 %v9771_v32, %s9529_s30 }
 0x765   : > { %v2635_v47 = vpop.xlane.xlu0 %2634 }
 0x766   : > { %8963 = vpow2.f32 %v2676_v2  ;;  %v2680_v19 = vmul.f32 1.442695, %v2656_v43  ;;  %v2657_v9 = vsub.f32 %v10923_v49, %v2635_v47 }
 0x767   : > { %v2637_v11 = vpop.xlane.xlu1 %2636  ;;  %8965 = vpow2.f32 %v2678_v54 }
 0x768   : > { %v2682_v60 = vmul.f32 1.442695, %v2657_v9  ;;  %v2658_v17 = vsub.f32 %v10926_v3, %v2637_v11  ;;  %3497 = vrot.lane.b32.xlu1 %v9785_v44, %s9529_s30  ;;  %8967 = vpow2.f32 %v2680_v19 }
 0x769   : > { %v2639_v12 = vpop.xlane.xlu0 %2638  ;;  %v11059_v40 = vpop.eup %8955 }
 0x76a   : > { %8969 = vpow2.f32 %v2682_v60  ;;  %v2659_v20 = vsub.f32 %v10929_v29, %v2639_v12  ;;  %14263 = vst [vmem:[#allocation98_spill] sm:$0xff] %v11059_v40  ;;  %v2684_v61 = vmul.f32 1.442695, %v2658_v17 }
 0x76b   : > { %v2641_v63 = vpop.xlane.xlu1 %2640 }
 0x76c   : > { %v2686_v53 = vmul.f32 1.442695, %v2659_v20  ;;  %v2660_v49 = vsub.f32 %v10932_v46, %v2641_v63  ;;  %3495 = vrot.lane.b32.xlu1 %v9761_v28, %s9529_s30 }
 0x76d   : > { %v11064_v35 = vpop.eup %8957  ;;  %v2643_v3 = vpop.xlane.xlu0 %2642 }
 0x76e   : > { %14264 = vst [vmem:[#allocation99_spill] sm:$0xff] %v11064_v35  ;;  %8971 = vpow2.f32 %v2686_v53  ;;  %v2688_v36 = vmul.f32 1.442695, %v2660_v49  ;;  %v2661_v41 = vsub.f32 %v10935_v51, %v2643_v3  ;;  %v2745_v29 = vpack.c.bf16 %v11059_v40, %v11064_v35  ;;  %v11069_v54 = vpop.eup %8959 }
 0x76f   : > { %14265 = vst [vmem:[#allocation100_spill] sm:$0xff] %v11069_v54  ;;  %8973 = vpow2.f32 %v2684_v61 }
 0x770   : > { %v2690_v2 = vmul.f32 1.442695, %v2661_v41  ;;  %8100 = vmatmul.mubr.bf16.vlgmr.msra.gmra.mxu0 %v2745_v29  ;;  %8975 = vpow2.f32 %v2688_v36  ;;  %v2926_v41 = vpop.permute.xlu1 %2925 }
 0x771   : > { %v11071_v43 = vpop.eup %8961  ;;  %8116 = vmatpush3.xpose.msk.msra.mxu0 %vm712_vm1, %v10857_v34  ;;  %v2647_v46 = vpop.xlane.xlu0 %2646 }
 0x772   : > { %14266 = vst [vmem:[#allocation101_spill] sm:$0xff] %v11071_v43  ;;  %8977 = vpow2.f32 %v2690_v2  ;;  %8117 = vmatprep.subr.msk.mxu0 %vm712_vm1, %v10946_v15  ;;  %v2746_v51 = vpack.c.bf16 %v11071_v43, %v11069_v54 }
 0x773   : > { %v11079_v47 = vpop.eup %8963 }
 0x774   : > { %14267 = vst [vmem:[#allocation102_spill] sm:$0xff] %v11079_v47  ;;  %8103 = vmatprep.mubr.bf16.mxu0 %v2746_v51  ;;  %v11081_v19 = vpop.eup %8965 }
 0x775   : > { %14268 = vst [vmem:[#allocation103_spill] sm:$0xff] %v11081_v19  ;;  %8118 = vmatpush3.xpose.msk.msra.mxu0 %vm712_vm1, %v10946_v15  ;;  %v2928_v9 = vpop.permute.xlu0 %2927  ;;  %v11085_v11 = vpop.eup %8967  ;;  %v2747_v34 = vpack.c.bf16 %v11081_v19, %v11079_v47 }
 0x776   : > { %14269 = vst [vmem:[#allocation104_spill] sm:$0xff] %v11085_v11  ;;  %8119 = vmatprep.subr.msk.mxu0 %vm712_vm1, %v10950_v25 }
 0x777   : > { %v11091_v60 = vpop.eup %8969 }
 0x778   : > { %14270 = vst [vmem:[#allocation105_spill] sm:$0xff] %v11091_v60  ;;  %8104 = vmatmul.mubr.bf16.gmra.mxu0 %v2747_v34  ;;  %v2748_v17 = vpack.c.bf16 %v11091_v60, %v11085_v11 }
 0x779   : > { %8120 = vmatpush3.xpose.msk.msra.mxu0 %vm712_vm1, %v10950_v25  ;;  %v2924_v12 = vpop.permute.xlu0 %2923 }
 0x77a   : > { %8121 = vmatprep.subr.msk.mxu0 %vm712_vm1, %v10964_v16  ;;  %8107 = vmatprep.mubr.bf16.mxu0 %v2748_v17 }
 0x77b   : > { %v11099_v15 = vpop.eup %8971 }
 0x77c   : > { %14271 = vst [vmem:[#allocation106_spill] sm:$0xff] %v11099_v15  ;;  %v11101_v20 = vpop.eup %8973 }
 0x77d   : > { %14272 = vst [vmem:[#allocation107_spill] sm:$0xff] %v11101_v20  ;;  %8122 = vmatpush3.xpose.msk.msra.mxu0 %vm712_vm1, %v10964_v16  ;;  %v2890_v63 = vpop.permute.xlu0 %2889  ;;  %v11105_v61 = vpop.eup %8975  ;;  %v2749_v25 = vpack.c.bf16 %v11099_v15, %v11101_v20 }
 0x77e   : > { %14273 = vst [vmem:[#allocation108_spill] sm:$0xff] %v11105_v61  ;;  %8123 = vmatprep.subr.msk.mxu0 %vm712_vm1, %v10956_v13 }
 0x77f   : > { %v11111_v53 = vpop.eup %8977 }
 0x780   : > { %14274 = vst [vmem:[#allocation109_spill] sm:$0xff] %v11111_v53  ;;  %8108 = vmatmul.mubr.bf16.gmra.mxu0 %v2749_v25  ;;  %v2750_v49 = vpack.c.bf16 %v11111_v53, %v11105_v61 }
 0x781   : > { %8124 = vmatpush3.xpose.msk.msra.mxu0 %vm712_vm1, %v10956_v13  ;;  %v2894_v3 = vpop.permute.xlu0 %2893 }
 0x782   : > { %8125 = vmatprep.subr.msk.mxu0 %vm712_vm1, %v10973_v0  ;;  %8111 = vmatprep.mubr.bf16.mxu0 %v2750_v49 }
 0x785   : > { %8126 = vmatpush3.xpose.msk.msra.mxu0 %vm712_vm1, %v10973_v0  ;;  %v2898_v16 = vpop.permute.xlu0 %2897 }
 0x786   : > { %8127 = vmatprep.subr.msk.mxu0 %vm712_vm1, %v10960_v31 }
 0x789   : > { %8128 = vmatpush3.xpose.msk.msra.mxu0 %vm712_vm1, %v10960_v31  ;;  %v2902_v36 = vpop.permute.xlu0 %2901 }
 0x78a   : > { %8129 = vmatprep.subr.msk.mxu0 %vm712_vm1, %v10981_v18 }
 0x78d   : > { %8130 = vmatpush3.xpose.msk.msra.mxu0 %vm712_vm1, %v10981_v18  ;;  %v2906_v13 = vpop.permute.xlu0 %2905 }
 0x78e   : > { %8131 = vmatprep.subr.msk.mxu0 %vm712_vm1, %v10971_v37 }
 0x791   : > { %8132 = vmatpush3.xpose.msk.msra.mxu0 %vm712_vm1, %v10971_v37  ;;  %v2910_v0 = vpop.permute.xlu0 %2909  ;;  %v2663_v37 = vsub.f32 %v10939_v8, %v2647_v46 }
 0x792   : > { %8133 = vmatprep.subr.msk.mxu0 %vm712_vm1, %v10977_v62 }
 0x795   : > { %8134 = vmatpush3.xpose.msk.msra.mxu0 %vm712_vm1, %v10977_v62  ;;  %v2914_v31 = vpop.permute.xlu0 %2913  ;;  %v2694_v62 = vmul.f32 1.442695, %v2663_v37 }
 0x796   : > { %8135 = vmatprep.subr.msk.mxu0 %vm712_vm1, %v11037_v26 }
 0x797   : > { %8979 = vpow2.f32 %v2694_v62 }
 0x799   : > { %8136 = vmatpush3.xpose.msk.msra.mxu0 %vm712_vm1, %v11037_v26  ;;  %v2918_v18 = vpop.permute.xlu0 %2917 }
 0x79a   : > { %8137 = vmatprep.subr.msk.mxu0 %vm712_vm1, %v11033_v1 }
 0x79d   : > { %8138 = vmatpush3.xpose.msk.msra.mxu0 %vm712_vm1, %v11033_v1  ;;  %v3329_v29 = vpop.permute.xlu0 %3328 }
 0x79e   : > { %8139 = vmatprep.subr.msk.mxu0 %vm712_vm1, %v2928_v9  ;;  %8171 = vmatprep.subr.bf16.mxu1 %v3329_v29 }
 0x79f   : > { %8172 = vmatpush3.bf16.msra.mxu1 %v3329_v29 }
 0x7a0   : > { %v2645_v2 = vpop.xlane.xlu1 %2644 }
 0x7a1   : > { %8140 = vmatpush3.xpose.msk.msra.mxu0 %vm712_vm1, %v2928_v9  ;;  %v2662_v26 = vsub.f32 %v10966_v58, %v2645_v2  ;;  %v3325_v29 = vpop.permute.xlu0 %3324 }
 0x7a2   : > { %8141 = vmatprep.subr.msk.mxu0 %vm712_vm1, %v2926_v41 }
 0x7a3   : > { %v2692_v51 = vmul.f32 1.442695, %v2662_v26 }
 0x7a4   : > { %v2922_v34 = vpop.permute.xlu1 %2921  ;;  %v11155_v58 = vpop.eup %8979 }
 0x7a5   : > { %8981 = vpow2.f32 %v2692_v51  ;;  %8142 = vmatpush3.xpose.msk.msra.mxu0 %vm712_vm1, %v2926_v41  ;;  %14275 = vst [vmem:[#allocation110_spill] sm:$0xff] %v11155_v58 }
 0x7a6   : > { %8143 = vmatprep.subr.msk.mxu0 %vm712_vm1, %v2924_v12 }
 0x7a8   : > { %v2892_v8 = vpop.permute.xlu1 %2891 }
 0x7a9   : > { %8144 = vmatpush3.xpose.msk.msra.mxu0 %vm712_vm1, %v2924_v12 }
 0x7aa   : > { %8145 = vmatprep.subr.msk.mxu0 %vm712_vm1, %v2922_v34 }
 0x7ac   : > { %v2896_v1 = vpop.permute.xlu1 %2895 }
 0x7ad   : > { %8146 = vmatpush3.xpose.msk.msra.mxu0 %vm712_vm1, %v2922_v34 }
 0x7b0   : > { %v2900_v46 = vpop.permute.xlu1 %2899 }
 0x7b2   : > { %v11157_v9 = vpop.eup %8981 }
 0x7b3   : > { %14276 = vst [vmem:[#allocation111_spill] sm:$0xff] %v11157_v9  ;;  %v2751_v17 = vpack.c.bf16 %v11155_v58, %v11157_v9 }
 0x7b4   : > { %v2904_v25 = vpop.permute.xlu1 %2903 }
 0x7b5   : > { %8112 = vmatmul.mubr.bf16.gmra.mxu0 %v2751_v17 }
 0x7b6   : > { %8147 = vmatprep.mubr.msk.f32.mxu0 %vm712_vm1, %v2890_v63  ;;  %v3323_v63 = vpop.permute.xlu0 %3322 }
 0x7b8   : > { %v2908_v49 = vpop.permute.xlu1 %2907 }
 0x7bc   : > { %v2912_v41 = vpop.permute.xlu1 %2911 }
 0x7bd   : > { %8148 = vmatmul.mubr.msk.f32.vlgmr.msra.gmra.mxu0 %vm712_vm1, %v2892_v8 }
 0x7be   : > { %8150 = vmatprep.mubr.msk.f32.mxu0 %vm712_vm1, %v2894_v3  ;;  %v3321_v3 = vpop.permute.xlu0 %3320 }
 0x7c0   : > { %v2916_v12 = vpop.permute.xlu1 %2915 }
 0x7c1   : > { %8151 = vmatmul.mubr.msk.f32.gmra.mxu0 %vm712_vm1, %v2896_v1 }
 0x7c2   : > { %8153 = vmatprep.mubr.msk.f32.mxu0 %vm712_vm1, %v2898_v16 }
 0x7c4   : > { %v2920_v37 = vpop.permute.xlu1 %2919 }
 0x7c5   : > { %8154 = vmatmul.mubr.msk.f32.gmra.mxu0 %vm712_vm1, %v2900_v46 }
 0x7c6   : > { %8156 = vmatprep.mubr.msk.f32.mxu0 %vm712_vm1, %v2902_v36  ;;  %v3317_v36 = vpop.permute.xlu0 %3316 }
 0x7c8   : > { %v3327_v62 = vpop.permute.xlu1 %3326 }
 0x7c9   : > { %8157 = vmatmul.mubr.msk.f32.gmra.mxu0 %vm712_vm1, %v2904_v25  ;;  %8173 = vmatprep.subr.bf16.mxu1 %v3327_v62 }
 0x7ca   : > { %8159 = vmatprep.mubr.msk.f32.mxu0 %vm712_vm1, %v2906_v13  ;;  %8174 = vmatpush3.bf16.msra.mxu1 %v3327_v62 }
 0x7cb   : > { %8175 = vmatprep.subr.bf16.mxu1 %v3325_v29 }
 0x7cc   : > { %v3319_v16 = vpop.permute.xlu1 %3318 }
 0x7cd   : > { %8160 = vmatmul.mubr.msk.f32.gmra.mxu0 %vm712_vm1, %v2908_v49 }
 0x7ce   : > { %8162 = vmatprep.mubr.msk.f32.mxu0 %vm712_vm1, %v2910_v0  ;;  %8176 = vmatpush3.bf16.msra.mxu1 %v3325_v29  ;;  %v11177_v0 = vpop.permute.xlu0 %3513 }
 0x7cf   : > { %8177 = vmatprep.subr.bf16.mxu1 %v3323_v63 }
 0x7d0   : > { %v3315_v13 = vpop.permute.xlu1 %3314 }
 0x7d1   : > { %8163 = vmatmul.mubr.msk.f32.gmra.mxu0 %vm712_vm1, %v2912_v41 }
 0x7d2   : > { %8165 = vmatprep.mubr.msk.f32.mxu0 %vm712_vm1, %v2914_v31  ;;  %8178 = vmatpush3.bf16.msra.mxu1 %v3323_v63 }
 0x7d3   : > { %8179 = vmatprep.subr.bf16.mxu1 %v3321_v3 }
 0x7d5   : > { %8166 = vmatmul.mubr.msk.f32.gmra.mxu0 %vm712_vm1, %v2916_v12 }
 0x7d6   : > { %8168 = vmatprep.mubr.msk.f32.mxu0 %vm712_vm1, %v2918_v18  ;;  %8180 = vmatpush3.bf16.msra.mxu1 %v3321_v3 }
 0x7d7   : > { %8181 = vmatprep.subr.bf16.mxu1 %v3319_v16 }
 0x7d9   : > { %8169 = vmatmul.mubr.msk.f32.gmra.mxu0 %vm712_vm1, %v2920_v37 }
 0x7da   : > { %8182 = vmatpush3.bf16.msra.mxu1 %v3319_v16 }
 0x7db   : > { %8183 = vmatprep.subr.bf16.mxu1 %v3317_v36 }
 0x7de   : > { %8184 = vmatpush3.bf16.msra.mxu1 %v3317_v36 }
 0x7df   : > { %8185 = vmatprep.subr.bf16.mxu1 %v3315_v13 }
 0x7e2   : > { %8186 = vmatpush3.bf16.msra.mxu1 %v3315_v13 }
 0x7e3   : > { %8203 = vmatprep.subr.msk.mxu1 %vm712_vm1, %v11177_v0 }
 0x830   : > { %v11181_v31 = vpop.f32.mrf.mxu0 }
 0x831   : > { %14277 = vst [vmem:[#allocation112_spill] sm:$0xff] %v11181_v31 }
 0x832   : > { %v11183_v2 = vpop.f32.mrf.mxu0 }
 0x833   : > { %14278 = vst [vmem:[#allocation113_spill] sm:$0xff] %v11183_v2 }
 0x834   : > { %v11185_v18 = vpop.f32.mrf.mxu0 }
 0x835   : > { %14279 = vst [vmem:[#allocation114_spill] sm:$0xff] %v11185_v18  ;;  %v11284_v18 = vpop.permute.xlu0 %3507 }
 0x836   : > { %v11187_v26 = vpop.f32.mrf.mxu0 }
 0x837   : > { %14280 = vst [vmem:[#allocation115_spill] sm:$0xff] %v11187_v26 }
 0x838   : > { %v11189_v51 = vpop.f32.mrf.mxu0 }
 0x839   : > { %14281 = vst [vmem:[#allocation116_spill] sm:$0xff] %v11189_v51  ;;  %v11293_v53 = vpop.permute.xlu0 %3503 }
 0x83a   : > { %v11191_v34 = vpop.f32.mrf.mxu0 }
 0x83b   : > { %14282 = vst [vmem:[#allocation117_spill] sm:$0xff] %v11191_v34 }
 0x83c   : > { %v11193_v8 = vpop.f32.mrf.mxu0 }
 0x83d   : > { %14283 = vst [vmem:[#allocation118_spill] sm:$0xff] %v11193_v8  ;;  %v11301_v61 = vpop.permute.xlu0 %3499 }
 0x83e   : > { %v11195_v1 = vpop.f32.mrf.mxu0 }
 0x83f   : > { %14284 = vst [vmem:[#allocation119_spill] sm:$0xff] %v11195_v1 }
 0x840   : > { %v11197_v46 = vpop.f32.mrf.mxu0 }
 0x841   : > { %14285 = vst [vmem:[#allocation120_spill] sm:$0xff] %v11197_v46 }
 0x842   : > { %v11199_v17 = vpop.f32.mrf.mxu0 }
 0x843   : > { %14286 = vst [vmem:[#allocation121_spill] sm:$0xff] %v11199_v17 }
 0x844   : > { %v11201_v25 = vpop.f32.mrf.mxu0 }
 0x845   : > { %14287 = vst [vmem:[#allocation122_spill] sm:$0xff] %v11201_v25 }
 0x846   : > { %v11203_v49 = vpop.f32.mrf.mxu0 }
 0x847   : > { %14288 = vst [vmem:[#allocation123_spill] sm:$0xff] %v11203_v49 }
 0x875   : > { %v11205_v41 = vpop.f32.mrf.mxu0 }
 0x876   : > { %14289 = vst [vmem:[#allocation124_spill] sm:$0xff] %v11205_v41 }
 0x877   : > { %v11207_v12 = vpop.f32.mrf.mxu0 }
 0x878   : > { %14290 = vst [vmem:[#allocation125_spill] sm:$0xff] %v11207_v12 }
 0x879   : > { %v11209_v37 = vpop.f32.mrf.mxu0 }
 0x87a   : > { %14291 = vst [vmem:[#allocation126_spill] sm:$0xff] %v11209_v37 }
 0x87b   : > { %v11211_v29 = vpop.f32.mrf.mxu0 }
 0x87c   : > { %14292 = vst [vmem:[#allocation127_spill] sm:$0xff] %v11211_v29 }
 0x87d   : > { %v8149_v62 = vpop.f32.mrf.mxu0 }
 0x87e   : > { %v11213_v63 = vmul.f32 0.35355338, %v8149_v62 }
 0x87f   : > { %v3083_v3 = vpop.f32.mrf.mxu0 }
 0x880   : > { %v11215_v16 = vmul.f32 0.35355338, %v3083_v3  ;;  %3180 = vmax.xlane.f32.xlu1 %v11213_v63 }
 0x881   : > { %v8152_v36 = vpop.f32.mrf.mxu0 }
 0x882   : > { %3178 = vmax.xlane.f32.xlu0 %v11215_v16  ;;  %v11223_v46 = vmul.f32 0.35355338, %v8152_v36 }
 0x883   : > { %v3093_v13 = vpop.f32.mrf.mxu0 }
 0x884   : > { %v11228_v17 = vmul.f32 0.35355338, %v3093_v13 }
 0x885   : > { %v8155_v12 = vpop.f32.mrf.mxu0 }
 0x886   : > { %v11234_v34 = vmul.f32 0.35355338, %v8155_v12 }
 0x887   : > { %v3103_v29 = vpop.f32.mrf.mxu0 }
 0x888   : > { %v11225_v25 = vmul.f32 0.35355338, %v3103_v29 }
 0x889   : > { %v8158_v41 = vpop.f32.mrf.mxu0 }
 0x88a   : > { %v11231_v1 = vmul.f32 0.35355338, %v8158_v41 }
 0x88b   : > { %v3113_v62 = vpop.f32.mrf.mxu0 }
 0x88c   : > { %v11237_v8 = vmul.f32 0.35355338, %v3113_v62 }
 0x88d   : > { %v8161_v37 = vpop.f32.mrf.mxu0 }
 0x88e   : > { %v11243_v51 = vmul.f32 0.35355338, %v8161_v37 }
 0x88f   : > { %v3123_v3 = vpop.f32.mrf.mxu0 }
 0x890   : > { %v11240_v29 = vmul.f32 0.35355338, %v3123_v3 }
 0x891   : > { %3491 = vrot.lane.b32.xlu1 %v9775_v33, %s9529_s30  ;;  %v8164_v49 = vpop.f32.mrf.mxu0 }
 0x892   : > { %v11249_v26 = vmul.f32 0.35355338, %v8164_v49  ;;  %v11266_v49 = vpop.permute.xlu1 %3511 }
 0x893   : > { %v3133_v36 = vpop.f32.mrf.mxu0 }
 0x894   : > { %v11246_v41 = vmul.f32 0.35355338, %v3133_v36 }
 0x895   : > { %v8167_v13 = vpop.f32.mrf.mxu0 }
 0x896   : > { %v11255_v3 = vmul.f32 0.35355338, %v8167_v13  ;;  %v11270_v13 = vpop.permute.xlu1 %3509 }
 0x897   : > { %v3143_v12 = vpop.f32.mrf.mxu0 }
 0x898   : > { %3493 = vrot.lane.b32.xlu0 %v9799_v55, %s9529_s30  ;;  %v11252_v62 = vmul.f32 0.35355338, %v3143_v12 }
 0x899   : > { %v8170_v37 = vpop.f32.mrf.mxu0 }
 0x89a   : > { %v11259_v36 = vmul.f32 0.35355338, %v8170_v37  ;;  %v11276_v12 = vpop.permute.xlu1 %3505 }
 0x89b   : > { %v3153_v2 = vpop.f32.mrf.mxu0 }
 0x89c   : > { %v11286_v31 = vmul.f32 0.35355338, %v3153_v2 }
 0x89e   : > { %v11280_v37 = vpop.permute.xlu1 %3501 }
 0x8a2   : > { %v11291_v58 = vpop.permute.xlu1 %3497 }
 0x8a6   : > { %v11297_v9 = vpop.permute.xlu1 %3495 }
 0x8b5   : > { %3184 = vmax.xlane.f32.xlu1 %v11223_v46 }
 0x8b7   : > { %3186 = vmax.xlane.f32.xlu0 %v11225_v25 }
 0x8b9   : > { %3182 = vmax.xlane.f32.xlu1 %v11228_v17 }
 0x8bb   : > { %3192 = vmax.xlane.f32.xlu0 %v11231_v1 }
 0x8bd   : > { %3188 = vmax.xlane.f32.xlu1 %v11234_v34 }
 0x8bf   : > { %3190 = vmax.xlane.f32.xlu0 %v11237_v8 }
 0x8c1   : > { %3194 = vmax.xlane.f32.xlu1 %v11240_v29 }
 0x8c3   : > { %3196 = vmax.xlane.f32.xlu0 %v11243_v51 }
 0x8c5   : > { %3198 = vmax.xlane.f32.xlu1 %v11246_v41 }
 0x8c7   : > { %3200 = vmax.xlane.f32.xlu0 %v11249_v26 }
 0x8c9   : > { %3202 = vmax.xlane.f32.xlu1 %v11252_v62 }
 0x8cb   : > { %3204 = vmax.xlane.f32.xlu0 %v11255_v3 }
 0x8cf   : > { %3208 = vmax.xlane.f32.xlu0 %v11259_v36 }
 0x8da   : > { %3487 = vrot.lane.b32.xlu1 %v9702_v45, %s9529_s30 }
 0x8e5   : > { %3489 = vrot.lane.b32.xlu0 %v9707_v48, %s9529_s30 }
 0x8e9   : > { %3485 = vrot.lane.b32.xlu0 %v9697_v42, %s9529_s30 }
 0x8ed   : > { %3451 = vrot.lane.b32.xlu0 %v9690_v39, %s9530_s14 }
 0x8f1   : > { %3455 = vrot.lane.b32.xlu0 %v9702_v45, %s9530_s14 }
 0x8f5   : > { %3459 = vrot.lane.b32.xlu0 %v9775_v33, %s9530_s14 }
 0x8f9   : > { %3463 = vrot.lane.b32.xlu0 %v9761_v28, %s9530_s14 }
 0x8fd   : > { %3467 = vrot.lane.b32.xlu0 %v9746_v23, %s9530_s14 }
 0x8fe   : > { %3206 = vmax.xlane.f32.xlu1 %v11286_v31 }
 0x901   : > { %3471 = vrot.lane.b32.xlu0 %v9731_v14, %s9530_s14 }
 0x905   : > { %3475 = vrot.lane.b32.xlu0 %v9724_v10, %s9530_s14 }
 0x909   : > { %3479 = vrot.lane.b32.xlu0 %v9741_v21, %s9530_s14  ;;  %v3181_v2 = vpop.xlane.xlu1 %3180 }
 0x90a   : > { %v3211_v15 = vsub.f32 %v11213_v63, %v3181_v2 }
 0x90b   : > { %v3179_v60 = vpop.xlane.xlu0 %3178 }
 0x90c   : > { %v3228_v20 = vmul.f32 1.442695, %v3211_v15  ;;  %v3210_v11 = vsub.f32 %v11215_v16, %v3179_v60 }
 0x90d   : > { %3890 = vrot.lane.b32.xlu0 %v9743_v22, %s9530_s14  ;;  %v11353_v15 = vpop.permute.xlu1 %3491 }
 0x90e   : > { %v3226_v47 = vmul.f32 1.442695, %v3210_v11  ;;  %8983 = vpow2.f32 %v3228_v20 }
 0x90f   : > { %3483 = vrot.lane.b32.xlu1 %v9690_v39, %s9529_s30  ;;  %v11357_v20 = vpop.permute.xlu0 %3493 }
 0x910   : > { %8985 = vpow2.f32 %v3226_v47 }
 0x911   : > { %3886 = vrot.lane.b32.xlu0 %v9763_v30, %s9530_s14 }
 0x913   : > { %3453 = vrot.lane.b32.xlu1 %v9697_v42, %s9530_s14 }
 0x915   : > { %3884 = vrot.lane.b32.xlu0 %v9777_v38, %s9530_s14 }
 0x917   : > { %3457 = vrot.lane.b32.xlu1 %v9707_v48, %s9530_s14 }
 0x919   : > { %3882 = vrot.lane.b32.xlu0 %v9789_v50, %s9530_s14 }
 0x91b   : > { %3461 = vrot.lane.b32.xlu1 %v9799_v55, %s9530_s14  ;;  %v11323_v11 = vpop.eup %8983 }
 0x91c   : > { %14293 = vst [vmem:[#allocation128_spill] sm:$0xff] %v11323_v11 }
 0x91d   : > { %v11325_v47 = vpop.eup %8985  ;;  %3878 = vrot.lane.b32.xlu0 %v9813_v52, %s9530_s14 }
 0x91e   : > { %14294 = vst [vmem:[#allocation129_spill] sm:$0xff] %v11325_v47  ;;  %v3306_v60 = vpack.c.bf16 %v11323_v11, %v11325_v47 }
 0x91f   : > { %3465 = vrot.lane.b32.xlu1 %v9785_v44, %s9530_s14 }
 0x920   : > { %8187 = vmatprep.mubr.bf16.mxu1 %v3306_v60 }
 0x921   : > { %4075 = vrot.lane.b32.xlu0 %v14167_v59, %s9531_s15 }
 0x923   : > { %3469 = vrot.lane.b32.xlu1 %v9771_v32, %s9530_s14 }
 0x925   : > { %4069 = vrot.lane.b32.xlu0 %v9724_v10, %s9531_s15 }
 0x927   : > { %3473 = vrot.lane.b32.xlu1 %v9757_v27, %s9530_s14 }
 0x929   : > { %4065 = vrot.lane.b32.xlu0 %v9731_v14, %s9531_s15 }
 0x92b   : > { %3477 = vrot.lane.b32.xlu1 %v9718_v6, %s9530_s14 }
 0x92d   : > { %4061 = vrot.lane.b32.xlu0 %v9746_v23, %s9531_s15 }
 0x92f   : > { %3481 = vrot.lane.b32.xlu1 %v14167_v59, %s9530_s14 }
 0x933   : > { %3888 = vrot.lane.b32.xlu1 %v14170_v5, %s9530_s14 }
 0x937   : > { %3880 = vrot.lane.b32.xlu1 %v14172_v57, %s9530_s14 }
 0x93b   : > { %3876 = vrot.lane.b32.xlu1 %v14174_v56, %s9530_s14 }
 0x93e   : > { %v3185_v63 = vpop.xlane.xlu1 %3184 }
 0x93f   : > { %v3213_v16 = vsub.f32 %v11223_v46, %v3185_v63  ;;  %4073 = vrot.lane.b32.xlu1 %v9741_v21, %s9531_s15 }
 0x940   : > { %v3187_v2 = vpop.xlane.xlu0 %3186 }
 0x941   : > { %v3232_v60 = vmul.f32 1.442695, %v3213_v16  ;;  %v3214_v54 = vsub.f32 %v11225_v25, %v3187_v2 }
 0x942   : > { %v3183_v47 = vpop.xlane.xlu1 %3182 }
 0x943   : > { %v3212_v35 = vsub.f32 %v11228_v17, %v3183_v47  ;;  %4071 = vrot.lane.b32.xlu1 %v9718_v6, %s9531_s15  ;;  %8987 = vpow2.f32 %v3232_v60  ;;  %v3234_v11 = vmul.f32 1.442695, %v3214_v54 }
 0x944   : > { %v3193_v19 = vpop.xlane.xlu0 %3192 }
 0x945   : > { %v3230_v43 = vmul.f32 1.442695, %v3212_v35  ;;  %v3217_v46 = vsub.f32 %v11231_v1, %v3193_v19 }
 0x946   : > { %v3189_v40 = vpop.xlane.xlu1 %3188 }
 0x947   : > { %8989 = vpow2.f32 %v3230_v43  ;;  %v3215_v63 = vsub.f32 %v11234_v34, %v3189_v40  ;;  %4067 = vrot.lane.b32.xlu1 %v9757_v27, %s9531_s15  ;;  %v3240_v2 = vmul.f32 1.442695, %v3217_v46 }
 0x948   : > { %v3191_v25 = vpop.xlane.xlu0 %3190  ;;  %8991 = vpow2.f32 %v3234_v11 }
 0x949   : > { %v3236_v16 = vmul.f32 1.442695, %v3215_v63  ;;  %v3216_v17 = vsub.f32 %v11237_v8, %v3191_v25 }
 0x94a   : > { %v3195_v47 = vpop.xlane.xlu1 %3194 }
 0x94b   : > { %8993 = vpow2.f32 %v3236_v16  ;;  %v3238_v35 = vmul.f32 1.442695, %v3216_v17  ;;  %v3218_v54 = vsub.f32 %v11240_v29, %v3195_v47  ;;  %4063 = vrot.lane.b32.xlu1 %v9771_v32, %s9531_s15 }
 0x94c   : > { %v3197_v43 = vpop.xlane.xlu0 %3196 }
 0x94d   : > { %8995 = vpow2.f32 %v3238_v35  ;;  %v3242_v40 = vmul.f32 1.442695, %v3218_v54  ;;  %v3219_v19 = vsub.f32 %v11243_v51, %v3197_v43 }
 0x94e   : > { %v3199_v34 = vpop.xlane.xlu1 %3198  ;;  %8997 = vpow2.f32 %v3240_v2 }
 0x94f   : > { %v3244_v1 = vmul.f32 1.442695, %v3219_v19  ;;  %v3220_v8 = vsub.f32 %v11246_v41, %v3199_v34  ;;  %4059 = vrot.lane.b32.xlu1 %v9785_v44, %s9531_s15  ;;  %8999 = vpow2.f32 %v3242_v40 }
 0x950   : > { %v3201_v11 = vpop.xlane.xlu0 %3200  ;;  %v11379_v46 = vpop.eup %8987 }
 0x951   : > { %9001 = vpow2.f32 %v3244_v1  ;;  %v3221_v29 = vsub.f32 %v11249_v26, %v3201_v11  ;;  %v3246_v63 = vmul.f32 1.442695, %v3220_v8 }
 0x952   : > { %v3203_v60 = vpop.xlane.xlu1 %3202 }
 0x953   : > { %v3248_v25 = vmul.f32 1.442695, %v3221_v29  ;;  %v3222_v51 = vsub.f32 %v11252_v62, %v3203_v60  ;;  %4057 = vrot.lane.b32.xlu1 %v9761_v28, %s9531_s15 }
 0x954   : > { %v11384_v16 = vpop.eup %8989  ;;  %v3205_v41 = vpop.xlane.xlu0 %3204 }
 0x955   : > { %14295 = vst [vmem:[#allocation130_spill] sm:$0xff] %v11384_v16  ;;  %9003 = vpow2.f32 %v3248_v25  ;;  %v3250_v17 = vmul.f32 1.442695, %v3222_v51  ;;  %v3223_v47 = vsub.f32 %v11255_v3, %v3205_v41  ;;  %v3307_v26 = vpack.c.bf16 %v11379_v46, %v11384_v16  ;;  %v11389_v2 = vpop.eup %8991 }
 0x956   : > { %14296 = vst [vmem:[#allocation131_spill] sm:$0xff] %v11389_v2  ;;  %9005 = vpow2.f32 %v3246_v63 }
 0x957   : > { %v3252_v35 = vmul.f32 1.442695, %v3223_v47  ;;  %8188 = vmatmul.mubr.bf16.vlgmr.msra.gmra.mxu1 %v3307_v26  ;;  %9007 = vpow2.f32 %v3250_v17  ;;  %v3488_v47 = vpop.permute.xlu1 %3487 }
 0x958   : > { %v11391_v54 = vpop.eup %8993  ;;  %8204 = vmatpush3.xpose.msk.msra.mxu1 %vm712_vm1, %v11177_v0  ;;  %v3209_v62 = vpop.xlane.xlu0 %3208 }
 0x959   : > { %14297 = vst [vmem:[#allocation132_spill] sm:$0xff] %v11391_v54  ;;  %9009 = vpow2.f32 %v3252_v35  ;;  %8205 = vmatprep.subr.msk.mxu1 %vm712_vm1, %v11266_v49  ;;  %v3308_v3 = vpack.c.bf16 %v11391_v54, %v11389_v2 }
 0x95a   : > { %v11399_v43 = vpop.eup %8995 }
 0x95b   : > { %14298 = vst [vmem:[#allocation133_spill] sm:$0xff] %v11399_v43  ;;  %8191 = vmatprep.mubr.bf16.mxu1 %v3308_v3  ;;  %v11401_v40 = vpop.eup %8997 }
 0x95c   : > { %14299 = vst [vmem:[#allocation134_spill] sm:$0xff] %v11401_v40  ;;  %8206 = vmatpush3.xpose.msk.msra.mxu1 %vm712_vm1, %v11266_v49  ;;  %v3490_v19 = vpop.permute.xlu0 %3489  ;;  %v11405_v34 = vpop.eup %8999  ;;  %v3309_v0 = vpack.c.bf16 %v11401_v40, %v11399_v43 }
 0x95d   : > { %14300 = vst [vmem:[#allocation135_spill] sm:$0xff] %v11405_v34  ;;  %8207 = vmatprep.subr.msk.mxu1 %vm712_vm1, %v11270_v13 }
 0x95e   : > { %v11411_v1 = vpop.eup %9001 }
 0x95f   : > { %14301 = vst [vmem:[#allocation136_spill] sm:$0xff] %v11411_v1  ;;  %8192 = vmatmul.mubr.bf16.gmra.mxu1 %v3309_v0  ;;  %v3310_v8 = vpack.c.bf16 %v11411_v1, %v11405_v34 }
 0x960   : > { %8208 = vmatpush3.xpose.msk.msra.mxu1 %vm712_vm1, %v11270_v13  ;;  %v3486_v11 = vpop.permute.xlu0 %3485 }
 0x961   : > { %8209 = vmatprep.subr.msk.mxu1 %vm712_vm1, %v11284_v18  ;;  %8195 = vmatprep.mubr.bf16.mxu1 %v3310_v8 }
 0x962   : > { %v11419_v49 = vpop.eup %9003 }
 0x963   : > { %14302 = vst [vmem:[#allocation137_spill] sm:$0xff] %v11419_v49  ;;  %v11421_v29 = vpop.eup %9005 }
 0x964   : > { %14303 = vst [vmem:[#allocation138_spill] sm:$0xff] %v11421_v29  ;;  %8210 = vmatpush3.xpose.msk.msra.mxu1 %vm712_vm1, %v11284_v18  ;;  %v3452_v60 = vpop.permute.xlu0 %3451  ;;  %v11425_v63 = vpop.eup %9007  ;;  %v3311_v13 = vpack.c.bf16 %v11419_v49, %v11421_v29 }
 0x965   : > { %14304 = vst [vmem:[#allocation139_spill] sm:$0xff] %v11425_v63  ;;  %8211 = vmatprep.subr.msk.mxu1 %vm712_vm1, %v11276_v12 }
 0x966   : > { %v11431_v25 = vpop.eup %9009 }
 0x967   : > { %14305 = vst [vmem:[#allocation140_spill] sm:$0xff] %v11431_v25  ;;  %8196 = vmatmul.mubr.bf16.gmra.mxu1 %v3311_v13  ;;  %v3312_v51 = vpack.c.bf16 %v11431_v25, %v11425_v63 }
 0x968   : > { %8212 = vmatpush3.xpose.msk.msra.mxu1 %vm712_vm1, %v11276_v12  ;;  %v3456_v41 = vpop.permute.xlu0 %3455 }
 0x969   : > { %8213 = vmatprep.subr.msk.mxu1 %vm712_vm1, %v11293_v53  ;;  %8199 = vmatprep.mubr.bf16.mxu1 %v3312_v51 }
 0x96c   : > { %8214 = vmatpush3.xpose.msk.msra.mxu1 %vm712_vm1, %v11293_v53  ;;  %v3460_v18 = vpop.permute.xlu0 %3459 }
 0x96d   : > { %8215 = vmatprep.subr.msk.mxu1 %vm712_vm1, %v11280_v37 }
 0x970   : > { %8216 = vmatpush3.xpose.msk.msra.mxu1 %vm712_vm1, %v11280_v37  ;;  %v3464_v17 = vpop.permute.xlu0 %3463 }
 0x971   : > { %8217 = vmatprep.subr.msk.mxu1 %vm712_vm1, %v11301_v61 }
 0x974   : > { %8218 = vmatpush3.xpose.msk.msra.mxu1 %vm712_vm1, %v11301_v61  ;;  %v3468_v12 = vpop.permute.xlu0 %3467 }
 0x975   : > { %8219 = vmatprep.subr.msk.mxu1 %vm712_vm1, %v11291_v58 }
 0x978   : > { %8220 = vmatpush3.xpose.msk.msra.mxu1 %vm712_vm1, %v11291_v58  ;;  %v3472_v53 = vpop.permute.xlu0 %3471  ;;  %v3225_v58 = vsub.f32 %v11259_v36, %v3209_v62 }
 0x979   : > { %8221 = vmatprep.subr.msk.mxu1 %vm712_vm1, %v11297_v9 }
 0x97c   : > { %8222 = vmatpush3.xpose.msk.msra.mxu1 %vm712_vm1, %v11297_v9  ;;  %v3476_v37 = vpop.permute.xlu0 %3475  ;;  %v3256_v9 = vmul.f32 1.442695, %v3225_v58 }
 0x97d   : > { %8223 = vmatprep.subr.msk.mxu1 %vm712_vm1, %v11357_v20 }
 0x97e   : > { %9011 = vpow2.f32 %v3256_v9 }
 0x980   : > { %8224 = vmatpush3.xpose.msk.msra.mxu1 %vm712_vm1, %v11357_v20  ;;  %v3480_v61 = vpop.permute.xlu0 %3479 }
 0x981   : > { %8225 = vmatprep.subr.msk.mxu1 %vm712_vm1, %v11353_v15 }
 0x984   : > { %8226 = vmatpush3.xpose.msk.msra.mxu1 %vm712_vm1, %v11353_v15  ;;  %v3891_v26 = vpop.permute.xlu0 %3890 }
 0x985   : > { %8227 = vmatprep.subr.msk.mxu1 %vm712_vm1, %v3490_v19  ;;  %8259 = vmatprep.subr.bf16.mxu0 %v3891_v26 }
 0x986   : > { %8260 = vmatpush3.bf16.msra.mxu0 %v3891_v26 }
 0x987   : > { %v3207_v35 = vpop.xlane.xlu1 %3206 }
 0x988   : > { %8228 = vmatpush3.xpose.msk.msra.mxu1 %vm712_vm1, %v3490_v19  ;;  %v3224_v20 = vsub.f32 %v11286_v31, %v3207_v35  ;;  %v3887_v26 = vpop.permute.xlu0 %3886 }
 0x989   : > { %8229 = vmatprep.subr.msk.mxu1 %vm712_vm1, %v3488_v47 }
 0x98a   : > { %v3254_v3 = vmul.f32 1.442695, %v3224_v20 }
 0x98b   : > { %v3484_v0 = vpop.permute.xlu1 %3483  ;;  %v11475_v31 = vpop.eup %9011 }
 0x98c   : > { %9013 = vpow2.f32 %v3254_v3  ;;  %8230 = vmatpush3.xpose.msk.msra.mxu1 %vm712_vm1, %v3488_v47  ;;  %14306 = vst [vmem:[#allocation141_spill] sm:$0xff] %v11475_v31 }
 0x98d   : > { %8231 = vmatprep.subr.msk.mxu1 %vm712_vm1, %v3486_v11 }
 0x98f   : > { %v3454_v36 = vpop.permute.xlu1 %3453 }
 0x990   : > { %8232 = vmatpush3.xpose.msk.msra.mxu1 %vm712_vm1, %v3486_v11 }
 0x991   : > { %8233 = vmatprep.subr.msk.mxu1 %vm712_vm1, %v3484_v0 }
 0x993   : > { %v3458_v15 = vpop.permute.xlu1 %3457 }
 0x994   : > { %8234 = vmatpush3.xpose.msk.msra.mxu1 %vm712_vm1, %v3484_v0 }
 0x997   : > { %v3462_v62 = vpop.permute.xlu1 %3461 }
 0x999   : > { %v11477_v19 = vpop.eup %9013 }
 0x99a   : > { %14307 = vst [vmem:[#allocation142_spill] sm:$0xff] %v11477_v19  ;;  %v3313_v8 = vpack.c.bf16 %v11475_v31, %v11477_v19 }
 0x99b   : > { %v3466_v13 = vpop.permute.xlu1 %3465 }
 0x99c   : > { %8200 = vmatmul.mubr.bf16.gmra.mxu1 %v3313_v8 }
 0x99d   : > { %8235 = vmatprep.mubr.msk.f32.mxu1 %vm712_vm1, %v3452_v60  ;;  %v3885_v60 = vpop.permute.xlu0 %3884 }
 0x99f   : > { %v3470_v51 = vpop.permute.xlu1 %3469 }
 0x9a3   : > { %v3474_v47 = vpop.permute.xlu1 %3473 }
 0x9a4   : > { %8236 = vmatmul.mubr.msk.f32.vlgmr.msra.gmra.mxu1 %vm712_vm1, %v3454_v36 }
 0x9a5   : > { %8238 = vmatprep.mubr.msk.f32.mxu1 %vm712_vm1, %v3456_v41  ;;  %v3883_v41 = vpop.permute.xlu0 %3882 }
 0x9a7   : > { %v3478_v11 = vpop.permute.xlu1 %3477 }
 0x9a8   : > { %8239 = vmatmul.mubr.msk.f32.gmra.mxu1 %vm712_vm1, %v3458_v15 }
 0x9a9   : > { %8241 = vmatprep.mubr.msk.f32.mxu1 %vm712_vm1, %v3460_v18 }
 0x9ab   : > { %v3482_v58 = vpop.permute.xlu1 %3481 }
 0x9ac   : > { %8242 = vmatmul.mubr.msk.f32.gmra.mxu1 %vm712_vm1, %v3462_v62 }
 0x9ad   : > { %8244 = vmatprep.mubr.msk.f32.mxu1 %vm712_vm1, %v3464_v17  ;;  %v3879_v17 = vpop.permute.xlu0 %3878 }
 0x9af   : > { %v3889_v9 = vpop.permute.xlu1 %3888 }
 0x9b0   : > { %8245 = vmatmul.mubr.msk.f32.gmra.mxu1 %vm712_vm1, %v3466_v13  ;;  %8261 = vmatprep.subr.bf16.mxu0 %v3889_v9 }
 0x9b1   : > { %8247 = vmatprep.mubr.msk.f32.mxu1 %vm712_vm1, %v3468_v12  ;;  %8262 = vmatpush3.bf16.msra.mxu0 %v3889_v9 }
 0x9b2   : > { %8263 = vmatprep.subr.bf16.mxu0 %v3887_v26 }
 0x9b3   : > { %v3881_v18 = vpop.permute.xlu1 %3880 }
 0x9b4   : > { %8248 = vmatmul.mubr.msk.f32.gmra.mxu1 %vm712_vm1, %v3470_v51 }
 0x9b5   : > { %8250 = vmatprep.mubr.msk.f32.mxu1 %vm712_vm1, %v3472_v53  ;;  %8264 = vmatpush3.bf16.msra.mxu0 %v3887_v26  ;;  %v11497_v53 = vpop.permute.xlu0 %4075 }
 0x9b6   : > { %8265 = vmatprep.subr.bf16.mxu0 %v3885_v60 }
 0x9b7   : > { %v3877_v12 = vpop.permute.xlu1 %3876 }
 0x9b8   : > { %8251 = vmatmul.mubr.msk.f32.gmra.mxu1 %vm712_vm1, %v3474_v47 }
 0x9b9   : > { %8253 = vmatprep.mubr.msk.f32.mxu1 %vm712_vm1, %v3476_v37  ;;  %8266 = vmatpush3.bf16.msra.mxu0 %v3885_v60 }
 0x9ba   : > { %8267 = vmatprep.subr.bf16.mxu0 %v3883_v41 }
 0x9bc   : > { %8254 = vmatmul.mubr.msk.f32.gmra.mxu1 %vm712_vm1, %v3478_v11 }
 0x9bd   : > { %8256 = vmatprep.mubr.msk.f32.mxu1 %vm712_vm1, %v3480_v61  ;;  %8268 = vmatpush3.bf16.msra.mxu0 %v3883_v41 }
 0x9be   : > { %8269 = vmatprep.subr.bf16.mxu0 %v3881_v18 }
 0x9c0   : > { %8257 = vmatmul.mubr.msk.f32.gmra.mxu1 %vm712_vm1, %v3482_v58 }
 0x9c1   : > { %8270 = vmatpush3.bf16.msra.mxu0 %v3881_v18 }
 0x9c2   : > { %8271 = vmatprep.subr.bf16.mxu0 %v3879_v17 }
 0x9c5   : > { %8272 = vmatpush3.bf16.msra.mxu0 %v3879_v17 }
 0x9c6   : > { %8273 = vmatprep.subr.bf16.mxu0 %v3877_v12 }
 0x9c9   : > { %8274 = vmatpush3.bf16.msra.mxu0 %v3877_v12 }
 0x9ca   : > { %8291 = vmatprep.subr.msk.mxu0 %vm712_vm1, %v11497_v53 }
 0xa17   : > { %v11501_v37 = vpop.f32.mrf.mxu1 }
 0xa18   : > { %14308 = vst [vmem:[#allocation143_spill] sm:$0xff] %v11501_v37  ;;  %v11608_v37 = vpop.permute.xlu0 %4069 }
 0xa19   : > { %v11503_v35 = vpop.f32.mrf.mxu1 }
 0xa1a   : > { %14309 = vst [vmem:[#allocation144_spill] sm:$0xff] %v11503_v35 }
 0xa1b   : > { %v11505_v61 = vpop.f32.mrf.mxu1 }
 0xa1c   : > { %14310 = vst [vmem:[#allocation145_spill] sm:$0xff] %v11505_v61  ;;  %v11614_v35 = vpop.permute.xlu0 %4065 }
 0xa1d   : > { %v11507_v20 = vpop.f32.mrf.mxu1 }
 0xa1e   : > { %14311 = vst [vmem:[#allocation146_spill] sm:$0xff] %v11507_v20 }
 0xa1f   : > { %v11509_v3 = vpop.f32.mrf.mxu1 }
 0xa20   : > { %14312 = vst [vmem:[#allocation147_spill] sm:$0xff] %v11509_v3  ;;  %v11625_v63 = vpop.permute.xlu0 %4061 }
 0xa21   : > { %v11511_v0 = vpop.f32.mrf.mxu1 }
 0xa22   : > { %14313 = vst [vmem:[#allocation148_spill] sm:$0xff] %v11511_v0 }
 0xa23   : > { %v11513_v36 = vpop.f32.mrf.mxu1 }
 0xa24   : > { %14314 = vst [vmem:[#allocation149_spill] sm:$0xff] %v11513_v36 }
 0xa25   : > { %v11515_v15 = vpop.f32.mrf.mxu1 }
 0xa26   : > { %14315 = vst [vmem:[#allocation150_spill] sm:$0xff] %v11515_v15 }
 0xa27   : > { %v11517_v62 = vpop.f32.mrf.mxu1 }
 0xa28   : > { %14316 = vst [vmem:[#allocation151_spill] sm:$0xff] %v11517_v62 }
 0xa29   : > { %v11519_v8 = vpop.f32.mrf.mxu1 }
 0xa2a   : > { %14317 = vst [vmem:[#allocation152_spill] sm:$0xff] %v11519_v8 }
 0xa2b   : > { %v11521_v13 = vpop.f32.mrf.mxu1 }
 0xa2c   : > { %14318 = vst [vmem:[#allocation153_spill] sm:$0xff] %v11521_v13 }
 0xa2d   : > { %v11523_v51 = vpop.f32.mrf.mxu1 }
 0xa2e   : > { %14319 = vst [vmem:[#allocation154_spill] sm:$0xff] %v11523_v51 }
 0xa5c   : > { %v11525_v47 = vpop.f32.mrf.mxu1 }
 0xa5d   : > { %14320 = vst [vmem:[#allocation155_spill] sm:$0xff] %v11525_v47 }
 0xa5e   : > { %v11527_v11 = vpop.f32.mrf.mxu1 }
 0xa5f   : > { %14321 = vst [vmem:[#allocation156_spill] sm:$0xff] %v11527_v11 }
 0xa60   : > { %v11529_v58 = vpop.f32.mrf.mxu1 }
 0xa61   : > { %14322 = vst [vmem:[#allocation157_spill] sm:$0xff] %v11529_v58 }
 0xa62   : > { %v11531_v26 = vpop.f32.mrf.mxu1 }
 0xa63   : > { %14323 = vst [vmem:[#allocation158_spill] sm:$0xff] %v11531_v26 }
 0xa64   : > { %v8237_v9 = vpop.f32.mrf.mxu1 }
 0xa65   : > { %v11533_v60 = vmul.f32 0.35355338, %v8237_v9 }
 0xa66   : > { %v3645_v41 = vpop.f32.mrf.mxu1 }
 0xa67   : > { %v11535_v18 = vmul.f32 0.35355338, %v3645_v41  ;;  %3742 = vmax.xlane.f32.xlu1 %v11533_v60 }
 0xa68   : > { %v8240_v17 = vpop.f32.mrf.mxu1 }
 0xa69   : > { %3740 = vmax.xlane.f32.xlu0 %v11535_v18  ;;  %v11543_v8 = vmul.f32 0.35355338, %v8240_v17 }
 0xa6a   : > { %v3655_v12 = vpop.f32.mrf.mxu1 }
 0xa6b   : > { %v11548_v13 = vmul.f32 0.35355338, %v3655_v12 }
 0xa6c   : > { %v8243_v11 = vpop.f32.mrf.mxu1 }
 0xa6d   : > { %v11554_v3 = vmul.f32 0.35355338, %v8243_v11 }
 0xa6e   : > { %v3665_v26 = vpop.f32.mrf.mxu1 }
 0xa6f   : > { %v11545_v51 = vmul.f32 0.35355338, %v3665_v26 }
 0xa70   : > { %v8246_v47 = vpop.f32.mrf.mxu1 }
 0xa71   : > { %v11551_v36 = vmul.f32 0.35355338, %v8246_v47 }
 0xa72   : > { %v3675_v9 = vpop.f32.mrf.mxu1 }
 0xa73   : > { %v11557_v15 = vmul.f32 0.35355338, %v3675_v9 }
 0xa74   : > { %v8249_v58 = vpop.f32.mrf.mxu1 }
 0xa75   : > { %v11563_v0 = vmul.f32 0.35355338, %v8249_v58 }
 0xa76   : > { %v3685_v41 = vpop.f32.mrf.mxu1 }
 0xa77   : > { %v11560_v26 = vmul.f32 0.35355338, %v3685_v41 }
 0xa78   : > { %4053 = vrot.lane.b32.xlu1 %v9775_v33, %s9531_s15  ;;  %v8252_v62 = vpop.f32.mrf.mxu1 }
 0xa79   : > { %v11569_v61 = vmul.f32 0.35355338, %v8252_v62  ;;  %v11590_v62 = vpop.permute.xlu1 %4073 }
 0xa7a   : > { %v3695_v17 = vpop.f32.mrf.mxu1 }
 0xa7b   : > { %v11566_v47 = vmul.f32 0.35355338, %v3695_v17 }
 0xa7c   : > { %v8255_v12 = vpop.f32.mrf.mxu1 }
 0xa7d   : > { %v11575_v41 = vmul.f32 0.35355338, %v8255_v12  ;;  %v11594_v12 = vpop.permute.xlu1 %4071 }
 0xa7e   : > { %v3705_v11 = vpop.f32.mrf.mxu1 }
 0xa7f   : > { %4055 = vrot.lane.b32.xlu0 %v9799_v55, %s9531_s15  ;;  %v11572_v9 = vmul.f32 0.35355338, %v3705_v11 }
 0xa80   : > { %v8258_v58 = vpop.f32.mrf.mxu1 }
 0xa81   : > { %v11579_v17 = vmul.f32 0.35355338, %v8258_v58  ;;  %v11600_v11 = vpop.permute.xlu1 %4067 }
 0xa82   : > { %v3715_v31 = vpop.f32.mrf.mxu1 }
 0xa83   : > { %v11618_v25 = vmul.f32 0.35355338, %v3715_v31 }
 0xa85   : > { %v11604_v58 = vpop.permute.xlu1 %4063 }
 0xa89   : > { %v11612_v20 = vpop.permute.xlu1 %4059 }
 0xa8d   : > { %v11620_v19 = vpop.permute.xlu1 %4057 }
 0xa9c   : > { %3746 = vmax.xlane.f32.xlu1 %v11543_v8 }
 0xa9e   : > { %3748 = vmax.xlane.f32.xlu0 %v11545_v51 }
 0xaa0   : > { %3744 = vmax.xlane.f32.xlu1 %v11548_v13 }
 0xaa2   : > { %3754 = vmax.xlane.f32.xlu0 %v11551_v36 }
 0xaa4   : > { %3750 = vmax.xlane.f32.xlu1 %v11554_v3 }
 0xaa6   : > { %3752 = vmax.xlane.f32.xlu0 %v11557_v15 }
 0xaa8   : > { %3756 = vmax.xlane.f32.xlu1 %v11560_v26 }
 0xaaa   : > { %3758 = vmax.xlane.f32.xlu0 %v11563_v0 }
 0xaac   : > { %3760 = vmax.xlane.f32.xlu1 %v11566_v47 }
 0xaae   : > { %3762 = vmax.xlane.f32.xlu0 %v11569_v61 }
 0xab0   : > { %3764 = vmax.xlane.f32.xlu1 %v11572_v9 }
 0xab2   : > { %3766 = vmax.xlane.f32.xlu0 %v11575_v41 }
 0xab6   : > { %3770 = vmax.xlane.f32.xlu0 %v11579_v17 }
 0xac1   : > { %4049 = vrot.lane.b32.xlu1 %v9702_v45, %s9531_s15 }
 0xac5   : > { %4045 = vrot.lane.b32.xlu1 %v9690_v39, %s9531_s15 }
 0xac9   : > { %4015 = vrot.lane.b32.xlu1 %v9697_v42, %s9532_s16 }
 0xacc   : > { %4051 = vrot.lane.b32.xlu0 %v9707_v48, %s9531_s15 }
 0xad0   : > { %4047 = vrot.lane.b32.xlu0 %v9697_v42, %s9531_s15 }
 0xad4   : > { %4013 = vrot.lane.b32.xlu0 %v9690_v39, %s9532_s16 }
 0xad8   : > { %4017 = vrot.lane.b32.xlu0 %v9702_v45, %s9532_s16 }
 0xadc   : > { %4021 = vrot.lane.b32.xlu0 %v9775_v33, %s9532_s16 }
 0xae0   : > { %4025 = vrot.lane.b32.xlu0 %v9761_v28, %s9532_s16 }
 0xae4   : > { %4029 = vrot.lane.b32.xlu0 %v9746_v23, %s9532_s16 }
 0xae8   : > { %4033 = vrot.lane.b32.xlu0 %v9731_v14, %s9532_s16 }
 0xaec   : > { %4037 = vrot.lane.b32.xlu0 %v9724_v10, %s9532_s16 }
 0xaed   : > { %3768 = vmax.xlane.f32.xlu1 %v11618_v25 }
 0xaf0   : > { %4041 = vrot.lane.b32.xlu0 %v9741_v21, %s9532_s16  ;;  %v3743_v29 = vpop.xlane.xlu1 %3742 }
 0xaf1   : > { %v3773_v49 = vsub.f32 %v11533_v60, %v3743_v29 }
 0xaf2   : > { %v3741_v1 = vpop.xlane.xlu0 %3740 }
 0xaf3   : > { %v3790_v34 = vmul.f32 1.442695, %v3773_v49  ;;  %v3772_v31 = vsub.f32 %v11535_v18, %v3741_v1 }
 0xaf4   : > { %4452 = vrot.lane.b32.xlu0 %v9743_v22, %s9532_s16 }
 0xaf5   : > { %v3788_v43 = vmul.f32 1.442695, %v3772_v31  ;;  %9015 = vpow2.f32 %v3790_v34  ;;  %v11679_v34 = vpop.permute.xlu1 %4053 }
 0xaf6   : > { %v11683_v29 = vpop.permute.xlu0 %4055 }
 0xaf7   : > { %9017 = vpow2.f32 %v3788_v43 }
 0xaf8   : > { %4448 = vrot.lane.b32.xlu0 %v9763_v30, %s9532_s16 }
 0xafc   : > { %4446 = vrot.lane.b32.xlu0 %v9777_v38, %s9532_s16 }
 0xafe   : > { %4019 = vrot.lane.b32.xlu1 %v9707_v48, %s9532_s16 }
 0xb00   : > { %4444 = vrot.lane.b32.xlu0 %v9789_v50, %s9532_s16 }
 0xb02   : > { %4023 = vrot.lane.b32.xlu1 %v9799_v55, %s9532_s16  ;;  %v11643_v1 = vpop.eup %9015 }
 0xb03   : > { %14324 = vst [vmem:[#allocation159_spill] sm:$0xff] %v11643_v1 }
 0xb04   : > { %v11645_v49 = vpop.eup %9017  ;;  %4440 = vrot.lane.b32.xlu0 %v9813_v52, %s9532_s16 }
 0xb05   : > { %14325 = vst [vmem:[#allocation160_spill] sm:$0xff] %v11645_v49  ;;  %v3868_v43 = vpack.c.bf16 %v11643_v1, %v11645_v49 }
 0xb06   : > { %4027 = vrot.lane.b32.xlu1 %v9785_v44, %s9532_s16 }
 0xb07   : > { %8275 = vmatprep.mubr.bf16.mxu0 %v3868_v43 }
 0xb08   : > { %4637 = vrot.lane.b32.xlu0 %v14167_v59, %s9533_s17 }
 0xb0a   : > { %4031 = vrot.lane.b32.xlu1 %v9771_v32, %s9532_s16 }
 0xb0c   : > { %4631 = vrot.lane.b32.xlu0 %v9724_v10, %s9533_s17 }
 0xb0e   : > { %4035 = vrot.lane.b32.xlu1 %v9757_v27, %s9532_s16 }
 0xb10   : > { %4627 = vrot.lane.b32.xlu0 %v9731_v14, %s9533_s17 }
 0xb12   : > { %4039 = vrot.lane.b32.xlu1 %v9718_v6, %s9532_s16 }
 0xb14   : > { %4623 = vrot.lane.b32.xlu0 %v9746_v23, %s9533_s17 }
 0xb16   : > { %4043 = vrot.lane.b32.xlu1 %v14167_v59, %s9532_s16 }
 0xb18   : > { %4617 = vrot.lane.b32.xlu0 %v9799_v55, %s9533_s17 }
 0xb1a   : > { %4450 = vrot.lane.b32.xlu1 %v14170_v5, %s9532_s16 }
 0xb1c   : > { %4613 = vrot.lane.b32.xlu0 %v9707_v48, %s9533_s17 }
 0xb1e   : > { %4442 = vrot.lane.b32.xlu1 %v14172_v57, %s9532_s16 }
 0xb20   : > { %4609 = vrot.lane.b32.xlu0 %v9697_v42, %s9533_s17 }
 0xb22   : > { %4438 = vrot.lane.b32.xlu1 %v14174_v56, %s9532_s16 }
 0xb24   : > { %4575 = vrot.lane.b32.xlu0 %v9690_v39, %s9534_s19 }
 0xb25   : > { %v3747_v60 = vpop.xlane.xlu1 %3746 }
 0xb26   : > { %v3775_v18 = vsub.f32 %v11543_v8, %v3747_v60  ;;  %4635 = vrot.lane.b32.xlu1 %v9741_v21, %s9533_s17 }
 0xb27   : > { %v3749_v31 = vpop.xlane.xlu0 %3748 }
 0xb28   : > { %4579 = vrot.lane.b32.xlu0 %v9702_v45, %s9534_s19  ;;  %v3794_v43 = vmul.f32 1.442695, %v3775_v18  ;;  %v3776_v49 = vsub.f32 %v11545_v51, %v3749_v31 }
 0xb29   : > { %v3745_v2 = vpop.xlane.xlu1 %3744 }
 0xb2a   : > { %v3774_v16 = vsub.f32 %v11548_v13, %v3745_v2  ;;  %4633 = vrot.lane.b32.xlu1 %v9718_v6, %s9533_s17  ;;  %9019 = vpow2.f32 %v3794_v43  ;;  %v3796_v8 = vmul.f32 1.442695, %v3776_v49 }
 0xb2b   : > { %v3755_v1 = vpop.xlane.xlu0 %3754 }
 0xb2c   : > { %v3792_v40 = vmul.f32 1.442695, %v3774_v16  ;;  %4583 = vrot.lane.b32.xlu0 %v9775_v33, %s9534_s19  ;;  %v3779_v54 = vsub.f32 %v11551_v36, %v3755_v1 }
 0xb2d   : > { %v3751_v60 = vpop.xlane.xlu1 %3750 }
 0xb2e   : > { %9021 = vpow2.f32 %v3792_v40  ;;  %v3777_v18 = vsub.f32 %v11554_v3, %v3751_v60  ;;  %4629 = vrot.lane.b32.xlu1 %v9757_v27, %s9533_s17  ;;  %v3802_v31 = vmul.f32 1.442695, %v3779_v54 }
 0xb2f   : > { %v3753_v2 = vpop.xlane.xlu0 %3752  ;;  %9023 = vpow2.f32 %v3796_v8 }
 0xb30   : > { %v3798_v13 = vmul.f32 1.442695, %v3777_v18  ;;  %v3778_v51 = vsub.f32 %v11557_v15, %v3753_v2  ;;  %4587 = vrot.lane.b32.xlu0 %v9761_v28, %s9534_s19 }
 0xb31   : > { %v3757_v16 = vpop.xlane.xlu1 %3756 }
 0xb32   : > { %9025 = vpow2.f32 %v3798_v13  ;;  %v3800_v49 = vmul.f32 1.442695, %v3778_v51  ;;  %v3780_v40 = vsub.f32 %v11560_v26, %v3757_v16  ;;  %4625 = vrot.lane.b32.xlu1 %v9771_v32, %s9533_s17 }
 0xb33   : > { %v3759_v3 = vpop.xlane.xlu0 %3758 }
 0xb34   : > { %9027 = vpow2.f32 %v3800_v49  ;;  %v3804_v36 = vmul.f32 1.442695, %v3780_v40  ;;  %v3781_v1 = vsub.f32 %v11563_v0, %v3759_v3  ;;  %4591 = vrot.lane.b32.xlu0 %v9746_v23, %s9534_s19 }
 0xb35   : > { %v3761_v15 = vpop.xlane.xlu1 %3760  ;;  %9029 = vpow2.f32 %v3802_v31 }
 0xb36   : > { %v3806_v43 = vmul.f32 1.442695, %v3781_v1  ;;  %v3782_v54 = vsub.f32 %v11566_v47, %v3761_v15  ;;  %4621 = vrot.lane.b32.xlu1 %v9785_v44, %s9533_s17  ;;  %9031 = vpow2.f32 %v3804_v36 }
 0xb37   : > { %v3763_v26 = vpop.xlane.xlu0 %3762  ;;  %v11717_v60 = vpop.eup %9019 }
 0xb38   : > { %9033 = vpow2.f32 %v3806_v43  ;;  %v3783_v8 = vsub.f32 %v11569_v61, %v3763_v26  ;;  %4595 = vrot.lane.b32.xlu0 %v9731_v14, %s9534_s19  ;;  %v3808_v23 = vmul.f32 1.442695, %v3782_v54 }
 0xb39   : > { %v3765_v0 = vpop.xlane.xlu1 %3764 }
 0xb3a   : > { %v3810_v18 = vmul.f32 1.442695, %v3783_v8  ;;  %v3784_v2 = vsub.f32 %v11572_v9, %v3765_v0  ;;  %4619 = vrot.lane.b32.xlu1 %v9761_v28, %s9533_s17 }
 0xb3b   : > { %v11722_v47 = vpop.eup %9021  ;;  %v3767_v13 = vpop.xlane.xlu0 %3766 }
 0xb3c   : > { %v3869_v51 = vpack.c.bf16 %v11717_v60, %v11722_v47  ;;  %9035 = vpow2.f32 %v3810_v18  ;;  %v3812_v61 = vmul.f32 1.442695, %v3784_v2  ;;  %v3785_v14 = vsub.f32 %v11575_v41, %v3767_v13  ;;  %4599 = vrot.lane.b32.xlu0 %v9724_v10, %s9534_s19  ;;  %v11729_v16 = vpop.eup %9023  ;;  %v14332_v18 = vld [vmem:[#allocation69_spill] sm:$0xff]  ;;  %v14333_v13 = vld [vmem:[#allocation71_spill] sm:$0xff] }
 0xb3d   : > { %9037 = vpow2.f32 %v3808_v23 }
 0xb3e   : > { %v3814_v9 = vmul.f32 1.442695, %v3785_v14  ;;  %4615 = vrot.lane.b32.xlu1 %v9775_v33, %s9533_s17  ;;  %8276 = vmatmul.mubr.bf16.vlgmr.msra.gmra.mxu0 %v3869_v51  ;;  %9039 = vpow2.f32 %v3812_v61  ;;  %v14334_v14 = vld [vmem:[#allocation101_spill] sm:$0xff] }
 0xb3f   : > { %v11733_v28 = vpop.eup %9025  ;;  %8292 = vmatpush3.xpose.msk.msra.mxu0 %vm712_vm1, %v11497_v53  ;;  %v11737_v31 = vpop.xlane.xlu0 %3770 }
 0xb40   : > { %9041 = vpow2.f32 %v3814_v9  ;;  %8293 = vmatprep.subr.msk.mxu0 %vm712_vm1, %v11590_v62  ;;  %4603 = vrot.lane.b32.xlu0 %v9741_v21, %s9534_s19  ;;  %v3870_v10 = vpack.c.bf16 %v11733_v28, %v11729_v16 }
 0xb41   : > { %v11745_v33 = vpop.eup %9027 }
 0xb42   : > { %4611 = vrot.lane.b32.xlu1 %v9702_v45, %s9533_s17  ;;  %8279 = vmatprep.mubr.bf16.mxu0 %v3870_v10  ;;  %v11749_v41 = vpop.eup %9029  ;;  %v14335_v10 = vld [vmem:[#allocation103_spill] sm:$0xff] }
 0xb43   : > { %8294 = vmatpush3.xpose.msk.msra.mxu0 %vm712_vm1, %v11590_v62  ;;  %v11753_v53 = vpop.permute.xlu0 %4051  ;;  %v11755_v49 = vpop.eup %9031  ;;  %v3871_v21 = vpack.c.bf16 %v11749_v41, %v11745_v33 }
 0xb44   : > { %8295 = vmatprep.subr.msk.mxu0 %vm712_vm1, %v11594_v12  ;;  %5012 = vrot.lane.b32.xlu0 %v14170_v5, %s9534_s19 }
 0xb45   : > { %v11763_v45 = vpop.eup %9033 }
 0xb46   : > { %4607 = vrot.lane.b32.xlu1 %v9690_v39, %s9533_s17  ;;  %8280 = vmatmul.mubr.bf16.gmra.mxu0 %v3871_v21  ;;  %v3872_v62 = vpack.c.bf16 %v11763_v45, %v11755_v49  ;;  %v14336_v21 = vld [vmem:[#allocation132_spill] sm:$0xff] }
 0xb47   : > { %8296 = vmatpush3.xpose.msk.msra.mxu0 %vm712_vm1, %v11594_v12  ;;  %v11771_v40 = vpop.permute.xlu0 %4047 }
 0xb48   : > { %8297 = vmatprep.subr.msk.mxu0 %vm712_vm1, %v11608_v37  ;;  %5004 = vrot.lane.b32.xlu0 %v14172_v57, %s9534_s19 }
 0xb49   : > { %v11777_v5 = vpop.eup %9035  ;;  %8283 = vmatprep.mubr.bf16.mxu0 %v3872_v62 }
 0xb4a   : > { %4577 = vrot.lane.b32.xlu1 %v9697_v42, %s9534_s19  ;;  %v11781_v39 = vpop.eup %9037 }
 0xb4b   : > { %8298 = vmatpush3.xpose.msk.msra.mxu0 %vm712_vm1, %v11608_v37  ;;  %v11785_v12 = vpop.permute.xlu0 %4013  ;;  %v11787_v3 = vpop.eup %9039  ;;  %v3873_v57 = vpack.c.bf16 %v11777_v5, %v11781_v39 }
 0xb4c   : > { %8299 = vmatprep.subr.msk.mxu0 %vm712_vm1, %v11600_v11 }
 0xb4d   : > { %v11793_v36 = vpop.eup %9041 }
 0xb4e   : > { %4581 = vrot.lane.b32.xlu1 %v9707_v48, %s9534_s19  ;;  %8284 = vmatmul.mubr.bf16.gmra.mxu0 %v3873_v57  ;;  %v3874_v42 = vpack.c.bf16 %v11793_v36, %v11787_v3  ;;  %v14338_v57 = vld [vmem:[#allocation134_spill] sm:$0xff] }
 0xb4f   : > { %8300 = vmatpush3.xpose.msk.msra.mxu0 %vm712_vm1, %v11600_v11  ;;  %v11801_v37 = vpop.permute.xlu0 %4017 }
 0xb50   : > { %8301 = vmatprep.subr.msk.mxu0 %vm712_vm1, %v11614_v35  ;;  %8287 = vmatprep.mubr.bf16.mxu0 %v3874_v42 }
 0xb52   : > { %4585 = vrot.lane.b32.xlu1 %v9799_v55, %s9534_s19 }
 0xb53   : > { %8302 = vmatpush3.xpose.msk.msra.mxu0 %vm712_vm1, %v11614_v35  ;;  %v11809_v48 = vpop.permute.xlu0 %4021 }
 0xb54   : > { %8303 = vmatprep.subr.msk.mxu0 %vm712_vm1, %v11604_v58 }
 0xb56   : > { %4589 = vrot.lane.b32.xlu1 %v9785_v44, %s9534_s19 }
 0xb57   : > { %8304 = vmatpush3.xpose.msk.msra.mxu0 %vm712_vm1, %v11604_v58  ;;  %v11817_v11 = vpop.permute.xlu0 %4025 }
 0xb58   : > { %8305 = vmatprep.subr.msk.mxu0 %vm712_vm1, %v11625_v63 }
 0xb5a   : > { %4593 = vrot.lane.b32.xlu1 %v9771_v32, %s9534_s19 }
 0xb5b   : > { %8306 = vmatpush3.xpose.msk.msra.mxu0 %vm712_vm1, %v11625_v63  ;;  %v11825_v55 = vpop.permute.xlu0 %4029 }
 0xb5c   : > { %8307 = vmatprep.subr.msk.mxu0 %vm712_vm1, %v11612_v20 }
 0xb5e   : > { %4597 = vrot.lane.b32.xlu1 %v9757_v27, %s9534_s19  ;;  %v4050_v27 = vpop.permute.xlu1 %4049 }
 0xb5f   : > { %8308 = vmatpush3.xpose.msk.msra.mxu0 %vm712_vm1, %v11612_v20  ;;  %v11833_v44 = vpop.permute.xlu0 %4033  ;;  %v14327_v20 = vld [vmem:[#allocation96_spill] sm:$0xff] }
 0xb60   : > { %8309 = vmatprep.subr.msk.mxu0 %vm712_vm1, %v11620_v19 }
 0xb62   : > { %4601 = vrot.lane.b32.xlu1 %v9718_v6, %s9534_s19 }
 0xb63   : > { %8310 = vmatpush3.xpose.msk.msra.mxu0 %vm712_vm1, %v11620_v19  ;;  %v11841_v32 = vpop.permute.xlu0 %4037 }
 0xb64   : > { %8311 = vmatprep.subr.msk.mxu0 %vm712_vm1, %v11683_v29 }
 0xb66   : > { %4605 = vrot.lane.b32.xlu1 %v14167_v59, %s9534_s19  ;;  %v4046_v59 = vpop.permute.xlu1 %4045 }
 0xb67   : > { %8312 = vmatpush3.xpose.msk.msra.mxu0 %vm712_vm1, %v11683_v29  ;;  %1566 = vadd.xlane.f32.xlu0 %v10341_v24  ;;  %v11850_v63 = vpop.permute.xlu0 %4041 }
 0xb68   : > { %8313 = vmatprep.subr.msk.mxu0 %vm712_vm1, %v11679_v34 }
 0xb6a   : > { %5014 = vrot.lane.b32.xlu1 %v9743_v22, %s9534_s19  ;;  %v3787_v22 = vsub.f32 %v11579_v17, %v11737_v31  ;;  %v4016_v24 = vpop.permute.xlu1 %4015 }
 0xb6b   : > { %8314 = vmatpush3.xpose.msk.msra.mxu0 %vm712_vm1, %v11679_v34  ;;  %1570 = vadd.xlane.f32.xlu0 %v10353_v4  ;;  %v4453_v6 = vpop.permute.xlu0 %4452  ;;  %v14326_v4 = vld [vmem:[#allocation66_spill] sm:$0xff]  ;;  %v14329_v34 = vld [vmem:[#allocation128_spill] sm:$0xff] }
 0xb6c   : > { %8315 = vmatprep.subr.msk.mxu0 %vm712_vm1, %v11753_v53  ;;  %8347 = vmatprep.subr.bf16.mxu1 %v4453_v6 }
 0xb6d   : > { %8348 = vmatpush3.bf16.msra.mxu1 %v4453_v6 }
 0xb6e   : > { %5010 = vrot.lane.b32.xlu1 %v9763_v30, %s9534_s19  ;;  %v3818_v30 = vmul.f32 1.442695, %v3787_v22 }
 0xb6f   : > { %8316 = vmatpush3.xpose.msk.msra.mxu0 %vm712_vm1, %v11753_v53  ;;  %2136 = vadd.xlane.f32.xlu0 %v10683_v7  ;;  %v4449_v19 = vpop.permute.xlu0 %4448 }
 0xb70   : > { %8317 = vmatprep.subr.msk.mxu0 %vm712_vm1, %v4050_v27  ;;  %9043 = vpow2.f32 %v3818_v30 }
 0xb72   : > { %5008 = vrot.lane.b32.xlu1 %v9777_v38, %s9534_s19 }
 0xb73   : > { %8318 = vmatpush3.xpose.msk.msra.mxu0 %vm712_vm1, %v4050_v27  ;;  %2140 = vadd.xlane.f32.xlu0 %v14326_v4  ;;  %v4447_v58 = vpop.permute.xlu0 %4446  ;;  %v14342_v27 = vld [vmem:[#allocation159_spill] sm:$0xff] }
 0xb74   : > { %8319 = vmatprep.subr.msk.mxu0 %vm712_vm1, %v11771_v40 }
 0xb76   : > { %5006 = vrot.lane.b32.xlu1 %v9789_v50, %s9534_s19  ;;  %v3769_v7 = vpop.xlane.xlu1 %3768  ;;  %v14328_v50 = vld [vmem:[#allocation98_spill] sm:$0xff] }
 0xb77   : > { %8320 = vmatpush3.xpose.msk.msra.mxu0 %vm712_vm1, %v11771_v40  ;;  %v3786_v35 = vsub.f32 %v11618_v25, %v3769_v7  ;;  %2698 = vadd.xlane.f32.xlu0 %v14327_v20  ;;  %v4445_v29 = vpop.permute.xlu0 %4444  ;;  %v14337_v40 = vld [vmem:[#allocation38_spill] sm:$0xff] }
 0xb78   : > { %8321 = vmatprep.subr.msk.mxu0 %vm712_vm1, %v4046_v59  ;;  %v14350_v20 = vld [vmem:[#allocation130_spill] sm:$0xff] }
 0xb79   : > { %v3816_v38 = vmul.f32 1.442695, %v3786_v35 }
 0xb7a   : > { %5002 = vrot.lane.b32.xlu1 %v9813_v52, %s9534_s19  ;;  %v4020_v17 = vpop.permute.xlu1 %4019  ;;  %v14330_v52 = vld [vmem:[#allocation3_spill] sm:$0xff] }
 0xb7b   : > { %9045 = vpow2.f32 %v3816_v38  ;;  %8322 = vmatpush3.xpose.msk.msra.mxu0 %vm712_vm1, %v4046_v59  ;;  %2702 = vadd.xlane.f32.xlu0 %v14328_v50  ;;  %v4441_v26 = vpop.permute.xlu0 %4440  ;;  %v14343_v59 = vld [vmem:[#allocation67_spill] sm:$0xff] }
 0xb7d   : > { %v11890_v43 = vpop.eup %9043 }
 0xb7e   : > { %5000 = vrot.lane.b32.xlu1 %v14174_v56, %s9534_s19  ;;  %v4024_v25 = vpop.permute.xlu1 %4023  ;;  %v14331_v56 = vld [vmem:[#allocation8_spill] sm:$0xff] }
 0xb7f   : > { %3260 = vadd.xlane.f32.xlu0 %v14329_v34  ;;  %v11900_v23 = vpop.permute.xlu0 %4637  ;;  %v14358_v34 = vld [vmem:[#allocation68_spill] sm:$0xff] }
 0xb82   : > { %v4028_v1 = vpop.permute.xlu1 %4027 }
 0xb83   : > { %3264 = vadd.xlane.f32.xlu0 %v11379_v46  ;;  %v11905_v51 = vpop.permute.xlu0 %4631 }
 0xb86   : > { %v4032_v15 = vpop.permute.xlu1 %4031 }
 0xb87   : > { %1574 = vadd.xlane.f32.xlu0 %v14330_v52  ;;  %v11913_v9 = vpop.permute.xlu0 %4627 }
 0xb88   : > { %v11893_v54 = vpop.eup %9045 }
 0xb89   : > { %v3875_v8 = vpack.c.bf16 %v11890_v43, %v11893_v54 }
 0xb8a   : > { %v4036_v0 = vpop.permute.xlu1 %4035 }
 0xb8b   : > { %1578 = vadd.xlane.f32.xlu0 %v14331_v56  ;;  %8288 = vmatmul.mubr.bf16.gmra.mxu0 %v3875_v8  ;;  %v11921_v62 = vpop.permute.xlu0 %4623  ;;  %v14366_v56 = vld [vmem:[#allocation102_spill] sm:$0xff] }
 0xb8c   : > { %8323 = vmatprep.mubr.msk.f32.mxu0 %vm712_vm1, %v11785_v12 }
 0xb8e   : > { %v4040_v46 = vpop.permute.xlu1 %4039 }
 0xb8f   : > { %2144 = vadd.xlane.f32.xlu0 %v14332_v18  ;;  %v11932_v42 = vpop.permute.xlu0 %4617  ;;  %v14368_v18 = vld [vmem:[#allocation131_spill] sm:$0xff] }
 0xb92   : > { %v4044_v2 = vpop.permute.xlu1 %4043 }
 0xb93   : > { %2148 = vadd.xlane.f32.xlu0 %v14333_v13  ;;  %8324 = vmatmul.mubr.msk.f32.vlgmr.msra.gmra.mxu0 %vm712_vm1, %v4016_v24  ;;  %v11946_v6 = vpop.permute.xlu0 %4613  ;;  %v14345_v24 = vld [vmem:[#allocation97_spill] sm:$0xff] }
 0xb94   : > { %8326 = vmatprep.mubr.msk.f32.mxu0 %vm712_vm1, %v11801_v37  ;;  %v14339_v37 = vld [vmem:[#allocation39_spill] sm:$0xff] }
 0xb96   : > { %v4451_v61 = vpop.permute.xlu1 %4450 }
 0xb97   : > { %2706 = vadd.xlane.f32.xlu0 %v14334_v14  ;;  %8327 = vmatmul.mubr.msk.f32.gmra.mxu0 %vm712_vm1, %v4020_v17  ;;  %v11955_v22 = vpop.permute.xlu0 %4609  ;;  %v14352_v17 = vld [vmem:[#allocation7_spill] sm:$0xff] }
 0xb98   : > { %8349 = vmatprep.subr.bf16.mxu1 %v4451_v61  ;;  %8329 = vmatprep.mubr.msk.f32.mxu0 %vm712_vm1, %v11809_v48  ;;  %14344 = vst [vmem:[#allocation66_spill] sm:$0xff] %v11955_v22  ;;  %v14413_v22 = vld [vmem:[#allocation14_spill] sm:$0xff] }
 0xb99   : > { %8350 = vmatpush3.bf16.msra.mxu1 %v4451_v61  ;;  %v14371_v61 = vld [vmem:[#allocation133_spill] sm:$0xff] }
 0xb9a   : > { %8351 = vmatprep.subr.bf16.mxu1 %v4449_v19  ;;  %v4443_v31 = vpop.permute.xlu1 %4442 }
 0xb9b   : > { %2710 = vadd.xlane.f32.xlu0 %v14335_v10  ;;  %8330 = vmatmul.mubr.msk.f32.gmra.mxu0 %vm712_vm1, %v4024_v25  ;;  %v14374_v10 = vld [vmem:[#allocation13_spill] sm:$0xff] }
 0xb9c   : > { %8332 = vmatprep.mubr.msk.f32.mxu0 %vm712_vm1, %v11817_v11  ;;  %v14340_v11 = vld [vmem:[#allocation5_spill] sm:$0xff] }
 0xb9d   : > { %8352 = vmatpush3.bf16.msra.mxu1 %v4449_v19  ;;  %v14348_v19 = vld [vmem:[#allocation129_spill] sm:$0xff] }
 0xb9e   : > { %8353 = vmatprep.subr.bf16.mxu1 %v4447_v58  ;;  %v4439_v53 = vpop.permute.xlu1 %4438 }
 0xb9f   : > { %3268 = vadd.xlane.f32.xlu0 %v14336_v21  ;;  %8333 = vmatmul.mubr.msk.f32.gmra.mxu0 %vm712_vm1, %v4028_v1  ;;  %v14360_v1 = vld [vmem:[#allocation70_spill] sm:$0xff]  ;;  %v14376_v21 = vld [vmem:[#allocation9_spill] sm:$0xff] }
 0xba0   : > { %8335 = vmatprep.mubr.msk.f32.mxu0 %vm712_vm1, %v11825_v55  ;;  %v14341_v55 = vld [vmem:[#allocation65_spill] sm:$0xff] }
 0xba1   : > { %8354 = vmatpush3.bf16.msra.mxu1 %v4447_v58  ;;  %v14355_v58 = vld [vmem:[#allocation4_spill] sm:$0xff] }
 0xba2   : > { %8355 = vmatprep.subr.bf16.mxu1 %v4445_v29  ;;  %1564 = vadd.xlane.f32.xlu1 %v14337_v40  ;;  %v11926_v12 = vpop.permute.xlu1 %4635 }
 0xba3   : > { %3272 = vadd.xlane.f32.xlu0 %v14338_v57  ;;  %8336 = vmatmul.mubr.msk.f32.gmra.mxu0 %vm712_vm1, %v4032_v15 }
 0xba4   : > { %8338 = vmatprep.mubr.msk.f32.mxu0 %vm712_vm1, %v11833_v44 }
 0xba5   : > { %8356 = vmatpush3.bf16.msra.mxu1 %v4445_v29 }
 0xba6   : > { %8357 = vmatprep.subr.bf16.mxu1 %v4443_v31  ;;  %1568 = vadd.xlane.f32.xlu1 %v14339_v37  ;;  %v11935_v48 = vpop.permute.xlu1 %4633  ;;  %v14377_v37 = vld [vmem:[#allocation160_spill] sm:$0xff] }
 0xba7   : > { %1582 = vadd.xlane.f32.xlu0 %v14340_v11  ;;  %8339 = vmatmul.mubr.msk.f32.gmra.mxu0 %vm712_vm1, %v4036_v0 }
 0xba8   : > { %8341 = vmatprep.mubr.msk.f32.mxu0 %vm712_vm1, %v11841_v32 }
 0xba9   : > { %8358 = vmatpush3.bf16.msra.mxu1 %v4443_v31 }
 0xbaa   : > { %8359 = vmatprep.subr.bf16.mxu1 %v4441_v26  ;;  %2134 = vadd.xlane.f32.xlu1 %v14341_v55  ;;  %v11942_v44 = vpop.permute.xlu1 %4629 }
 0xbab   : > { %3822 = vadd.xlane.f32.xlu0 %v14342_v27  ;;  %8342 = vmatmul.mubr.msk.f32.gmra.mxu0 %vm712_vm1, %v4040_v46 }
 0xbac   : > { %8344 = vmatprep.mubr.msk.f32.mxu0 %vm712_vm1, %v11850_v63  ;;  %v14346_v63 = vld [vmem:[#allocation99_spill] sm:$0xff] }
 0xbad   : > { %8360 = vmatpush3.bf16.msra.mxu1 %v4441_v26  ;;  %v14363_v26 = vld [vmem:[#allocation100_spill] sm:$0xff] }
 0xbae   : > { %8361 = vmatprep.subr.bf16.mxu1 %v4439_v53  ;;  %2138 = vadd.xlane.f32.xlu1 %v14343_v59  ;;  %v11951_v32 = vpop.permute.xlu1 %4625 }
 0xbaf   : > { %3826 = vadd.xlane.f32.xlu0 %v11717_v60  ;;  %8345 = vmatmul.mubr.msk.f32.gmra.mxu0 %vm712_vm1, %v4044_v2  ;;  %v11967_v60 = vpop.permute.xlu0 %4575 }
 0xbb0   : > { %14347 = vst [vmem:[#allocation96_spill] sm:$0xff] %v11967_v60  ;;  %v14412_v60 = vld [vmem:[#allocation79_spill] sm:$0xff] }
 0xbb1   : > { %8362 = vmatpush3.bf16.msra.mxu1 %v4439_v53 }
 0xbb2   : > { %8379 = vmatprep.subr.msk.mxu1 %vm712_vm1, %v11900_v23  ;;  %2696 = vadd.xlane.f32.xlu1 %v14345_v24  ;;  %v11960_v4 = vpop.permute.xlu1 %4621 }
 0xbb3   : > { %3830 = vadd.xlane.f32.xlu0 %v11733_v28  ;;  %v11972_v35 = vpop.permute.xlu0 %4579 }
 0xbb4   : > { %14349 = vst [vmem:[#allocation98_spill] sm:$0xff] %v11972_v35  ;;  %v14408_v35 = vld [vmem:[#allocation11_spill] sm:$0xff] }
 0xbb6   : > { %2700 = vadd.xlane.f32.xlu1 %v14346_v63  ;;  %v11964_v30 = vpop.permute.xlu1 %4619 }
 0xbb7   : > { %3834 = vadd.xlane.f32.xlu0 %v11749_v41  ;;  %v11980_v50 = vpop.permute.xlu0 %4583 }
 0xbb8   : > { %14354 = vst [vmem:[#allocation8_spill] sm:$0xff] %v11980_v50 }
 0xbba   : > { %3258 = vadd.xlane.f32.xlu1 %v14348_v19  ;;  %v11970_v7 = vpop.permute.xlu1 %4615 }
 0xbbb   : > { %v11985_v25 = vpop.permute.xlu0 %4587 }
 0xbbc   : > { %14357 = vst [vmem:[#allocation71_spill] sm:$0xff] %v11985_v25 }
 0xbbe   : > { %3262 = vadd.xlane.f32.xlu1 %v14350_v20  ;;  %v11975_v38 = vpop.permute.xlu1 %4611 }
 0xbbf   : > { %14351 = vst [vmem:[#allocation128_spill] sm:$0xff] %v11975_v38  ;;  %v11993_v52 = vpop.permute.xlu0 %4591 }
 0xbc0   : > { %14362 = vst [vmem:[#allocation132_spill] sm:$0xff] %v11993_v52 }
 0xbc2   : > { %1572 = vadd.xlane.f32.xlu1 %v14352_v17  ;;  %v11978_v28 = vpop.permute.xlu1 %4607 }
 0xbc3   : > { %14353 = vst [vmem:[#allocation3_spill] sm:$0xff] %v11978_v28  ;;  %v11998_v0 = vpop.permute.xlu0 %4595  ;;  %v14411_v28 = vld [vmem:[#allocation19_spill] sm:$0xff] }
 0xbc4   : > { %14365 = vst [vmem:[#allocation134_spill] sm:$0xff] %v11998_v0 }
 0xbc6   : > { %1576 = vadd.xlane.f32.xlu1 %v14355_v58  ;;  %v11983_v41 = vpop.permute.xlu1 %4577 }
 0xbc7   : > { %14356 = vst [vmem:[#allocation69_spill] sm:$0xff] %v11983_v41  ;;  %v12006_v13 = vpop.permute.xlu0 %4599  ;;  %v14410_v41 = vld [vmem:[#allocation76_spill] sm:$0xff] }
 0xbc8   : > { %14370 = vst [vmem:[#allocation65_spill] sm:$0xff] %v12006_v13 }
 0xbca   : > { %2142 = vadd.xlane.f32.xlu1 %v14358_v34  ;;  %v11988_v29 = vpop.permute.xlu1 %4581 }
 0xbcb   : > { %14359 = vst [vmem:[#allocation101_spill] sm:$0xff] %v11988_v29  ;;  %v12011_v31 = vpop.permute.xlu0 %4603 }
 0xbcc   : > { %14373 = vst [vmem:[#allocation67_spill] sm:$0xff] %v12011_v31 }
 0xbce   : > { %2146 = vadd.xlane.f32.xlu1 %v14360_v1  ;;  %v11991_v15 = vpop.permute.xlu1 %4585 }
 0xbcf   : > { %14361 = vst [vmem:[#allocation103_spill] sm:$0xff] %v11991_v15  ;;  %v5013_v57 = vpop.permute.xlu0 %5012 }
 0xbd2   : > { %2704 = vadd.xlane.f32.xlu1 %v14363_v26  ;;  %v11996_v8 = vpop.permute.xlu1 %4589 }
 0xbd3   : > { %14364 = vst [vmem:[#allocation38_spill] sm:$0xff] %v11996_v8  ;;  %v5005_v59 = vpop.permute.xlu0 %5004 }
 0xbd6   : > { %2708 = vadd.xlane.f32.xlu1 %v14366_v56  ;;  %v12001_v46 = vpop.permute.xlu1 %4593 }
 0xbd7   : > { %14367 = vst [vmem:[#allocation39_spill] sm:$0xff] %v12001_v46 }
 0xbda   : > { %3266 = vadd.xlane.f32.xlu1 %v14368_v18  ;;  %v12004_v2 = vpop.permute.xlu1 %4597 }
 0xbdb   : > { %14369 = vst [vmem:[#allocation5_spill] sm:$0xff] %v12004_v2 }
 0xbde   : > { %3270 = vadd.xlane.f32.xlu1 %v14371_v61  ;;  %v12009_v14 = vpop.permute.xlu1 %4601 }
 0xbdf   : > { %14372 = vst [vmem:[#allocation159_spill] sm:$0xff] %v12009_v14  ;;  %v14404_v14 = vld [vmem:[#allocation138_spill] sm:$0xff] }
 0xbe2   : > { %1580 = vadd.xlane.f32.xlu1 %v14374_v10  ;;  %v12014_v53 = vpop.permute.xlu1 %4605 }
 0xbe3   : > { %14375 = vst [vmem:[#allocation97_spill] sm:$0xff] %v12014_v53 }
 0xbe6   : > { %1584 = vadd.xlane.f32.xlu1 %v14376_v21  ;;  %v5015_v40 = vpop.permute.xlu1 %5014 }
 0xbe7   : > { %8435 = vmatprep.subr.bf16.mxu0 %v5015_v40 }
 0xbe8   : > { %8436 = vmatpush3.bf16.msra.mxu0 %v5015_v40 }
 0xbe9   : > { %8437 = vmatprep.subr.bf16.mxu0 %v5013_v57 }
 0xbea   : > { %3820 = vadd.xlane.f32.xlu1 %v14377_v37  ;;  %v5011_v11 = vpop.permute.xlu1 %5010 }
 0xbec   : > { %8438 = vmatpush3.bf16.msra.mxu0 %v5013_v57 }
 0xbed   : > { %8439 = vmatprep.subr.bf16.mxu0 %v5011_v11 }
 0xbee   : > { %3824 = vadd.xlane.f32.xlu1 %v11722_v47  ;;  %v5009_v55 = vpop.permute.xlu1 %5008 }
 0xbf0   : > { %8440 = vmatpush3.bf16.msra.mxu0 %v5011_v11 }
 0xbf1   : > { %8441 = vmatprep.subr.bf16.mxu0 %v5009_v55 }
 0xbf2   : > { %3828 = vadd.xlane.f32.xlu1 %v11729_v16  ;;  %v5007_v27 = vpop.permute.xlu1 %5006 }
 0xbf4   : > { %8442 = vmatpush3.bf16.msra.mxu0 %v5009_v55 }
 0xbf5   : > { %8443 = vmatprep.subr.bf16.mxu0 %v5007_v27 }
 0xbf6   : > { %3832 = vadd.xlane.f32.xlu1 %v11745_v33  ;;  %v5003_v24 = vpop.permute.xlu1 %5002 }
 0xbf8   : > { %8444 = vmatpush3.bf16.msra.mxu0 %v5007_v27 }
 0xbf9   : > { %8445 = vmatprep.subr.bf16.mxu0 %v5005_v59 }
 0xbfa   : > { %v5001_v63 = vpop.permute.xlu1 %5000 }
 0xbfc   : > { %8446 = vmatpush3.bf16.msra.mxu0 %v5005_v59  ;;  %v14392_v59 = vld [vmem:[#allocation72_spill] sm:$0xff] }
 0xbfd   : > { %8447 = vmatprep.subr.bf16.mxu0 %v5003_v24 }
 0xbfe   : > { %v12021_v47 = vpop.f32.mrf.mxu0 }
 0xbff   : > { %14378 = vst [vmem:[#allocation99_spill] sm:$0xff] %v12021_v47 }
 0xc00   : > { %8448 = vmatpush3.bf16.msra.mxu0 %v5003_v24  ;;  %v12023_v19 = vpop.f32.mrf.mxu0  ;;  %v14393_v24 = vld [vmem:[#allocation6_spill] sm:$0xff] }
 0xc01   : > { %8449 = vmatprep.subr.bf16.mxu0 %v5001_v63 }
 0xc02   : > { %v12025_v16 = vpop.f32.mrf.mxu0 }
 0xc03   : > { %14379 = vst [vmem:[#allocation129_spill] sm:$0xff] %v12025_v16 }
 0xc04   : > { %8450 = vmatpush3.bf16.msra.mxu0 %v5001_v63  ;;  %v12027_v20 = vpop.f32.mrf.mxu0 }
 0xc06   : > { %v12029_v17 = vpop.f32.mrf.mxu0 }
 0xc07   : > { %14380 = vst [vmem:[#allocation130_spill] sm:$0xff] %v12029_v17 }
 0xc08   : > { %v12031_v33 = vpop.f32.mrf.mxu0 }
 0xc09   : > { %14381 = vst [vmem:[#allocation7_spill] sm:$0xff] %v12031_v33 }
 0xc0a   : > { %v12033_v58 = vpop.f32.mrf.mxu0 }
 0xc0b   : > { %14382 = vst [vmem:[#allocation4_spill] sm:$0xff] %v12033_v58 }
 0xc0c   : > { %v12035_v34 = vpop.f32.mrf.mxu0 }
 0xc0d   : > { %14383 = vst [vmem:[#allocation68_spill] sm:$0xff] %v12035_v34 }
 0xc0e   : > { %v12037_v1 = vpop.f32.mrf.mxu0 }
 0xc0f   : > { %14384 = vst [vmem:[#allocation70_spill] sm:$0xff] %v12037_v1 }
 0xc10   : > { %v12039_v26 = vpop.f32.mrf.mxu0 }
 0xc11   : > { %14385 = vst [vmem:[#allocation100_spill] sm:$0xff] %v12039_v26  ;;  %v14397_v26 = vld [vmem:[#allocation74_spill] sm:$0xff] }
 0xc12   : > { %v12041_v56 = vpop.f32.mrf.mxu0 }
 0xc13   : > { %14386 = vst [vmem:[#allocation102_spill] sm:$0xff] %v12041_v56 }
 0xc14   : > { %v12043_v18 = vpop.f32.mrf.mxu0 }
 0xc15   : > { %14387 = vst [vmem:[#allocation131_spill] sm:$0xff] %v12043_v18  ;;  %v12069_v18 = vpop.xlane.xlu0 %1566 }
 0xc2b   : > { %v12061_v63 = vpop.xlane.xlu1 %1564 }
 0xc2c   : > { %9047 = vrcp.f32 %v12061_v63 }
 0xc2d   : > { %9049 = vrcp.f32 %v12069_v18  ;;  %v14444_v18 = vld [vmem:[#allocation29_spill] sm:$0xff] }
 0xc4b   : > { %v12045_v61 = vpop.f32.mrf.mxu0 }
 0xc4c   : > { %14388 = vst [vmem:[#allocation133_spill] sm:$0xff] %v12045_v61  ;;  %v14394_v61 = vld [vmem:[#allocation75_spill] sm:$0xff] }
 0xc4d   : > { %v12047_v10 = vpop.f32.mrf.mxu0 }
 0xc4e   : > { %14389 = vst [vmem:[#allocation13_spill] sm:$0xff] %v12047_v10 }
 0xc4f   : > { %v12049_v21 = vpop.f32.mrf.mxu0 }
 0xc50   : > { %14390 = vst [vmem:[#allocation9_spill] sm:$0xff] %v12049_v21  ;;  %v14396_v21 = vld [vmem:[#allocation104_spill] sm:$0xff] }
 0xc51   : > { %v12051_v40 = vpop.f32.mrf.mxu0 }
 0xc52   : > { %14391 = vst [vmem:[#allocation160_spill] sm:$0xff] %v12051_v40  ;;  %v14395_v40 = vld [vmem:[#allocation73_spill] sm:$0xff] }
 0xc53   : > { %v8325_v57 = vpop.f32.mrf.mxu0 }
 0xc54   : > { %v12053_v37 = vmul.f32 0.35355338, %v8325_v57 }
 0xc55   : > { %v4207_v11 = vpop.f32.mrf.mxu0 }
 0xc56   : > { %v12055_v55 = vmul.f32 0.35355338, %v4207_v11  ;;  %4304 = vmax.xlane.f32.xlu1 %v12053_v37  ;;  %v12066_v11 = vpop.xlane.xlu1 %1568 }
 0xc57   : > { %v8328_v27 = vpop.f32.mrf.mxu0 }
 0xc58   : > { %4302 = vmax.xlane.f32.xlu0 %v12055_v55  ;;  %v12078_v17 = vmul.f32 0.35355338, %v8328_v27 }
 0xc59   : > { %v4217_v10 = vpop.f32.mrf.mxu0 }
 0xc5a   : > { %2150 = vadd.xlane.f32.xlu1 %v14392_v59  ;;  %v14398_v59 = vld [vmem:[#allocation107_spill] sm:$0xff]  ;;  %v12073_v56 = vpop.xlane.xlu1 %2134  ;;  %v12084_v33 = vmul.f32 0.35355338, %v4217_v10 }
 0xc5b   : > { %v8331_v57 = vpop.f32.mrf.mxu0  ;;  %9051 = vrcp.f32 %v12073_v56 }
 0xc5c   : > { %1586 = vadd.xlane.f32.xlu0 %v14393_v24  ;;  %v14399_v24 = vld [vmem:[#allocation105_spill] sm:$0xff]  ;;  %v12104_v0 = vmul.f32 0.35355338, %v8331_v57 }
 0xc5d   : > { %v4227_v1 = vpop.f32.mrf.mxu0 }
 0xc5e   : > { %2154 = vadd.xlane.f32.xlu1 %v14394_v61  ;;  %v14400_v61 = vld [vmem:[#allocation135_spill] sm:$0xff] }
 0xc5f   : > { %v8334_v58 = vpop.f32.mrf.mxu0 }
 0xc60   : > { %2152 = vadd.xlane.f32.xlu0 %v14395_v40  ;;  %v12076_v40 = vpop.xlane.xlu0 %1570 }
 0xc61   : > { %v4237_v34 = vpop.f32.mrf.mxu0 }
 0xc62   : > { %2712 = vadd.xlane.f32.xlu1 %v14396_v21  ;;  %v14401_v21 = vld [vmem:[#allocation106_spill] sm:$0xff]  ;;  %v12109_v46 = vmul.f32 0.35355338, %v4237_v34 }
 0xc63   : > { %v8337_v53 = vpop.f32.mrf.mxu0 }
 0xc64   : > { %2156 = vadd.xlane.f32.xlu0 %v14397_v26  ;;  %v12082_v26 = vpop.xlane.xlu1 %2138  ;;  %v12117_v52 = vmul.f32 0.35355338, %v8337_v53 }
 0xc65   : > { %v4247_v31 = vpop.f32.mrf.mxu0 }
 0xc66   : > { %2716 = vadd.xlane.f32.xlu1 %v14398_v59  ;;  %v14402_v59 = vld [vmem:[#allocation136_spill] sm:$0xff] }
 0xc67   : > { %v8340_v10 = vpop.f32.mrf.mxu0 }
 0xc68   : > { %2714 = vadd.xlane.f32.xlu0 %v14399_v24  ;;  %v12087_v24 = vpop.xlane.xlu0 %2136  ;;  %v12091_v27 = vpop.xlane.xlu1 %2696  ;;  %v12125_v25 = vmul.f32 0.35355338, %v8340_v10 }
 0xc69   : > { %9053 = vrcp.f32 %v12087_v24 }
 0xc6a   : > { %3274 = vadd.xlane.f32.xlu1 %v14400_v61  ;;  %v14403_v61 = vld [vmem:[#allocation137_spill] sm:$0xff]  ;;  %9055 = vrcp.f32 %v12082_v26 }
 0xc6c   : > { %2718 = vadd.xlane.f32.xlu0 %v14401_v21  ;;  %v12093_v21 = vmul.f32 0.35355338, %v4227_v1  ;;  %v12096_v13 = vpop.xlane.xlu0 %2140  ;;  %v12102_v2 = vpop.xlane.xlu1 %2700 }
 0xc6d   : > { %v4257_v1 = vpop.f32.mrf.mxu0  ;;  %9057 = vrcp.f32 %v12096_v13  ;;  %v14446_v13 = vld [vmem:[#allocation50_spill] sm:$0xff] }
 0xc6e   : > { %4308 = vmax.xlane.f32.xlu1 %v12078_v17  ;;  %v12122_v8 = vmul.f32 0.35355338, %v4257_v1  ;;  %9059 = vrcp.f32 %v12066_v11 }
 0xc6f   : > { %9061 = vrcp.f32 %v12102_v2 }
 0xc70   : > { %3276 = vadd.xlane.f32.xlu0 %v14402_v59  ;;  %v12099_v59 = vmul.f32 0.35355338, %v8334_v58  ;;  %v12115_v58 = vpop.xlane.xlu1 %3258  ;;  %9063 = vrcp.f32 %v12076_v40 }
 0xc72   : > { %4306 = vmax.xlane.f32.xlu1 %v12084_v33 }
 0xc74   : > { %3280 = vadd.xlane.f32.xlu0 %v14403_v61  ;;  %v12107_v61 = vpop.xlane.xlu0 %2698 }
 0xc76   : > { %3278 = vadd.xlane.f32.xlu1 %v14404_v14  ;;  %v12112_v14 = vmul.f32 0.35355338, %v4247_v31  ;;  %v12128_v31 = vpop.xlane.xlu1 %3262 }
 0xc78   : > { %4310 = vmax.xlane.f32.xlu0 %v12093_v21  ;;  %v12120_v57 = vpop.xlane.xlu0 %2702 }
 0xc79   : > { %9065 = vrcp.f32 %v12120_v57 }
 0xc7a   : > { %3836 = vadd.xlane.f32.xlu1 %v11755_v49  ;;  %v8343_v49 = vpop.f32.mrf.mxu0  ;;  %v12139_v16 = vpop.xlane.xlu1 %1572  ;;  %9067 = vrcp.f32 %v12091_v27 }
 0xc7b   : > { %v12135_v50 = vmul.f32 0.35355338, %v8343_v49  ;;  %14405 = vst [vmem:[#allocation72_spill] sm:$0xff] %v12139_v16  ;;  %9069 = vrcp.f32 %v12107_v61 }
 0xc7c   : > { %4316 = vmax.xlane.f32.xlu0 %v12099_v59  ;;  %v4267_v34 = vpop.f32.mrf.mxu0  ;;  %v12133_v53 = vpop.xlane.xlu0 %3260  ;;  %9071 = vrcp.f32 %v12115_v58 }
 0xc7d   : > { %v12130_v15 = vmul.f32 0.35355338, %v4267_v34  ;;  %v14406_v34 = vld [vmem:[#allocation10_spill] sm:$0xff]  ;;  %9073 = vrcp.f32 %v12133_v53 }
 0xc7e   : > { %4312 = vmax.xlane.f32.xlu1 %v12104_v0  ;;  %v8346_v1 = vpop.f32.mrf.mxu0  ;;  %v12148_v47 = vpop.xlane.xlu1 %1576 }
 0xc7f   : > { %v12141_v10 = vmul.f32 0.35355338, %v8346_v1 }
 0xc80   : > { %4314 = vmax.xlane.f32.xlu0 %v12109_v46  ;;  %v12144_v29 = vpop.xlane.xlu0 %3264 }
 0xc82   : > { %4318 = vmax.xlane.f32.xlu1 %v12112_v14  ;;  %v12155_v1 = vpop.xlane.xlu1 %2142 }
 0xc83   : > { %14409 = vst [vmem:[#allocation75_spill] sm:$0xff] %v12155_v1  ;;  %v4277_v1 = vpop.f32.mrf.mxu0 }
 0xc84   : > { %4320 = vmax.xlane.f32.xlu0 %v12117_v52  ;;  %v12151_v49 = vpop.xlane.xlu0 %1574 }
 0xc85   : > { %14407 = vst [vmem:[#allocation6_spill] sm:$0xff] %v12151_v49  ;;  %v14415_v49 = vld [vmem:[#allocation108_spill] sm:$0xff] }
 0xc86   : > { %4322 = vmax.xlane.f32.xlu1 %v12122_v8 }
 0xc88   : > { %4324 = vmax.xlane.f32.xlu0 %v12125_v25 }
 0xc8a   : > { %4326 = vmax.xlane.f32.xlu1 %v12130_v15 }
 0xc8c   : > { %4328 = vmax.xlane.f32.xlu0 %v12135_v50 }
 0xc8e   : > { %3840 = vadd.xlane.f32.xlu1 %v11781_v39  ;;  %v12158_v39 = vpop.xlane.xlu0 %1578 }
 0xc90   : > { %4332 = vmax.xlane.f32.xlu0 %v12141_v10 }
 0xc92   : > { %1588 = vadd.xlane.f32.xlu1 %v14406_v34  ;;  %v12162_v34 = vpop.xlane.xlu1 %2146 }
 0xc94   : > { %3838 = vadd.xlane.f32.xlu0 %v11763_v45  ;;  %v12165_v45 = vpop.xlane.xlu0 %2144 }
 0xc95   : > { %14414 = vst [vmem:[#allocation73_spill] sm:$0xff] %v12165_v45  ;;  %v14422_v45 = vld [vmem:[#allocation109_spill] sm:$0xff] }
 0xc96   : > { %1592 = vadd.xlane.f32.xlu1 %v14408_v35  ;;  %v14416_v35 = vld [vmem:[#allocation77_spill] sm:$0xff] }
 0xc98   : > { %3842 = vadd.xlane.f32.xlu0 %v11777_v5  ;;  %v12169_v5 = vpop.xlane.xlu1 %2704  ;;  %v12172_v16 = vpop.xlane.xlu0 %2148 }
 0xc99   : > { %14417 = vst [vmem:[#allocation104_spill] sm:$0xff] %v12169_v5  ;;  %14419 = vst [vmem:[#allocation74_spill] sm:$0xff] %v12172_v16  ;;  %v14425_v5 = vld [vmem:[#allocation110_spill] sm:$0xff]  ;;  %v14429_v16 = vld [vmem:[#allocation140_spill] sm:$0xff] }
 0xc9a   : > { %2158 = vadd.xlane.f32.xlu1 %v14410_v41  ;;  %v14418_v41 = vld [vmem:[#allocation111_spill] sm:$0xff] }
 0xc9c   : > { %1590 = vadd.xlane.f32.xlu0 %v14411_v28  ;;  %v12174_v28 = vmul.f32 0.35355338, %v4277_v1 }
 0xc9e   : > { %2162 = vadd.xlane.f32.xlu1 %v14412_v60  ;;  %v14420_v60 = vld [vmem:[#allocation78_spill] sm:$0xff] }
 0xca0   : > { %1594 = vadd.xlane.f32.xlu0 %v14413_v22  ;;  %v12178_v22 = vpop.xlane.xlu1 %2708 }
 0xca1   : > { %14421 = vst [vmem:[#allocation107_spill] sm:$0xff] %v12178_v22  ;;  %v14431_v22 = vld [vmem:[#allocation141_spill] sm:$0xff] }
 0xca2   : > { %2720 = vadd.xlane.f32.xlu1 %v14415_v49  ;;  %v12181_v49 = vpop.xlane.xlu0 %2706 }
 0xca3   : > { %14423 = vst [vmem:[#allocation105_spill] sm:$0xff] %v12181_v49 }
 0xca4   : > { %2160 = vadd.xlane.f32.xlu0 %v14416_v35  ;;  %v14424_v35 = vld [vmem:[#allocation139_spill] sm:$0xff]  ;;  %v12185_v38 = vpop.xlane.xlu1 %3266 }
 0xca5   : > { %14426 = vst [vmem:[#allocation135_spill] sm:$0xff] %v12185_v38  ;;  %v14456_v38 = vld [vmem:[#allocation112_spill] sm:$0xff] }
 0xca6   : > { %2724 = vadd.xlane.f32.xlu1 %v14418_v41  ;;  %v14427_v41 = vld [vmem:[#allocation142_spill] sm:$0xff]  ;;  %v12188_v1 = vpop.xlane.xlu0 %2710 }
 0xca7   : > { %14428 = vst [vmem:[#allocation106_spill] sm:$0xff] %v12188_v1 }
 0xca8   : > { %2164 = vadd.xlane.f32.xlu0 %v14420_v60  ;;  %v12192_v60 = vpop.xlane.xlu1 %3270 }
 0xca9   : > { %14430 = vst [vmem:[#allocation136_spill] sm:$0xff] %v12192_v60  ;;  %v14438_v60 = vld [vmem:[#allocation22_spill] sm:$0xff] }
 0xcaa   : > { %4330 = vmax.xlane.f32.xlu1 %v12174_v28 }
 0xcac   : > { %2722 = vadd.xlane.f32.xlu0 %v14422_v45  ;;  %v12195_v45 = vpop.xlane.xlu0 %3268 }
 0xcad   : > { %14432 = vst [vmem:[#allocation137_spill] sm:$0xff] %v12195_v45 }
 0xcae   : > { %3282 = vadd.xlane.f32.xlu1 %v14424_v35  ;;  %v14434_v35 = vld [vmem:[#allocation23_spill] sm:$0xff] }
 0xcb0   : > { %2726 = vadd.xlane.f32.xlu0 %v14425_v5  ;;  %v12199_v5 = vpop.xlane.xlu1 %1580 }
 0xcb1   : > { %14433 = vst [vmem:[#allocation138_spill] sm:$0xff] %v12199_v5 }
 0xcb2   : > { %3286 = vadd.xlane.f32.xlu1 %v14427_v41  ;;  %v12202_v41 = vpop.xlane.xlu0 %3272 }
 0xcb3   : > { %14435 = vst [vmem:[#allocation10_spill] sm:$0xff] %v12202_v41 }
 0xcb4   : > { %3284 = vadd.xlane.f32.xlu0 %v14429_v16  ;;  %v14436_v16 = vld [vmem:[#allocation25_spill] sm:$0xff] }
 0xcb6   : > { %3844 = vadd.xlane.f32.xlu1 %v11787_v3  ;;  %v12206_v3 = vpop.xlane.xlu1 %1584 }
 0xcb7   : > { %14437 = vst [vmem:[#allocation11_spill] sm:$0xff] %v12206_v3 }
 0xcb8   : > { %3288 = vadd.xlane.f32.xlu0 %v14431_v22  ;;  %v12210_v22 = vpop.xlane.xlu0 %1582 }
 0xcb9   : > { %14439 = vst [vmem:[#allocation76_spill] sm:$0xff] %v12210_v22  ;;  %v14449_v22 = vld [vmem:[#allocation81_spill] sm:$0xff] }
 0xcba   : > { %3848 = vadd.xlane.f32.xlu1 %v11893_v54  ;;  %v14440_v54 = vld [vmem:[#allocation26_spill] sm:$0xff] }
 0xcbc   : > { %3846 = vadd.xlane.f32.xlu0 %v11793_v36  ;;  %v14441_v36 = vld [vmem:[#allocation24_spill] sm:$0xff] }
 0xcbe   : > { %1018 = vadd.xlane.f32.xlu1 %v14434_v35  ;;  %v12216_v35 = vpop.xlane.xlu1 %3820 }
 0xcc0   : > { %3850 = vadd.xlane.f32.xlu0 %v11890_v43  ;;  %v14442_v43 = vld [vmem:[#allocation28_spill] sm:$0xff] }
 0xcc2   : > { %1022 = vadd.xlane.f32.xlu1 %v14436_v16  ;;  %v12220_v16 = vpop.xlane.xlu0 %3822  ;;  %v12225_v63 = vpop.xlane.xlu1 %3824 }
 0xcc4   : > { %1020 = vadd.xlane.f32.xlu0 %v14438_v60  ;;  %v14443_v60 = vld [vmem:[#allocation27_spill] sm:$0xff] }
 0xcc6   : > { %1026 = vadd.xlane.f32.xlu1 %v14440_v54  ;;  %v12229_v56 = vpop.xlane.xlu0 %3826  ;;  %v9048_v54 = vpop.eup %9047 }
 0xcc7   : > { %v9050_v24 = vpop.eup %9049  ;;  %v12235_v26 = vpop.xlane.xlu1 %3828 }
 0xcc8   : > { %1024 = vadd.xlane.f32.xlu0 %v14441_v36  ;;  %14445 = vst [vmem:[#allocation19_spill] sm:$0xff] %v12235_v26  ;;  %v1749_v36 = vmul.f32 %v9048_v54, %v14446_v13  ;;  %v14451_v54 = vld [vmem:[#allocation83_spill] sm:$0xff] }
 0xcca   : > { %1030 = vadd.xlane.f32.xlu1 %v14442_v43  ;;  %v9052_v43 = vpop.eup %9051  ;;  %v12239_v11 = vpop.xlane.xlu0 %3830 }
 0xccb   : > { %14447 = vst [vmem:[#allocation79_spill] sm:$0xff] %v12239_v11  ;;  %v9054_v2 = vpop.eup %9053  ;;  %v2311_v57 = vmul.f32 %v9052_v43, %v14449_v22  ;;  %v12245_v27 = vpop.xlane.xlu1 %3832  ;;  %v14454_v43 = vld [vmem:[#allocation82_spill] sm:$0xff] }
 0xccc   : > { %1028 = vadd.xlane.f32.xlu0 %v14443_v60  ;;  %v14448_v60 = vld [vmem:[#allocation52_spill] sm:$0xff]  ;;  %v9056_v5 = vpop.eup %9055  ;;  %14450 = vst [vmem:[#allocation14_spill] sm:$0xff] %v12245_v27  ;;  %v2312_v13 = vmul.f32 %v9054_v2, %v14451_v54 }
 0xccd   : > { %v9058_v61 = vpop.eup %9057 }
 0xcce   : > { %v9060_v3 = vpop.eup %9059  ;;  %v12249_v41 = vpop.xlane.xlu0 %3834  ;;  %v2314_v53 = vmul.f32 %v9058_v61, %v14454_v43  ;;  %v14458_v61 = vld [vmem:[#allocation114_spill] sm:$0xff] }
 0xccf   : > { %14452 = vst [vmem:[#allocation108_spill] sm:$0xff] %v12249_v41  ;;  %v9062_v58 = vpop.eup %9061 }
 0xcd0   : > { %1032 = vadd.xlane.f32.xlu0 %v14444_v18  ;;  %v1750_v18 = vmul.f32 %v9050_v24, %v14448_v60  ;;  %v8541_v24 = vpack.i.bf16 %v2312_v13, %v2311_v57  ;;  %v14453_v60 = vld [vmem:[#allocation80_spill] sm:$0xff]  ;;  %v2875_v41 = vmul.f32 %v9062_v58, %v14456_v38  ;;  %v14457_v13 = vld [vmem:[#allocation51_spill] sm:$0xff] }
 0xcd1   : > { %v2313_v11 = vmul.f32 %v9056_v5, %v14453_v60 }
 0xcd2   : > { %v8531_v40 = vpack.i.bf16 %v1750_v18, %v1749_v36  ;;  %v9064_v36 = vpop.eup %9063 }
 0xcd3   : > { %v9066_v18 = vpop.eup %9065  ;;  %v8546_v45 = vpack.i.bf16 %v2314_v53, %v2313_v11  ;;  %v1752_v60 = vmul.f32 %v9064_v36, %v14457_v13  ;;  %v14461_v53 = vld [vmem:[#allocation144_spill] sm:$0xff] }
 0xcd4   : > { %v9068_v2 = vpop.eup %9067  ;;  %v2876_v43 = vmul.f32 %v9066_v18, %v14458_v61 }
 0xcd5   : > { %v9070_v49 = vpop.eup %9069 }
 0xcd6   : > { %v9072_v1 = vpop.eup %9071  ;;  %v8556_v38 = vpack.i.bf16 %v2876_v43, %v2875_v41 }
 0xcd7   : > { %v9074_v58 = vpop.eup %9073 }
 0xcdb   : > { %8532 = vrot.lane.b32.xlu1 %v8531_v40, %s9533_s17  ;;  %v14455_v40 = vld [vmem:[#allocation49_spill] sm:$0xff] }
 0xcdc   : > { %v1751_v26 = vmul.f32 %v9060_v3, %v14455_v40  ;;  %v14459_v3 = vld [vmem:[#allocation113_spill] sm:$0xff] }
 0xcdd   : > { %v2873_v40 = vmul.f32 %v9068_v2, %v14459_v3  ;;  %v14462_v2 = vld [vmem:[#allocation146_spill] sm:$0xff] }
 0xcdf   : > { %8542 = vrot.lane.b32.xlu1 %v8541_v24, %s9531_s15  ;;  %v4305_v22 = vpop.xlane.xlu1 %4304 }
 0xce0   : > { %v4335_v27 = vsub.f32 %v12053_v37, %v4305_v22  ;;  %v8536_v22 = vpack.i.bf16 %v1752_v60, %v1751_v26  ;;  %v3435_v26 = vmul.f32 %v9072_v1, %v14461_v53 }
 0xce1   : > { %v4303_v54 = vpop.xlane.xlu0 %4302 }
 0xce2   : > { %v4352_v57 = vmul.f32 1.442695, %v4335_v27  ;;  %v4334_v5 = vsub.f32 %v12055_v55, %v4303_v54  ;;  %v14460_v55 = vld [vmem:[#allocation115_spill] sm:$0xff]  ;;  %v3436_v54 = vmul.f32 %v9074_v58, %v14462_v2 }
 0xce3   : > { %8547 = vrot.lane.b32.xlu1 %v8546_v45, %s9531_s15  ;;  %v12260_v24 = vpop.xlane.xlu1 %2150  ;;  %v2874_v27 = vmul.f32 %v9070_v49, %v14460_v55 }
 0xce4   : > { %v4350_v37 = vmul.f32 1.442695, %v4334_v5  ;;  %9075 = vpow2.f32 %v4352_v57  ;;  %v8561_v57 = vpack.i.bf16 %v3436_v54, %v3435_v26 }
 0xce5   : > { %v12264_v11 = vpop.xlane.xlu0 %1586  ;;  %v8551_v36 = vpack.i.bf16 %v2874_v27, %v2873_v40 }
 0xce6   : > { %9077 = vpow2.f32 %v4350_v37  ;;  %8537 = vrot.lane.b32.xlu0 %v8536_v22, %s9533_s17 }
 0xce7   : > { %8557 = vrot.lane.b32.xlu1 %v8556_v38, %s9529_s30  ;;  %v12269_v45 = vpop.xlane.xlu1 %2154 }
 0xce9   : > { %v12272_v18 = vpop.xlane.xlu0 %2152 }
 0xcea   : > { %8552 = vrot.lane.b32.xlu0 %v8551_v36, %s9529_s30 }
 0xceb   : > { %v12276_v41 = vpop.xlane.xlu1 %2712 }
 0xced   : > { %v12278_v5 = vpop.xlane.xlu0 %2156 }
 0xcee   : > { %8562 = vrot.lane.b32.xlu0 %v8561_v57, %s9527_s28 }
 0xcef   : > { %v12281_v49 = vpop.xlane.xlu1 %2716 }
 0xcf1   : > { %v12283_v13 = vpop.xlane.xlu0 %2714  ;;  %v12285_v60 = vpop.eup %9075 }
 0xcf3   : > { %v12287_v1 = vpop.eup %9077  ;;  %v12289_v61 = vpop.xlane.xlu1 %3274 }
 0xcf4   : > { %v4430_v43 = vpack.c.bf16 %v12285_v60, %v12287_v1 }
 0xcf5   : > { %v12293_v37 = vpop.xlane.xlu0 %2718 }
 0xcf6   : > { %8363 = vmatprep.mubr.bf16.mxu1 %v4430_v43 }
 0xcf7   : > { %v4309_v22 = vpop.xlane.xlu1 %4308 }
 0xcf8   : > { %v4337_v3 = vsub.f32 %v12078_v17, %v4309_v22 }
 0xcf9   : > { %v12296_v40 = vpop.xlane.xlu0 %3276 }
 0xcfa   : > { %v4356_v38 = vmul.f32 1.442695, %v4337_v3 }
 0xcfb   : > { %v4307_v55 = vpop.xlane.xlu1 %4306 }
 0xcfc   : > { %v4336_v27 = vsub.f32 %v12084_v33, %v4307_v55  ;;  %9079 = vpow2.f32 %v4356_v38 }
 0xcfd   : > { %v12299_v58 = vpop.xlane.xlu0 %3280 }
 0xcfe   : > { %v4354_v36 = vmul.f32 1.442695, %v4336_v27  ;;  %v14463_v27 = vld [vmem:[#allocation30_spill] sm:$0xff] }
 0xcff   : > { %v12301_v53 = vpop.xlane.xlu1 %3278 }
 0xd00   : > { %9081 = vpow2.f32 %v4354_v36 }
 0xd01   : > { %v4311_v26 = vpop.xlane.xlu0 %4310  ;;  %9083 = vrcp.f32 %v12216_v35 }
 0xd02   : > { %v4338_v2 = vsub.f32 %v12093_v21, %v4311_v26  ;;  %9085 = vrcp.f32 %v12220_v16 }
 0xd03   : > { %v12304_v54 = vpop.xlane.xlu1 %3836  ;;  %9087 = vrcp.f32 %v12128_v31 }
 0xd04   : > { %v4358_v43 = vmul.f32 1.442695, %v4338_v2  ;;  %v14464_v2 = vld [vmem:[#allocation31_spill] sm:$0xff] }
 0xd05   : > { %v4317_v57 = vpop.xlane.xlu0 %4316 }
 0xd06   : > { %v4341_v17 = vsub.f32 %v12099_v59, %v4317_v57  ;;  %9089 = vpow2.f32 %v4358_v43 }
 0xd07   : > { %v4313_v22 = vpop.xlane.xlu1 %4312 }
 0xd08   : > { %v4339_v33 = vsub.f32 %v12104_v0, %v4313_v22  ;;  %v4364_v3 = vmul.f32 1.442695, %v4341_v17 }
 0xd09   : > { %v4315_v38 = vpop.xlane.xlu0 %4314  ;;  %v12313_v35 = vpop.eup %9079 }
 0xd0a   : > { %v4360_v55 = vmul.f32 1.442695, %v4339_v33  ;;  %v4340_v21 = vsub.f32 %v12109_v46, %v4315_v38 }
 0xd0b   : > { %1034 = vadd.xlane.f32.xlu1 %v14463_v27  ;;  %v4319_v36 = vpop.xlane.xlu1 %4318 }
 0xd0c   : > { %9091 = vpow2.f32 %v4360_v55  ;;  %v4362_v59 = vmul.f32 1.442695, %v4340_v21  ;;  %v4342_v26 = vsub.f32 %v12112_v14, %v4319_v36 }
 0xd0d   : > { %v12316_v16 = vpop.eup %9081  ;;  %9093 = vpow2.f32 %v4364_v3  ;;  %v4321_v0 = vpop.xlane.xlu0 %4320  ;;  %1036 = vadd.xlane.f32.xlu0 %v14464_v2 }
 0xd0e   : > { %9095 = vpow2.f32 %v4362_v59  ;;  %v4366_v31 = vmul.f32 1.442695, %v4342_v26  ;;  %v4343_v46 = vsub.f32 %v12117_v52, %v4321_v0  ;;  %v4431_v57 = vpack.c.bf16 %v12313_v35, %v12316_v16  ;;  %v9084_v52 = vpop.eup %9083 }
 0xd0f   : > { %9097 = vrcp.f32 %v12144_v29  ;;  %v4323_v17 = vpop.xlane.xlu1 %4322  ;;  %v9086_v21 = vpop.eup %9085 }
 0xd10   : > { %v4368_v43 = vmul.f32 1.442695, %v4343_v46  ;;  %v4344_v22 = vsub.f32 %v12122_v8, %v4323_v17  ;;  %8364 = vmatmul.mubr.bf16.vlgmr.msra.gmra.mxu1 %v4431_v57  ;;  %9099 = vpow2.f32 %v4366_v31  ;;  %v9088_v36 = vpop.eup %9087  ;;  %v3998_v0 = vmul.f32 %v9086_v21, %v12027_v20  ;;  %v14465_v57 = vld [vmem:[#allocation143_spill] sm:$0xff] }
 0xd11   : > { %8380 = vmatpush3.xpose.msk.msra.mxu1 %vm712_vm1, %v11900_v23  ;;  %v4325_v14 = vpop.xlane.xlu0 %4324  ;;  %v3437_v17 = vmul.f32 %v9088_v36, %v14465_v57  ;;  %v14480_v57 = vld [vmem:[#allocation75_spill] sm:$0xff] }
 0xd12   : > { %9101 = vpow2.f32 %v4368_v43  ;;  %v4370_v33 = vmul.f32 1.442695, %v4344_v22  ;;  %v4345_v3 = vsub.f32 %v12125_v25, %v4325_v14  ;;  %8381 = vmatprep.subr.msk.mxu1 %vm712_vm1, %v11926_v12  ;;  %v3997_v25 = vmul.f32 %v9084_v52, %v12023_v19 }
 0xd13   : > { %v4327_v38 = vpop.xlane.xlu1 %4326  ;;  %v12338_v26 = vpop.eup %9089 }
 0xd14   : > { %v4372_v29 = vmul.f32 1.442695, %v4345_v3  ;;  %v4346_v55 = vsub.f32 %v12130_v15, %v4327_v38  ;;  %9103 = vpow2.f32 %v4370_v33  ;;  %v14466_v33 = vld [vmem:[#allocation145_spill] sm:$0xff] }
 0xd15   : > { %8382 = vmatpush3.xpose.msk.msra.mxu1 %vm712_vm1, %v11926_v12  ;;  %v4329_v8 = vpop.xlane.xlu0 %4328 }
 0xd16   : > { %9105 = vpow2.f32 %v4372_v29  ;;  %v4374_v23 = vmul.f32 1.442695, %v4346_v55  ;;  %v4347_v27 = vsub.f32 %v12135_v50, %v4329_v8  ;;  %8383 = vmatprep.subr.msk.mxu1 %vm712_vm1, %v11935_v48  ;;  %v8571_v50 = vpack.i.bf16 %v3998_v0, %v3997_v25 }
 0xd17   : > { %v12336_v59 = vpop.xlane.xlu1 %3840 }
 0xd18   : > { %v4376_v15 = vmul.f32 1.442695, %v4347_v27  ;;  %9107 = vpow2.f32 %v4374_v23 }
 0xd19   : > { %v12341_v2 = vpop.eup %9091  ;;  %8384 = vmatpush3.xpose.msk.msra.mxu1 %vm712_vm1, %v11935_v48  ;;  %v4333_v25 = vpop.xlane.xlu0 %4332 }
 0xd1a   : > { %v12345_v12 = vpop.eup %9093  ;;  %9109 = vpow2.f32 %v4376_v15  ;;  %8385 = vmatprep.subr.msk.mxu1 %vm712_vm1, %v11905_v51  ;;  %v4432_v19 = vpack.c.bf16 %v12341_v2, %v12338_v26  ;;  %v4349_v36 = vsub.f32 %v12141_v10, %v4333_v25 }
 0xd1b   : > { %v12351_v31 = vpop.eup %9095  ;;  %v12353_v46 = vpop.xlane.xlu1 %1588 }
 0xd1c   : > { %v9098_v20 = vpop.eup %9097  ;;  %8572 = vrot.lane.b32.xlu1 %v8571_v50, %s9525_s23  ;;  %8367 = vmatprep.mubr.bf16.mxu1 %v4432_v19  ;;  %v4433_v48 = vpack.c.bf16 %v12345_v12, %v12351_v31 }
 0xd1d   : > { %8386 = vmatpush3.xpose.msk.msra.mxu1 %vm712_vm1, %v11905_v51  ;;  %v12361_v43 = vpop.eup %9099  ;;  %v3438_v3 = vmul.f32 %v9098_v20, %v14466_v33  ;;  %v14478_v20 = vld [vmem:[#allocation6_spill] sm:$0xff]  ;;  %v14482_v33 = vld [vmem:[#allocation53_spill] sm:$0xff] }
 0xd1e   : > { %8387 = vmatprep.subr.msk.mxu1 %vm712_vm1, %v11942_v44  ;;  %8368 = vmatmul.mubr.bf16.gmra.mxu1 %v4433_v48 }
 0xd1f   : > { %v12365_v22 = vpop.eup %9101  ;;  %v12367_v14 = vpop.xlane.xlu1 %1592  ;;  %v8566_v51 = vpack.i.bf16 %v3438_v3, %v3437_v17  ;;  %v14481_v17 = vld [vmem:[#allocation3_spill] sm:$0xff] }
 0xd20   : > { %v4434_v52 = vpack.c.bf16 %v12365_v22, %v12361_v43 }
 0xd21   : > { %8388 = vmatpush3.xpose.msk.msra.mxu1 %vm712_vm1, %v11942_v44  ;;  %v12374_v38 = vpop.eup %9103 }
 0xd22   : > { %8389 = vmatprep.subr.msk.mxu1 %vm712_vm1, %v11913_v9  ;;  %8371 = vmatprep.mubr.bf16.mxu1 %v4434_v52 }
 0xd23   : > { %v12378_v29 = vpop.eup %9105  ;;  %8567 = vrot.lane.b32.xlu0 %v8566_v51, %s9527_s28  ;;  %v12381_v55 = vpop.xlane.xlu1 %2158  ;;  %v14483_v51 = vld [vmem:[#allocation73_spill] sm:$0xff] }
 0xd24   : > { %14467 = vst [vmem:[#allocation77_spill] sm:$0xff] %v12381_v55  ;;  %v4435_v21 = vpack.c.bf16 %v12378_v29, %v12374_v38 }
 0xd25   : > { %8390 = vmatpush3.xpose.msk.msra.mxu1 %vm712_vm1, %v11913_v9  ;;  %v12387_v44 = vpop.eup %9107 }
 0xd26   : > { %8391 = vmatprep.subr.msk.mxu1 %vm712_vm1, %v11951_v32  ;;  %8372 = vmatmul.mubr.bf16.gmra.mxu1 %v4435_v21  ;;  %v14484_v21 = vld [vmem:[#allocation55_spill] sm:$0xff] }
 0xd27   : > { %v12391_v8 = vpop.eup %9109  ;;  %v12393_v23 = vpop.xlane.xlu1 %2162 }
 0xd28   : > { %v4436_v27 = vpack.c.bf16 %v12391_v8, %v12387_v44 }
 0xd29   : > { %8392 = vmatpush3.xpose.msk.msra.mxu1 %vm712_vm1, %v11951_v32  ;;  %v4380_v32 = vmul.f32 1.442695, %v4349_v36  ;;  %v14485_v36 = vld [vmem:[#allocation104_spill] sm:$0xff] }
 0xd2a   : > { %8393 = vmatprep.subr.msk.mxu1 %vm712_vm1, %v11921_v62  ;;  %8375 = vmatprep.mubr.bf16.mxu1 %v4436_v27 }
 0xd2b   : > { %v12401_v9 = vpop.xlane.xlu1 %2720  ;;  %9111 = vpow2.f32 %v4380_v32 }
 0xd2c   : > { %14468 = vst [vmem:[#allocation111_spill] sm:$0xff] %v12401_v9 }
 0xd2d   : > { %8394 = vmatpush3.xpose.msk.msra.mxu1 %vm712_vm1, %v11921_v62 }
 0xd2e   : > { %8395 = vmatprep.subr.msk.mxu1 %vm712_vm1, %v11960_v4 }
 0xd2f   : > { %v12408_v15 = vpop.xlane.xlu1 %2724 }
 0xd30   : > { %14469 = vst [vmem:[#allocation78_spill] sm:$0xff] %v12408_v15 }
 0xd31   : > { %8396 = vmatpush3.xpose.msk.msra.mxu1 %vm712_vm1, %v11960_v4  ;;  %v14470_v4 = vld [vmem:[#allocation32_spill] sm:$0xff] }
 0xd32   : > { %8397 = vmatprep.subr.msk.mxu1 %vm712_vm1, %v11964_v30 }
 0xd33   : > { %v4331_v0 = vpop.xlane.xlu1 %4330 }
 0xd34   : > { %v4348_v50 = vsub.f32 %v12174_v28, %v4331_v0  ;;  %v14477_v28 = vld [vmem:[#allocation66_spill] sm:$0xff] }
 0xd35   : > { %8398 = vmatpush3.xpose.msk.msra.mxu1 %vm712_vm1, %v11964_v30  ;;  %v14471_v30 = vld [vmem:[#allocation74_spill] sm:$0xff] }
 0xd36   : > { %v4378_v62 = vmul.f32 1.442695, %v4348_v50  ;;  %8399 = vmatprep.subr.msk.mxu1 %vm712_vm1, %v11932_v42  ;;  %v14486_v50 = vld [vmem:[#allocation84_spill] sm:$0xff] }
 0xd38   : > { %9113 = vpow2.f32 %v4378_v62  ;;  %v12439_v10 = vpop.eup %9111 }
 0xd39   : > { %8400 = vmatpush3.xpose.msk.msra.mxu1 %vm712_vm1, %v11932_v42  ;;  %9115 = vrcp.f32 %v12148_v47  ;;  %v14472_v42 = vld [vmem:[#allocation128_spill] sm:$0xff]  ;;  %v14473_v47 = vld [vmem:[#allocation33_spill] sm:$0xff] }
 0xd3a   : > { %8401 = vmatprep.subr.msk.mxu1 %vm712_vm1, %v11970_v7  ;;  %9117 = vrcp.f32 %v12158_v39 }
 0xd3b   : > { %9119 = vrcp.f32 %v12162_v34  ;;  %v14475_v34 = vld [vmem:[#allocation106_spill] sm:$0xff] }
 0xd3c   : > { %9121 = vrcp.f32 %v14471_v30  ;;  %v14487_v30 = vld [vmem:[#allocation105_spill] sm:$0xff] }
 0xd3d   : > { %8402 = vmatpush3.xpose.msk.msra.mxu1 %vm712_vm1, %v11970_v7  ;;  %9123 = vrcp.f32 %v12225_v63  ;;  %v14474_v7 = vld [vmem:[#allocation107_spill] sm:$0xff] }
 0xd3e   : > { %8403 = vmatprep.subr.msk.mxu1 %vm712_vm1, %v11946_v6  ;;  %9125 = vrcp.f32 %v14474_v7  ;;  %v14489_v7 = vld [vmem:[#allocation98_spill] sm:$0xff] }
 0xd3f   : > { %9127 = vrcp.f32 %v12229_v56  ;;  %v14479_v56 = vld [vmem:[#allocation96_spill] sm:$0xff] }
 0xd40   : > { %1038 = vadd.xlane.f32.xlu1 %v14470_v4  ;;  %9129 = vrcp.f32 %v14475_v34  ;;  %v14490_v34 = vld [vmem:[#allocation86_spill] sm:$0xff] }
 0xd41   : > { %8404 = vmatpush3.xpose.msk.msra.mxu1 %vm712_vm1, %v11946_v6  ;;  %v14476_v6 = vld [vmem:[#allocation72_spill] sm:$0xff] }
 0xd42   : > { %8405 = vmatprep.subr.msk.mxu1 %vm712_vm1, %v14472_v42  ;;  %1040 = vadd.xlane.f32.xlu0 %v14473_v47  ;;  %9131 = vrcp.f32 %v14476_v6 }
 0xd43   : > { %9133 = vrcp.f32 %v14478_v20 }
 0xd44   : > { %9135 = vrcp.f32 %v14480_v57 }
 0xd45   : > { %v12442_v39 = vpop.eup %9113  ;;  %8406 = vmatpush3.xpose.msk.msra.mxu1 %vm712_vm1, %v14472_v42  ;;  %9137 = vrcp.f32 %v14483_v51  ;;  %v14488_v42 = vld [vmem:[#allocation69_spill] sm:$0xff]  ;;  %v14495_v51 = vld [vmem:[#allocation8_spill] sm:$0xff] }
 0xd46   : > { %8407 = vmatprep.subr.msk.mxu1 %vm712_vm1, %v14477_v28  ;;  %v4437_v63 = vpack.c.bf16 %v12439_v10, %v12442_v39  ;;  %v9116_v19 = vpop.eup %9115  ;;  %9139 = vrcp.f32 %v14485_v36  ;;  %v14497_v36 = vld [vmem:[#allocation54_spill] sm:$0xff] }
 0xd47   : > { %v9118_v48 = vpop.eup %9117  ;;  %v1755_v3 = vmul.f32 %v9116_v19, %v14482_v33  ;;  %9141 = vrcp.f32 %v14487_v30  ;;  %v14494_v33 = vld [vmem:[#allocation129_spill] sm:$0xff] }
 0xd48   : > { %8376 = vmatmul.mubr.bf16.gmra.mxu1 %v4437_v63  ;;  %v9120_v52 = vpop.eup %9119  ;;  %v1756_v27 = vmul.f32 %v9118_v48, %v14484_v21  ;;  %v14491_v63 = vld [vmem:[#allocation99_spill] sm:$0xff]  ;;  %v14492_v48 = vld [vmem:[#allocation116_spill] sm:$0xff]  ;;  %v14496_v21 = vld [vmem:[#allocation118_spill] sm:$0xff] }
 0xd49   : > { %8408 = vmatpush3.xpose.msk.msra.mxu1 %vm712_vm1, %v14477_v28  ;;  %8411 = vmatprep.mubr.msk.f32.mxu1 %vm712_vm1, %v14479_v56  ;;  %v9122_v25 = vpop.eup %9121  ;;  %v2317_v62 = vmul.f32 %v9120_v52, %v14486_v50 }
 0xd4a   : > { %8409 = vmatprep.subr.msk.mxu1 %vm712_vm1, %v14481_v17  ;;  %v9124_v32 = vpop.eup %9123  ;;  %v8586_v0 = vpack.i.bf16 %v1756_v27, %v1755_v3  ;;  %v2318_v6 = vmul.f32 %v9122_v25, %v14490_v34  ;;  %v14501_v34 = vld [vmem:[#allocation85_spill] sm:$0xff] }
 0xd4b   : > { %v9126_v4 = vpop.eup %9125  ;;  %v3999_v19 = vmul.f32 %v9124_v32, %v14491_v63  ;;  %v14502_v63 = vld [vmem:[#allocation38_spill] sm:$0xff] }
 0xd4c   : > { %v9128_v47 = vpop.eup %9127  ;;  %v8596_v56 = vpack.i.bf16 %v2318_v6, %v2317_v62  ;;  %v2879_v57 = vmul.f32 %v9126_v4, %v14492_v48  ;;  %v14498_v62 = vld [vmem:[#allocation103_spill] sm:$0xff]  ;;  %v14499_v4 = vld [vmem:[#allocation56_spill] sm:$0xff] }
 0xd4d   : > { %8410 = vmatpush3.xpose.msk.msra.mxu1 %vm712_vm1, %v14481_v17  ;;  %v9130_v28 = vpop.eup %9129  ;;  %v14493_v17 = vld [vmem:[#allocation101_spill] sm:$0xff]  ;;  %v4000_v3 = vmul.f32 %v9128_v47, %v14494_v33  ;;  %v14500_v47 = vld [vmem:[#allocation71_spill] sm:$0xff]  ;;  %v14504_v48 = vld [vmem:[#allocation132_spill] sm:$0xff] }
 0xd4e   : > { %v2880_v27 = vmul.f32 %v9130_v28, %v14496_v21  ;;  %v14508_v21 = vld [vmem:[#allocation134_spill] sm:$0xff] }
 0xd4f   : > { %v9132_v20 = vpop.eup %9131  ;;  %v8576_v25 = vpack.i.bf16 %v4000_v3, %v3999_v19  ;;  %v14503_v19 = vld [vmem:[#allocation87_spill] sm:$0xff] }
 0xd50   : > { %8412 = vmatmul.mubr.msk.f32.vlgmr.msra.gmra.mxu1 %vm712_vm1, %v14488_v42  ;;  %v9134_v52 = vpop.eup %9133  ;;  %v1753_v32 = vmul.f32 %v9132_v20, %v14497_v36  ;;  %v8606_v50 = vpack.i.bf16 %v2880_v27, %v2879_v57  ;;  %v14506_v3 = vld [vmem:[#allocation39_spill] sm:$0xff]  ;;  %v14510_v36 = vld [vmem:[#allocation65_spill] sm:$0xff] }
 0xd51   : > { %8587 = vrot.lane.b32.xlu1 %v8586_v0, %s9533_s17  ;;  %8414 = vmatprep.mubr.msk.f32.mxu1 %vm712_vm1, %v14489_v7  ;;  %v9136_v0 = vpop.eup %9135  ;;  %v1754_v30 = vmul.f32 %v9134_v52, %v14499_v4  ;;  %v14507_v52 = vld [vmem:[#allocation119_spill] sm:$0xff]  ;;  %v12517_v4 = vpop.xlane.xlu0 %3838 }
 0xd52   : > { %v9138_v42 = vpop.eup %9137  ;;  %v2315_v6 = vmul.f32 %v9136_v0, %v14501_v34  ;;  %v14512_v0 = vld [vmem:[#allocation67_spill] sm:$0xff] }
 0xd53   : > { %v8581_v7 = vpack.i.bf16 %v1754_v30, %v1753_v32  ;;  %v9140_v28 = vpop.eup %9139  ;;  %v2316_v20 = vmul.f32 %v9138_v42, %v14503_v19  ;;  %v14511_v32 = vld [vmem:[#allocation159_spill] sm:$0xff] }
 0xd54   : > { %8415 = vmatmul.mubr.msk.f32.gmra.mxu1 %vm712_vm1, %v14493_v17  ;;  %v14505_v17 = vld [vmem:[#allocation117_spill] sm:$0xff] }
 0xd55   : > { %8597 = vrot.lane.b32.xlu1 %v8596_v56, %s9531_s15  ;;  %8417 = vmatprep.mubr.msk.f32.mxu1 %vm712_vm1, %v14495_v51  ;;  %v9142_v56 = vpop.eup %9141  ;;  %v8591_v57 = vpack.i.bf16 %v2316_v20, %v2315_v6  ;;  %v2877_v33 = vmul.f32 %v9140_v28, %v14505_v17  ;;  %v12519_v30 = vpop.xlane.xlu0 %3842 }
 0xd56   : > { %v2878_v51 = vmul.f32 %v9142_v56, %v14507_v52 }
 0xd58   : > { %8577 = vrot.lane.b32.xlu0 %v8576_v25, %s9525_s23  ;;  %8418 = vmatmul.mubr.msk.f32.gmra.mxu1 %vm712_vm1, %v14498_v62  ;;  %v8601_v27 = vpack.i.bf16 %v2878_v51, %v2877_v33  ;;  %v14509_v25 = vld [vmem:[#allocation5_spill] sm:$0xff]  ;;  %v14514_v62 = vmov 0  }
 0xd59   : > { %8607 = vrot.lane.b32.xlu1 %v8606_v50, %s9529_s30  ;;  %8420 = vmatprep.mubr.msk.f32.mxu1 %vm712_vm1, %v14500_v47  ;;  %v14513_v50 = vld [vmem:[#allocation97_spill] sm:$0xff]  ;;  %v12523_v42 = vpop.xlane.xlu0 %1590 }
 0xd5c   : > { %8582 = vrot.lane.b32.xlu0 %v8581_v7, %s9533_s17  ;;  %8421 = vmatmul.mubr.msk.f32.gmra.mxu1 %vm712_vm1, %v14502_v63 }
 0xd5d   : > { %8423 = vmatprep.mubr.msk.f32.mxu1 %vm712_vm1, %v14504_v48  ;;  %v12528_v47 = vpop.xlane.xlu0 %1594 }
 0xd60   : > { %8592 = vrot.lane.b32.xlu0 %v8591_v57, %s9531_s15  ;;  %8424 = vmatmul.mubr.msk.f32.gmra.mxu1 %vm712_vm1, %v14506_v3 }
 0xd61   : > { %8426 = vmatprep.mubr.msk.f32.mxu1 %vm712_vm1, %v14508_v21  ;;  %v12533_v7 = vpop.xlane.xlu0 %2160 }
 0xd62   : > { %14515 = vst [vmem:[#allocation109_spill] sm:$0xff] %v12533_v7 }
 0xd64   : > { %8602 = vrot.lane.b32.xlu0 %v8601_v27, %s9529_s30  ;;  %8427 = vmatmul.mubr.msk.f32.gmra.mxu1 %vm712_vm1, %v14509_v25 }
 0xd65   : > { %8429 = vmatprep.mubr.msk.f32.mxu1 %vm712_vm1, %v14510_v36 }
 0xd68   : > { %8430 = vmatmul.mubr.msk.f32.gmra.mxu1 %vm712_vm1, %v14511_v32 }
 0xd69   : > { %8432 = vmatprep.mubr.msk.f32.mxu1 %vm712_vm1, %v14512_v0 }
 0xd6c   : > { %8433 = vmatmul.mubr.msk.f32.gmra.mxu1 %vm712_vm1, %v14513_v50 }
 0xd6d   : > { %6266 = vmatprep.mubr.bf16.mxu1 %v14514_v62 }
 0xd7d   : > { %4382 = vadd.xlane.f32.xlu1 %v12287_v1 }
 0xd81   : > { %4386 = vadd.xlane.f32.xlu1 %v12316_v16 }
 0xd83   : > { %4384 = vadd.xlane.f32.xlu0 %v12285_v60  ;;  %v12538_v60 = vpop.xlane.xlu0 %2164 }
 0xd85   : > { %4390 = vadd.xlane.f32.xlu1 %v12338_v26 }
 0xd87   : > { %4388 = vadd.xlane.f32.xlu0 %v12313_v35  ;;  %v12543_v1 = vpop.xlane.xlu0 %2722  ;;  %v12546_v35 = vpop.xlane.xlu1 %3282 }
 0xd88   : > { %14516 = vst [vmem:[#allocation139_spill] sm:$0xff] %v12543_v1  ;;  %14517 = vst [vmem:[#allocation110_spill] sm:$0xff] %v12546_v35 }
 0xd89   : > { %4394 = vadd.xlane.f32.xlu1 %v12351_v31 }
 0xd8b   : > { %4392 = vadd.xlane.f32.xlu0 %v12341_v2  ;;  %v12549_v16 = vpop.xlane.xlu0 %2726  ;;  %v12551_v26 = vpop.xlane.xlu1 %3286 }
 0xd8c   : > { %14518 = vst [vmem:[#allocation142_spill] sm:$0xff] %v12549_v16  ;;  %14519 = vst [vmem:[#allocation140_spill] sm:$0xff] %v12551_v26 }
 0xd8d   : > { %4398 = vadd.xlane.f32.xlu1 %v12361_v43 }
 0xd8f   : > { %4396 = vadd.xlane.f32.xlu0 %v12345_v12  ;;  %v12553_v2 = vpop.xlane.xlu0 %3284  ;;  %v12555_v12 = vpop.xlane.xlu1 %3844 }
 0xd90   : > { %14520 = vst [vmem:[#allocation141_spill] sm:$0xff] %v12553_v2  ;;  %14521 = vst [vmem:[#allocation23_spill] sm:$0xff] %v12555_v12 }
 0xd91   : > { %4402 = vadd.xlane.f32.xlu1 %v12374_v38 }
 0xd93   : > { %4400 = vadd.xlane.f32.xlu0 %v12365_v22  ;;  %v12557_v31 = vpop.xlane.xlu0 %3288  ;;  %v12559_v43 = vpop.xlane.xlu1 %3848 }
 0xd94   : > { %14522 = vst [vmem:[#allocation25_spill] sm:$0xff] %v12557_v31  ;;  %14523 = vst [vmem:[#allocation22_spill] sm:$0xff] %v12559_v43 }
 0xd95   : > { %4406 = vadd.xlane.f32.xlu1 %v12387_v44 }
 0xd97   : > { %4404 = vadd.xlane.f32.xlu0 %v12378_v29  ;;  %v12561_v22 = vpop.xlane.xlu0 %3846  ;;  %v12563_v38 = vpop.xlane.xlu1 %1018 }
 0xd98   : > { %14524 = vst [vmem:[#allocation26_spill] sm:$0xff] %v12561_v22  ;;  %14525 = vst [vmem:[#allocation24_spill] sm:$0xff] %v12563_v38 }
 0xd99   : > { %4410 = vadd.xlane.f32.xlu1 %v12442_v39 }
 0xd9b   : > { %4408 = vadd.xlane.f32.xlu0 %v12391_v8  ;;  %v12565_v29 = vpop.xlane.xlu0 %3850  ;;  %v12567_v44 = vpop.xlane.xlu1 %1022 }
 0xd9c   : > { %14526 = vst [vmem:[#allocation28_spill] sm:$0xff] %v12565_v29  ;;  %14527 = vst [vmem:[#allocation27_spill] sm:$0xff] %v12567_v44 }
 0xd9f   : > { %4412 = vadd.xlane.f32.xlu0 %v12439_v10  ;;  %v12569_v8 = vpop.xlane.xlu0 %1020  ;;  %v12571_v10 = vpop.xlane.xlu1 %1026 }
 0xda0   : > { %14528 = vst [vmem:[#allocation29_spill] sm:$0xff] %v12569_v8  ;;  %14529 = vst [vmem:[#allocation50_spill] sm:$0xff] %v12571_v10 }
 0xda3   : > { %v12573_v39 = vpop.xlane.xlu0 %1024  ;;  %v12575_v34 = vpop.xlane.xlu1 %1030 }
 0xda4   : > { %14530 = vst [vmem:[#allocation52_spill] sm:$0xff] %v12573_v39  ;;  %14531 = vst [vmem:[#allocation81_spill] sm:$0xff] %v12575_v34 }
 0xda7   : > { %v12577_v6 = vpop.xlane.xlu0 %1028  ;;  %v12579_v28 = vpop.permute.xlu1 %8532 }
 0xda8   : > { %14532 = vst [vmem:[#allocation83_spill] sm:$0xff] %v12577_v6  ;;  %14533 = vst [vmem:[#allocation80_spill] sm:$0xff] %v12579_v28 }
 0xdab   : > { %v12581_v63 = vpop.xlane.xlu0 %1032  ;;  %v12583_v19 = vpop.permute.xlu1 %8542 }
 0xdac   : > { %14534 = vst [vmem:[#allocation82_spill] sm:$0xff] %v12581_v63  ;;  %14535 = vst [vmem:[#allocation49_spill] sm:$0xff] %v12583_v19 }
 0xdaf   : > { %v12585_v20 = vpop.permute.xlu0 %8537  ;;  %v12587_v56 = vpop.permute.xlu1 %8547 }
 0xdb0   : > { %14536 = vst [vmem:[#allocation112_spill] sm:$0xff] %v12585_v20  ;;  %14537 = vst [vmem:[#allocation51_spill] sm:$0xff] %v12587_v56 }
 0xdb3   : > { %v12589_v48 = vpop.permute.xlu0 %8552  ;;  %v12595_v33 = vpop.permute.xlu1 %8557 }
 0xdb4   : > { %14538 = vst [vmem:[#allocation114_spill] sm:$0xff] %v12589_v48  ;;  %14539 = vst [vmem:[#allocation113_spill] sm:$0xff] %v12595_v33 }
 0xdb7   : > { %v12597_v3 = vpop.permute.xlu0 %8562  ;;  %v12601_v51 = vpop.xlane.xlu1 %1034 }
 0xdb8   : > { %14540 = vst [vmem:[#allocation115_spill] sm:$0xff] %v12597_v3  ;;  %14541 = vst [vmem:[#allocation144_spill] sm:$0xff] %v12601_v51 }
 0xdbb   : > { %v12603_v21 = vpop.xlane.xlu0 %1036  ;;  %v12609_v36 = vpop.permute.xlu1 %8572 }
 0xdbc   : > { %14542 = vst [vmem:[#allocation146_spill] sm:$0xff] %v12603_v21  ;;  %14543 = vst [vmem:[#allocation30_spill] sm:$0xff] %v12609_v36 }
 0xdbf   : > { %v12611_v32 = vpop.permute.xlu0 %8567 }
 0xdc0   : > { %14544 = vst [vmem:[#allocation31_spill] sm:$0xff] %v12611_v32 }
 0xdc9   : > { %v12615_v50 = vpop.xlane.xlu1 %1038 }
 0xdca   : > { %14545 = vst [vmem:[#allocation143_spill] sm:$0xff] %v12615_v50 }
 0xdcb   : > { %v12617_v62 = vpop.xlane.xlu0 %1040 }
 0xdcc   : > { %14546 = vst [vmem:[#allocation145_spill] sm:$0xff] %v12617_v62 }
 0xdcd   : > { %v12621_v33 = vpop.permute.xlu1 %8587 }
 0xdce   : > { %14547 = vst [vmem:[#allocation32_spill] sm:$0xff] %v12621_v33 }
 0xdcf   : > { %v12623_v48 = vpop.permute.xlu0 %8577 }
 0xdd0   : > { %v12591_v57 = vpop.f32.mrf.mxu1  ;;  %14548 = vst [vmem:[#allocation74_spill] sm:$0xff] %v12623_v48 }
 0xdd1   : > { %v12629_v56 = vpop.permute.xlu1 %8597 }
 0xdd2   : > { %v12593_v17 = vpop.f32.mrf.mxu1  ;;  %14550 = vst [vmem:[#allocation33_spill] sm:$0xff] %v12629_v56 }
 0xdd3   : > { %v12631_v36 = vpop.permute.xlu0 %8582 }
 0xdd4   : > { %v12599_v52 = vpop.f32.mrf.mxu1  ;;  %14551 = vst [vmem:[#allocation107_spill] sm:$0xff] %v12631_v36 }
 0xdd5   : > { %v12635_v19 = vpop.permute.xlu1 %8607 }
 0xdd6   : > { %v12605_v27 = vpop.f32.mrf.mxu1  ;;  %14552 = vst [vmem:[#allocation106_spill] sm:$0xff] %v12635_v19 }
 0xdd7   : > { %v12637_v50 = vpop.permute.xlu0 %8592 }
 0xdd8   : > { %14553 = vst [vmem:[#allocation72_spill] sm:$0xff] %v12637_v50 }
 0xddb   : > { %v12643_v48 = vpop.permute.xlu0 %8602 }
 0xddc   : > { %14555 = vst [vmem:[#allocation6_spill] sm:$0xff] %v12643_v48 }
 0xdde   : > { %v12607_v25 = vpop.f32.mrf.mxu1 }
 0xde0   : > { %v12613_v0 = vpop.f32.mrf.mxu1 }
 0xde2   : > { %v12619_v3 = vpop.f32.mrf.mxu1 }
 0xde4   : > { %v12625_v21 = vpop.f32.mrf.mxu1 }
 0xde6   : > { %v12627_v51 = vpop.f32.mrf.mxu1 }
 0xde7   : > { %14549 = vst [vmem:[#allocation128_spill] sm:$0xff] %v12627_v51 }
 0xde8   : > { %v12633_v32 = vpop.f32.mrf.mxu1 }
 0xdea   : > { %v12639_v62 = vpop.f32.mrf.mxu1 }
 0xdeb   : > { %14554 = vst [vmem:[#allocation66_spill] sm:$0xff] %v12639_v62 }
 0xdec   : > { %v12641_v63 = vpop.f32.mrf.mxu1 }
 0xe06   : > { %v4383_v33 = vpop.xlane.xlu1 %4382 }
 0xe08   : > { %v12645_v6 = vpop.f32.mrf.mxu1 }
 0xe0a   : > { %v12647_v34 = vpop.f32.mrf.mxu1  ;;  %v4387_v56 = vpop.xlane.xlu1 %4386 }
 0xe0b   : > { %9143 = vrcp.f32 %v4387_v56 }
 0xe0c   : > { %v4385_v20 = vpop.xlane.xlu0 %4384  ;;  %v12649_v36 = vpop.f32.mrf.mxu1 }
 0xe0d   : > { %9145 = vrcp.f32 %v4385_v20 }
 0xe0e   : > { %v12651_v10 = vpop.f32.mrf.mxu1  ;;  %v4391_v19 = vpop.xlane.xlu1 %4390 }
 0xe10   : > { %v4389_v50 = vpop.xlane.xlu0 %4388  ;;  %v12653_v28 = vpop.f32.mrf.mxu1 }
 0xe11   : > { %9147 = vrcp.f32 %v4389_v50 }
 0xe12   : > { %9149 = vrcp.f32 %v4383_v33  ;;  %v4769_v44 = vpop.f32.mrf.mxu1  ;;  %v12655_v48 = vpop.xlane.xlu1 %4394 }
 0xe13   : > { %9151 = vrcp.f32 %v4391_v19  ;;  %v12657_v39 = vmul.f32 0.35355338, %v4769_v44 }
 0xe14   : > { %v4393_v8 = vpop.xlane.xlu0 %4392  ;;  %v8416_v38 = vpop.f32.mrf.mxu1 }
 0xe15   : > { %9153 = vrcp.f32 %v4393_v8  ;;  %4864 = vmax.xlane.f32.xlu0 %v12657_v39  ;;  %v12660_v56 = vmul.f32 0.35355338, %v8416_v38 }
 0xe16   : > { %v4779_v12 = vpop.f32.mrf.mxu1  ;;  %v4399_v22 = vpop.xlane.xlu1 %4398 }
 0xe17   : > { %v12669_v44 = vmul.f32 0.35355338, %v4779_v12  ;;  %9155 = vrcp.f32 %v4399_v22 }
 0xe18   : > { %v12662_v20 = vpop.xlane.xlu0 %4396  ;;  %v12664_v43 = vpop.f32.mrf.mxu1 }
 0xe19   : > { %4870 = vmax.xlane.f32.xlu0 %v12660_v56  ;;  %v9144_v19 = vpop.eup %9143 }
 0xe1a   : > { %v4789_v33 = vpop.f32.mrf.mxu1  ;;  %v12667_v50 = vpop.xlane.xlu1 %4402  ;;  %v4561_v51 = vmul.f32 %v9144_v19, %v12591_v57 }
 0xe1b   : > { %v9146_v35 = vpop.eup %9145  ;;  %v12672_v9 = vmul.f32 0.35355338, %v4789_v33 }
 0xe1c   : > { %v4401_v8 = vpop.xlane.xlu0 %4400  ;;  %v8422_v29 = vpop.f32.mrf.mxu1  ;;  %v4560_v62 = vmul.f32 %v9146_v35, %v12605_v27 }
 0xe1d   : > { %9157 = vrcp.f32 %v4401_v8  ;;  %4868 = vmax.xlane.f32.xlu0 %v12669_v44  ;;  %v12683_v7 = vmul.f32 0.35355338, %v8422_v29 }
 0xe1e   : > { %v9148_v38 = vpop.eup %9147  ;;  %v4799_v2 = vpop.f32.mrf.mxu1 }
 0xe1f   : > { %v4407_v31 = vpop.xlane.xlu1 %4406  ;;  %v9150_v26 = vpop.eup %9149  ;;  %v4562_v1 = vmul.f32 %v9148_v38, %v12599_v52 }
 0xe20   : > { %v9152_v12 = vpop.eup %9151  ;;  %v12676_v15 = vpop.xlane.xlu0 %4404  ;;  %v4559_v55 = vmul.f32 %v9150_v26, %v12593_v17  ;;  %9159 = vrcp.f32 %v4407_v31  ;;  %v12695_v26 = vmul.f32 0.35355338, %v4799_v2 }
 0xe21   : > { %v12678_v22 = vpop.f32.mrf.mxu1  ;;  %4872 = vmax.xlane.f32.xlu0 %v12672_v9  ;;  %v8611_v8 = vpack.i.bf16 %v4562_v1, %v4561_v51  ;;  %v12687_v57 = vmul.f32 %v9152_v12, %v12613_v0 }
 0xe22   : > { %v9154_v16 = vpop.eup %9153  ;;  %v8616_v1 = vpack.i.bf16 %v4560_v62, %v4559_v55 }
 0xe23   : > { %v4809_v33 = vpop.f32.mrf.mxu1  ;;  %8612 = vrot.lane.b32.xlu1 %v8611_v8, %s9523_s21  ;;  %v12690_v52 = vmul.f32 %v9154_v16, %v12625_v21  ;;  %v4411_v19 = vpop.xlane.xlu1 %4410 }
 0xe24   : > { %v4409_v38 = vpop.xlane.xlu0 %4408  ;;  %v9156_v31 = vpop.eup %9155  ;;  %v12699_v51 = vmul.f32 0.35355338, %v4809_v33 }
 0xe25   : > { %9161 = vrcp.f32 %v4409_v38  ;;  %4878 = vmax.xlane.f32.xlu0 %v12683_v7  ;;  %v8428_v29 = vpop.f32.mrf.mxu1  ;;  %v12702_v21 = vmul.f32 %v9156_v31, %v12633_v32 }
 0xe26   : > { %9163 = vrcp.f32 %v4411_v19  ;;  %v12710_v27 = vmul.f32 0.35355338, %v8428_v29 }
 0xe27   : > { %8617 = vrot.lane.b32.xlu1 %v8616_v1, %s9523_s21  ;;  %14556 = vst [vmem:[#allocation96_spill] sm:$0xff] %v12702_v21  ;;  %v4819_v62 = vpop.f32.mrf.mxu1 }
 0xe28   : > { %v4413_v17 = vpop.xlane.xlu0 %4412  ;;  %v12713_v33 = vmul.f32 0.35355338, %v4819_v62 }
 0xe29   : > { %9165 = vrcp.f32 %v4413_v17  ;;  %4876 = vmax.xlane.f32.xlu0 %v12695_v26  ;;  %v8431_v12 = vpop.f32.mrf.mxu1 }
 0xe2a   : > { %v9158_v16 = vpop.eup %9157  ;;  %v12724_v29 = vmul.f32 0.35355338, %v8431_v12  ;;  %v14563_v12 = vld [vmem:[#allocation137_spill] sm:$0xff] }
 0xe2b   : > { %v12705_v55 = vmul.f32 %v9158_v16, %v12641_v63  ;;  %v4829_v38 = vpop.f32.mrf.mxu1 }
 0xe2d   : > { %14557 = vst [vmem:[#allocation75_spill] sm:$0xff] %v12705_v55  ;;  %4880 = vmax.xlane.f32.xlu0 %v12699_v51  ;;  %v9160_v0 = vpop.eup %9159 }
 0xe2e   : > { %v12716_v32 = vmul.f32 %v9160_v0, %v12647_v34  ;;  %v8434_v34 = vpop.f32.mrf.mxu1  ;;  %v14562_v0 = vld [vmem:[#allocation135_spill] sm:$0xff] }
 0xe2f   : > { %v12735_v62 = vmul.f32 0.35355338, %v8434_v34  ;;  %9167 = vrcp.f32 %v14562_v0  ;;  %v14565_v34 = vld [vmem:[#allocation150_spill] sm:$0xff] }
 0xe30   : > { %14558 = vst [vmem:[#allocation3_spill] sm:$0xff] %v12716_v32  ;;  %9169 = vrcp.f32 %v14563_v12  ;;  %v4839_v2 = vpop.f32.mrf.mxu1  ;;  %v14571_v32 = vld [vmem:[#allocation136_spill] sm:$0xff] }
 0xe31   : > { %4886 = vmax.xlane.f32.xlu0 %v12710_v27 }
 0xe32   : > { %v9162_v8 = vpop.eup %9161 }
 0xe33   : > { %v12719_v63 = vmul.f32 %v9162_v8, %v12651_v10  ;;  %v9164_v19 = vpop.eup %9163  ;;  %v12751_v10 = vmul.f32 0.35355338, %v12678_v22 }
 0xe34   : > { %v12727_v17 = vmul.f32 %v9164_v19, %v12645_v6  ;;  %v12741_v6 = vmul.f32 0.35355338, %v12653_v28  ;;  %v12745_v19 = vmul.f32 0.35355338, %v12664_v43  ;;  %v12755_v28 = vmul.f32 0.35355338, %v4829_v38 }
 0xe35   : > { %14559 = vst [vmem:[#allocation53_spill] sm:$0xff] %v12719_v63  ;;  %4884 = vmax.xlane.f32.xlu0 %v12713_v33  ;;  %v14566_v43 = vld [vmem:[#allocation19_spill] sm:$0xff] }
 0xe36   : > { %v9166_v31 = vpop.eup %9165  ;;  %14560 = vst [vmem:[#allocation73_spill] sm:$0xff] %v12727_v17  ;;  %9171 = vrcp.f32 %v14566_v43  ;;  %v14572_v43 = vld [vmem:[#allocation35_spill] sm:$0xff] }
 0xe37   : > { %v12730_v16 = vmul.f32 %v9166_v31, %v12649_v36  ;;  %v14564_v31 = vld [vmem:[#allocation148_spill] sm:$0xff]  ;;  %v14574_v63 = vld [vmem:[#allocation147_spill] sm:$0xff] }
 0xe39   : > { %14561 = vst [vmem:[#allocation55_spill] sm:$0xff] %v12730_v16  ;;  %4890 = vmax.xlane.f32.xlu0 %v12724_v29  ;;  %v14575_v16 = vld [vmem:[#allocation149_spill] sm:$0xff] }
 0xe3c   : > { %v9168_v8 = vpop.eup %9167 }
 0xe3d   : > { %4894 = vmax.xlane.f32.xlu0 %v12735_v62  ;;  %v9170_v36 = vpop.eup %9169  ;;  %v3439_v1 = vmul.f32 %v9168_v8, %v14564_v31  ;;  %v14567_v8 = vld [vmem:[#allocation34_spill] sm:$0xff]  ;;  %v14568_v31 = vld [vmem:[#allocation79_spill] sm:$0xff] }
 0xe3e   : > { %v3440_v0 = vmul.f32 %v9170_v36, %v14565_v34  ;;  %9173 = vrcp.f32 %v14568_v31  ;;  %v12761_v36 = vmul.f32 0.35355338, %v4839_v2  ;;  %v14569_v34 = vld [vmem:[#allocation7_spill] sm:$0xff] }
 0xe3f   : > { %9175 = vrcp.f32 %v14571_v32 }
 0xe40   : > { %v8621_v12 = vpack.i.bf16 %v3440_v0, %v3439_v1 }
 0xe43   : > { %v9172_v22 = vpop.eup %9171 }
 0xe44   : > { %v4001_v0 = vmul.f32 %v9172_v22, %v14569_v34  ;;  %v14576_v22 = vld [vmem:[#allocation36_spill] sm:$0xff] }
 0xe4b   : > { %4866 = vmax.xlane.f32.xlu1 %v12741_v6  ;;  %v9174_v1 = vpop.eup %9173 }
 0xe4c   : > { %v9176_v31 = vpop.eup %9175 }
 0xe4d   : > { %v3441_v17 = vmul.f32 %v9176_v31, %v14574_v63  ;;  %v14577_v63 = vpack.i.bf16 %v12690_v52, %v12687_v57  ;;  %v14581_v57 = vld [vmem:[#allocation130_spill] sm:$0xff] }
 0xe4f   : > { %4874 = vmax.xlane.f32.xlu1 %v12745_v19 }
 0xe53   : > { %8622 = vrot.lane.b32.xlu0 %v8621_v12, %s9527_s28  ;;  %4882 = vmax.xlane.f32.xlu1 %v12751_v10  ;;  %v14570_v12 = vld [vmem:[#allocation68_spill] sm:$0xff] }
 0xe54   : > { %v4002_v38 = vmul.f32 %v9174_v1, %v14570_v12 }
 0xe56   : > { %v8631_v35 = vpack.i.bf16 %v4002_v38, %v4001_v0  ;;  %v14580_v0 = vld [vmem:[#allocation108_spill] sm:$0xff] }
 0xe57   : > { %4888 = vmax.xlane.f32.xlu1 %v12755_v28 }
 0xe5b   : > { %1042 = vadd.xlane.f32.xlu1 %v14567_v8  ;;  %v14573_v8 = vld [vmem:[#allocation10_spill] sm:$0xff] }
 0xe5c   : > { %9177 = vrcp.f32 %v14573_v8 }
 0xe5d   : > { %9179 = vrcp.f32 %v12662_v20  ;;  %v14579_v20 = vld [vmem:[#allocation37_spill] sm:$0xff] }
 0xe5e   : > { %9181 = vrcp.f32 %v12655_v48 }
 0xe5f   : > { %4892 = vmax.xlane.f32.xlu1 %v12761_v36 }
 0xe69   : > { %v9178_v2 = vpop.eup %9177 }
 0xe6a   : > { %v3442_v21 = vmul.f32 %v9178_v2, %v14575_v16 }
 0xe6c   : > { %v8626_v55 = vpack.i.bf16 %v3442_v21, %v3441_v17 }
 0xe70   : > { %8632 = vrot.lane.b32.xlu1 %v8631_v35, %s9525_s23  ;;  %v9180_v35 = vpop.eup %9179 }
 0xe71   : > { %v9182_v1 = vpop.eup %9181  ;;  %v4566_v34 = vmul.f32 %v9180_v35, %v12619_v3 }
 0xe72   : > { %1044 = vadd.xlane.f32.xlu0 %v14572_v43  ;;  %v4565_v21 = vmul.f32 %v9182_v1, %v12607_v25  ;;  %v14582_v25 = vld [vmem:[#allocation4_spill] sm:$0xff] }
 0xe74   : > { %v8646_v16 = vpack.i.bf16 %v4566_v34, %v4565_v21 }
 0xe88   : > { %8627 = vrot.lane.b32.xlu0 %v8626_v55, %s9527_s28  ;;  %v14578_v55 = vld [vmem:[#allocation14_spill] sm:$0xff] }
 0xe89   : > { %9183 = vrcp.f32 %v14578_v55 }
 0xe8a   : > { %9185 = vrcp.f32 %v14580_v0 }
 0xe94   : > { %1046 = vadd.xlane.f32.xlu1 %v14576_v22 }
 0xe96   : > { %v9184_v3 = vpop.eup %9183 }
 0xe97   : > { %v9186_v38 = vpop.eup %9185  ;;  %v4003_v52 = vmul.f32 %v9184_v3, %v14581_v57  ;;  %v14583_v57 = vld [vmem:[#allocation11_spill] sm:$0xff] }
 0xe98   : > { %v4004_v31 = vmul.f32 %v9186_v38, %v14582_v25 }
 0xe9a   : > { %v8636_v35 = vpack.i.bf16 %v4004_v31, %v4003_v52 }
 0xe9e   : > { %v4865_v32 = vpop.xlane.xlu0 %4864 }
 0xe9f   : > { %v4896_v43 = vsub.f32 %v12657_v39, %v4865_v32 }
 0xea1   : > { %v4912_v2 = vmul.f32 1.442695, %v4896_v43 }
 0xea2   : > { %v4871_v17 = vpop.xlane.xlu0 %4870 }
 0xea3   : > { %9187 = vpow2.f32 %v4912_v2 }
 0xea5   : > { %8642 = vrot.lane.b32.xlu1 %v14577_v63, %s9523_s21 }
 0xea6   : > { %v4869_v48 = vpop.xlane.xlu0 %4868 }
 0xea7   : > { %1048 = vadd.xlane.f32.xlu0 %v14579_v20  ;;  %v4898_v22 = vsub.f32 %v12669_v44, %v4869_v48 }
 0xea9   : > { %8647 = vrot.lane.b32.xlu1 %v8646_v16, %s9523_s21  ;;  %v4916_v34 = vmul.f32 1.442695, %v4898_v22  ;;  %v12794_v16 = vpop.permute.xlu1 %8612 }
 0xeaa   : > { %v4873_v12 = vpop.xlane.xlu0 %4872 }
 0xeab   : > { %v4900_v63 = vsub.f32 %v12672_v9, %v4873_v12  ;;  %9189 = vpow2.f32 %v4916_v34  ;;  %v4899_v9 = vsub.f32 %v12660_v56, %v4871_v17 }
 0xead   : > { %v4920_v21 = vmul.f32 1.442695, %v4900_v63  ;;  %v12796_v3 = vpop.permute.xlu1 %8617 }
 0xeae   : > { %v4879_v8 = vpop.xlane.xlu0 %4878 }
 0xeaf   : > { %9191 = vpow2.f32 %v4920_v21  ;;  %v4903_v56 = vsub.f32 %v12683_v7, %v4879_v8 }
 0xeb0   : > { %v9188_v0 = vpop.eup %9187 }
 0xeb1   : > { %v4926_v34 = vmul.f32 1.442695, %v4903_v56  ;;  %v14585_v56 = vld [vmem:[#allocation57_spill] sm:$0xff] }
 0xeb2   : > { %v4877_v1 = vpop.xlane.xlu0 %4876 }
 0xeb3   : > { %v4902_v39 = vsub.f32 %v12695_v26, %v4877_v1 }
 0xeb5   : > { %v4924_v55 = vmul.f32 1.442695, %v4902_v39 }
 0xeb6   : > { %v4881_v32 = vpop.xlane.xlu0 %4880 }
 0xeb7   : > { %v4904_v20 = vsub.f32 %v12699_v51, %v4881_v32  ;;  %9193 = vpow2.f32 %v4924_v55  ;;  %v4918_v51 = vmul.f32 1.442695, %v4899_v9 }
 0xeb8   : > { %v9190_v48 = vpop.eup %9189 }
 0xeb9   : > { %v4928_v44 = vmul.f32 1.442695, %v4904_v20 }
 0xeba   : > { %v4887_v26 = vpop.xlane.xlu0 %4886 }
 0xebb   : > { %9195 = vpow2.f32 %v4928_v44  ;;  %v4907_v7 = vsub.f32 %v12710_v27, %v4887_v26 }
 0xebc   : > { %v9192_v12 = vpop.eup %9191  ;;  %9197 = vrcp.f32 %v14583_v57 }
 0xebd   : > { %8637 = vrot.lane.b32.xlu0 %v8636_v35, %s9525_s23  ;;  %9199 = vrcp.f32 %v12264_v11 }
 0xebe   : > { %v4885_v17 = vpop.xlane.xlu0 %4884 }
 0xebf   : > { %v4906_v11 = vsub.f32 %v12713_v33, %v4885_v17 }
 0xec1   : > { %v4932_v55 = vmul.f32 1.442695, %v4906_v11 }
 0xec2   : > { %v4891_v21 = vpop.xlane.xlu0 %4890 }
 0xec3   : > { %v4909_v8 = vsub.f32 %v12724_v29, %v4891_v21 }
 0xec4   : > { %v12801_v25 = vpop.eup %9193 }
 0xec5   : > { %v4938_v33 = vmul.f32 1.442695, %v4909_v8 }
 0xec8   : > { %v9196_v22 = vpop.eup %9195 }
 0xec9   : > { %v9198_v32 = vpop.eup %9197 }
 0xeca   : > { %v1759_v17 = vmul.f32 %v9198_v32, %v14585_v56  ;;  %v14587_v32 = vld [vmem:[#allocation76_spill] sm:$0xff] }
 0xecd   : > { %4944 = vadd.xlane.f32.xlu1 %v9188_v0 }
 0xed1   : > { %4948 = vadd.xlane.f32.xlu1 %v9190_v48 }
 0xed4   : > { %v4867_v38 = vpop.xlane.xlu1 %4866 }
 0xed5   : > { %v4897_v43 = vsub.f32 %v12741_v6, %v4867_v38  ;;  %4952 = vadd.xlane.f32.xlu1 %v9192_v12  ;;  %v4934_v38 = vmul.f32 1.442695, %v4907_v7  ;;  %v14586_v7 = vld [vmem:[#allocation138_spill] sm:$0xff] }
 0xed7   : > { %v4914_v52 = vmul.f32 1.442695, %v4897_v43 }
 0xed8   : > { %v4875_v31 = vpop.xlane.xlu1 %4874 }
 0xed9   : > { %9201 = vpow2.f32 %v4914_v52  ;;  %v4901_v2 = vsub.f32 %v12745_v19, %v4875_v31  ;;  %4956 = vadd.xlane.f32.xlu1 %v12801_v25  ;;  %v14584_v31 = vld [vmem:[#allocation59_spill] sm:$0xff] }
 0xeda   : > { %9203 = vpow2.f32 %v4918_v51  ;;  %v4895_v51 = vpop.xlane.xlu0 %4894 }
 0xedb   : > { %v4922_v6 = vmul.f32 1.442695, %v4901_v2  ;;  %v4911_v2 = vsub.f32 %v12735_v62, %v4895_v51 }
 0xedc   : > { %v4883_v35 = vpop.xlane.xlu1 %4882 }
 0xedd   : > { %9205 = vpow2.f32 %v4922_v6  ;;  %v4905_v1 = vsub.f32 %v12751_v10, %v4883_v35  ;;  %4960 = vadd.xlane.f32.xlu1 %v9196_v22  ;;  %v9200_v10 = vpop.eup %9199 }
 0xede   : > { %v1760_v27 = vmul.f32 %v9200_v10, %v14584_v31  ;;  %v14591_v31 = vld [vmem:[#allocation88_spill] sm:$0xff] }
 0xedf   : > { %v4930_v63 = vmul.f32 1.442695, %v4905_v1  ;;  %v4942_v1 = vmul.f32 1.442695, %v4911_v2 }
 0xee0   : > { %v4889_v39 = vpop.xlane.xlu1 %4888 }
 0xee1   : > { %9207 = vpow2.f32 %v4930_v63  ;;  %v4908_v19 = vsub.f32 %v12755_v28, %v4889_v39 }
 0xee2   : > { %9209 = vpow2.f32 %v4926_v34 }
 0xee3   : > { %v4936_v44 = vmul.f32 1.442695, %v4908_v19  ;;  %9211 = vpow2.f32 %v4932_v55 }
 0xee4   : > { %v12812_v20 = vpop.xlane.xlu1 %1042 }
 0xee5   : > { %9213 = vpow2.f32 %v4936_v44  ;;  %v14588_v44 = vld [vmem:[#allocation58_spill] sm:$0xff] }
 0xee6   : > { %v9202_v9 = vpop.eup %9201  ;;  %9215 = vpow2.f32 %v4934_v38  ;;  %v14589_v38 = vld [vmem:[#allocation60_spill] sm:$0xff] }
 0xee7   : > { %v9204_v43 = vpop.eup %9203  ;;  %4946 = vadd.xlane.f32.xlu0 %v9202_v9  ;;  %v4992_v57 = vpack.c.bf16 %v9202_v9, %v9188_v0  ;;  %9217 = vpow2.f32 %v4938_v33 }
 0xee8   : > { %v4993_v52 = vpack.c.bf16 %v9204_v43, %v9190_v48  ;;  %v4893_v28 = vpop.xlane.xlu1 %4892  ;;  %v8656_v48 = vpack.i.bf16 %v1760_v27, %v1759_v17  ;;  %v14593_v17 = vld [vmem:[#allocation89_spill] sm:$0xff] }
 0xee9   : > { %v4910_v29 = vsub.f32 %v12761_v36, %v4893_v28  ;;  %8451 = vmatprep.mubr.bf16.mxu0 %v4992_v57 }
 0xeea   : > { %v9206_v26 = vpop.eup %9205  ;;  %8452 = vmatmul.mubr.bf16.vlgmr.msra.gmra.mxu0 %v4993_v52  ;;  %v14590_v52 = vld [vmem:[#allocation90_spill] sm:$0xff] }
 0xeeb   : > { %4950 = vadd.xlane.f32.xlu0 %v9204_v43  ;;  %v4994_v6 = vpack.c.bf16 %v9206_v26, %v9192_v12  ;;  %v4940_v0 = vmul.f32 1.442695, %v4910_v29 }
 0xeed   : > { %8455 = vmatprep.mubr.bf16.mxu0 %v4994_v6  ;;  %9219 = vpow2.f32 %v4940_v0 }
 0xeee   : > { %v9208_v35 = vpop.eup %9207  ;;  %8657 = vrot.lane.b32.xlu1 %v8656_v48, %s9533_s17  ;;  %9221 = vpow2.f32 %v4942_v1  ;;  %v14594_v48 = vld [vmem:[#allocation123_spill] sm:$0xff] }
 0xeef   : > { %v9210_v34 = vpop.eup %9209  ;;  %4954 = vadd.xlane.f32.xlu0 %v9206_v26  ;;  %v4996_v63 = vpack.c.bf16 %v9208_v35, %v9196_v22  ;;  %9223 = vrcp.f32 %v14586_v7  ;;  %v14592_v26 = vld [vmem:[#allocation91_spill] sm:$0xff] }
 0xef0   : > { %v4995_v36 = vpack.c.bf16 %v9210_v34, %v12801_v25  ;;  %v9212_v62 = vpop.eup %9211  ;;  %9225 = vrcp.f32 %v14587_v32 }
 0xef1   : > { %9227 = vrcp.f32 %v12278_v5 }
 0xef2   : > { %8456 = vmatmul.mubr.bf16.gmra.mxu0 %v4995_v36  ;;  %v9214_v11 = vpop.eup %9213  ;;  %9229 = vrcp.f32 %v12269_v45  ;;  %v14596_v36 = vld [vmem:[#allocation122_spill] sm:$0xff] }
 0xef3   : > { %4958 = vadd.xlane.f32.xlu0 %v9210_v34  ;;  %8459 = vmatprep.mubr.bf16.mxu0 %v4996_v63  ;;  %v9216_v12 = vpop.eup %9215  ;;  %9231 = vrcp.f32 %v12272_v18  ;;  %v14597_v63 = vld [vmem:[#allocation120_spill] sm:$0xff] }
 0xef4   : > { %v9218_v21 = vpop.eup %9217  ;;  %v4997_v39 = vpack.c.bf16 %v9216_v12, %v9212_v62  ;;  %9233 = vrcp.f32 %v12260_v24  ;;  %v14595_v24 = vld [vmem:[#allocation121_spill] sm:$0xff] }
 0xef5   : > { %v4998_v19 = vpack.c.bf16 %v9218_v21, %v9214_v11  ;;  %9235 = vrcp.f32 %v12283_v13 }
 0xef6   : > { %9237 = vrcp.f32 %v12276_v41 }
 0xef7   : > { %4962 = vadd.xlane.f32.xlu0 %v9208_v35  ;;  %9239 = vrcp.f32 %v12293_v37 }
 0xef8   : > { %9241 = vrcp.f32 %v12281_v49  ;;  %v8823_v49 = vld [vmem:[%s13986_s3 + $0x18] sm:$0xff]  }
 0xef9   : > { %8467 = vmatprep.subr.bf16.mxu0 %v8823_v49  ;;  %9243 = vrcp.f32 %v12296_v40 }
 0xefa   : > { %8460 = vmatmul.mubr.bf16.gmra.mxu0 %v4997_v39  ;;  %v9220_v8 = vpop.eup %9219  ;;  %v12854_v39 = vpop.permute.xlu0 %8622  ;;  %9245 = vrcp.f32 %v12299_v58  ;;  %v8826_v58 = vld [vmem:[%s13986_s3] sm:$0xff]  }
 0xefb   : > { %4966 = vadd.xlane.f32.xlu0 %v9216_v12  ;;  %8463 = vmatprep.mubr.bf16.mxu0 %v4998_v19  ;;  %v9222_v25 = vpop.eup %9221  ;;  %v8824_v12 = vld [vmem:[%s13986_s3 + $0x10] sm:$0xff]   ;;  %v12856_v19 = vpop.permute.xlu1 %8632  ;;  %9247 = vrcp.f32 %v12301_v53 }
 0xefc   : > { %v4999_v22 = vpack.c.bf16 %v9222_v25, %v9220_v8  ;;  %v9224_v55 = vpop.eup %9223  ;;  %8468 = vmatpush3.bf16.msra.mxu0 %v8823_v49 }
 0xefd   : > { %v9226_v10 = vpop.eup %9225  ;;  %v1757_v9 = vmul.f32 %v9224_v55, %v14588_v44  ;;  %8469 = vmatprep.subr.bf16.mxu0 %v8824_v12 }
 0xefe   : > { %v1758_v43 = vmul.f32 %v9226_v10, %v14589_v38  ;;  %v9228_v51 = vpop.eup %9227  ;;  %v12858_v7 = vpop.xlane.xlu0 %1044 }
 0xeff   : > { %v9230_v57 = vpop.eup %9229  ;;  %v2322_v28 = vmul.f32 %v9228_v51, %v14590_v52 }
 0xf00   : > { %v8651_v33 = vpack.i.bf16 %v1758_v43, %v1757_v9  ;;  %v2321_v27 = vmul.f32 %v9230_v57, %v14591_v31  ;;  %v9232_v45 = vpop.eup %9231  ;;  %8470 = vmatpush3.bf16.msra.mxu0 %v8824_v12  ;;  %v14603_v12 = vld [vmem:[#allocation109_spill] sm:$0xff] }
 0xf01   : > { %v9234_v5 = vpop.eup %9233  ;;  %v2320_v2 = vmul.f32 %v9232_v45, %v14592_v26  ;;  %v14598_v45 = vld [vmem:[#allocation151_spill] sm:$0xff] }
 0xf02   : > { %8464 = vmatmul.mubr.bf16.gmra.mxu0 %v4999_v22  ;;  %v8666_v29 = vpack.i.bf16 %v2322_v28, %v2321_v27  ;;  %v9236_v56 = vpop.eup %9235  ;;  %v2319_v6 = vmul.f32 %v9234_v5, %v14593_v17  ;;  %v12862_v32 = vpop.permute.xlu0 %8627 }
 0xf03   : > { %v9238_v0 = vpop.eup %9237  ;;  %v2882_v35 = vmul.f32 %v9236_v56, %v14594_v48 }
 0xf04   : > { %v8661_v18 = vpack.i.bf16 %v2320_v2, %v2319_v6  ;;  %v2881_v13 = vmul.f32 %v9238_v0, %v14595_v24  ;;  %v9240_v1 = vpop.eup %9239 }
 0xf05   : > { %v9242_v34 = vpop.eup %9241  ;;  %v2884_v37 = vmul.f32 %v9240_v1, %v14596_v36  ;;  %v14601_v36 = vld [vmem:[#allocation152_spill] sm:$0xff] }
 0xf06   : > { %v8671_v41 = vpack.i.bf16 %v2882_v35, %v2881_v13  ;;  %v9244_v53 = vpop.eup %9243  ;;  %v14600_v35 = vld [vmem:[#allocation154_spill] sm:$0xff] }
 0xf07   : > { %v9246_v57 = vpop.eup %9245  ;;  %v3444_v24 = vmul.f32 %v9244_v53, %v14600_v35 }
 0xf11   : > { %8652 = vrot.lane.b32.xlu0 %v8651_v33, %s9533_s17 }
 0xf12   : > { %4964 = vadd.xlane.f32.xlu1 %v9212_v62  ;;  %v2883_v62 = vmul.f32 %v9242_v34, %v14597_v63  ;;  %v14602_v63 = vld [vmem:[#allocation102_spill] sm:$0xff] }
 0xf16   : > { %4968 = vadd.xlane.f32.xlu1 %v9214_v11  ;;  %v8676_v11 = vpack.i.bf16 %v2884_v37, %v2883_v62 }
 0xf27   : > { %8667 = vrot.lane.b32.xlu1 %v8666_v29, %s9531_s15 }
 0xf30   : > { %4970 = vadd.xlane.f32.xlu0 %v9218_v21  ;;  %v8825_v21 = vld [vmem:[%s13986_s3 + $0x8] sm:$0xff]   ;;  %v12866_v22 = vpop.xlane.xlu0 %1048 }
 0xf31   : > { %8471 = vmatprep.subr.bf16.mxu0 %v8825_v21 }
 0xf32   : > { %8472 = vmatpush3.bf16.msra.mxu0 %v8825_v21  ;;  %v14604_v21 = vld [vmem:[#allocation70_spill] sm:$0xff] }
 0xf33   : > { %8473 = vmatprep.subr.bf16.mxu0 %v8826_v58 }
 0xf34   : > { %4974 = vadd.xlane.f32.xlu0 %v9222_v25  ;;  %v12870_v10 = vpop.permute.xlu0 %8637 }
 0xf36   : > { %8474 = vmatpush3.bf16.msra.mxu0 %v8826_v58 }
 0xf4a   : > { %8662 = vrot.lane.b32.xlu0 %v8661_v18, %s9531_s15  ;;  %v14599_v18 = vld [vmem:[#allocation153_spill] sm:$0xff] }
 0xf4b   : > { %4972 = vadd.xlane.f32.xlu1 %v9220_v8  ;;  %v12860_v8 = vpop.xlane.xlu1 %1046  ;;  %v3446_v48 = vmul.f32 %v9246_v57, %v14599_v18 }
 0xf4e   : > { %8672 = vrot.lane.b32.xlu0 %v8671_v41, %s9529_s30 }
 0xf4f   : > { %v12864_v25 = vpop.permute.xlu1 %8642 }
 0xf53   : > { %v12868_v55 = vpop.permute.xlu1 %8647 }
 0xf57   : > { %v4945_v44 = vpop.xlane.xlu1 %4944 }
 0xf5b   : > { %v4949_v38 = vpop.xlane.xlu1 %4948 }
 0xf5c   : > { %8677 = vrot.lane.b32.xlu1 %v8676_v11, %s9529_s30  ;;  %9249 = vrcp.f32 %v4949_v38 }
 0xf5f   : > { %v4953_v40 = vpop.xlane.xlu1 %4952 }
 0xf70   : > { %v4947_v9 = vpop.xlane.xlu0 %4946 }
 0xf74   : > { %v4951_v43 = vpop.xlane.xlu0 %4950 }
 0xf75   : > { %9251 = vrcp.f32 %v4951_v43  ;;  %v14606_v43 = vld [vmem:[#allocation77_spill] sm:$0xff] }
 0xf76   : > { %9253 = vrcp.f32 %v4945_v44 }
 0xf77   : > { %9255 = vrcp.f32 %v4947_v9  ;;  %v14605_v9 = vld [vmem:[#allocation131_spill] sm:$0xff] }
 0xf78   : > { %9257 = vrcp.f32 %v12289_v61  ;;  %v4955_v33 = vpop.xlane.xlu0 %4954  ;;  %v9248_v61 = vpop.eup %9247 }
 0xf79   : > { %9259 = vrcp.f32 %v12519_v30  ;;  %v3445_v5 = vmul.f32 %v9248_v61, %v14598_v45 }
 0xf7a   : > { %9261 = vrcp.f32 %v12336_v59 }
 0xf7b   : > { %9263 = vrcp.f32 %v12517_v4  ;;  %v9250_v4 = vpop.eup %9249 }
 0xf7c   : > { %9265 = vrcp.f32 %v12304_v54  ;;  %v4959_v59 = vpop.xlane.xlu0 %4958  ;;  %v4957_v54 = vpop.xlane.xlu1 %4956 }
 0xf7d   : > { %9267 = vrcp.f32 %v12676_v15 }
 0xf7e   : > { %9269 = vrcp.f32 %v12667_v50 }
 0xf7f   : > { %9271 = vrcp.f32 %v12367_v14 }
 0xf80   : > { %9273 = vrcp.f32 %v12528_v47  ;;  %v4961_v41 = vpop.xlane.xlu1 %4960  ;;  %v4963_v49 = vpop.xlane.xlu0 %4962 }
 0xf81   : > { %9275 = vrcp.f32 %v4959_v59  ;;  %v14610_v59 = vld [vmem:[#allocation78_spill] sm:$0xff] }
 0xf82   : > { %v9252_v52 = vpop.eup %9251  ;;  %9277 = vrcp.f32 %v4957_v54  ;;  %v14611_v54 = vld [vmem:[#allocation139_spill] sm:$0xff] }
 0xf83   : > { %v9254_v28 = vpop.eup %9253  ;;  %9279 = vrcp.f32 %v4955_v33 }
 0xf84   : > { %v9256_v29 = vpop.eup %9255  ;;  %9281 = vrcp.f32 %v12523_v42  ;;  %v8696_v42 = vpack.i.bf16 %v3446_v48, %v3445_v5  ;;  %v14614_v5 = vld [vmem:[#allocation140_spill] sm:$0xff] }
 0xf85   : > { %v9258_v26 = vpop.eup %9257  ;;  %9283 = vrcp.f32 %v4953_v40  ;;  %v14607_v40 = vld [vmem:[#allocation142_spill] sm:$0xff] }
 0xf86   : > { %v9260_v14 = vpop.eup %9259  ;;  %9285 = vrcp.f32 %v12353_v46  ;;  %v3443_v37 = vmul.f32 %v9258_v26, %v14601_v36  ;;  %v14617_v36 = vld [vmem:[#allocation96_spill] sm:$0xff] }
 0xf87   : > { %v9262_v47 = vpop.eup %9261  ;;  %9287 = vrcp.f32 %v12538_v60  ;;  %v4008_v62 = vmul.f32 %v9260_v14, %v14602_v63  ;;  %v14619_v63 = vld [vmem:[#allocation63_spill] sm:$0xff] }
 0xf88   : > { %v9264_v13 = vpop.eup %9263  ;;  %9289 = vrcp.f32 %v12393_v23  ;;  %v8691_v46 = vpack.i.bf16 %v3444_v24, %v3443_v37  ;;  %v4007_v44 = vmul.f32 %v9262_v47, %v14604_v21  ;;  %v14608_v23 = vld [vmem:[#allocation100_spill] sm:$0xff] }
 0xf89   : > { %v9266_v34 = vpop.eup %9265  ;;  %9291 = vrcp.f32 %v14603_v12  ;;  %v4006_v60 = vmul.f32 %v9264_v13, %v14605_v9  ;;  %v14620_v12 = vld [vmem:[#allocation141_spill] sm:$0xff] }
 0xf8a   : > { %v9268_v11 = vpop.eup %9267  ;;  %9293 = vrcp.f32 %v14606_v43  ;;  %v8706_v58 = vpack.i.bf16 %v4008_v62, %v4007_v44  ;;  %v4005_v53 = vmul.f32 %v9266_v34, %v14608_v23  ;;  %v14622_v44 = vld [vmem:[#allocation64_spill] sm:$0xff] }
 0xf8b   : > { %v9270_v38 = vpop.eup %9269  ;;  %9295 = vrcp.f32 %v14607_v40 }
 0xf8c   : > { %v9272_v61 = vpop.eup %9271  ;;  %9297 = vrcp.f32 %v14610_v59 }
 0xf8d   : > { %9299 = vrcp.f32 %v14611_v54 }
 0xfaa   : > { %v8453_v51 = vpop.f32.mrf.mxu0 }
 0xfab   : > { %v5123_v31 = vmul.f32 %v9250_v4, %v8453_v51  ;;  %v14609_v51 = vld [vmem:[#allocation66_spill] sm:$0xff]  ;;  %v9274_v4 = vpop.eup %9273 }
 0xfac   : > { %v5058_v30 = vpop.f32.mrf.mxu0  ;;  %v4570_v57 = vmul.f32 %v9268_v11, %v14609_v51  ;;  %v1764_v62 = vmul.f32 %v9274_v4, %v14619_v63  ;;  %v14628_v4 = vld [vmem:[#allocation26_spill] sm:$0xff] }
 0xfad   : > { %v5121_v2 = vmul.f32 %v9254_v28, %v5058_v30  ;;  %v12908_v30 = vpop.permute.xlu1 %8657 }
 0xfae   : > { %v8454_v15 = vpop.f32.mrf.mxu0 }
 0xfaf   : > { %v5124_v27 = vmul.f32 %v9252_v52, %v8454_v15  ;;  %v8701_v52 = vpack.i.bf16 %v4006_v60, %v4005_v53  ;;  %v14612_v15 = vld [vmem:[#allocation128_spill] sm:$0xff]  ;;  %v14623_v60 = vld [vmem:[#allocation110_spill] sm:$0xff] }
 0xfb0   : > { %v5061_v50 = vpop.f32.mrf.mxu0  ;;  %v4569_v28 = vmul.f32 %v9270_v38, %v14612_v15 }
 0xfb1   : > { %v8681_v56 = vpack.i.bf16 %v5124_v27, %v5123_v31  ;;  %v5122_v17 = vmul.f32 %v9256_v29, %v5061_v50  ;;  %v9276_v31 = vpop.eup %9275  ;;  %v14613_v27 = vld [vmem:[#allocation111_spill] sm:$0xff]  ;;  %v4967_v29 = vpop.xlane.xlu0 %4966 }
 0xfb2   : > { %v8457_v6 = vpop.f32.mrf.mxu0  ;;  %9301 = vrcp.f32 %v14613_v27  ;;  %v9278_v45 = vpop.eup %9277 }
 0xfb3   : > { %v8686_v0 = vpack.i.bf16 %v5122_v17, %v5121_v2  ;;  %8682 = vrot.lane.b32.xlu1 %v8681_v56, %s9521_s18  ;;  %9303 = vrcp.f32 %v14614_v5  ;;  %v8716_v2 = vpack.i.bf16 %v4570_v57, %v4569_v28  ;;  %v9280_v56 = vpop.eup %9279  ;;  %v14615_v17 = vld [vmem:[#allocation25_spill] sm:$0xff]  ;;  %v4965_v14 = vpop.xlane.xlu1 %4964  ;;  %v14627_v57 = vld [vmem:[#allocation22_spill] sm:$0xff]  ;;  %v14630_v28 = vld [vmem:[#allocation95_spill] sm:$0xff] }
 0xfb4   : > { %v5074_v1 = vpop.f32.mrf.mxu0  ;;  %9305 = vrcp.f32 %v14615_v17  ;;  %v9282_v47 = vpop.eup %9281  ;;  %v14633_v17 = vld [vmem:[#allocation126_spill] sm:$0xff] }
 0xfb5   : > { %8687 = vrot.lane.b32.xlu0 %v8686_v0, %s9521_s18  ;;  %9307 = vrcp.f32 %v4967_v29  ;;  %v5127_v0 = vmul.f32 %v9278_v45, %v8457_v6  ;;  %v9284_v48 = vpop.eup %9283  ;;  %v14631_v45 = vld [vmem:[#allocation23_spill] sm:$0xff] }
 0xfb6   : > { %v8458_v33 = vpop.f32.mrf.mxu0  ;;  %9309 = vrcp.f32 %v4963_v49  ;;  %v9286_v24 = vpop.eup %9285  ;;  %v5125_v13 = vmul.f32 %v9284_v48, %v5074_v1  ;;  %v14621_v49 = vld [vmem:[#allocation61_spill] sm:$0xff]  ;;  %v1762_v1 = vmul.f32 %v9282_v47, %v14622_v44 }
 0xfb7   : > { %8697 = vrot.lane.b32.xlu1 %v8696_v42, %s9527_s28  ;;  %v5128_v26 = vmul.f32 %v9276_v31, %v8458_v33  ;;  %9311 = vrcp.f32 %v4965_v14  ;;  %v14616_v42 = vld [vmem:[#allocation75_spill] sm:$0xff]  ;;  %v9288_v11 = vpop.eup %9287  ;;  %v1763_v21 = vmul.f32 %v9272_v61, %v14621_v49  ;;  %v14624_v33 = vld [vmem:[#allocation28_spill] sm:$0xff]  ;;  %v12933_v61 = vpop.permute.xlu0 %8652 }
 0xfb8   : > { %v5077_v50 = vpop.f32.mrf.mxu0  ;;  %v14618_v37 = vpack.i.bf16 %v14616_v42, %v14617_v36  ;;  %9313 = vrcp.f32 %v14620_v12  ;;  %v9290_v6 = vpop.eup %9289  ;;  %v14636_v12 = vld [vmem:[#allocation125_spill] sm:$0xff] }
 0xfb9   : > { %8692 = vrot.lane.b32.xlu0 %v8691_v46, %s9527_s28  ;;  %v5126_v18 = vmul.f32 %v9280_v56, %v5077_v50  ;;  %v8721_v34 = vpack.i.bf16 %v5128_v26, %v5127_v0  ;;  %9315 = vrcp.f32 %v4961_v41  ;;  %v9292_v9 = vpop.eup %9291  ;;  %v8736_v40 = vpack.i.bf16 %v1764_v62, %v1763_v21  ;;  %v14626_v41 = vld [vmem:[#allocation94_spill] sm:$0xff]  ;;  %v4969_v5 = vpop.xlane.xlu1 %4968 }
 0xfba   : > { %v8461_v35 = vpop.f32.mrf.mxu0  ;;  %9317 = vrcp.f32 %v14623_v60  ;;  %v9294_v43 = vpop.eup %9293  ;;  %v2326_v53 = vmul.f32 %v9288_v11, %v14626_v41  ;;  %v2324_v31 = vmul.f32 %v9292_v9, %v14630_v28  ;;  %v14637_v41 = vld [vmem:[#allocation157_spill] sm:$0xff] }
 0xfbb   : > { %8707 = vrot.lane.b32.xlu1 %v8706_v58, %s9525_s23  ;;  %v8726_v46 = vpack.i.bf16 %v5126_v18, %v5125_v13  ;;  %9319 = vrcp.f32 %v14624_v33  ;;  %v14625_v58 = vld [vmem:[#allocation62_spill] sm:$0xff]  ;;  %v9296_v51 = vpop.eup %9295  ;;  %v4971_v0 = vpop.xlane.xlu0 %4970 }
 0xfbc   : > { %v5090_v38 = vpop.f32.mrf.mxu0  ;;  %v1761_v23 = vmul.f32 %v9286_v24, %v14625_v58  ;;  %9321 = vrcp.f32 %v14627_v57  ;;  %v9298_v59 = vpop.eup %9297  ;;  %v2888_v14 = vmul.f32 %v9296_v51, %v14633_v17  ;;  %v14634_v24 = vld [vmem:[#allocation124_spill] sm:$0xff] }
 0xfbd   : > { %8702 = vrot.lane.b32.xlu0 %v8701_v52, %s9525_s23  ;;  %9323 = vrcp.f32 %v14628_v4  ;;  %v14629_v52 = vld [vmem:[#allocation92_spill] sm:$0xff]  ;;  %v9300_v27 = vpop.eup %9299  ;;  %v2887_v13 = vmul.f32 %v9298_v59, %v14634_v24  ;;  %v12948_v21 = vpop.permute.xlu1 %8667 }
 0xfbe   : > { %v8731_v54 = vpack.i.bf16 %v1762_v1, %v1761_v23  ;;  %v2325_v15 = vmul.f32 %v9290_v6, %v14629_v52  ;;  %v8462_v29 = vpop.f32.mrf.mxu0  ;;  %9325 = vrcp.f32 %v14631_v45  ;;  %v14643_v17 = vld [vmem:[#allocation160_spill] sm:$0xff] }
 0xfbf   : > { %8717 = vrot.lane.b32.xlu1 %v8716_v2, %s9523_s21  ;;  %v9302_v50 = vpop.eup %9301  ;;  %v14632_v2 = vld [vmem:[#allocation93_spill] sm:$0xff]  ;;  %v8756_v11 = vpack.i.bf16 %v2888_v14, %v2887_v13  ;;  %9327 = vrcp.f32 %v4971_v0 }
 0xfc0   : > { %v8746_v26 = vpack.i.bf16 %v2326_v53, %v2325_v15  ;;  %v2323_v56 = vmul.f32 %v9294_v43, %v14632_v2  ;;  %v9304_v47 = vpop.eup %9303  ;;  %v2885_v6 = vmul.f32 %v9302_v50, %v14636_v12  ;;  %v4975_v43 = vpop.xlane.xlu0 %4974  ;;  %9329 = vrcp.f32 %v4969_v5  ;;  %v14641_v50 = vld [vmem:[#allocation9_spill] sm:$0xff] }
 0xfc1   : > { %8712 = vrot.lane.b32.xlu0 %v14618_v37, %s9523_s21  ;;  %v9306_v18 = vpop.eup %9305  ;;  %v5093_v37 = vpop.f32.mrf.mxu0  ;;  %9331 = vrcp.f32 %v4975_v43  ;;  %v14642_v2 = vld [vmem:[#allocation133_spill] sm:$0xff] }
 0xfc2   : > { %v8741_v48 = vpack.i.bf16 %v2324_v31, %v2323_v56  ;;  %v9308_v36 = vpop.eup %9307  ;;  %v3450_v53 = vmul.f32 %v9306_v18, %v14637_v41  ;;  %v14644_v18 = vld [vmem:[#allocation13_spill] sm:$0xff]  ;;  %v14654_v41 = vld [vmem:[#allocation27_spill] sm:$0xff] }
 0xfc3   : > { %8722 = vrot.lane.b32.xlu1 %v8721_v34, %s9521_s18  ;;  %v14635_v34 = vld [vmem:[#allocation127_spill] sm:$0xff]  ;;  %v9310_v63 = vpop.eup %9309  ;;  %v5132_v62 = vmul.f32 %v9308_v36, %v8462_v29  ;;  %v8465_v33 = vpop.f32.mrf.mxu0 }
 0xfc4   : > { %v2886_v42 = vmul.f32 %v9300_v27, %v14635_v34  ;;  %v5130_v1 = vmul.f32 %v9310_v63, %v5093_v37  ;;  %v14640_v27 = vld [vmem:[#allocation156_spill] sm:$0xff]  ;;  %v14645_v37 = vld [vmem:[#allocation55_spill] sm:$0xff]  ;;  %v14646_v63 = vld [vmem:[#allocation73_spill] sm:$0xff] }
 0xfc5   : > { %8727 = vrot.lane.b32.xlu0 %v8726_v46, %s9521_s18  ;;  %v9312_v46 = vpop.eup %9311  ;;  %v5106_v28 = vpop.f32.mrf.mxu0 }
 0xfc6   : > { %v9314_v49 = vpop.eup %9313  ;;  %v5131_v44 = vmul.f32 %v9312_v46, %v8461_v35  ;;  %v8751_v9 = vpack.i.bf16 %v2886_v42, %v2885_v6  ;;  %v14638_v35 = vld [vmem:[#allocation155_spill] sm:$0xff]  ;;  %v14648_v6 = vld [vmem:[#allocation53_spill] sm:$0xff] }
 0xfc7   : > { %8737 = vrot.lane.b32.xlu1 %v8736_v40, %s9533_s17  ;;  %v9316_v60 = vpop.eup %9315  ;;  %v3449_v4 = vmul.f32 %v9304_v47, %v14638_v35  ;;  %v8466_v47 = vpop.f32.mrf.mxu0  ;;  %v14649_v46 = vld [vmem:[#allocation3_spill] sm:$0xff] }
 0xfc8   : > { %v9318_v40 = vpop.eup %9317  ;;  %v5129_v58 = vmul.f32 %v9316_v60, %v5090_v38  ;;  %v8761_v23 = vpack.i.bf16 %v5132_v62, %v5131_v44  ;;  %v14647_v62 = vpack.i.bf16 %v14645_v37, %v14646_v63  ;;  %v14668_v63 = vld [vmem:[#allocation114_spill] sm:$0xff] }
 0xfc9   : > { %8732 = vrot.lane.b32.xlu0 %v8731_v54, %s9533_s17  ;;  %v9320_v51 = vpop.eup %9319  ;;  %v14639_v54 = vld [vmem:[#allocation158_spill] sm:$0xff]  ;;  %v8776_v38 = vpack.i.bf16 %v3450_v53, %v3449_v4  ;;  %v3447_v29 = vmul.f32 %v9318_v40, %v14640_v27  ;;  %v5109_v34 = vpop.f32.mrf.mxu0  ;;  %v14651_v40 = vld [vmem:[#allocation24_spill] sm:$0xff]  ;;  %v14660_v27 = vld [vmem:[#allocation81_spill] sm:$0xff] }
 0xfca   : > { %v9322_v57 = vpop.eup %9321  ;;  %v8766_v59 = vpack.i.bf16 %v5130_v1, %v5129_v58  ;;  %v3448_v52 = vmul.f32 %v9314_v49, %v14639_v54  ;;  %v4012_v45 = vmul.f32 %v9320_v51, %v14641_v50  ;;  %v14650_v49 = vpack.i.bf16 %v14648_v6, %v14649_v46  ;;  %v14652_v58 = vld [vmem:[#allocation29_spill] sm:$0xff]  ;;  %v14657_v54 = vld [vmem:[#allocation12_spill] sm:$0xff] }
 0xfcb   : > { %8747 = vrot.lane.b32.xlu1 %v8746_v26, %s9531_s15  ;;  %v9324_v15 = vpop.eup %9323  ;;  %v4011_v56 = vmul.f32 %v9322_v57, %v14642_v2  ;;  %v14663_v2 = vld [vmem:[#allocation16_spill] sm:$0xff]  ;;  %v14669_v6 = vld [vmem:[#allocation113_spill] sm:$0xff] }
 0xfcc   : > { %v9326_v5 = vpop.eup %9325  ;;  %v8771_v26 = vpack.i.bf16 %v3448_v52, %v3447_v29  ;;  %v4010_v14 = vmul.f32 %v9324_v15, %v14643_v17  ;;  %v14658_v15 = vld [vmem:[#allocation15_spill] sm:$0xff]  ;;  %v14661_v29 = vld [vmem:[#allocation18_spill] sm:$0xff]  ;;  %v8560_v46 = vunpack.i.h.bf16 %v14669_v6 }
 0xfcd   : > { %8742 = vrot.lane.b32.xlu0 %v8741_v48, %s9531_s15  ;;  %v8786_v0 = vpack.i.bf16 %v4012_v45, %v4011_v56  ;;  %v4009_v48 = vmul.f32 %v9326_v5, %v14644_v18  ;;  %v9328_v13 = vpop.eup %9327  ;;  %v14662_v45 = vld [vmem:[#allocation83_spill] sm:$0xff]  ;;  %v14664_v17 = vld [vmem:[#allocation82_spill] sm:$0xff] }
 0xfce   : > { %v9330_v42 = vpop.eup %9329  ;;  %v5134_v36 = vmul.f32 %v9328_v13, %v5109_v34  ;;  %v14666_v13 = vld [vmem:[#allocation51_spill] sm:$0xff] }
 0xfcf   : > { %8757 = vrot.lane.b32.xlu1 %v8756_v11, %s9529_s30  ;;  %v8781_v24 = vpack.i.bf16 %v4010_v14, %v4009_v48  ;;  %v9332_v11 = vpop.eup %9331  ;;  %v5133_v12 = vmul.f32 %v9330_v42, %v5106_v28  ;;  %v14665_v14 = vld [vmem:[#allocation49_spill] sm:$0xff]  ;;  %v8549_v34 = vunpack.i.l.bf16 %v14666_v13  ;;  %v14667_v42 = vld [vmem:[#allocation144_spill] sm:$0xff]  ;;  %v8550_v37 = vunpack.i.h.bf16 %v14666_v13 }
 0xfd0   : > { %v5136_v1 = vmul.f32 %v9332_v11, %v8466_v47  ;;  %v8545_v47 = vunpack.i.h.bf16 %v14665_v14  ;;  %v8554_v11 = vunpack.i.l.bf16 %v14668_v63 }
 0xfd1   : > { %8752 = vrot.lane.b32.xlu0 %v8751_v9, %s9529_s30  ;;  %v8801_v9 = vpack.i.bf16 %v5134_v36, %v5133_v12  ;;  %v13003_v12 = vpop.permute.xlu0 %8662 }
 0xfd3   : > { %8762 = vrot.lane.b32.xlu1 %v8761_v23, %s9521_s18  ;;  %v14653_v23 = vld [vmem:[#allocation52_spill] sm:$0xff] }
 0xfd4   : > { %v4973_v31 = vpop.xlane.xlu1 %4972 }
 0xfd5   : > { %9333 = vrcp.f32 %v4973_v31  ;;  %8767 = vrot.lane.b32.xlu0 %v8766_v59, %s9521_s18  ;;  %v14655_v59 = vld [vmem:[#allocation80_spill] sm:$0xff] }
 0xfd6   : > { %9335 = vrcp.f32 %v14651_v40  ;;  %v8534_v35 = vunpack.i.l.bf16 %v14655_v59  ;;  %v14659_v31 = vld [vmem:[#allocation112_spill] sm:$0xff]  ;;  %v8535_v5 = vunpack.i.h.bf16 %v14655_v59 }
 0xfd7   : > { %8777 = vrot.lane.b32.xlu1 %v8776_v38, %s9527_s28  ;;  %9337 = vrcp.f32 %v14652_v58  ;;  %v8539_v38 = vunpack.i.l.bf16 %v14659_v31  ;;  %v8540_v18 = vunpack.i.h.bf16 %v14659_v31  ;;  %v14673_v31 = vld [vmem:[#allocation146_spill] sm:$0xff] }
 0xfd8   : > { %9339 = vrcp.f32 %v14653_v23 }
 0xfd9   : > { %8772 = vrot.lane.b32.xlu0 %v8771_v26, %s9527_s28  ;;  %9341 = vrcp.f32 %v14654_v41 }
 0xfdb   : > { %8787 = vrot.lane.b32.xlu1 %v8786_v0, %s9525_s23  ;;  %v8544_v0 = vunpack.i.l.bf16 %v14665_v14 }
 0xfdd   : > { %8782 = vrot.lane.b32.xlu0 %v8781_v24, %s9525_s23 }
 0xfdf   : > { %8797 = vrot.lane.b32.xlu1 %v14647_v62, %s9523_s21  ;;  %v8555_v62 = vunpack.i.h.bf16 %v14668_v63 }
 0xfe1   : > { %8792 = vrot.lane.b32.xlu0 %v14650_v49, %s9523_s21  ;;  %v8559_v49 = vunpack.i.l.bf16 %v14669_v6 }
 0xfe2   : > { %v9334_v44 = vpop.eup %9333 }
 0xfe3   : > { %v5135_v60 = vmul.f32 %v9334_v44, %v8465_v33  ;;  %v9336_v53 = vpop.eup %9335  ;;  %v14656_v33 = vld [vmem:[#allocation50_spill] sm:$0xff]  ;;  %v14670_v44 = vld [vmem:[#allocation115_spill] sm:$0xff] }
 0xfe4   : > { %v9338_v51 = vpop.eup %9337  ;;  %9343 = vrcp.f32 %v14656_v33  ;;  %v1179_v52 = vmul.f32 %v9336_v53, %v14657_v54  ;;  %v14672_v53 = vld [vmem:[#allocation31_spill] sm:$0xff]  ;;  %v13019_v33 = vpop.permute.xlu1 %8677 }
 0xfe5   : > { %8802 = vrot.lane.b32.xlu0 %v8801_v9, %s9521_s18  ;;  %v8806_v43 = vpack.i.bf16 %v5136_v1, %v5135_v60  ;;  %v9340_v57 = vpop.eup %9339  ;;  %v1180_v28 = vmul.f32 %v9338_v51, %v14658_v15  ;;  %9345 = vrcp.f32 %v14660_v27  ;;  %v8565_v1 = vunpack.i.h.bf16 %v14670_v44  ;;  %v14674_v27 = vld [vmem:[#allocation74_spill] sm:$0xff] }
 0xfe6   : > { %v9342_v4 = vpop.eup %9341  ;;  %v1182_v50 = vmul.f32 %v9340_v57, %v14661_v29  ;;  %9347 = vrcp.f32 %v14662_v45  ;;  %v5585_v26 = vsel %vm712_vm1, %v1179_v52, %v8534_v35  ;;  %v8564_v9 = vunpack.i.l.bf16 %v14670_v44  ;;  %v13029_v45 = vpop.permute.xlu0 %8672 }
 0xfe7   : > { %8807 = vrot.lane.b32.xlu1 %v8806_v43, %s9521_s18  ;;  %v1181_v56 = vmul.f32 %v9342_v4, %v14663_v2  ;;  %9349 = vrcp.f32 %v14664_v17  ;;  %v5586_v48 = vsel %vm712_vm1, %v1180_v28, %v8535_v5  ;;  %v5602_v60 = vsel %vm5601_vm2, %v5585_v26, %v8544_v0  ;;  %v14671_v43 = vld [vmem:[#allocation30_spill] sm:$0xff] }
 0xfe8   : > { %9351 = vrcp.f32 %v14667_v42  ;;  %v5588_v36 = vsel %vm712_vm1, %v1182_v50, %v8540_v18  ;;  %v8574_v40 = vunpack.i.l.bf16 %v14671_v43  ;;  %v5603_v58 = vsel %vm5601_vm2, %v5586_v48, %v8545_v47 }
 0xfe9   : > { %v5587_v24 = vsel %vm712_vm1, %v1181_v56, %v8539_v38  ;;  %v8575_v41 = vunpack.i.h.bf16 %v14671_v43  ;;  %v8569_v51 = vunpack.i.l.bf16 %v14672_v53  ;;  %v5605_v57 = vsel %vm5601_vm2, %v5588_v36, %v8550_v37  ;;  %v14676_v36 = vld [vmem:[#allocation32_spill] sm:$0xff] }
 0xfea   : > { %v5604_v23 = vsel %vm5601_vm2, %v5587_v24, %v8549_v34  ;;  %v5619_v59 = vsel %vm5618_vm3, %v5602_v60, %v8554_v11  ;;  %v5620_v35 = vsel %vm5618_vm3, %v5603_v58, %v8555_v62  ;;  %v8570_v4 = vunpack.i.h.bf16 %v14672_v53  ;;  %v14675_v24 = vld [vmem:[#allocation143_spill] sm:$0xff]  ;;  %v14678_v53 = vld [vmem:[#allocation17_spill] sm:$0xff] }
 0xfeb   : > { %v5621_v54 = vsel %vm5618_vm3, %v5604_v23, %v8559_v49  ;;  %v5622_v52 = vsel %vm5618_vm3, %v5605_v57, %v8560_v46  ;;  %v5636_v15 = vsel %vm5635_vm4, %v5619_v59, %v8564_v9  ;;  %v5637_v28 = vsel %vm5635_vm4, %v5620_v35, %v8565_v1  ;;  %v14677_v23 = vld [vmem:[#allocation21_spill] sm:$0xff]  ;;  %v14679_v35 = vld [vmem:[#allocation20_spill] sm:$0xff] }
 0xfec   : > { %9353 = vrcp.f32 %v14673_v31  ;;  %v5653_v38 = vsel %vm5652_vm5, %v5636_v15, %v8574_v40  ;;  %v8580_v29 = vunpack.i.h.bf16 %v14674_v27  ;;  %v8579_v50 = vunpack.i.l.bf16 %v14674_v27  ;;  %v14682_v27 = vld [vmem:[#allocation40_spill] sm:$0xff] }
 0xfed   : > { %v5654_v5 = vsel %vm5652_vm5, %v5637_v28, %v8575_v41  ;;  %v5638_v26 = vsel %vm5635_vm4, %v5621_v54, %v8569_v51  ;;  %v8615_v2 = vunpack.i.h.bf16 %v12794_v16  ;;  %v8614_v56 = vunpack.i.l.bf16 %v12794_v16  ;;  %v14680_v54 = vld [vmem:[#allocation33_spill] sm:$0xff] }
 0xfee   : > { %v5639_v14 = vsel %vm5635_vm4, %v5622_v52, %v8570_v4  ;;  %v8620_v47 = vunpack.i.h.bf16 %v12796_v3  ;;  %v8619_v0 = vunpack.i.l.bf16 %v12796_v3  ;;  %9355 = vrcp.f32 %v14675_v24 }
 0xfef   : > { %v8590_v37 = vunpack.i.h.bf16 %v14676_v36  ;;  %v8589_v16 = vunpack.i.l.bf16 %v14676_v36  ;;  %v5655_v63 = vsel %vm5652_vm5, %v5638_v26, %v8579_v50  ;;  %v5656_v62 = vsel %vm5652_vm5, %v5639_v14, %v8580_v29  ;;  %v14683_v50 = vld [vmem:[#allocation42_spill] sm:$0xff] }
 0xff0   : > { %v5672_v3 = vsel %vm5669_vm6, %v5655_v63, %v8614_v56  ;;  %v5673_v46 = vsel %vm5669_vm6, %v5656_v62, %v8615_v2  ;;  %v5670_v9 = vsel %vm5669_vm6, %v5653_v38, %v8619_v0  ;;  %v5671_v60 = vsel %vm5669_vm6, %v5654_v5, %v8620_v47  ;;  %v14681_v38 = vld [vmem:[#allocation145_spill] sm:$0xff] }
 0xff1   : > { %v9344_v17 = vpop.eup %9343  ;;  %v8600_v52 = vunpack.i.h.bf16 %v14680_v54  ;;  %v8599_v15 = vunpack.i.l.bf16 %v14680_v54  ;;  %9357 = vrcp.f32 %v14681_v38  ;;  %v8644_v38 = vunpack.i.l.bf16 %v12864_v25 }
 0xff2   : > { %v9346_v48 = vpop.eup %9345  ;;  %v1183_v51 = vmul.f32 %v9344_v17, %v14678_v53  ;;  %v14684_v17 = vld [vmem:[#allocation107_spill] sm:$0xff]  ;;  %9359 = vrcp.f32 %v12812_v20  ;;  %v8669_v20 = vunpack.i.l.bf16 %v12948_v21 }
 0xff3   : > { %v9348_v42 = vpop.eup %9347  ;;  %v1185_v41 = vmul.f32 %v9346_v48, %v14677_v23  ;;  %v8585_v14 = vunpack.i.h.bf16 %v14684_v17  ;;  %v8584_v47 = vunpack.i.l.bf16 %v14684_v17  ;;  %9361 = vrcp.f32 %v12858_v7 }
 0xff4   : > { %v9350_v6 = vpop.eup %9349  ;;  %v1184_v29 = vmul.f32 %v9348_v42, %v14682_v27  ;;  %9363 = vrcp.f32 %v12860_v8  ;;  %v8675_v7 = vunpack.i.h.bf16 %v13029_v45 }
 0xff5   : > { %v9352_v1 = vpop.eup %9351  ;;  %v1186_v4 = vmul.f32 %v9350_v6, %v14679_v35  ;;  %v5591_v56 = vsel %vm712_vm1, %v1185_v41, %v8589_v16  ;;  %v14687_v16 = vld [vmem:[#allocation6_spill] sm:$0xff]  ;;  %v8634_v35 = vunpack.i.l.bf16 %v12856_v19  ;;  %9365 = vrcp.f32 %v12866_v22 }
 0xff6   : > { %v13063_v5 = vmul.f32 %v9352_v1, %v14683_v50  ;;  %v5608_v36 = vsel %vm5601_vm2, %v5591_v56, %v8599_v15  ;;  %v8605_v63 = vunpack.i.h.bf16 %v14687_v16  ;;  %v8604_v62 = vunpack.i.l.bf16 %v14687_v16 }
 0xff7   : > { %v5592_v2 = vsel %vm712_vm1, %v1186_v4, %v8590_v37  ;;  %v5590_v1 = vsel %vm712_vm1, %v1184_v29, %v8585_v14 }
 0xff8   : > { %v5609_v37 = vsel %vm5601_vm2, %v5592_v2, %v8600_v52 }
 0xff9   : > { %v9354_v6 = vpop.eup %9353 }
0x1025   : > { %v8683_v18 = vpop.permute.xlu1 %8682 }
0x1026   : > { %v8685_v13 = vunpack.i.h.bf16 %v8683_v18  ;;  %v8684_v34 = vunpack.i.l.bf16 %v8683_v18  ;;  %v14685_v18 = vld [vmem:[#allocation106_spill] sm:$0xff] }
0x1027   : > { %v8688_v11 = vpop.permute.xlu0 %8687  ;;  %v8610_v48 = vunpack.i.h.bf16 %v14685_v18  ;;  %v8609_v24 = vunpack.i.l.bf16 %v14685_v18 }
0x1028   : > { %v8690_v49 = vunpack.i.h.bf16 %v8688_v11  ;;  %v8689_v44 = vunpack.i.l.bf16 %v8688_v11  ;;  %v5689_v43 = vsel %vm5686_vm7, %v5672_v3, %v8684_v34  ;;  %v5690_v40 = vsel %vm5686_vm7, %v5673_v46, %v8685_v13  ;;  %v14686_v13 = vld [vmem:[#allocation72_spill] sm:$0xff] }
0x1029   : > { %v13049_v58 = vpop.permute.xlu1 %8697  ;;  %v5704_v26 = vpack.c.bf16 %v5690_v40, %v5689_v43  ;;  %v8595_v34 = vunpack.i.h.bf16 %v14686_v13  ;;  %v8594_v42 = vunpack.i.l.bf16 %v14686_v13  ;;  %v8625_v3 = vunpack.i.h.bf16 %v12854_v39 }
0x102a   : > { %v5687_v57 = vsel %vm5686_vm7, %v5670_v9, %v8689_v44  ;;  %v5688_v59 = vsel %vm5686_vm7, %v5671_v60, %v8690_v49  ;;  %v8624_v46 = vunpack.i.l.bf16 %v12854_v39  ;;  %v8630_v49 = vunpack.i.h.bf16 %v12862_v32 }
0x102b   : > { %v5703_v28 = vpack.c.bf16 %v5688_v59, %v5687_v57  ;;  %v13058_v31 = vpop.permute.xlu0 %8692  ;;  %v8629_v44 = vunpack.i.l.bf16 %v12862_v32  ;;  %v5589_v9 = vsel %vm712_vm1, %v1183_v51, %v8584_v47  ;;  %v8640_v60 = vunpack.i.h.bf16 %v12870_v10  ;;  %v9356_v57 = vpop.eup %9355  ;;  %v14688_v47 = vld [vmem:[#allocation41_spill] sm:$0xff] }
0x102c   : > { %v8639_v43 = vunpack.i.l.bf16 %v12870_v10  ;;  %v5625_v23 = vsel %vm5618_vm3, %v5608_v36, %v8609_v24  ;;  %v5626_v41 = vsel %vm5618_vm3, %v5609_v37, %v8610_v48  ;;  %v5606_v39 = vsel %vm5601_vm2, %v5589_v9, %v8594_v42  ;;  %v14689_v48 = vld [vmem:[#allocation44_spill] sm:$0xff]  ;;  %v9358_v37 = vpop.eup %9357 }
0x102d   : > { %v13069_v0 = vpop.permute.xlu1 %8707  ;;  %8475 = vmatprep.mubr.msk.bf16.mxu0 %vm526_vm0, %v5703_v28  ;;  %v5607_v53 = vsel %vm5601_vm2, %v5590_v1, %v8595_v34  ;;  %v5623_v32 = vsel %vm5618_vm3, %v5606_v39, %v8604_v62  ;;  %v8635_v51 = vunpack.i.h.bf16 %v12856_v19  ;;  %v5642_v52 = vsel %vm5635_vm4, %v5625_v23, %v8629_v44  ;;  %v14690_v39 = vld [vmem:[#allocation43_spill] sm:$0xff] }
0x102e   : > { %8476 = vmatmul.mubr.msk.bf16.vlgmr.msra.gmra.mxu0 %vm526_vm0, %v5704_v26  ;;  %v5624_v59 = vsel %vm5618_vm3, %v5607_v53, %v8605_v63  ;;  %v5640_v54 = vsel %vm5635_vm4, %v5623_v32, %v8624_v46  ;;  %v5643_v15 = vsel %vm5635_vm4, %v5626_v41, %v8630_v49  ;;  %v8645_v28 = vunpack.i.h.bf16 %v12864_v25 }
0x102f   : > { %v13081_v11 = vpop.permute.xlu0 %8702  ;;  %v5641_v4 = vsel %vm5635_vm4, %v5624_v59, %v8625_v3  ;;  %v5659_v27 = vsel %vm5652_vm5, %v5642_v52, %v8639_v43  ;;  %v5660_v29 = vsel %vm5652_vm5, %v5643_v15, %v8640_v60  ;;  %v8650_v19 = vunpack.i.h.bf16 %v12868_v55 }
0x1030   : > { %v8649_v26 = vunpack.i.l.bf16 %v12868_v55  ;;  %v5658_v17 = vsel %vm5652_vm5, %v5641_v4, %v8635_v51  ;;  %v5657_v14 = vsel %vm5652_vm5, %v5640_v54, %v8634_v35  ;;  %v1189_v18 = vmul.f32 %v9356_v57, %v14688_v47 }
0x1031   : > { %v13091_v40 = vpop.permute.xlu1 %8717  ;;  %v1188_v24 = vmul.f32 %v9354_v6, %v14689_v48  ;;  %v5677_v34 = vsel %vm5669_vm6, %v5660_v29, %v8650_v19  ;;  %v5674_v55 = vsel %vm5669_vm6, %v5657_v14, %v8644_v38  ;;  %v5675_v16 = vsel %vm5669_vm6, %v5658_v17, %v8645_v28 }
0x1032   : > { %v5676_v13 = vsel %vm5669_vm6, %v5659_v27, %v8649_v26  ;;  %v8660_v6 = vunpack.i.h.bf16 %v12908_v30  ;;  %v8659_v44 = vunpack.i.l.bf16 %v12908_v30  ;;  %v8655_v1 = vunpack.i.h.bf16 %v12933_v61 }
0x1033   : > { %v13101_v10 = vpop.permute.xlu0 %8712  ;;  %v8654_v9 = vunpack.i.l.bf16 %v12933_v61  ;;  %v8670_v23 = vunpack.i.h.bf16 %v12948_v21  ;;  %v1190_v53 = vmul.f32 %v9358_v37, %v14690_v39  ;;  %v8665_v30 = vunpack.i.h.bf16 %v13003_v12 }
0x1034   : > { %v8664_v57 = vunpack.i.l.bf16 %v13003_v12  ;;  %v8674_v61 = vunpack.i.l.bf16 %v13029_v45  ;;  %v5595_v21 = vsel %vm712_vm1, %v1189_v18, %v8659_v44  ;;  %v5594_v59 = vsel %vm712_vm1, %v1188_v24, %v8655_v1 }
0x1035   : > { %v8723_v50 = vpop.permute.xlu1 %8722  ;;  %v5596_v8 = vsel %vm712_vm1, %v1190_v53, %v8660_v6  ;;  %v5593_v12 = vsel %vm712_vm1, %v13063_v5, %v8654_v9  ;;  %v5612_v35 = vsel %vm5601_vm2, %v5595_v21, %v8669_v20  ;;  %v8680_v4 = vunpack.i.h.bf16 %v13019_v33 }
0x1036   : > { %v8725_v2 = vunpack.i.h.bf16 %v8723_v50  ;;  %v8724_v56 = vunpack.i.l.bf16 %v8723_v50  ;;  %v5613_v22 = vsel %vm5601_vm2, %v5596_v8, %v8670_v23  ;;  %v8679_v45 = vunpack.i.l.bf16 %v13019_v33 }
0x1037   : > { %v8728_v25 = vpop.permute.xlu0 %8727  ;;  %v5610_v54 = vsel %vm5601_vm2, %v5593_v12, %v8664_v57  ;;  %v5611_v52 = vsel %vm5601_vm2, %v5594_v59, %v8665_v30  ;;  %v8700_v15 = vunpack.i.h.bf16 %v13049_v58  ;;  %v8699_v28 = vunpack.i.l.bf16 %v13049_v58 }
0x1038   : > { %v8730_v42 = vunpack.i.h.bf16 %v8728_v25  ;;  %v8729_v36 = vunpack.i.l.bf16 %v8728_v25  ;;  %v5693_v63 = vsel %vm5686_vm7, %v5676_v13, %v8724_v56  ;;  %v5694_v62 = vsel %vm5686_vm7, %v5677_v34, %v8725_v2 }
0x1039   : > { %v13123_v3 = vpop.permute.xlu1 %8737  ;;  %v5706_v41 = vpack.c.bf16 %v5694_v62, %v5693_v63  ;;  %v5627_v5 = vsel %vm5618_vm3, %v5610_v54, %v8674_v61  ;;  %v5628_v27 = vsel %vm5618_vm3, %v5611_v52, %v8675_v7  ;;  %v8695_v29 = vunpack.i.h.bf16 %v13058_v31  ;;  %v14693_v52 = vld [vmem:[#allocation46_spill] sm:$0xff] }
0x103a   : > { %v5691_v46 = vsel %vm5686_vm7, %v5674_v55, %v8729_v36  ;;  %v5692_v49 = vsel %vm5686_vm7, %v5675_v16, %v8730_v42  ;;  %v8694_v50 = vunpack.i.l.bf16 %v13058_v31  ;;  %v8710_v33 = vunpack.i.h.bf16 %v13069_v0  ;;  %v9360_v42 = vpop.eup %9359 }
0x103b   : > { %v5705_v60 = vpack.c.bf16 %v5692_v49, %v5691_v46  ;;  %v13132_v43 = vpop.permute.xlu0 %8732  ;;  %v8709_v19 = vunpack.i.l.bf16 %v13069_v0  ;;  %v8705_v26 = vunpack.i.h.bf16 %v13081_v11  ;;  %v8704_v2 = vunpack.i.l.bf16 %v13081_v11  ;;  %v9362_v46 = vpop.eup %9361 }
0x103c   : > { %v5629_v58 = vsel %vm5618_vm3, %v5612_v35, %v8679_v45  ;;  %v5630_v17 = vsel %vm5618_vm3, %v5613_v22, %v8680_v4  ;;  %v8720_v14 = vunpack.i.h.bf16 %v13091_v40  ;;  %v8719_v47 = vunpack.i.l.bf16 %v13091_v40  ;;  %v9364_v23 = vpop.eup %9363  ;;  %v14691_v35 = vld [vmem:[#allocation45_spill] sm:$0xff]  ;;  %v14692_v4 = vld [vmem:[#allocation47_spill] sm:$0xff] }
0x103d   : > { %v13141_v32 = vpop.permute.xlu1 %8747  ;;  %8479 = vmatprep.mubr.msk.bf16.mxu0 %vm526_vm0, %v5705_v60  ;;  %v5646_v31 = vsel %vm5635_vm4, %v5629_v58, %v8699_v28  ;;  %v5647_v18 = vsel %vm5635_vm4, %v5630_v17, %v8700_v15  ;;  %v8715_v0 = vunpack.i.h.bf16 %v13101_v10  ;;  %v8714_v48 = vunpack.i.l.bf16 %v13101_v10  ;;  %v9366_v39 = vpop.eup %9365  ;;  %v14694_v15 = vld [vmem:[#allocation48_spill] sm:$0xff] }
0x103e   : > { %8480 = vmatmul.mubr.msk.bf16.gmra.mxu0 %vm526_vm0, %v5706_v41  ;;  %v5645_v11 = vsel %vm5635_vm4, %v5628_v27, %v8695_v29  ;;  %v5644_v25 = vsel %vm5635_vm4, %v5627_v5, %v8694_v50  ;;  %v5663_v36 = vsel %vm5652_vm5, %v5646_v31, %v8709_v19  ;;  %v5664_v40 = vsel %vm5652_vm5, %v5647_v18, %v8710_v33 }
0x103f   : > { %v13153_v51 = vpop.permute.xlu0 %8742  ;;  %v5661_v37 = vsel %vm5652_vm5, %v5644_v25, %v8704_v2  ;;  %v5662_v55 = vsel %vm5652_vm5, %v5645_v11, %v8705_v26  ;;  %v5680_v63 = vsel %vm5669_vm6, %v5663_v36, %v8719_v47  ;;  %v5681_v10 = vsel %vm5669_vm6, %v5664_v40, %v8720_v14 }
0x1040   : > { %v5678_v49 = vsel %vm5669_vm6, %v5661_v37, %v8714_v48  ;;  %v5679_v44 = vsel %vm5669_vm6, %v5662_v55, %v8715_v0  ;;  %v8740_v57 = vunpack.i.h.bf16 %v13123_v3  ;;  %v8739_v7 = vunpack.i.l.bf16 %v13123_v3 }
0x1041   : > { %v13163_v38 = vpop.permute.xlu1 %8757  ;;  %v8735_v8 = vunpack.i.h.bf16 %v13132_v43  ;;  %v8734_v21 = vunpack.i.l.bf16 %v13132_v43  ;;  %v8750_v59 = vunpack.i.h.bf16 %v13141_v32  ;;  %v8749_v12 = vunpack.i.l.bf16 %v13141_v32 }
0x1042   : > { %v1193_v22 = vmul.f32 %v9364_v23, %v14691_v35  ;;  %v1194_v45 = vmul.f32 %v9366_v39, %v14692_v4  ;;  %v1191_v3 = vmul.f32 %v9360_v42, %v14693_v52  ;;  %v1192_v28 = vmul.f32 %v9362_v46, %v14694_v15 }
0x1043   : > { %v13173_v56 = vpop.permute.xlu0 %8752  ;;  %v8745_v5 = vunpack.i.h.bf16 %v13153_v51  ;;  %v8744_v43 = vunpack.i.l.bf16 %v13153_v51  ;;  %v8760_v50 = vunpack.i.h.bf16 %v13163_v38  ;;  %v8759_v33 = vunpack.i.l.bf16 %v13163_v38 }
0x1044   : > { %v5600_v32 = vsel %vm712_vm1, %v1194_v45, %v8740_v57  ;;  %v5599_v29 = vsel %vm712_vm1, %v1193_v22, %v8739_v7  ;;  %v5598_v19 = vsel %vm712_vm1, %v1192_v28, %v8735_v8  ;;  %v5597_v26 = vsel %vm712_vm1, %v1191_v3, %v8734_v21  ;;  %v13248_v45 = vld [vmem:[%s13987_s4] ss:$0 sm:$0xff] }
0x1045   : > { %v8763_v24 = vpop.permute.xlu1 %8762  ;;  %v5616_v2 = vsel %vm5601_vm2, %v5599_v29, %v8749_v12  ;;  %v5617_v58 = vsel %vm5601_vm2, %v5600_v32, %v8750_v59  ;;  %v8755_v17 = vunpack.i.h.bf16 %v13173_v56  ;;  %v8754_v51 = vunpack.i.l.bf16 %v13173_v56  ;;  %v9495_v28 = vld [vmem:[%s9640_s27] sm:$0xff] }
0x1046   : > { %v8765_v13 = vunpack.i.h.bf16 %v8763_v24  ;;  %v8764_v34 = vunpack.i.l.bf16 %v8763_v24  ;;  %v5614_v31 = vsel %vm5601_vm2, %v5597_v26, %v8744_v43  ;;  %v5615_v18 = vsel %vm5601_vm2, %v5598_v19, %v8745_v5  ;;  %v9497_v19 = vld [vmem:[%s9640_s27 + $0x8] sm:$0xff] }
0x1047   : > { %v8768_v16 = vpop.permute.xlu0 %8767  ;;  %v5633_v24 = vsel %vm5618_vm3, %v5616_v2, %v8759_v33  ;;  %v5634_v11 = vsel %vm5618_vm3, %v5617_v58, %v8760_v50  ;;  %v5631_v37 = vsel %vm5618_vm3, %v5614_v31, %v8754_v51  ;;  %v5632_v55 = vsel %vm5618_vm3, %v5615_v18, %v8755_v17  ;;  %v9498_v2 = vld [vmem:[%s9640_s27 + $0x18] sm:$0xff] }
0x1048   : > { %v8770_v62 = vunpack.i.h.bf16 %v8768_v16  ;;  %v8769_v6 = vunpack.i.l.bf16 %v8768_v16  ;;  %v5697_v1 = vsel %vm5686_vm7, %v5680_v63, %v8764_v34  ;;  %v5698_v9 = vsel %vm5686_vm7, %v5681_v10, %v8765_v13 }
0x1049   : > { %v8778_v60 = vpop.permute.xlu1 %8777  ;;  %v5708_v61 = vpack.c.bf16 %v5698_v9, %v5697_v1 }
0x104a   : > { %v5696_v20 = vsel %vm5686_vm7, %v5679_v44, %v8770_v62  ;;  %v5695_v41 = vsel %vm5686_vm7, %v5678_v49, %v8769_v6  ;;  %v8780_v14 = vunpack.i.h.bf16 %v8778_v60  ;;  %v8779_v47 = vunpack.i.l.bf16 %v8778_v60 }
0x104b   : > { %v5707_v53 = vpack.c.bf16 %v5696_v20, %v5695_v41  ;;  %v8773_v30 = vpop.permute.xlu0 %8772 }
0x104c   : > { %v8775_v0 = vunpack.i.h.bf16 %v8773_v30  ;;  %v8774_v38 = vunpack.i.l.bf16 %v8773_v30  ;;  %v5650_v16 = vsel %vm5635_vm4, %v5633_v24, %v8779_v47  ;;  %v5651_v63 = vsel %vm5635_vm4, %v5634_v11, %v8780_v14 }
0x104d   : > { %8483 = vmatprep.mubr.msk.bf16.mxu0 %vm526_vm0, %v5707_v53  ;;  %v8788_v54 = vpop.permute.xlu1 %8787 }
0x104e   : > { %8484 = vmatmul.mubr.msk.bf16.gmra.mxu0 %vm526_vm0, %v5708_v61  ;;  %v8790_v42 = vunpack.i.h.bf16 %v8788_v54  ;;  %v8789_v36 = vunpack.i.l.bf16 %v8788_v54  ;;  %v5649_v10 = vsel %vm5635_vm4, %v5632_v55, %v8775_v0  ;;  %v5648_v62 = vsel %vm5635_vm4, %v5631_v37, %v8774_v38  ;;  %v9502_v37 = vld [vmem:[%s9640_s27 + $0x38] sm:$0xff] }
0x104f   : > { %v8783_v27 = vpop.permute.xlu0 %8782 }
0x1050   : > { %v8785_v25 = vunpack.i.h.bf16 %v8783_v27  ;;  %v8784_v13 = vunpack.i.l.bf16 %v8783_v27  ;;  %v5667_v23 = vsel %vm5652_vm5, %v5650_v16, %v8789_v36  ;;  %v5668_v20 = vsel %vm5652_vm5, %v5651_v63, %v8790_v42  ;;  %v9496_v27 = vld [vmem:[%s9640_s27 + $0x10] sm:$0xff] }
0x1051   : > { %v8798_v34 = vpop.permute.xlu1 %8797 }
0x1052   : > { %v8800_v6 = vunpack.i.h.bf16 %v8798_v34  ;;  %v8799_v46 = vunpack.i.l.bf16 %v8798_v34  ;;  %v5665_v44 = vsel %vm5652_vm5, %v5648_v62, %v8784_v13  ;;  %v5666_v1 = vsel %vm5652_vm5, %v5649_v10, %v8785_v25  ;;  %v9500_v25 = vld [vmem:[%s9640_s27 + $0x30] sm:$0xff] }
0x1053   : > { %v8793_v48 = vpop.permute.xlu0 %8792 }
0x1054   : > { %v8795_v40 = vunpack.i.h.bf16 %v8793_v48  ;;  %v8794_v56 = vunpack.i.l.bf16 %v8793_v48  ;;  %v5684_v8 = vsel %vm5669_vm6, %v5667_v23, %v8799_v46  ;;  %v5685_v21 = vsel %vm5669_vm6, %v5668_v20, %v8800_v6  ;;  %v9499_v48 = vld [vmem:[%s9640_s27 + $0x20] sm:$0xff]  ;;  %v9504_v23 = vld [vmem:[%s9640_s27 + $0x50] sm:$0xff] }
0x1056   : > { %v5682_v41 = vsel %vm5669_vm6, %v5665_v44, %v8794_v56  ;;  %v5683_v39 = vsel %vm5669_vm6, %v5666_v1, %v8795_v40  ;;  %v9501_v40 = vld [vmem:[%s9640_s27 + $0x28] sm:$0xff]  ;;  %v9503_v1 = vld [vmem:[%s9640_s27 + $0x40] sm:$0xff] }
0x1057   : > { %v8803_v49 = vpop.permute.xlu0 %8802 }
0x1058   : > { %v8805_v9 = vunpack.i.h.bf16 %v8803_v49  ;;  %v8804_v60 = vunpack.i.l.bf16 %v8803_v49 }
0x1059   : > { %v8808_v53 = vpop.permute.xlu1 %8807 }
0x105a   : > { %v5700_v30 = vsel %vm5686_vm7, %v5683_v39, %v8805_v9  ;;  %v5699_v57 = vsel %vm5686_vm7, %v5682_v41, %v8804_v60  ;;  %v8810_v7 = vunpack.i.h.bf16 %v8808_v53  ;;  %v8809_v61 = vunpack.i.l.bf16 %v8808_v53 }
0x105b   : > { %v5709_v59 = vpack.c.bf16 %v5700_v30, %v5699_v57  ;;  %v9505_v30 = vld [vmem:[%s9640_s27 + $0x48] sm:$0xff] }
0x105c   : > { %v5701_v12 = vsel %vm5686_vm7, %v5684_v8, %v8809_v61  ;;  %v5702_v35 = vsel %vm5686_vm7, %v5685_v21, %v8810_v7  ;;  %v9506_v7 = vld [vmem:[%s9640_s27 + $0x58] sm:$0xff] }
0x105d   : > { %v5710_v22 = vpack.c.bf16 %v5702_v35, %v5701_v12  ;;  %8487 = vmatprep.mubr.msk.bf16.mxu0 %vm526_vm0, %v5709_v59 }
0x105f   : > { %8488 = vmatmul.mubr.msk.bf16.gmra.mxu0 %vm526_vm0, %v5710_v22 }
0x10ee   : > { %v8477_v4 = vpop.f32.mrf.mxu0 }
0x10ef   : > { %v5817_v52 = vadd.f32 %v8477_v4, %v13248_v45 }
0x10f0   : > { %v5808_v54 = vpop.f32.mrf.mxu0 }
0x10f1   : > { %v5809_v3 = vadd.f32 %v13248_v45, %v5808_v54  ;;  %v13256_v32 = vadd.f32 %v9496_v27, %v5817_v52  ;;  %v9507_v52 = vld [vmem:[%s9640_s27 + $0x60] sm:$0xff] }
0x10f2   : > { %v8478_v15 = vpop.f32.mrf.mxu0 }
0x10f3   : > { %v13253_v5 = vadd.f32 %v9495_v28, %v5809_v3  ;;  %v5820_v29 = vadd.f32 %v8478_v15, %v13248_v45  ;;  %v5893_v51 = vsel %vm526_vm0, %v13256_v32, 0.0  ;;  %v9508_v28 = vld [vmem:[%s9640_s27 + $0x70] sm:$0xff] }
0x10f4   : > { %v5811_v43 = vpop.f32.mrf.mxu0 }
0x10f5   : > { %v5812_v50 = vadd.f32 %v13248_v45, %v5811_v43  ;;  %v5887_v33 = vsel %vm526_vm0, %v13253_v5, 0.0  ;;  %v13266_v58 = vadd.f32 %v9498_v2, %v5820_v29  ;;  %v9510_v2 = vld [vmem:[%s9640_s27 + $0x78] sm:$0xff] }
0x10f6   : > { %5888 = vadd.xlane.f32.xlu0 %v5887_v33  ;;  %v9509_v33 = vld [vmem:[%s9640_s27 + $0x68] sm:$0xff] }
0x10f7   : > { %v13263_v26 = vadd.f32 %v9497_v19, %v5812_v50  ;;  %v5896_v14 = vsel %vm526_vm0, %v13266_v58, 0.0 }
0x10f9   : > { %v5890_v17 = vsel %vm526_vm0, %v13263_v26, 0.0 }
0x10fa   : > { %5891 = vadd.xlane.f32.xlu1 %v5890_v17  ;;  %5894 = vadd.xlane.f32.xlu0 %v5893_v51 }
0x10fe   : > { %v8481_v47 = vpop.f32.mrf.mxu0  ;;  %5897 = vadd.xlane.f32.xlu0 %v5896_v14 }
0x10ff   : > { %v5833_v18 = vadd.f32 %v8481_v47, %v13248_v45  ;;  %v8827_v47 = vld [vmem:[%s13990_s7 + $0x30] ss:$8 sps:$4 sm:$0xff]  }
0x1100   : > { %v5824_v31 = vpop.f32.mrf.mxu0 }
0x1101   : > { %v5825_v0 = vadd.f32 %v13248_v45, %v5824_v31  ;;  %v13280_v13 = vadd.f32 %v9500_v25, %v5833_v18  ;;  %v8829_v31 = vld [vmem:[%s13990_s7 + $0x34] ss:$8 sps:$4 sm:$0xff]  }
0x1102   : > { %v8482_v38 = vpop.f32.mrf.mxu0  ;;  %6242 = vmatprep.subr.bf16.mxu1 %v8829_v31 }
0x1103   : > { %v13277_v24 = vadd.f32 %v9499_v48, %v5825_v0  ;;  %v5836_v34 = vadd.f32 %v8482_v38, %v13248_v45  ;;  %v5905_v16 = vsel %vm526_vm0, %v13280_v13, 0.0  ;;  %6243 = vmatpush1.bf16.msra.mxu1 %v8827_v47  ;;  %v8833_v47 = vld [vmem:[%s13990_s7 + $0x10] ss:$8 sps:$4 sm:$0xff]  }
0x1104   : > { %v5827_v11 = vpop.f32.mrf.mxu0 }
0x1105   : > { %v5828_v42 = vadd.f32 %v13248_v45, %v5827_v11  ;;  %v5899_v36 = vsel %vm526_vm0, %v13277_v24, 0.0  ;;  %v13290_v55 = vadd.f32 %v9502_v37, %v5836_v34 }
0x1106   : > { %5900 = vadd.xlane.f32.xlu1 %v5899_v36 }
0x1107   : > { %v13287_v56 = vadd.f32 %v9501_v40, %v5828_v42  ;;  %v5908_v10 = vsel %vm526_vm0, %v13290_v55, 0.0 }
0x1109   : > { %v5902_v63 = vsel %vm526_vm0, %v13287_v56, 0.0 }
0x110a   : > { %5906 = vadd.xlane.f32.xlu1 %v5905_v16  ;;  %5903 = vadd.xlane.f32.xlu0 %v5902_v63 }
0x110e   : > { %v8485_v62 = vpop.f32.mrf.mxu0  ;;  %5909 = vadd.xlane.f32.xlu0 %v5908_v10 }
0x110f   : > { %v5849_v46 = vadd.f32 %v8485_v62, %v13248_v45 }
0x1110   : > { %v5840_v6 = vpop.f32.mrf.mxu0 }
0x1111   : > { %v5841_v49 = vadd.f32 %v13248_v45, %v5840_v6  ;;  %v13304_v20 = vadd.f32 %v9504_v23, %v5849_v46 }
0x1112   : > { %v8486_v44 = vpop.f32.mrf.mxu0 }
0x1113   : > { %v13301_v9 = vadd.f32 %v9503_v1, %v5841_v49  ;;  %v5852_v41 = vadd.f32 %v8486_v44, %v13248_v45  ;;  %v5917_v8 = vsel %vm526_vm0, %v13304_v20, 0.0 }
0x1114   : > { %v5843_v60 = vpop.f32.mrf.mxu0 }
0x1115   : > { %v5844_v39 = vadd.f32 %v13248_v45, %v5843_v60  ;;  %v5911_v53 = vsel %vm526_vm0, %v13301_v9, 0.0  ;;  %v13314_v61 = vadd.f32 %v9506_v7, %v5852_v41 }
0x1116   : > { %5912 = vadd.xlane.f32.xlu1 %v5911_v53 }
0x1117   : > { %v13311_v57 = vadd.f32 %v9505_v30, %v5844_v39  ;;  %v5920_v59 = vsel %vm526_vm0, %v13314_v61, 0.0 }
0x1119   : > { %v5914_v21 = vsel %vm526_vm0, %v13311_v57, 0.0 }
0x111a   : > { %5918 = vadd.xlane.f32.xlu1 %v5917_v8  ;;  %5915 = vadd.xlane.f32.xlu0 %v5914_v21 }
0x111e   : > { %5921 = vadd.xlane.f32.xlu0 %v5920_v59 }
0x111f   : > { %v8489_v12 = vpop.f32.mrf.mxu0 }
0x1120   : > { %v5865_v22 = vadd.f32 %v8489_v12, %v13248_v45 }
0x1121   : > { %v5856_v35 = vpop.f32.mrf.mxu0 }
0x1122   : > { %v5857_v4 = vadd.f32 %v13248_v45, %v5856_v35  ;;  %v13328_v43 = vadd.f32 %v9508_v28, %v5865_v22 }
0x1123   : > { %v8490_v54 = vpop.f32.mrf.mxu0 }
0x1124   : > { %v13325_v3 = vadd.f32 %v9507_v52, %v5857_v4  ;;  %v5868_v27 = vadd.f32 %v8490_v54, %v13248_v45  ;;  %v5929_v51 = vsel %vm526_vm0, %v13328_v43, 0.0 }
0x1125   : > { %v5859_v15 = vpop.f32.mrf.mxu0 }
0x1126   : > { %v5860_v29 = vadd.f32 %v13248_v45, %v5859_v15  ;;  %v5923_v50 = vsel %vm526_vm0, %v13325_v3, 0.0  ;;  %v13338_v17 = vadd.f32 %v9510_v2, %v5868_v27  ;;  %v8830_v27 = vld [vmem:[%s13990_s7 + $0x20] ss:$8 sps:$4 sm:$0xff]  }
0x1127   : > { %5924 = vadd.xlane.f32.xlu1 %v5923_v50 }
0x1128   : > { %v13335_v19 = vadd.f32 %v9509_v33, %v5860_v29  ;;  %v5932_v45 = vsel %vm526_vm0, %v13338_v17, 0.0 }
0x112a   : > { %v5926_v14 = vsel %vm526_vm0, %v13335_v19, 0.0 }
0x112b   : > { %5930 = vadd.xlane.f32.xlu1 %v5929_v51  ;;  %5927 = vadd.xlane.f32.xlu0 %v5926_v14  ;;  %v8835_v14 = vld [vmem:[%s13990_s7 + $0x14] ss:$8 sps:$4 sm:$0xff]  }
0x112f   : > { %5933 = vadd.xlane.f32.xlu0 %v5932_v45 }
0x117f   : > { %v5889_v18 = vpop.xlane.xlu0 %5888 }
0x1180   : > { %v5936_v0 = vmul.f32 0.015625, %v5889_v18 }
0x1182   : > { %v13353_v38 = vsub.f32 %v13253_v5, %v5936_v0 }
0x1183   : > { %v5892_v48 = vpop.xlane.xlu1 %5891  ;;  %v5895_v11 = vpop.xlane.xlu0 %5894 }
0x1184   : > { %v5937_v25 = vmul.f32 0.015625, %v5892_v48  ;;  %v5938_v34 = vmul.f32 0.015625, %v5895_v11  ;;  %v5968_v42 = vmul.f32 %v13353_v38, %v13353_v38  ;;  %v8838_v11 = vld [vmem:[%s13990_s7 + $0x4] ss:$8 sps:$4 sm:$0xff]  }
0x1186   : > { %v13358_v36 = vsub.f32 %v13263_v26, %v5937_v25  ;;  %v13361_v40 = vsub.f32 %v13256_v32, %v5938_v34  ;;  %v5984_v37 = vsel %vm526_vm0, %v5968_v42, 0.0  ;;  %v8836_v25 = vld [vmem:[%s13990_s7] ss:$8 sps:$4 sm:$0xff]  }
0x1187   : > { %5985 = vadd.xlane.f32.xlu1 %v5984_v37  ;;  %v5898_v16 = vpop.xlane.xlu0 %5897 }
0x1188   : > { %v5939_v63 = vmul.f32 0.015625, %v5898_v16  ;;  %v5969_v5 = vmul.f32 %v13358_v36, %v13358_v36  ;;  %v5970_v10 = vmul.f32 %v13361_v40, %v13361_v40 }
0x118a   : > { %v13369_v62 = vsub.f32 %v13266_v58, %v5939_v63  ;;  %v5987_v26 = vsel %vm526_vm0, %v5969_v5, 0.0  ;;  %v5990_v6 = vsel %vm526_vm0, %v5970_v10, 0.0 }
0x118b   : > { %5988 = vadd.xlane.f32.xlu0 %v5987_v26  ;;  %5991 = vadd.xlane.f32.xlu1 %v5990_v6 }
0x118c   : > { %v5971_v32 = vmul.f32 %v13369_v62, %v13369_v62 }
0x118e   : > { %v5993_v46 = vsel %vm526_vm0, %v5971_v32, 0.0 }
0x118f   : > { %v5901_v49 = vpop.xlane.xlu1 %5900  ;;  %5994 = vadd.xlane.f32.xlu0 %v5993_v46 }
0x1190   : > { %v5940_v44 = vmul.f32 0.015625, %v5901_v49 }
0x1192   : > { %v13377_v1 = vsub.f32 %v13277_v24, %v5940_v44 }
0x1193   : > { %v5907_v60 = vpop.xlane.xlu1 %5906  ;;  %v5904_v58 = vpop.xlane.xlu0 %5903 }
0x1194   : > { %v5942_v23 = vmul.f32 0.015625, %v5907_v60  ;;  %v5941_v41 = vmul.f32 0.015625, %v5904_v58  ;;  %v5972_v39 = vmul.f32 %v13377_v1, %v13377_v1 }
0x1196   : > { %v13382_v53 = vsub.f32 %v13280_v13, %v5942_v23  ;;  %v13385_v30 = vsub.f32 %v13287_v56, %v5941_v41  ;;  %v5996_v7 = vsel %vm526_vm0, %v5972_v39, 0.0 }
0x1197   : > { %5997 = vadd.xlane.f32.xlu1 %v5996_v7  ;;  %v5910_v8 = vpop.xlane.xlu0 %5909  ;;  %v8839_v7 = vld [vmem:[%s13992_s9 + $0x78] sm:$0xff]  }
0x1198   : > { %v5943_v21 = vmul.f32 0.015625, %v5910_v8  ;;  %v5974_v24 = vmul.f32 %v13382_v53, %v13382_v53  ;;  %v5973_v59 = vmul.f32 %v13385_v30, %v13385_v30  ;;  %v13475_v8 = vld [vmem:[%s13992_s9 + $0x70] sm:$0xff]   ;;  %7699 = vmatprep.subr.bf16.mxu0 %v8839_v7 }
0x119a   : > { %v13393_v12 = vsub.f32 %v13290_v55, %v5943_v21  ;;  %v6002_v13 = vsel %vm526_vm0, %v5974_v24, 0.0  ;;  %v5999_v35 = vsel %vm526_vm0, %v5973_v59, 0.0  ;;  %v8832_v55 = vld [vmem:[%s13990_s7 + $0x24] ss:$8 sps:$4 sm:$0xff]   ;;  %v13480_v21 = vld [vmem:[%s13992_s9 + $0x30] sm:$0xff]  }
0x119b   : > { %6003 = vadd.xlane.f32.xlu1 %v6002_v13  ;;  %6000 = vadd.xlane.f32.xlu0 %v5999_v35 }
0x119c   : > { %v5975_v56 = vmul.f32 %v13393_v12, %v13393_v12  ;;  %6244 = vmatprep.subr.bf16.mxu1 %v8832_v55 }
0x119d   : > { %6245 = vmatpush1.bf16.msra.mxu1 %v8830_v27 }
0x119e   : > { %v6005_v22 = vsel %vm526_vm0, %v5975_v56, 0.0  ;;  %6246 = vmatprep.subr.bf16.mxu1 %v8835_v14 }
0x119f   : > { %v5913_v4 = vpop.xlane.xlu1 %5912  ;;  %6006 = vadd.xlane.f32.xlu0 %v6005_v22 }
0x11a0   : > { %v5944_v54 = vmul.f32 0.015625, %v5913_v4 }
0x11a1   : > { %6247 = vmatpush1.bf16.msra.mxu1 %v8833_v47 }
0x11a2   : > { %v13401_v52 = vsub.f32 %v13301_v9, %v5944_v54  ;;  %6248 = vmatprep.subr.bf16.mxu1 %v8838_v11 }
0x11a3   : > { %v5919_v15 = vpop.xlane.xlu1 %5918  ;;  %v5916_v28 = vpop.xlane.xlu0 %5915 }
0x11a4   : > { %v5946_v29 = vmul.f32 0.015625, %v5919_v15  ;;  %v5945_v50 = vmul.f32 0.015625, %v5916_v28  ;;  %v5976_v33 = vmul.f32 %v13401_v52, %v13401_v52 }
0x11a5   : > { %6249 = vmatpush1.bf16.msra.mxu1 %v8836_v25 }
0x11a6   : > { %v13412_v9 = vsub.f32 %v13304_v20, %v5946_v29  ;;  %v13415_v2 = vsub.f32 %v13311_v57, %v5945_v50  ;;  %v6008_v51 = vsel %vm526_vm0, %v5976_v33, 0.0  ;;  %8491 = vmatprep.subr.bf16.mxu1 %v8839_v7 }
0x11a7   : > { %6009 = vadd.xlane.f32.xlu1 %v6008_v51  ;;  %v5922_v45 = vpop.xlane.xlu0 %5921 }
0x11a8   : > { %v5947_v31 = vmul.f32 0.015625, %v5922_v45  ;;  %v5978_v20 = vmul.f32 %v13412_v9, %v13412_v9  ;;  %v5977_v57 = vmul.f32 %v13415_v2, %v13415_v2 }
0x11aa   : > { %v13429_v18 = vsub.f32 %v13314_v61, %v5947_v31  ;;  %v6014_v0 = vsel %vm526_vm0, %v5978_v20, 0.0  ;;  %v6011_v48 = vsel %vm526_vm0, %v5977_v57, 0.0  ;;  %v13488_v31 = vld [vmem:[%s13988_s5] ss:$0 sm:$0xff] }
0x11ab   : > { %6015 = vadd.xlane.f32.xlu1 %v6014_v0  ;;  %6012 = vadd.xlane.f32.xlu0 %v6011_v48 }
0x11ac   : > { %v5979_v34 = vmul.f32 %v13429_v18, %v13429_v18 }
0x11ae   : > { %v6017_v61 = vsel %vm526_vm0, %v5979_v34, 0.0 }
0x11af   : > { %6018 = vadd.xlane.f32.xlu0 %v6017_v61 }
0x11b0   : > { %v5925_v42 = vpop.xlane.xlu1 %5924 }
0x11b1   : > { %v5948_v37 = vmul.f32 0.015625, %v5925_v42 }
0x11b3   : > { %v13443_v16 = vsub.f32 %v13325_v3, %v5948_v37 }
0x11b4   : > { %v5931_v63 = vpop.xlane.xlu1 %5930  ;;  %v5928_v5 = vpop.xlane.xlu0 %5927 }
0x11b5   : > { %v5950_v10 = vmul.f32 0.015625, %v5931_v63  ;;  %v5949_v26 = vmul.f32 0.015625, %v5928_v5  ;;  %v5980_v6 = vmul.f32 %v13443_v16, %v13443_v16 }
0x11b7   : > { %v13448_v32 = vsub.f32 %v13328_v43, %v5950_v10  ;;  %v13451_v46 = vsub.f32 %v13335_v19, %v5949_v26  ;;  %v6020_v49 = vsel %vm526_vm0, %v5980_v6, 0.0 }
0x11b8   : > { %6021 = vadd.xlane.f32.xlu1 %v6020_v49  ;;  %v5934_v44 = vpop.xlane.xlu0 %5933 }
0x11b9   : > { %v5951_v60 = vmul.f32 0.015625, %v5934_v44  ;;  %v5982_v3 = vmul.f32 %v13448_v32, %v13448_v32  ;;  %v5981_v58 = vmul.f32 %v13451_v46, %v13451_v46 }
0x11bb   : > { %v13459_v23 = vsub.f32 %v13338_v17, %v5951_v60  ;;  %v6026_v43 = vsel %vm526_vm0, %v5982_v3, 0.0  ;;  %v6023_v41 = vsel %vm526_vm0, %v5981_v58, 0.0  ;;  %v8840_v17 = vld [vmem:[%s13992_s9 + $0x38] sm:$0xff]  }
0x11bc   : > { %6027 = vadd.xlane.f32.xlu1 %v6026_v43  ;;  %6024 = vadd.xlane.f32.xlu0 %v6023_v41  ;;  %v14695_v43 = vmov 0  }
0x11bd   : > { %v5983_v19 = vmul.f32 %v13459_v23, %v13459_v23  ;;  %7700 = vmatpush3.bf16.msra.mxu0 %v8840_v17 }
0x11be   : > { %7701 = vmatprep.subr.bf16.mxu0 %v13475_v8 }
0x11bf   : > { %v6029_v39 = vsel %vm526_vm0, %v5983_v19, 0.0 }
0x11c0   : > { %6030 = vadd.xlane.f32.xlu0 %v6029_v39 }
0x11c1   : > { %7702 = vmatpush3.bf16.msra.mxu0 %v13480_v21 }
0x1210   : > { %v5986_v24 = vpop.xlane.xlu1 %5985 }
0x1211   : > { %v6032_v59 = vmul.f32 0.015625, %v5986_v24 }
0x1213   : > { %v6048_v13 = vadd.f32 1e-05, %v6032_v59 }
0x1214   : > { %v5992_v35 = vpop.xlane.xlu1 %5991  ;;  %v5989_v56 = vpop.xlane.xlu0 %5988 }
0x1215   : > { %9367 = vrsqrt.f32 %v6048_v13  ;;  %v6034_v22 = vmul.f32 0.015625, %v5992_v35  ;;  %v6033_v4 = vmul.f32 0.015625, %v5989_v56 }
0x1217   : > { %v6049_v54 = vadd.f32 1e-05, %v6033_v4  ;;  %v6050_v55 = vadd.f32 1e-05, %v6034_v22 }
0x1218   : > { %v5995_v15 = vpop.xlane.xlu0 %5994 }
0x1219   : > { %v6035_v28 = vmul.f32 0.015625, %v5995_v15  ;;  %9369 = vrsqrt.f32 %v6049_v54 }
0x121a   : > { %9371 = vrsqrt.f32 %v6050_v55 }
0x121b   : > { %v6051_v27 = vadd.f32 1e-05, %v6035_v28 }
0x121d   : > { %9373 = vrsqrt.f32 %v6051_v27 }
0x1220   : > { %v5998_v29 = vpop.xlane.xlu1 %5997 }
0x1221   : > { %v6036_v50 = vmul.f32 0.015625, %v5998_v29 }
0x1222   : > { %v9368_v33 = vpop.eup %9367 }
0x1223   : > { %v6052_v51 = vadd.f32 1e-05, %v6036_v50  ;;  %v6080_v14 = vmul.f32 %v9368_v33, %v13353_v38  ;;  %v13495_v38 = vld [vmem:[%s13989_s6] ss:$0 sm:$0xff] }
0x1224   : > { %v6004_v45 = vpop.xlane.xlu1 %6003  ;;  %v6001_v47 = vpop.xlane.xlu0 %6000 }
0x1225   : > { %9375 = vrsqrt.f32 %v6052_v51  ;;  %v6038_v20 = vmul.f32 0.015625, %v6004_v45  ;;  %v6037_v57 = vmul.f32 0.015625, %v6001_v47  ;;  %v6103_v11 = vmul.f32 %v13488_v31, %v6080_v14 }
0x1226   : > { %v9370_v0 = vpop.eup %9369 }
0x1227   : > { %v6053_v48 = vadd.f32 1e-05, %v6037_v57  ;;  %v6081_v25 = vmul.f32 %v9370_v0, %v13358_v36  ;;  %v6054_v34 = vadd.f32 1e-05, %v6038_v20  ;;  %v9372_v42 = vpop.eup %9371  ;;  %v13500_v6 = vadd.f32 %v13495_v38, %v6103_v11 }
0x1228   : > { %v6007_v61 = vpop.xlane.xlu0 %6006  ;;  %v6082_v36 = vmul.f32 %v9372_v42, %v13361_v40 }
0x1229   : > { %v6039_v37 = vmul.f32 0.015625, %v6007_v61  ;;  %v6104_v5 = vmul.f32 %v13488_v31, %v6081_v25  ;;  %9377 = vrsqrt.f32 %v6053_v48 }
0x122a   : > { %v9374_v63 = vpop.eup %9373  ;;  %9379 = vrsqrt.f32 %v6054_v34 }
0x122b   : > { %v6083_v10 = vmul.f32 %v9374_v63, %v13369_v62  ;;  %v6055_v26 = vadd.f32 1e-05, %v6039_v37  ;;  %v13504_v49 = vadd.f32 %v13495_v38, %v6104_v5  ;;  %v6105_v62 = vmul.f32 %v13488_v31, %v6082_v36 }
0x122d   : > { %9381 = vrsqrt.f32 %v6055_v26  ;;  %v6142_v44 = vpack.c.bf16 %v13504_v49, %v13500_v6  ;;  %v6106_v60 = vmul.f32 %v13488_v31, %v6083_v10  ;;  %v13518_v59 = vadd.f32 %v13495_v38, %v6105_v62 }
0x122f   : > { %7272 = vmatmul.mubr.msk.bf16.vlgmr.msra.gmra.mxu1 %vm526_vm0, %v6142_v44  ;;  %v13513_v41 = vadd.f32 %v13495_v38, %v6106_v60 }
0x1230   : > { %v6010_v3 = vpop.xlane.xlu1 %6009  ;;  %6276 = vmatprep.mubr.bf16.mxu1 %v14695_v43  ;;  %8499 = vmatpush3.bf16.msra.mxu1 %v8840_v17 }
0x1231   : > { %v6040_v58 = vmul.f32 0.015625, %v6010_v3  ;;  %8492 = vmatprep.subr.bf16.mxu1 %v13475_v8  ;;  %v6143_v17 = vpack.c.bf16 %v13513_v41, %v13518_v59 }
0x1232   : > { %v9376_v40 = vpop.eup %9375 }
0x1233   : > { %v6056_v19 = vadd.f32 1e-05, %v6040_v58  ;;  %v6084_v39 = vmul.f32 %v9376_v40, %v13377_v1 }
0x1234   : > { %v6016_v7 = vpop.xlane.xlu1 %6015  ;;  %v6013_v24 = vpop.xlane.xlu0 %6012  ;;  %8500 = vmatpush3.bf16.msra.mxu1 %v13480_v21 }
0x1235   : > { %9383 = vrsqrt.f32 %v6056_v19  ;;  %v6042_v13 = vmul.f32 0.015625, %v6016_v7  ;;  %v6041_v35 = vmul.f32 0.015625, %v6013_v24  ;;  %v6107_v54 = vmul.f32 %v13488_v31, %v6084_v39 }
0x1236   : > { %v9378_v56 = vpop.eup %9377 }
0x1237   : > { %v6057_v22 = vadd.f32 1e-05, %v6041_v35  ;;  %v6085_v8 = vmul.f32 %v9378_v56, %v13385_v30  ;;  %v6058_v4 = vadd.f32 1e-05, %v6042_v13  ;;  %7273 = vmatmul.mubr.msk.bf16.gmra.mxu1 %vm526_vm0, %v6143_v17  ;;  %v9380_v55 = vpop.eup %9379  ;;  %v13531_v30 = vadd.f32 %v13495_v38, %v6107_v54 }
0x1238   : > { %v6019_v1 = vpop.xlane.xlu0 %6018  ;;  %6286 = vmatprep.mubr.bf16.mxu1 %v14695_v43  ;;  %v6086_v50 = vmul.f32 %v9380_v55, %v13382_v53 }
0x1239   : > { %v6043_v15 = vmul.f32 0.015625, %v6019_v1  ;;  %9385 = vrsqrt.f32 %v6057_v22  ;;  %v6108_v21 = vmul.f32 %v13488_v31, %v6085_v8 }
0x123a   : > { %v9382_v28 = vpop.eup %9381  ;;  %9387 = vrsqrt.f32 %v6058_v4 }
0x123b   : > { %v6087_v27 = vmul.f32 %v9382_v28, %v13393_v12  ;;  %v6059_v29 = vadd.f32 1e-05, %v6043_v15  ;;  %v13534_v33 = vadd.f32 %v13495_v38, %v6108_v21  ;;  %v6109_v12 = vmul.f32 %v13488_v31, %v6086_v50  ;;  %v8843_v50 = vld [vmem:[%s13992_s9 + $0x68] sm:$0xff]  }
0x123c   : > { %7703 = vmatprep.subr.bf16.mxu0 %v8843_v50  ;;  %8493 = vmatprep.subr.bf16.mxu1 %v8843_v50 }
0x123d   : > { %9389 = vrsqrt.f32 %v6059_v29  ;;  %v6144_v51 = vpack.c.bf16 %v13534_v33, %v13531_v30  ;;  %v6110_v14 = vmul.f32 %v13488_v31, %v6087_v27  ;;  %v13547_v48 = vadd.f32 %v13495_v38, %v6109_v12  ;;  %v8849_v12 = vld [vmem:[%s13992_s9 + $0x50] sm:$0xff]  }
0x123f   : > { %7274 = vmatmul.mubr.msk.bf16.gmra.mxu1 %vm526_vm0, %v6144_v51  ;;  %v13543_v20 = vadd.f32 %v13495_v38, %v6110_v14  ;;  %v8847_v51 = vld [vmem:[%s13992_s9 + $0x58] sm:$0xff]  }
0x1240   : > { %6296 = vmatprep.mubr.bf16.mxu1 %v14695_v43  ;;  %v8848_v14 = vld [vmem:[%s13992_s9 + $0x18] sm:$0xff]  }
0x1241   : > { %v6022_v45 = vpop.xlane.xlu1 %6021  ;;  %v6145_v42 = vpack.c.bf16 %v13543_v20, %v13547_v48 }
0x1242   : > { %v9384_v53 = vpop.eup %9383  ;;  %v6044_v47 = vmul.f32 0.015625, %v6022_v45  ;;  %v8850_v45 = vld [vmem:[%s13992_s9 + $0x10] sm:$0xff]  }
0x1243   : > { %v6088_v57 = vmul.f32 %v9384_v53, %v13401_v52  ;;  %v8851_v53 = vld [vmem:[%s13992_s9 + $0x48] sm:$0xff]  }
0x1244   : > { %v6060_v0 = vadd.f32 1e-05, %v6044_v47  ;;  %v8852_v47 = vld [vmem:[%s13992_s9 + $0x8] sm:$0xff]  }
0x1245   : > { %v6028_v11 = vpop.xlane.xlu1 %6027  ;;  %v6025_v25 = vpop.xlane.xlu0 %6024  ;;  %v6111_v52 = vmul.f32 %v13488_v31, %v6088_v57  ;;  %v8853_v57 = vld [vmem:[%s13992_s9 + $0x40] sm:$0xff]  }
0x1246   : > { %9391 = vrsqrt.f32 %v6060_v0  ;;  %v6046_v34 = vmul.f32 0.015625, %v6028_v11  ;;  %v6045_v61 = vmul.f32 0.015625, %v6025_v25  ;;  %v9386_v37 = vpop.eup %9385  ;;  %v8854_v0 = vld [vmem:[%s13992_s9] sm:$0xff]  }
0x1247   : > { %v6089_v63 = vmul.f32 %v9386_v37, %v13415_v2  ;;  %7275 = vmatmul.mubr.msk.bf16.gmra.mxu1 %vm526_vm0, %v6145_v42  ;;  %v9388_v10 = vpop.eup %9387  ;;  %v13559_v40 = vadd.f32 %v13495_v38, %v6111_v52  ;;  %v6158_v11 = vld [vmem:[%s13991_s8] sm:$0x3] }
0x1248   : > { %v6061_v5 = vadd.f32 1e-05, %v6045_v61  ;;  %v6062_v26 = vadd.f32 1e-05, %v6046_v34  ;;  %6306 = vmatprep.mubr.bf16.mxu1 %v14695_v43  ;;  %v6090_v58 = vmul.f32 %v9388_v10, %v13412_v9  ;;  %v14696_v25 = vld [vmem:[#allocation2_spill] sm:$0xff] }
0x1249   : > { %v6031_v36 = vpop.xlane.xlu0 %6030  ;;  %v6112_v3 = vmul.f32 %v13488_v31, %v6089_v63  ;;  %v14697_v34 = vsub.s32 1, %v14696_v25  ;;  %v14698_v37 = vsub.s32 0, %v14696_v25 }
0x124a   : > { %v9390_v44 = vpop.eup %9389  ;;  %v6047_v60 = vmul.f32 0.015625, %v6031_v36  ;;  %9393 = vrsqrt.f32 %v6061_v5 }
0x124b   : > { %v6091_v62 = vmul.f32 %v9390_v44, %v13429_v18  ;;  %v13562_v19 = vadd.f32 %v13495_v38, %v6112_v3  ;;  %9395 = vrsqrt.f32 %v6062_v26  ;;  %v6113_v18 = vmul.f32 %v13488_v31, %v6090_v58 }
0x124c   : > { %v6063_v2 = vadd.f32 1e-05, %v6047_v60  ;;  %v13648_v61 = vrot.slane %v6158_v11, %v14697_v34  ;;  %v13652_v63 = vrot.slane %v6158_v11, %v14698_v37 }
0x124d   : > { %v6146_v39 = vpack.c.bf16 %v13562_v19, %v13559_v40  ;;  %v6114_v7 = vmul.f32 %v13488_v31, %v6091_v62  ;;  %v13574_v13 = vadd.f32 %v13495_v38, %v6113_v18 }
0x124e   : > { %9397 = vrsqrt.f32 %v6063_v2 }
0x124f   : > { %7276 = vmatmul.mubr.msk.bf16.gmra.mxu1 %vm526_vm0, %v6146_v39  ;;  %v13571_v9 = vadd.f32 %v13495_v38, %v6114_v7 }
0x1250   : > { %6316 = vmatprep.mubr.bf16.mxu1 %v14695_v43 }
0x1251   : > { %v6147_v17 = vpack.c.bf16 %v13571_v9, %v13574_v13 }
0x1253   : > { %v9392_v24 = vpop.eup %9391 }
0x1254   : > { %v6092_v35 = vmul.f32 %v9392_v24, %v13443_v16 }
0x1256   : > { %v6115_v8 = vmul.f32 %v13488_v31, %v6092_v35 }
0x1257   : > { %v9394_v56 = vpop.eup %9393  ;;  %7277 = vmatmul.mubr.msk.bf16.gmra.mxu1 %vm526_vm0, %v6147_v17 }
0x1258   : > { %v6093_v22 = vmul.f32 %v9394_v56, %v13451_v46  ;;  %6326 = vmatprep.mubr.bf16.mxu1 %v14695_v43  ;;  %v9396_v4 = vpop.eup %9395  ;;  %v13587_v15 = vadd.f32 %v13495_v38, %v6115_v8 }
0x1259   : > { %v6094_v16 = vmul.f32 %v9396_v4, %v13448_v32 }
0x125a   : > { %v6116_v54 = vmul.f32 %v13488_v31, %v6093_v22 }
0x125b   : > { %v9398_v1 = vpop.eup %9397  ;;  %v6117_v27 = vmul.f32 %v13488_v31, %v6094_v16 }
0x125c   : > { %v6095_v55 = vmul.f32 %v9398_v1, %v13459_v23  ;;  %v13590_v28 = vadd.f32 %v13495_v38, %v6116_v54 }
0x125d   : > { %v13602_v32 = vadd.f32 %v13495_v38, %v6117_v27 }
0x125e   : > { %v6148_v46 = vpack.c.bf16 %v13590_v28, %v13587_v15  ;;  %v6118_v21 = vmul.f32 %v13488_v31, %v6095_v55  ;;  %v8844_v31 = vld [vmem:[%s13992_s9 + $0x28] sm:$0xff]  }
0x125f   : > { %7704 = vmatpush3.bf16.msra.mxu0 %v8844_v31  ;;  %8501 = vmatpush3.bf16.msra.mxu1 %v8844_v31 }
0x1260   : > { %7278 = vmatmul.mubr.msk.bf16.gmra.mxu1 %vm526_vm0, %v6148_v46  ;;  %v13599_v23 = vadd.f32 %v13495_v38, %v6118_v21  ;;  %v8845_v38 = vld [vmem:[%s13992_s9 + $0x60] sm:$0xff]  }
0x1261   : > { %6336 = vmatprep.mubr.bf16.mxu1 %v14695_v43  ;;  %v8846_v43 = vld [vmem:[%s13992_s9 + $0x20] sm:$0xff]   ;;  %7705 = vmatprep.subr.bf16.mxu0 %v8845_v38 }
0x1262   : > { %v6149_v29 = vpack.c.bf16 %v13599_v23, %v13602_v32  ;;  %8494 = vmatprep.subr.bf16.mxu1 %v8845_v38 }
0x1263   : > { %7706 = vmatpush3.bf16.msra.mxu0 %v8846_v43  ;;  %8502 = vmatpush3.bf16.msra.mxu1 %v8846_v43 }
0x1264   : > { %7707 = vmatprep.subr.bf16.mxu0 %v8847_v51  ;;  %8495 = vmatprep.subr.bf16.mxu1 %v8847_v51 }
0x1267   : > { %7708 = vmatpush3.bf16.msra.mxu0 %v8848_v14  ;;  %8503 = vmatpush3.bf16.msra.mxu1 %v8848_v14 }
0x1268   : > { %7279 = vmatmul.mubr.msk.bf16.gmra.mxu1 %vm526_vm0, %v6149_v29  ;;  %7709 = vmatprep.subr.bf16.mxu0 %v8849_v12 }
0x1269   : > { %8496 = vmatprep.subr.bf16.mxu1 %v8849_v12 }
0x126b   : > { %7710 = vmatpush3.bf16.msra.mxu0 %v8850_v45  ;;  %8504 = vmatpush3.bf16.msra.mxu1 %v8850_v45 }
0x126c   : > { %7711 = vmatprep.subr.bf16.mxu0 %v8851_v53  ;;  %8497 = vmatprep.subr.bf16.mxu1 %v8851_v53 }
0x126f   : > { %7712 = vmatpush3.bf16.msra.mxu0 %v8852_v47  ;;  %8505 = vmatpush3.bf16.msra.mxu1 %v8852_v47 }
0x1270   : > { %7713 = vmatprep.subr.bf16.mxu0 %v8853_v57  ;;  %8498 = vmatprep.subr.bf16.mxu1 %v8853_v57 }
0x1273   : > { %7714 = vmatpush3.bf16.msra.mxu0 %v8854_v0  ;;  %8506 = vmatpush3.bf16.msra.mxu1 %v8854_v0 }
0x12ef   : > { %v6268_v42 = vpop.f32.mrf.mxu1 }
0x12f0   : > { %v6269_v36 = vadd.f32 %v6268_v42, %v13652_v63 }
0x12f1   : > { %v6270_v5 = vpop.f32.mrf.mxu1 }
0x12f2   : > { %v6271_v52 = vadd.f32 %v6270_v5, %v13648_v61 }
0x12f3   : > { %v6272_v10 = vpop.f32.mrf.mxu1 }
0x12f4   : > { %v6273_v26 = vadd.f32 %v6272_v10, %v13652_v63  ;;  %9399 = vtanh.f32 %v6271_v52 }
0x12f5   : > { %v6274_v44 = vpop.f32.mrf.mxu1 }
0x12f6   : > { %v6275_v60 = vadd.f32 %v6274_v44, %v13648_v61  ;;  %9401 = vtanh.f32 %v6273_v26 }
0x12f7   : > { %v6278_v3 = vpop.f32.mrf.mxu1 }
0x12f8   : > { %9403 = vtanh.f32 %v6275_v60  ;;  %v6279_v7 = vadd.f32 %v6278_v3, %v13652_v63 }
0x12f9   : > { %9405 = vtanh.f32 %v6269_v36  ;;  %v6280_v62 = vpop.f32.mrf.mxu1 }
0x12fa   : > { %v6281_v58 = vadd.f32 %v6280_v62, %v13648_v61 }
0x12fb   : > { %v6282_v2 = vpop.f32.mrf.mxu1 }
0x12fc   : > { %v6283_v39 = vadd.f32 %v6282_v2, %v13652_v63  ;;  %9407 = vtanh.f32 %v6281_v58 }
0x12fd   : > { %v6284_v18 = vpop.f32.mrf.mxu1 }
0x12fe   : > { %v6285_v24 = vadd.f32 %v6284_v18, %v13648_v61  ;;  %9409 = vtanh.f32 %v6283_v39 }
0x12ff   : > { %v6288_v35 = vpop.f32.mrf.mxu1 }
0x1300   : > { %9411 = vtanh.f32 %v6285_v24  ;;  %v6289_v55 = vadd.f32 %v6288_v35, %v13652_v63 }
0x1301   : > { %9413 = vtanh.f32 %v6279_v7  ;;  %v6290_v17 = vpop.f32.mrf.mxu1  ;;  %v9400_v22 = vpop.eup %9399 }
0x1302   : > { %v6291_v56 = vadd.f32 %v6290_v17, %v13648_v61 }
0x1303   : > { %v6292_v8 = vpop.f32.mrf.mxu1  ;;  %v9402_v4 = vpop.eup %9401 }
0x1304   : > { %v6293_v1 = vadd.f32 %v6292_v8, %v13652_v63  ;;  %9415 = vtanh.f32 %v6291_v56 }
0x1305   : > { %v9404_v54 = vpop.eup %9403  ;;  %v6294_v16 = vpop.f32.mrf.mxu1 }
0x1306   : > { %v9406_v46 = vpop.eup %9405  ;;  %v6295_v21 = vadd.f32 %v6294_v16, %v13648_v61  ;;  %v6380_v27 = vpack.c.bf16 %v9404_v54, %v9400_v22  ;;  %9417 = vtanh.f32 %v6293_v1 }
0x1307   : > { %v6379_v29 = vpack.c.bf16 %v9402_v4, %v9406_v46  ;;  %v6298_v50 = vpop.f32.mrf.mxu1 }
0x1308   : > { %9419 = vtanh.f32 %v6295_v21  ;;  %6562 = vmatprep.mubr.bf16.mxu0 %v6380_v27  ;;  %v6299_v53 = vadd.f32 %v6298_v50, %v13652_v63 }
0x1309   : > { %9421 = vtanh.f32 %v6289_v55  ;;  %v6300_v31 = vpop.f32.mrf.mxu1  ;;  %6563 = vmatmul.mubr.bf16.vlgmr.msra.gmra.mxu0 %v6379_v29  ;;  %v9408_v43 = vpop.eup %9407 }
0x130a   : > { %v6301_v38 = vadd.f32 %v6300_v31, %v13648_v61 }
0x130b   : > { %v6302_v51 = vpop.f32.mrf.mxu1  ;;  %v9410_v14 = vpop.eup %9409 }
0x130c   : > { %v6303_v12 = vadd.f32 %v6302_v51, %v13652_v63  ;;  %9423 = vtanh.f32 %v6301_v38 }
0x130d   : > { %v9412_v45 = vpop.eup %9411  ;;  %v6304_v47 = vpop.f32.mrf.mxu1 }
0x130e   : > { %v9414_v57 = vpop.eup %9413  ;;  %v6305_v0 = vadd.f32 %v6304_v47, %v13648_v61  ;;  %v6382_v11 = vpack.c.bf16 %v9412_v45, %v9408_v43  ;;  %9425 = vtanh.f32 %v6303_v12 }
0x130f   : > { %v6308_v25 = vpop.f32.mrf.mxu1  ;;  %v6381_v34 = vpack.c.bf16 %v9410_v14, %v9414_v57 }
0x1310   : > { %9427 = vtanh.f32 %v6305_v0  ;;  %6570 = vmatprep.mubr.bf16.mxu0 %v6382_v11  ;;  %v6309_v44 = vadd.f32 %v6308_v25, %v13652_v63 }
0x1311   : > { %9429 = vtanh.f32 %v6299_v53  ;;  %v6310_v42 = vpop.f32.mrf.mxu1  ;;  %6571 = vmatmul.mubr.bf16.gmra.mxu0 %v6381_v34  ;;  %v9416_v5 = vpop.eup %9415 }
0x1312   : > { %v6311_v37 = vadd.f32 %v6310_v42, %v13648_v61 }
0x1313   : > { %v6312_v52 = vpop.f32.mrf.mxu1  ;;  %v9418_v10 = vpop.eup %9417 }
0x1314   : > { %v6313_v26 = vadd.f32 %v6312_v52, %v13652_v63  ;;  %9431 = vtanh.f32 %v6311_v37 }
0x1315   : > { %v9420_v36 = vpop.eup %9419  ;;  %v6314_v60 = vpop.f32.mrf.mxu1 }
0x1316   : > { %v9422_v3 = vpop.eup %9421  ;;  %v6315_v62 = vadd.f32 %v6314_v60, %v13648_v61  ;;  %v6384_v58 = vpack.c.bf16 %v9420_v36, %v9416_v5  ;;  %9433 = vtanh.f32 %v6313_v26 }
0x1317   : > { %v6318_v2 = vpop.f32.mrf.mxu1  ;;  %v6383_v39 = vpack.c.bf16 %v9418_v10, %v9422_v3 }
0x1318   : > { %9435 = vtanh.f32 %v6315_v62  ;;  %6578 = vmatprep.mubr.bf16.mxu0 %v6384_v58  ;;  %v6319_v8 = vadd.f32 %v6318_v2, %v13652_v63 }
0x1319   : > { %9437 = vtanh.f32 %v6309_v44  ;;  %v6320_v7 = vpop.f32.mrf.mxu1  ;;  %6579 = vmatmul.mubr.bf16.gmra.mxu0 %v6383_v39  ;;  %v9424_v24 = vpop.eup %9423 }
0x131a   : > { %v6321_v18 = vadd.f32 %v6320_v7, %v13648_v61 }
0x131b   : > { %v6322_v35 = vpop.f32.mrf.mxu1  ;;  %v9426_v17 = vpop.eup %9425 }
0x131c   : > { %v6323_v56 = vadd.f32 %v6322_v35, %v13652_v63  ;;  %9439 = vtanh.f32 %v6321_v18 }
0x131d   : > { %v9428_v22 = vpop.eup %9427  ;;  %v6324_v4 = vpop.f32.mrf.mxu1 }
0x131e   : > { %v9430_v1 = vpop.eup %9429  ;;  %v6325_v54 = vadd.f32 %v6324_v4, %v13648_v61  ;;  %v6386_v55 = vpack.c.bf16 %v9428_v22, %v9424_v24  ;;  %9441 = vtanh.f32 %v6323_v56  ;;  %v13689_v22 = vld [vmem:[%s13993_s10] ss:$0 sm:$0xff] }
0x131f   : > { %v6385_v16 = vpack.c.bf16 %v9426_v17, %v9430_v1 }
0x1320   : > { %9443 = vtanh.f32 %v6325_v54  ;;  %v6328_v46 = vpop.f32.mrf.mxu1  ;;  %6586 = vmatprep.mubr.bf16.mxu0 %v6386_v55 }
0x1321   : > { %9445 = vtanh.f32 %v6319_v8  ;;  %6587 = vmatmul.mubr.bf16.gmra.mxu0 %v6385_v16  ;;  %v9432_v27 = vpop.eup %9431  ;;  %v6329_v14 = vadd.f32 %v6328_v46, %v13652_v63 }
0x1322   : > { %v6330_v21 = vpop.f32.mrf.mxu1 }
0x1323   : > { %v6331_v29 = vadd.f32 %v6330_v21, %v13648_v61  ;;  %v9434_v50 = vpop.eup %9433 }
0x1324   : > { %v6332_v31 = vpop.f32.mrf.mxu1 }
0x1325   : > { %v9436_v38 = vpop.eup %9435  ;;  %v6333_v43 = vadd.f32 %v6332_v31, %v13652_v63  ;;  %9447 = vtanh.f32 %v6331_v29 }
0x1326   : > { %v9438_v51 = vpop.eup %9437  ;;  %v6334_v12 = vpop.f32.mrf.mxu1  ;;  %v6388_v45 = vpack.c.bf16 %v9436_v38, %v9432_v27 }
0x1327   : > { %v6335_v53 = vadd.f32 %v6334_v12, %v13648_v61  ;;  %v6387_v47 = vpack.c.bf16 %v9434_v50, %v9438_v51  ;;  %9449 = vtanh.f32 %v6333_v43 }
0x1328   : > { %v6338_v57 = vpop.f32.mrf.mxu1  ;;  %6594 = vmatprep.mubr.bf16.mxu0 %v6388_v45 }
0x1329   : > { %9451 = vtanh.f32 %v6335_v53  ;;  %6595 = vmatmul.mubr.bf16.gmra.mxu0 %v6387_v47  ;;  %v9440_v11 = vpop.eup %9439  ;;  %v6339_v10 = vadd.f32 %v6338_v57, %v13652_v63 }
0x132a   : > { %9453 = vtanh.f32 %v6329_v14  ;;  %v6340_v0 = vpop.f32.mrf.mxu1 }
0x132b   : > { %v6341_v25 = vadd.f32 %v6340_v0, %v13648_v61  ;;  %v9442_v34 = vpop.eup %9441 }
0x132c   : > { %v6342_v42 = vpop.f32.mrf.mxu1 }
0x132d   : > { %v9444_v37 = vpop.eup %9443  ;;  %v6343_v5 = vadd.f32 %v6342_v42, %v13652_v63  ;;  %9455 = vtanh.f32 %v6341_v25 }
0x132e   : > { %v9446_v52 = vpop.eup %9445  ;;  %v6344_v26 = vpop.f32.mrf.mxu1  ;;  %v6390_v36 = vpack.c.bf16 %v9444_v37, %v9440_v11 }
0x132f   : > { %v6345_v44 = vadd.f32 %v6344_v26, %v13648_v61  ;;  %v6389_v60 = vpack.c.bf16 %v9442_v34, %v9446_v52  ;;  %9457 = vtanh.f32 %v6343_v5 }
0x1330   : > { %6602 = vmatprep.mubr.bf16.mxu0 %v6390_v36 }
0x1331   : > { %9459 = vtanh.f32 %v6345_v44  ;;  %6603 = vmatmul.mubr.bf16.gmra.mxu0 %v6389_v60 }
0x1332   : > { %9461 = vtanh.f32 %v6339_v10  ;;  %v9448_v3 = vpop.eup %9447 }
0x1334   : > { %v9450_v62 = vpop.eup %9449 }
0x1336   : > { %v9452_v58 = vpop.eup %9451 }
0x1337   : > { %v9454_v2 = vpop.eup %9453  ;;  %v6392_v39 = vpack.c.bf16 %v9452_v58, %v9448_v3 }
0x1338   : > { %v6391_v7 = vpack.c.bf16 %v9450_v62, %v9454_v2 }
0x1339   : > { %6610 = vmatprep.mubr.bf16.mxu0 %v6392_v39 }
0x133a   : > { %6611 = vmatmul.mubr.bf16.gmra.mxu0 %v6391_v7  ;;  %v9456_v63 = vpop.eup %9455 }
0x133c   : > { %v9458_v18 = vpop.eup %9457 }
0x133e   : > { %v9460_v24 = vpop.eup %9459 }
0x133f   : > { %v9462_v35 = vpop.eup %9461  ;;  %v6394_v17 = vpack.c.bf16 %v9460_v24, %v9456_v63 }
0x1340   : > { %v6393_v61 = vpack.c.bf16 %v9458_v18, %v9462_v35 }
0x1341   : > { %6618 = vmatprep.mubr.bf16.mxu1 %v6394_v17 }
0x1342   : > { %6619 = vmatmul.mubr.bf16.vlgmr.msra.gmra.mxu1 %v6393_v61 }
0x13c9   : > { %v7715_v56 = vpop.f32.mrf.mxu0 }
0x13cb   : > { %v7716_v8 = vpop.f32.mrf.mxu0 }
0x13cc   : > { %v7717_v4 = vadd.f32 %v7716_v8, %v7715_v56 }
0x13cd   : > { %v7718_v1 = vpop.f32.mrf.mxu0 }
0x13ce   : > { %v6565_v54 = vadd.f32 %v7717_v4, %v13689_v22 }
0x13cf   : > { %v7719_v55 = vpop.f32.mrf.mxu0 }
0x13d0   : > { %v7720_v16 = vadd.f32 %v7719_v55, %v7718_v1  ;;  %v13693_v46 = vadd.f32 %v6565_v54, %v13500_v6 }
0x13d1   : > { %v7721_v21 = vpop.f32.mrf.mxu0 }
0x13d2   : > { %v6568_v27 = vadd.f32 %v7720_v16, %v13689_v22  ;;  %v6643_v29 = vsel %vm526_vm0, %v13693_v46, 0.0 }
0x13d3   : > { %6644 = vadd.xlane.f32.xlu1 %v6643_v29  ;;  %v7722_v50 = vpop.f32.mrf.mxu0 }
0x13d4   : > { %v7723_v31 = vadd.f32 %v7722_v50, %v7721_v21  ;;  %v13699_v38 = vadd.f32 %v6568_v27, %v13504_v49 }
0x13d5   : > { %v7724_v43 = vpop.f32.mrf.mxu0 }
0x13d6   : > { %v6573_v51 = vadd.f32 %v7723_v31, %v13689_v22  ;;  %v6646_v14 = vsel %vm526_vm0, %v13699_v38, 0.0 }
0x13d7   : > { %6647 = vadd.xlane.f32.xlu0 %v6646_v14  ;;  %v7725_v6 = vpop.f32.mrf.mxu0 }
0x13d8   : > { %v7726_v12 = vadd.f32 %v7725_v6, %v7724_v43  ;;  %v13705_v45 = vadd.f32 %v6573_v51, %v13518_v59 }
0x13d9   : > { %v7727_v53 = vpop.f32.mrf.mxu0 }
0x13da   : > { %v6576_v47 = vadd.f32 %v7726_v12, %v13689_v22  ;;  %v6649_v57 = vsel %vm526_vm0, %v13705_v45, 0.0 }
0x13db   : > { %6650 = vadd.xlane.f32.xlu1 %v6649_v57  ;;  %v7728_v49 = vpop.f32.mrf.mxu0 }
0x13dc   : > { %v7729_v0 = vadd.f32 %v7728_v49, %v7727_v53  ;;  %v13711_v11 = vadd.f32 %v6576_v47, %v13513_v41 }
0x13dd   : > { %v7730_v25 = vpop.f32.mrf.mxu0 }
0x13de   : > { %v6581_v34 = vadd.f32 %v7729_v0, %v13689_v22  ;;  %v6652_v42 = vsel %vm526_vm0, %v13711_v11, 0.0 }
0x13df   : > { %6653 = vadd.xlane.f32.xlu0 %v6652_v42  ;;  %v7731_v59 = vpop.f32.mrf.mxu0 }
0x13e0   : > { %v7732_v37 = vadd.f32 %v7731_v59, %v7730_v25  ;;  %v13717_v5 = vadd.f32 %v6581_v34, %v13531_v30 }
0x13e1   : > { %v7733_v52 = vpop.f32.mrf.mxu0 }
0x13e2   : > { %v6584_v10 = vadd.f32 %v7732_v37, %v13689_v22  ;;  %v6655_v26 = vsel %vm526_vm0, %v13717_v5, 0.0 }
0x13e3   : > { %6656 = vadd.xlane.f32.xlu1 %v6655_v26  ;;  %v7734_v41 = vpop.f32.mrf.mxu0 }
0x13e4   : > { %v7735_v36 = vadd.f32 %v7734_v41, %v7733_v52  ;;  %v13723_v44 = vadd.f32 %v6584_v10, %v13534_v33 }
0x13e5   : > { %v7736_v60 = vpop.f32.mrf.mxu0 }
0x13e6   : > { %v6589_v3 = vadd.f32 %v7735_v36, %v13689_v22  ;;  %v6658_v62 = vsel %vm526_vm0, %v13723_v44, 0.0 }
0x13e7   : > { %6659 = vadd.xlane.f32.xlu0 %v6658_v62  ;;  %v7737_v30 = vpop.f32.mrf.mxu0 }
0x13e8   : > { %v7738_v58 = vadd.f32 %v7737_v30, %v7736_v60  ;;  %v13729_v2 = vadd.f32 %v6589_v3, %v13547_v48 }
0x13e9   : > { %v7739_v39 = vpop.f32.mrf.mxu0 }
0x13ea   : > { %v6592_v7 = vadd.f32 %v7738_v58, %v13689_v22  ;;  %v6661_v63 = vsel %vm526_vm0, %v13729_v2, 0.0 }
0x13eb   : > { %6662 = vadd.xlane.f32.xlu1 %v6661_v63  ;;  %v7740_v33 = vpop.f32.mrf.mxu0 }
0x13ec   : > { %v7741_v18 = vadd.f32 %v7740_v33, %v7739_v39  ;;  %v13735_v24 = vadd.f32 %v6592_v7, %v13543_v20 }
0x13ed   : > { %v7742_v35 = vpop.f32.mrf.mxu0 }
0x13ee   : > { %v6597_v17 = vadd.f32 %v7741_v18, %v13689_v22  ;;  %v6664_v61 = vsel %vm526_vm0, %v13735_v24, 0.0 }
0x13ef   : > { %6665 = vadd.xlane.f32.xlu0 %v6664_v61  ;;  %v7743_v48 = vpop.f32.mrf.mxu0 }
0x13f0   : > { %v7744_v56 = vadd.f32 %v7743_v48, %v7742_v35  ;;  %v13741_v8 = vadd.f32 %v6597_v17, %v13559_v40 }
0x13f1   : > { %v7745_v4 = vpop.f32.mrf.mxu0 }
0x13f2   : > { %v6600_v1 = vadd.f32 %v7744_v56, %v13689_v22  ;;  %v6667_v54 = vsel %vm526_vm0, %v13741_v8, 0.0 }
0x13f3   : > { %6668 = vadd.xlane.f32.xlu1 %v6667_v54  ;;  %v7746_v20 = vpop.f32.mrf.mxu0 }
0x13f4   : > { %v7747_v55 = vadd.f32 %v7746_v20, %v7745_v4  ;;  %v13747_v16 = vadd.f32 %v6600_v1, %v13562_v19 }
0x13f5   : > { %v7748_v21 = vpop.f32.mrf.mxu0 }
0x13f6   : > { %v6605_v27 = vadd.f32 %v7747_v55, %v13689_v22  ;;  %v6670_v29 = vsel %vm526_vm0, %v13747_v16, 0.0 }
0x13f7   : > { %6671 = vadd.xlane.f32.xlu0 %v6670_v29  ;;  %v7749_v40 = vpop.f32.mrf.mxu0 }
0x13f8   : > { %v7750_v50 = vadd.f32 %v7749_v40, %v7748_v21  ;;  %v13753_v31 = vadd.f32 %v6605_v27, %v13574_v13 }
0x13fa   : > { %v6608_v43 = vadd.f32 %v7750_v50, %v13689_v22  ;;  %v7751_v51 = vpop.f32.mrf.mxu0  ;;  %v6673_v14 = vsel %vm526_vm0, %v13753_v31, 0.0 }
0x13fb   : > { %6674 = vadd.xlane.f32.xlu1 %v6673_v14 }
0x13fc   : > { %v7752_v19 = vpop.f32.mrf.mxu0  ;;  %v13759_v6 = vadd.f32 %v6608_v43, %v13571_v9 }
0x13fd   : > { %v7753_v12 = vadd.f32 %v7752_v19, %v7751_v51 }
0x13fe   : > { %v7754_v53 = vpop.f32.mrf.mxu0  ;;  %v6676_v47 = vsel %vm526_vm0, %v13759_v6, 0.0 }
0x13ff   : > { %v6613_v57 = vadd.f32 %v7753_v12, %v13689_v22  ;;  %6677 = vadd.xlane.f32.xlu0 %v6676_v47 }
0x1400   : > { %v7755_v13 = vpop.f32.mrf.mxu0 }
0x1401   : > { %v7756_v49 = vadd.f32 %v7755_v13, %v7754_v53  ;;  %v13765_v0 = vadd.f32 %v6613_v57, %v13587_v15 }
0x1402   : > { %v7757_v25 = vpop.f32.mrf.mxu1 }
0x1403   : > { %v6616_v34 = vadd.f32 %v7756_v49, %v13689_v22  ;;  %v6679_v9 = vsel %vm526_vm0, %v13765_v0, 0.0 }
0x1404   : > { %6680 = vadd.xlane.f32.xlu1 %v6679_v9  ;;  %v7758_v42 = vpop.f32.mrf.mxu1 }
0x1405   : > { %v7759_v59 = vadd.f32 %v7758_v42, %v7757_v25  ;;  %v13771_v37 = vadd.f32 %v6616_v34, %v13590_v28 }
0x1406   : > { %v7760_v52 = vpop.f32.mrf.mxu1 }
0x1407   : > { %v6621_v10 = vadd.f32 %v7759_v59, %v13689_v22  ;;  %v6682_v26 = vsel %vm526_vm0, %v13771_v37, 0.0 }
0x1408   : > { %6683 = vadd.xlane.f32.xlu0 %v6682_v26  ;;  %v7761_v15 = vpop.f32.mrf.mxu1 }
0x1409   : > { %v7762_v41 = vadd.f32 %v7761_v15, %v7760_v52  ;;  %v13777_v36 = vadd.f32 %v6621_v10, %v13602_v32 }
0x140b   : > { %v6624_v60 = vadd.f32 %v7762_v41, %v13689_v22  ;;  %v6685_v3 = vsel %vm526_vm0, %v13777_v36, 0.0 }
0x140c   : > { %6686 = vadd.xlane.f32.xlu1 %v6685_v3 }
0x140d   : > { %v13783_v28 = vadd.f32 %v6624_v60, %v13599_v23 }
0x140f   : > { %v6688_v62 = vsel %vm526_vm0, %v13783_v28, 0.0 }
0x1410   : > { %6689 = vadd.xlane.f32.xlu0 %v6688_v62 }
0x145c   : > { %v6645_v30 = vpop.xlane.xlu1 %6644 }
0x145d   : > { %v6691_v58 = vmul.f32 0.015625, %v6645_v30 }
0x145f   : > { %v13788_v39 = vsub.f32 %v13693_v46, %v6691_v58 }
0x1460   : > { %v6648_v32 = vpop.xlane.xlu0 %6647 }
0x1461   : > { %v6692_v7 = vmul.f32 0.015625, %v6648_v32  ;;  %v6723_v22 = vmul.f32 %v13788_v39, %v13788_v39 }
0x1463   : > { %v13793_v63 = vsub.f32 %v13699_v38, %v6692_v7  ;;  %v6739_v23 = vsel %vm526_vm0, %v6723_v22, 0.0 }
0x1464   : > { %v6651_v33 = vpop.xlane.xlu1 %6650  ;;  %6740 = vadd.xlane.f32.xlu1 %v6739_v23 }
0x1465   : > { %v6693_v18 = vmul.f32 0.015625, %v6651_v33  ;;  %v6724_v35 = vmul.f32 %v13793_v63, %v13793_v63 }
0x1467   : > { %v13799_v17 = vsub.f32 %v13705_v45, %v6693_v18  ;;  %v6742_v46 = vsel %vm526_vm0, %v6724_v35, 0.0 }
0x1468   : > { %6743 = vadd.xlane.f32.xlu0 %v6742_v46  ;;  %v6654_v61 = vpop.xlane.xlu0 %6653 }
0x1469   : > { %v6694_v48 = vmul.f32 0.015625, %v6654_v61  ;;  %v6725_v38 = vmul.f32 %v13799_v17, %v13799_v17 }
0x146b   : > { %v13805_v56 = vsub.f32 %v13711_v11, %v6694_v48  ;;  %v6745_v4 = vsel %vm526_vm0, %v6725_v38, 0.0 }
0x146c   : > { %v6657_v1 = vpop.xlane.xlu1 %6656  ;;  %6746 = vadd.xlane.f32.xlu1 %v6745_v4 }
0x146d   : > { %v6695_v54 = vmul.f32 0.015625, %v6657_v1  ;;  %v6726_v45 = vmul.f32 %v13805_v56, %v13805_v56 }
0x146f   : > { %v13811_v20 = vsub.f32 %v13717_v5, %v6695_v54  ;;  %v6748_v55 = vsel %vm526_vm0, %v6726_v45, 0.0 }
0x1470   : > { %6749 = vadd.xlane.f32.xlu0 %v6748_v55  ;;  %v6660_v21 = vpop.xlane.xlu0 %6659 }
0x1471   : > { %v6696_v27 = vmul.f32 0.015625, %v6660_v21  ;;  %v6727_v11 = vmul.f32 %v13811_v20, %v13811_v20 }
0x1473   : > { %v13817_v29 = vsub.f32 %v13723_v44, %v6696_v27  ;;  %v6751_v40 = vsel %vm526_vm0, %v6727_v11, 0.0 }
0x1474   : > { %v6663_v50 = vpop.xlane.xlu1 %6662  ;;  %6752 = vadd.xlane.f32.xlu1 %v6751_v40 }
0x1475   : > { %v6697_v43 = vmul.f32 0.015625, %v6663_v50  ;;  %v6728_v5 = vmul.f32 %v13817_v29, %v13817_v29 }
0x1477   : > { %v13823_v51 = vsub.f32 %v13729_v2, %v6697_v43  ;;  %v6754_v14 = vsel %vm526_vm0, %v6728_v5, 0.0 }
0x1478   : > { %6755 = vadd.xlane.f32.xlu0 %v6754_v14  ;;  %v6666_v19 = vpop.xlane.xlu0 %6665 }
0x1479   : > { %v6698_v12 = vmul.f32 0.015625, %v6666_v19  ;;  %v6729_v44 = vmul.f32 %v13823_v51, %v13823_v51 }
0x147b   : > { %v13829_v53 = vsub.f32 %v13735_v24, %v6698_v12  ;;  %v6757_v47 = vsel %vm526_vm0, %v6729_v44, 0.0 }
0x147c   : > { %v6669_v57 = vpop.xlane.xlu1 %6668  ;;  %6758 = vadd.xlane.f32.xlu1 %v6757_v47 }
0x147d   : > { %v6699_v13 = vmul.f32 0.015625, %v6669_v57  ;;  %v6730_v2 = vmul.f32 %v13829_v53, %v13829_v53 }
0x147f   : > { %v13835_v49 = vsub.f32 %v13741_v8, %v6699_v13  ;;  %v6760_v25 = vsel %vm526_vm0, %v6730_v2, 0.0  ;;  %v13886_v13 = vld [vmem:[%s13994_s11] ss:$0 sm:$0xff] }
0x1480   : > { %6761 = vadd.xlane.f32.xlu0 %v6760_v25  ;;  %v6672_v34 = vpop.xlane.xlu0 %6671 }
0x1481   : > { %v6700_v9 = vmul.f32 0.015625, %v6672_v34  ;;  %v6731_v24 = vmul.f32 %v13835_v49, %v13835_v49  ;;  %v13892_v34 = vld [vmem:[%s13995_s12] ss:$0 sm:$0xff] }
0x1483   : > { %v13841_v42 = vsub.f32 %v13747_v16, %v6700_v9  ;;  %v6763_v59 = vsel %vm526_vm0, %v6731_v24, 0.0 }
0x1484   : > { %v6675_v52 = vpop.xlane.xlu1 %6674  ;;  %6764 = vadd.xlane.f32.xlu1 %v6763_v59 }
0x1485   : > { %v6701_v10 = vmul.f32 0.015625, %v6675_v52  ;;  %v6732_v8 = vmul.f32 %v13841_v42, %v13841_v42 }
0x1487   : > { %v13847_v26 = vsub.f32 %v13753_v31, %v6701_v10  ;;  %v6766_v15 = vsel %vm526_vm0, %v6732_v8, 0.0 }
0x1488   : > { %6767 = vadd.xlane.f32.xlu0 %v6766_v15  ;;  %v6678_v41 = vpop.xlane.xlu0 %6677 }
0x1489   : > { %v6702_v60 = vmul.f32 0.015625, %v6678_v41  ;;  %v6733_v16 = vmul.f32 %v13847_v26, %v13847_v26 }
0x148b   : > { %v13853_v3 = vsub.f32 %v13759_v6, %v6702_v60  ;;  %v6769_v62 = vsel %vm526_vm0, %v6733_v16, 0.0 }
0x148c   : > { %6770 = vadd.xlane.f32.xlu1 %v6769_v62 }
0x148d   : > { %v6681_v30 = vpop.xlane.xlu1 %6680  ;;  %v6734_v58 = vmul.f32 %v13853_v3, %v13853_v3 }
0x148e   : > { %v6703_v31 = vmul.f32 0.015625, %v6681_v30 }
0x148f   : > { %v6772_v32 = vsel %vm526_vm0, %v6734_v58, 0.0 }
0x1490   : > { %v13860_v7 = vsub.f32 %v13765_v0, %v6703_v31  ;;  %6773 = vadd.xlane.f32.xlu0 %v6772_v32 }
0x1491   : > { %v6684_v22 = vpop.xlane.xlu0 %6683 }
0x1492   : > { %v6704_v23 = vmul.f32 0.015625, %v6684_v22  ;;  %v6735_v6 = vmul.f32 %v13860_v7, %v13860_v7 }
0x1494   : > { %v13865_v33 = vsub.f32 %v13771_v37, %v6704_v23  ;;  %v6775_v18 = vsel %vm526_vm0, %v6735_v6, 0.0 }
0x1495   : > { %6776 = vadd.xlane.f32.xlu1 %v6775_v18  ;;  %v6687_v35 = vpop.xlane.xlu1 %6686 }
0x1496   : > { %v6705_v46 = vmul.f32 0.015625, %v6687_v35  ;;  %v6736_v61 = vmul.f32 %v13865_v33, %v13865_v33 }
0x1498   : > { %v13871_v0 = vsub.f32 %v13777_v36, %v6705_v46  ;;  %v6778_v48 = vsel %vm526_vm0, %v6736_v61, 0.0 }
0x1499   : > { %6779 = vadd.xlane.f32.xlu0 %v6778_v48  ;;  %v6690_v38 = vpop.xlane.xlu0 %6689 }
0x149a   : > { %v6706_v4 = vmul.f32 0.015625, %v6690_v38  ;;  %v6737_v37 = vmul.f32 %v13871_v0, %v13871_v0 }
0x149c   : > { %v13877_v1 = vsub.f32 %v13783_v28, %v6706_v4  ;;  %v6781_v54 = vsel %vm526_vm0, %v6737_v37, 0.0 }
0x149d   : > { %6782 = vadd.xlane.f32.xlu1 %v6781_v54 }
0x149e   : > { %v6738_v45 = vmul.f32 %v13877_v1, %v13877_v1 }
0x14a0   : > { %v6784_v36 = vsel %vm526_vm0, %v6738_v45, 0.0 }
0x14a1   : > { %6785 = vadd.xlane.f32.xlu0 %v6784_v36 }
0x14ed   : > { %v6741_v55 = vpop.xlane.xlu1 %6740 }
0x14ee   : > { %v6787_v21 = vmul.f32 0.015625, %v6741_v55 }
0x14f0   : > { %v6803_v27 = vadd.f32 1e-05, %v6787_v21 }
0x14f1   : > { %v6744_v11 = vpop.xlane.xlu0 %6743 }
0x14f2   : > { %9463 = vrsqrt.f32 %v6803_v27  ;;  %v6788_v40 = vmul.f32 0.015625, %v6744_v11 }
0x14f4   : > { %v6804_v50 = vadd.f32 1e-05, %v6788_v40 }
0x14f5   : > { %v6747_v43 = vpop.xlane.xlu1 %6746 }
0x14f6   : > { %9465 = vrsqrt.f32 %v6804_v50  ;;  %v6789_v28 = vmul.f32 0.015625, %v6747_v43 }
0x14f8   : > { %v6805_v5 = vadd.f32 1e-05, %v6789_v28 }
0x14f9   : > { %v6750_v14 = vpop.xlane.xlu0 %6749 }
0x14fa   : > { %9467 = vrsqrt.f32 %v6805_v5  ;;  %v6790_v19 = vmul.f32 0.015625, %v6750_v14 }
0x14fc   : > { %v6806_v12 = vadd.f32 1e-05, %v6790_v19 }
0x14fd   : > { %v6753_v44 = vpop.xlane.xlu1 %6752 }
0x14fe   : > { %9469 = vrsqrt.f32 %v6806_v12  ;;  %v6791_v47 = vmul.f32 0.015625, %v6753_v44 }
0x14ff   : > { %v9464_v57 = vpop.eup %9463 }
0x1500   : > { %v6835_v2 = vmul.f32 %v9464_v57, %v13788_v39  ;;  %v6807_v25 = vadd.f32 1e-05, %v6791_v47 }
0x1501   : > { %v6756_v9 = vpop.xlane.xlu0 %6755 }
0x1502   : > { %v6858_v24 = vmul.f32 %v13886_v13, %v6835_v2  ;;  %9471 = vrsqrt.f32 %v6807_v25  ;;  %v6792_v59 = vmul.f32 0.015625, %v6756_v9 }
0x1503   : > { %v9466_v52 = vpop.eup %9465 }
0x1504   : > { %v6881_v39 = vadd.f32 %v13892_v34, %v6858_v24  ;;  %v6836_v10 = vmul.f32 %v9466_v52, %v13793_v63  ;;  %v6808_v8 = vadd.f32 1e-05, %v6792_v59 }
0x1505   : > { %v6759_v15 = vpop.xlane.xlu1 %6758 }
0x1506   : > { %6897 = vst.msk [vmem:[%s13900_s29] sm:$0xff] %vm526_vm0, %v6881_v39  ;;  %v6859_v41 = vmul.f32 %v13886_v13, %v6836_v10  ;;  %9473 = vrsqrt.f32 %v6808_v8  ;;  %v6793_v60 = vmul.f32 0.015625, %v6759_v15 }
0x1507   : > { %v9468_v16 = vpop.eup %9467 }
0x1508   : > { %v6882_v62 = vadd.f32 %v13892_v34, %v6859_v41  ;;  %v6837_v30 = vmul.f32 %v9468_v16, %v13799_v17  ;;  %v6809_v58 = vadd.f32 1e-05, %v6793_v60 }
0x1509   : > { %v6762_v31 = vpop.xlane.xlu0 %6761 }
0x150a   : > { %6898 = vst.msk [vmem:[%s13900_s29 + $0x8] sm:$0xff] %vm526_vm0, %v6882_v62  ;;  %v6860_v63 = vmul.f32 %v13886_v13, %v6837_v30  ;;  %9475 = vrsqrt.f32 %v6809_v58  ;;  %v6794_v32 = vmul.f32 0.015625, %v6762_v31 }
0x150b   : > { %v9470_v22 = vpop.eup %9469 }
0x150c   : > { %v6883_v23 = vadd.f32 %v13892_v34, %v6860_v63  ;;  %v6838_v6 = vmul.f32 %v9470_v22, %v13805_v56  ;;  %v6810_v18 = vadd.f32 1e-05, %v6794_v32 }
0x150d   : > { %v6765_v35 = vpop.xlane.xlu1 %6764 }
0x150e   : > { %6899 = vst.msk [vmem:[%s13900_s29 + $0x10] sm:$0xff] %vm526_vm0, %v6883_v23  ;;  %v6861_v17 = vmul.f32 %v13886_v13, %v6838_v6  ;;  %9477 = vrsqrt.f32 %v6810_v18  ;;  %v6795_v46 = vmul.f32 0.015625, %v6765_v35 }
0x150f   : > { %v9472_v61 = vpop.eup %9471 }
0x1510   : > { %v6884_v48 = vadd.f32 %v13892_v34, %v6861_v17  ;;  %v6839_v38 = vmul.f32 %v9472_v61, %v13811_v20  ;;  %v6811_v4 = vadd.f32 1e-05, %v6795_v46 }
0x1511   : > { %v6768_v37 = vpop.xlane.xlu0 %6767 }
0x1512   : > { %6900 = vst.msk [vmem:[%s13900_s29 + $0x18] sm:$0xff] %vm526_vm0, %v6884_v48  ;;  %v6862_v56 = vmul.f32 %v13886_v13, %v6839_v38  ;;  %9479 = vrsqrt.f32 %v6811_v4  ;;  %v6796_v54 = vmul.f32 0.015625, %v6768_v37 }
0x1513   : > { %v9474_v45 = vpop.eup %9473 }
0x1514   : > { %v6885_v36 = vadd.f32 %v13892_v34, %v6862_v56  ;;  %v6840_v55 = vmul.f32 %v9474_v45, %v13817_v29  ;;  %v6812_v21 = vadd.f32 1e-05, %v6796_v54 }
0x1515   : > { %v6771_v27 = vpop.xlane.xlu1 %6770 }
0x1516   : > { %6901 = vst.msk [vmem:[%s13900_s29 + $0x20] sm:$0xff] %vm526_vm0, %v6885_v36  ;;  %v6863_v20 = vmul.f32 %v13886_v13, %v6840_v55  ;;  %9481 = vrsqrt.f32 %v6812_v21  ;;  %v6797_v11 = vmul.f32 0.015625, %v6771_v27 }
0x1517   : > { %v9476_v40 = vpop.eup %9475 }
0x1518   : > { %v6886_v50 = vadd.f32 %v13892_v34, %v6863_v20  ;;  %v6841_v43 = vmul.f32 %v9476_v40, %v13823_v51  ;;  %v6813_v28 = vadd.f32 1e-05, %v6797_v11 }
0x1519   : > { %v6774_v5 = vpop.xlane.xlu0 %6773 }
0x151a   : > { %6902 = vst.msk [vmem:[%s13900_s29 + $0x28] sm:$0xff] %vm526_vm0, %v6886_v50  ;;  %v6864_v29 = vmul.f32 %v13886_v13, %v6841_v43  ;;  %9483 = vrsqrt.f32 %v6813_v28  ;;  %v6798_v14 = vmul.f32 0.015625, %v6774_v5 }
0x151b   : > { %v9478_v19 = vpop.eup %9477 }
0x151c   : > { %v6887_v12 = vadd.f32 %v13892_v34, %v6864_v29  ;;  %v6842_v44 = vmul.f32 %v9478_v19, %v13829_v53  ;;  %v6814_v47 = vadd.f32 1e-05, %v6798_v14 }
0x151e   : > { %6903 = vst.msk [vmem:[%s13900_s29 + $0x30] sm:$0xff] %vm526_vm0, %v6887_v12  ;;  %v6865_v57 = vmul.f32 %v13886_v13, %v6842_v44  ;;  %9485 = vrsqrt.f32 %v6814_v47  ;;  %v6777_v51 = vpop.xlane.xlu1 %6776 }
0x151f   : > { %v9480_v2 = vpop.eup %9479  ;;  %v6799_v25 = vmul.f32 0.015625, %v6777_v51 }
0x1520   : > { %v6888_v9 = vadd.f32 %v13892_v34, %v6865_v57  ;;  %v6843_v24 = vmul.f32 %v9480_v2, %v13835_v49 }
0x1521   : > { %v6815_v59 = vadd.f32 1e-05, %v6799_v25 }
0x1522   : > { %6904 = vst.msk [vmem:[%s13900_s29 + $0x38] sm:$0xff] %vm526_vm0, %v6888_v9  ;;  %v6866_v52 = vmul.f32 %v13886_v13, %v6843_v24  ;;  %v6780_v53 = vpop.xlane.xlu0 %6779 }
0x1523   : > { %v9482_v39 = vpop.eup %9481  ;;  %9487 = vrsqrt.f32 %v6815_v59  ;;  %v6800_v10 = vmul.f32 0.015625, %v6780_v53 }
0x1524   : > { %v6889_v8 = vadd.f32 %v13892_v34, %v6866_v52  ;;  %v6844_v15 = vmul.f32 %v9482_v39, %v13841_v42 }
0x1525   : > { %v6816_v41 = vadd.f32 1e-05, %v6800_v10 }
0x1526   : > { %6905 = vst.msk [vmem:[%s13900_s29 + $0x40] sm:$0xff] %vm526_vm0, %v6889_v8  ;;  %v6867_v60 = vmul.f32 %v13886_v13, %v6844_v15  ;;  %v6783_v49 = vpop.xlane.xlu1 %6782 }
0x1527   : > { %v9484_v16 = vpop.eup %9483  ;;  %9489 = vrsqrt.f32 %v6816_v41  ;;  %v6801_v62 = vmul.f32 0.015625, %v6783_v49 }
0x1528   : > { %v6890_v30 = vadd.f32 %v13892_v34, %v6867_v60  ;;  %v6845_v58 = vmul.f32 %v9484_v16, %v13847_v26 }
0x1529   : > { %v6817_v31 = vadd.f32 1e-05, %v6801_v62 }
0x152a   : > { %6906 = vst.msk [vmem:[%s13900_s29 + $0x48] sm:$0xff] %vm526_vm0, %v6890_v30  ;;  %v6868_v42 = vmul.f32 %v13886_v13, %v6845_v58  ;;  %v6786_v63 = vpop.xlane.xlu0 %6785 }
0x152b   : > { %v9486_v32 = vpop.eup %9485  ;;  %9491 = vrsqrt.f32 %v6817_v31  ;;  %v6802_v22 = vmul.f32 0.015625, %v6786_v63 }
0x152c   : > { %v6891_v23 = vadd.f32 %v13892_v34, %v6868_v42  ;;  %v6846_v6 = vmul.f32 %v9486_v32, %v13853_v3 }
0x152d   : > { %v6818_v18 = vadd.f32 1e-05, %v6802_v22 }
0x152e   : > { %6907 = vst.msk [vmem:[%s13900_s29 + $0x50] sm:$0xff] %vm526_vm0, %v6891_v23  ;;  %v6869_v26 = vmul.f32 %v13886_v13, %v6846_v6 }
0x152f   : > { %9493 = vrsqrt.f32 %v6818_v18 }
0x1530   : > { %v9488_v35 = vpop.eup %9487  ;;  %v6892_v17 = vadd.f32 %v13892_v34, %v6869_v26 }
0x1531   : > { %v6847_v46 = vmul.f32 %v9488_v35, %v13860_v7 }
0x1532   : > { %6908 = vst.msk [vmem:[%s13900_s29 + $0x58] sm:$0xff] %vm526_vm0, %v6892_v17 }
0x1533   : > { %v6870_v61 = vmul.f32 %v13886_v13, %v6847_v46 }
0x1534   : > { %v9490_v48 = vpop.eup %9489 }
0x1535   : > { %v6893_v3 = vadd.f32 %v13892_v34, %v6870_v61  ;;  %v6848_v38 = vmul.f32 %v9490_v48, %v13865_v33 }
0x1537   : > { %6909 = vst.msk [vmem:[%s13900_s29 + $0x60] sm:$0xff] %vm526_vm0, %v6893_v3  ;;  %v6871_v4 = vmul.f32 %v13886_v13, %v6848_v38 }
0x1538   : > { %v9492_v37 = vpop.eup %9491 }
0x1539   : > { %v6894_v56 = vadd.f32 %v13892_v34, %v6871_v4  ;;  %v6849_v7 = vmul.f32 %v9492_v37, %v13871_v0 }
0x153b   : > { %6910 = vst.msk [vmem:[%s13900_s29 + $0x68] sm:$0xff] %vm526_vm0, %v6894_v56  ;;  %v6872_v54 = vmul.f32 %v13886_v13, %v6849_v7 }
0x153c   : > { %v9494_v45 = vpop.eup %9493 }
0x153d   : > { %v6895_v36 = vadd.f32 %v13892_v34, %v6872_v54  ;;  %v6850_v55 = vmul.f32 %v9494_v45, %v13877_v1 }
0x153f   : > { %6911 = vst.msk [vmem:[%s13900_s29 + $0x70] sm:$0xff] %vm526_vm0, %v6895_v36  ;;  %v6873_v33 = vmul.f32 %v13886_v13, %v6850_v55 }
0x1541   : > { %v6896_v21 = vadd.f32 %v13892_v34, %v6873_v33 }
0x1543   : > { %6912 = vst.msk [vmem:[%s13900_s29 + $0x78] sm:$0xff] %vm526_vm0, %v6896_v21 }
0x1544 PF: > { %s23_s25 = sadd.s32 1, %s9517_s25  }
0x1545   : > { %p20_p4 = scmp.ge.s32.totalorder %s23_s25, 4  }
0x1547   :  { %22 = sbr.rel (!%p20_p4) target bundleno = 1 (0x1), region = 102 }

</bundles_post_ra>
